<compile_context>
chip_gen: v7x
topology: tpu7x:2x2x1
jax: 0.10.0
libtpu: 0.0.40
codegen_flags: <defaults>
</compile_context>

<pallas_src>
import jax
import jax.numpy as jnp
from jax import lax
from jax.experimental import pallas as pl
from jax.experimental.pallas import tpu as pltpu

_SQRT_HALF = 0.7071067811865476


def _gelu_erf(x):
    """Exact-erf GELU via the Abramowitz-Stegun 7.1.26 erf polynomial.

    Max |erf error| < 1.5e-7, so it matches PyTorch's default nn.GELU() to
    ~1e-6; built only from exp/mul/add/div/where so it lowers deterministically
    in Mosaic (exp goes to the EUP slot).
    """
    z = x * _SQRT_HALF
    a = jnp.abs(z)
    t = 1.0 / (1.0 + 0.3275911 * a)
    poly = t * (0.254829592 + t * (-0.284496736 + t * (1.421413741
             + t * (-1.453152027 + t * 1.061405429))))
    erf_a = 1.0 - poly * jnp.exp(-(a * a))
    erf_z = jnp.where(z >= 0, erf_a, -erf_a)
    return 0.5 * x * (1.0 + erf_z)


def _build_se2_weight_bank(w, num_theta):
    """w: (C, Theta, k, k) base depthwise SE(2) kernel.

    Returns w_eff of shape (Theta_out, Theta_in, k, k, C): for output
    orientation r, the kernel is spatially rotated by r*2pi/Theta (bilinear,
    zero outside support) and its orientation axis is cyclically shifted so
    that input orientation s uses base slice (s - r) mod Theta.  The theta
    shift is applied exactly once here (fix for the previous double
    application).

    TODO(synk): the SE2ToSE2Conv source was not provided; rotation sign /
    shift direction are the standard SE(2)->SE(2) group-conv convention and
    are not validated against the PyTorch module.
    """
    C, T, k, _ = w.shape
    assert T == num_theta
    c0 = (k - 1) / 2.0
    ys, xs = jnp.meshgrid(jnp.arange(k, dtype=jnp.float32) - c0,
                          jnp.arange(k, dtype=jnp.float32) - c0, indexing="ij")
    banks = []
    for r in range(num_theta):
        th = 2.0 * jnp.pi * r / num_theta
        ct, st = jnp.cos(th), jnp.sin(th)
        # inverse-rotate the sampling coordinates
        sx = ct * xs + st * ys
        sy = -st * xs + ct * ys
        fy, fx = sy + c0, sx + c0
        y0, x0 = jnp.floor(fy), jnp.floor(fx)
        wy, wx = fy - y0, fx - x0

        def gather(yi, xi):
            valid = (yi >= 0) & (yi <= k - 1) & (xi >= 0) & (xi <= k - 1)
            yc = jnp.clip(yi, 0, k - 1).astype(jnp.int32)
            xc = jnp.clip(xi, 0, k - 1).astype(jnp.int32)
            return jnp.where(valid, w[:, :, yc, xc], 0.0)      # (C, T, k, k)

        rot = ((1 - wy) * (1 - wx) * gather(y0, x0)
               + (1 - wy) * wx * gather(y0, x0 + 1)
               + wy * (1 - wx) * gather(y0 + 1, x0)
               + wy * wx * gather(y0 + 1, x0 + 1))             # (C, T, k, k)
        shifted = jnp.stack([rot[:, (s - r) % T] for s in range(T)], axis=1)
        banks.append(shifted)                                   # (C, T_in, k, k)
    bank = jnp.stack(banks, axis=0)                             # (T_out, C, T_in, k, k)
    return jnp.transpose(bank, (0, 2, 3, 4, 1))                 # (T_out, T_in, k, k, C)


def _make_shift_masks(H, W, K, PAD):
    """masks[dy*K+dx, y*W+x] = 1 iff (y+dy-PAD, x+dx-PAD) is inside the
    un-padded image (i.e. the zero-padding mask for that kernel tap)."""
    ys = jnp.arange(H)
    xs = jnp.arange(W)
    rows = []
    for dy in range(K):
        for dx in range(K):
            my = (ys + dy - PAD >= 0) & (ys + dy - PAD < H)
            mx = (xs + dx - PAD >= 0) & (xs + dx - PAD < W)
            rows.append((my[:, None] & mx[None, :]).astype(jnp.float32).reshape(H * W))
    return jnp.stack(rows, axis=0)                              # (K*K, H*W)


def _make_convnext_call(N, Nb, T, H, W, C, K, PAD):
    HW = H * W
    M = T * HW
    C4 = 4 * C
    NbC = Nb * C
    n_blocks = N // Nb

    def kernel(x_ref, wcol_ref, mask_ref, bdw_ref, g_ref, bt_ref,
               w1_ref, b1_ref, w2_ref, b2_ref, out_ref):
        # ----------------- depthwise SE(2) conv, channel-major --------------
        # rows = (n, c) (full sublanes after batch folding), lanes = (y, x).
        # Zero padding is emulated with pltpu.roll (XLU, idle during the conv)
        # plus precomputed 0/1 boundary masks, so no padded buffer exists and
        # x is read exactly once.  Live values: T accumulators (each (NbC, HW),
        # ~1 vreg) + one shifted window -> live ranges stay bounded even though
        # the loop nest is fully unrolled.
        # TODO(synk): at production T/C move the (dy,dx,s) loops into
        # lax.fori_loop and keep the accumulators in a VMEM scratch.
        accs = [jnp.zeros((NbC, HW), jnp.float32) for _ in range(T)]
        for dy in range(K):
            for dx in range(K):
                kidx = dy * K + dx
                sh = (PAD - dy) * W + (PAD - dx)
                for s in range(T):                               # input orientation
                    win = x_ref[:, s, :]                         # (NbC, HW)
                    if not (dy == PAD and dx == PAD):
                        win = pltpu.roll(win, sh % HW, axis=1)   # XLU lane shift
                        win = win * mask_ref[kidx:kidx + 1, :]   # zero-pad mask
                    for r in range(T):                           # output orientation
                        widx = ((r * T + s) * K + dy) * K + dx
                        accs[r] = accs[r] + win * wcol_ref[:, widx:widx + 1]
        dw = jnp.concatenate(accs, axis=-1)                      # (NbC, T*H*W)

        # -------- LayerNorm(C) -> pwconv1 -> GELU -> pwconv2, per sample ----
        out_rows = []
        for nb in range(Nb):
            blk = dw[nb * C:(nb + 1) * C, :] + bdw_ref[...]      # (C, M) + dw bias
            # LayerNorm over channels = C explicit lane-dense row adds
            # (no cross-lane reduction over a 4-wide minor dim).
            mean = blk[0:1, :]
            for c in range(1, C):
                mean = mean + blk[c:c + 1, :]
            mean = mean * (1.0 / C)
            diff = blk - mean
            var = diff[0:1, :] * diff[0:1, :]
            for c in range(1, C):
                var = var + diff[c:c + 1, :] * diff[c:c + 1, :]
            var = var * (1.0 / C)
            xn = diff * lax.rsqrt(var + 1e-6)
            xn = xn * g_ref[...] + bt_ref[...]                   # per-row scale/shift

            # pwconv1 (C -> 4C): contraction dim is only C=4, so the MXU would
            # run at ~3%; do it as f32 VPU broadcast-FMAs (no bf16 casts).
            h1 = w1_ref[:, 0:1] * xn[0:1, :]                     # (4C, M)
            for c in range(1, C):
                h1 = h1 + w1_ref[:, c:c + 1] * xn[c:c + 1, :]
            h1 = _gelu_erf(h1 + b1_ref[...])                     # lane-dense GELU

            # pwconv2 (4C -> C), same broadcast-FMA form.
            h2 = w2_ref[:, 0:1] * h1[0:1, :]                     # (C, M)
            for j in range(1, C4):
                h2 = h2 + w2_ref[:, j:j + 1] * h1[j:j + 1, :]
            out_rows.append(h2 + b2_ref[...])

        h2_full = jnp.concatenate(out_rows, axis=0)              # (NbC, M)

        # ------------- residual skip (crop == 0) + lane-dense store ---------
        # Residual rebuilt from the same channel-major input block (no second
        # HBM read of the activation).
        xres = jnp.concatenate([x_ref[:, r, :] for r in range(T)], axis=-1)
        out_ref[...] = h2_full + xres

    grid_spec = pltpu.PrefetchScalarGridSpec(
        num_scalar_prefetch=0,
        grid=(n_blocks,),
        in_specs=[
            pl.BlockSpec((NbC, T, HW), lambda i: (i, 0, 0)),       # x, channel-major
            pl.BlockSpec((NbC, T * T * K * K), lambda i: (i, 0)),  # per-row conv weights
            pl.BlockSpec((K * K, HW), lambda i: (0, 0)),           # shift / zero-pad masks
            pl.BlockSpec((C, 1), lambda i: (0, 0)),                # dwconv bias
            pl.BlockSpec((C, 1), lambda i: (0, 0)),                # LN gamma
            pl.BlockSpec((C, 1), lambda i: (0, 0)),                # LN beta
            pl.BlockSpec((C4, C), lambda i: (0, 0)),               # pwconv1 weight (out, in)
            pl.BlockSpec((C4, 1), lambda i: (0, 0)),               # pwconv1 bias
            pl.BlockSpec((C, C4), lambda i: (0, 0)),               # pwconv2 weight (out, in)
            pl.BlockSpec((C, 1), lambda i: (0, 0)),                # pwconv2 bias
        ],
        out_specs=pl.BlockSpec((NbC, M), lambda i: (i, 0)),
    )

    cost = pl.CostEstimate(
        flops=int(2 * N * C * T * HW * T * K * K                  # depthwise conv
                  + 2 * 2 * N * T * HW * C * C4                   # two pointwise convs
                  + 10 * N * T * HW * C),                         # LayerNorm-ish
        transcendentals=int(N * T * HW * C4),                     # GELU exp
        bytes_accessed=int(4 * (2 * N * C * T * HW                # x in + out
                                + N * C * T * T * K * K           # conv weight bank
                                + K * K * HW + 2 * C * C4 + 6 * C + C4)),
    )

    # Footprint of this single-step kernel is ~1 MiB (no padded input buffer,
    # and with the batch folded into the block there is nothing to
    # double-buffer), so it fits v5e/v6e/v7x comfortably; the explicit limit
    # just documents the v7x (64 MiB physical / 32 MiB default-scoped) budget.
    # TODO(synk): at production H/W/C tile H with a halo-aware index_map and
    # consider bf16 activations on v6e/v7x (kept f32 here for PyTorch-matching
    # numerics and because v5e has no bf16 VPU).
    return pl.pallas_call(
        kernel,
        out_shape=jax.ShapeDtypeStruct((N * C, M), jnp.float32),
        grid_spec=grid_spec,
        cost_estimate=cost,
        compiler_params=pltpu.CompilerParams(
            dimension_semantics=("parallel",),
            vmem_limit_bytes=32 * 1024 * 1024,
        ),
    )


def se2_to_se2_convnext(x, w_dw, b_dw, gamma, beta, w1, b1, w2, b2,
                        *, num_theta, kernel_size, padding, batch_block=None):
    """x: (N, C, Theta, H, W) PyTorch layout.  Linear weights are in PyTorch
    nn.Linear layout: w1 (4C, C), b1 (4C,), w2 (C_out, 4C), b2 (C_out,).
    Returns (N, C, Theta, H, W)."""
    N, C, T, H, W = x.shape
    K, PAD = kernel_size, padding
    assert T == num_theta
    crop = int((2 * PAD - (K - 1)) / 2)
    assert crop == 0 and w2.shape[0] == C, \
        "only crop == 0, input_dim == output_dim implemented"
    # TODO(synk): crop != 0 skip branches (interior crop / replicate pad) not implemented.
    Nb = N if batch_block is None else batch_block
    assert N % Nb == 0
    HW = H * W

    # Channel-major view of x: rows (n, c), theta planes on sublanes, (y, x) on
    # lanes.  Free reshape (no transpose, no pad); the only HBM read of x.
    xcm = x.reshape(N * C, T, HW).astype(jnp.float32)

    w_eff = _build_se2_weight_bank(w_dw, T)                         # (T, T, K, K, C)
    wcol = jnp.tile(w_eff.reshape(T * T * K * K, C).T, (N, 1))      # (N*C, T*T*K*K)
    masks = _make_shift_masks(H, W, K, PAD)                         # (K*K, H*W)

    call = _make_convnext_call(N, Nb, T, H, W, C, K, PAD)
    out = call(xcm, wcol, masks,
               b_dw.reshape(C, 1), gamma.reshape(C, 1), beta.reshape(C, 1),
               w1.astype(jnp.float32), b1.reshape(4 * C, 1),
               w2.astype(jnp.float32), b2.reshape(C, 1))
    return out.reshape(N, C, T, H, W)


def _reference(x, w_dw, b_dw, gamma, beta, w1, b1, w2, b2, K, PAD):
    """Independent pure-JAX reference: explicit zero padding, dense pointwise
    convs, exact-erf GELU.  Does NOT mirror the kernel's roll/mask layout."""
    N, C, T, H, W = x.shape
    w_eff = _build_se2_weight_bank(w_dw, T)                         # (T, T, K, K, C)
    xpad = jnp.pad(x, ((0, 0), (0, 0), (0, 0), (PAD, PAD), (PAD, PAD)))
    planes = []
    for r in range(T):
        acc = jnp.zeros((N, C, H, W), jnp.float32)
        for s in range(T):
            for dy in range(K):
                for dx in range(K):
                    wvec = w_eff[r, s, dy, dx, :][None, :, None, None]
                    acc = acc + xpad[:, :, s, dy:dy + H, dx:dx + W] * wvec
        planes.append(acc)
    y = jnp.stack(planes, axis=2) + b_dw[None, :, None, None, None]  # (N, C, T, H, W)
    yp = jnp.transpose(y, (0, 2, 3, 4, 1))                           # (N, T, H, W, C)
    mean = jnp.mean(yp, axis=-1, keepdims=True)
    var = jnp.mean(jnp.square(yp - mean), axis=-1, keepdims=True)
    xn = (yp - mean) / jnp.sqrt(var + 1e-6) * gamma + beta
    h1 = jax.nn.gelu(xn @ w1.T + b1, approximate=False)
    h2 = h1 @ w2.T + b2
    return x + jnp.transpose(h2, (0, 4, 1, 2, 3))


if __name__ == "__main__":
    # Small shapes consistent with the module: input (N, C, Theta, H, W).
    N, C, T, H, W = 2, 4, 4, 8, 8
    K, PAD = 3, 1
    OUT = C  # input_dim == output_dim -> skip connection active

    key = jax.random.PRNGKey(0)
    ks = jax.random.split(key, 9)
    x = jax.random.normal(ks[0], (N, C, T, H, W), jnp.float32)       # PyTorch layout
    w_dw = 0.2 * jax.random.normal(ks[1], (C, T, K, K), jnp.float32)  # dwconv weight (groups=C)
    b_dw = 0.1 * jax.random.normal(ks[2], (C,), jnp.float32)
    gamma = 1.0 + 0.1 * jax.random.normal(ks[3], (C,), jnp.float32)  # LayerNorm weight
    beta = 0.1 * jax.random.normal(ks[4], (C,), jnp.float32)         # LayerNorm bias
    w1 = 0.2 * jax.random.normal(ks[5], (4 * C, C), jnp.float32)     # nn.Linear(C, 4C).weight
    b1 = 0.1 * jax.random.normal(ks[6], (4 * C,), jnp.float32)
    w2 = 0.2 * jax.random.normal(ks[7], (OUT, 4 * C), jnp.float32)   # nn.Linear(4C, C).weight
    b2 = 0.1 * jax.random.normal(ks[8], (OUT,), jnp.float32)

    out = jax.block_until_ready(
        se2_to_se2_convnext(x, w_dw, b_dw, gamma, beta, w1, b1, w2, b2,
                            num_theta=T, kernel_size=K, padding=PAD))
    assert out.shape == (N, OUT, T, H, W)

    # 1) Kernel vs independent (layout-agnostic, f32, exact-erf) reference.
    ref = _reference(x, w_dw, b_dw, gamma, beta, w1, b1, w2, b2, K, PAD)
    err = float(jnp.max(jnp.abs(out - ref)))
    assert jnp.allclose(out, ref, atol=5e-4, rtol=5e-4), err

    # 2) In-kernel GELU polynomial vs the exact-erf GELU (nn.GELU default).
    tgrid = jnp.linspace(-6.0, 6.0, 4097, dtype=jnp.float32)
    gerr = float(jnp.max(jnp.abs(_gelu_erf(tgrid)
                                 - jax.nn.gelu(tgrid, approximate=False))))
    assert gerr < 1e-5, gerr

    print("KERNEL_OK")
</pallas_src>

<mosaic_0001>
module attributes {stable_mosaic.version = 11 : i64} {
  func.func @kernel(%arg0: i32, %arg1: memref<8x4x64xf32, #tpu.memory_space<vmem>>, %arg2: memref<8x144xf32, #tpu.memory_space<vmem>>, %arg3: memref<9x64xf32, #tpu.memory_space<vmem>>, %arg4: memref<4x1xf32, #tpu.memory_space<vmem>>, %arg5: memref<4x1xf32, #tpu.memory_space<vmem>>, %arg6: memref<4x1xf32, #tpu.memory_space<vmem>>, %arg7: memref<16x4xf32, #tpu.memory_space<vmem>>, %arg8: memref<16x1xf32, #tpu.memory_space<vmem>>, %arg9: memref<4x16xf32, #tpu.memory_space<vmem>>, %arg10: memref<4x1xf32, #tpu.memory_space<vmem>>, %arg11: memref<8x256xf32, #tpu.memory_space<vmem>>) attributes {dimension_semantics = [#tpu.dimension_semantics<parallel>], iteration_bounds = array<i64: 1>, scalar_prefetch = 0 : i64, scratch_operands = 0 : i64, tpu.core_type = #tpu.core_type<tc>, window_params = [{transform_indices = @transform_0, window_bounds = array<i64: 8, 4, 64>}, {transform_indices = @transform_1, window_bounds = array<i64: 8, 144>}, {pipeline_mode = #tpu.pipeline_mode<synchronous>, transform_indices = @transform_2, window_bounds = array<i64: 9, 64>}, {pipeline_mode = #tpu.pipeline_mode<synchronous>, transform_indices = @transform_3, window_bounds = array<i64: 4, 1>}, {pipeline_mode = #tpu.pipeline_mode<synchronous>, transform_indices = @transform_4, window_bounds = array<i64: 4, 1>}, {pipeline_mode = #tpu.pipeline_mode<synchronous>, transform_indices = @transform_5, window_bounds = array<i64: 4, 1>}, {pipeline_mode = #tpu.pipeline_mode<synchronous>, transform_indices = @transform_6, window_bounds = array<i64: 16, 4>}, {pipeline_mode = #tpu.pipeline_mode<synchronous>, transform_indices = @transform_7, window_bounds = array<i64: 16, 1>}, {pipeline_mode = #tpu.pipeline_mode<synchronous>, transform_indices = @transform_8, window_bounds = array<i64: 4, 16>}, {pipeline_mode = #tpu.pipeline_mode<synchronous>, transform_indices = @transform_9, window_bounds = array<i64: 4, 1>}, {transform_indices = @transform_10, window_bounds = array<i64: 8, 256>}]} {
    %cst = arith.constant 0.000000e+00 : f32
    %0 = vector.broadcast %cst : f32 to vector<8x64xf32>
    %cst_0 = arith.constant 0.000000e+00 : f32
    %1 = vector.broadcast %cst_0 : f32 to vector<8x64xf32>
    %cst_1 = arith.constant 0.000000e+00 : f32
    %2 = vector.broadcast %cst_1 : f32 to vector<8x64xf32>
    %cst_2 = arith.constant 0.000000e+00 : f32
    %3 = vector.broadcast %cst_2 : f32 to vector<8x64xf32>
    %c0 = arith.constant 0 : index
    %c0_3 = arith.constant 0 : index
    %c0_4 = arith.constant 0 : index
    %4 = vector.load %arg1[%c0, %c0_3, %c0_4] : memref<8x4x64xf32, #tpu.memory_space<vmem>>, vector<8x1x64xf32>
    %5 = vector.shape_cast %4 : vector<8x1x64xf32> to vector<8x64xf32>
    %c9_i32 = arith.constant 9 : i32
    %6 = tpu.dynamic_rotate %5 by %c9_i32 dim 1 : vector<8x64xf32>, i32 -> vector<8x64xf32>
    %c0_5 = arith.constant 0 : index
    %c0_6 = arith.constant 0 : index
    %7 = vector.load %arg3[%c0_5, %c0_6] : memref<9x64xf32, #tpu.memory_space<vmem>>, vector<1x64xf32>
    %8 = vector.broadcast %7 : vector<1x64xf32> to vector<8x64xf32>
    %9 = arith.mulf %6, %8 : vector<8x64xf32>
    %c0_7 = arith.constant 0 : index
    %c0_8 = arith.constant 0 : index
    %10 = vector.load %arg2[%c0_7, %c0_8] : memref<8x144xf32, #tpu.memory_space<vmem>>, vector<8x1xf32>
    %11 = vector.broadcast %10 : vector<8x1xf32> to vector<8x64xf32>
    %12 = arith.mulf %9, %11 : vector<8x64xf32>
    %13 = arith.addf %0, %12 : vector<8x64xf32>
    %c0_9 = arith.constant 0 : index
    %c36 = arith.constant 36 : index
    %14 = vector.load %arg2[%c0_9, %c36] : memref<8x144xf32, #tpu.memory_space<vmem>>, vector<8x1xf32>
    %15 = vector.broadcast %14 : vector<8x1xf32> to vector<8x64xf32>
    %16 = arith.mulf %9, %15 : vector<8x64xf32>
    %17 = arith.addf %1, %16 : vector<8x64xf32>
    %c0_10 = arith.constant 0 : index
    %c72 = arith.constant 72 : index
    %18 = vector.load %arg2[%c0_10, %c72] : memref<8x144xf32, #tpu.memory_space<vmem>>, vector<8x1xf32>
    %19 = vector.broadcast %18 : vector<8x1xf32> to vector<8x64xf32>
    %20 = arith.mulf %9, %19 : vector<8x64xf32>
    %21 = arith.addf %2, %20 : vector<8x64xf32>
    %c0_11 = arith.constant 0 : index
    %c108 = arith.constant 108 : index
    %22 = vector.load %arg2[%c0_11, %c108] : memref<8x144xf32, #tpu.memory_space<vmem>>, vector<8x1xf32>
    %23 = vector.broadcast %22 : vector<8x1xf32> to vector<8x64xf32>
    %24 = arith.mulf %9, %23 : vector<8x64xf32>
    %25 = arith.addf %3, %24 : vector<8x64xf32>
    %c0_12 = arith.constant 0 : index
    %c1 = arith.constant 1 : index
    %c0_13 = arith.constant 0 : index
    %26 = vector.load %arg1[%c0_12, %c1, %c0_13] : memref<8x4x64xf32, #tpu.memory_space<vmem>>, vector<8x1x64xf32>
    %27 = vector.shape_cast %26 : vector<8x1x64xf32> to vector<8x64xf32>
    %c9_i32_14 = arith.constant 9 : i32
    %28 = tpu.dynamic_rotate %27 by %c9_i32_14 dim 1 : vector<8x64xf32>, i32 -> vector<8x64xf32>
    %c0_15 = arith.constant 0 : index
    %c0_16 = arith.constant 0 : index
    %29 = vector.load %arg3[%c0_15, %c0_16] : memref<9x64xf32, #tpu.memory_space<vmem>>, vector<1x64xf32>
    %30 = vector.broadcast %29 : vector<1x64xf32> to vector<8x64xf32>
    %31 = arith.mulf %28, %30 : vector<8x64xf32>
    %c0_17 = arith.constant 0 : index
    %c9 = arith.constant 9 : index
    %32 = vector.load %arg2[%c0_17, %c9] : memref<8x144xf32, #tpu.memory_space<vmem>>, vector<8x1xf32>
    %33 = vector.broadcast %32 : vector<8x1xf32> to vector<8x64xf32>
    %34 = arith.mulf %31, %33 : vector<8x64xf32>
    %35 = arith.addf %13, %34 : vector<8x64xf32>
    %c0_18 = arith.constant 0 : index
    %c45 = arith.constant 45 : index
    %36 = vector.load %arg2[%c0_18, %c45] : memref<8x144xf32, #tpu.memory_space<vmem>>, vector<8x1xf32>
    %37 = vector.broadcast %36 : vector<8x1xf32> to vector<8x64xf32>
    %38 = arith.mulf %31, %37 : vector<8x64xf32>
    %39 = arith.addf %17, %38 : vector<8x64xf32>
    %c0_19 = arith.constant 0 : index
    %c81 = arith.constant 81 : index
    %40 = vector.load %arg2[%c0_19, %c81] : memref<8x144xf32, #tpu.memory_space<vmem>>, vector<8x1xf32>
    %41 = vector.broadcast %40 : vector<8x1xf32> to vector<8x64xf32>
    %42 = arith.mulf %31, %41 : vector<8x64xf32>
    %43 = arith.addf %21, %42 : vector<8x64xf32>
    %c0_20 = arith.constant 0 : index
    %c117 = arith.constant 117 : index
    %44 = vector.load %arg2[%c0_20, %c117] : memref<8x144xf32, #tpu.memory_space<vmem>>, vector<8x1xf32>
    %45 = vector.broadcast %44 : vector<8x1xf32> to vector<8x64xf32>
    %46 = arith.mulf %31, %45 : vector<8x64xf32>
    %47 = arith.addf %25, %46 : vector<8x64xf32>
    %c0_21 = arith.constant 0 : index
    %c2 = arith.constant 2 : index
    %c0_22 = arith.constant 0 : index
    %48 = vector.load %arg1[%c0_21, %c2, %c0_22] : memref<8x4x64xf32, #tpu.memory_space<vmem>>, vector<8x1x64xf32>
    %49 = vector.shape_cast %48 : vector<8x1x64xf32> to vector<8x64xf32>
    %c9_i32_23 = arith.constant 9 : i32
    %50 = tpu.dynamic_rotate %49 by %c9_i32_23 dim 1 : vector<8x64xf32>, i32 -> vector<8x64xf32>
    %c0_24 = arith.constant 0 : index
    %c0_25 = arith.constant 0 : index
    %51 = vector.load %arg3[%c0_24, %c0_25] : memref<9x64xf32, #tpu.memory_space<vmem>>, vector<1x64xf32>
    %52 = vector.broadcast %51 : vector<1x64xf32> to vector<8x64xf32>
    %53 = arith.mulf %50, %52 : vector<8x64xf32>
    %c0_26 = arith.constant 0 : index
    %c18 = arith.constant 18 : index
    %54 = vector.load %arg2[%c0_26, %c18] : memref<8x144xf32, #tpu.memory_space<vmem>>, vector<8x1xf32>
    %55 = vector.broadcast %54 : vector<8x1xf32> to vector<8x64xf32>
    %56 = arith.mulf %53, %55 : vector<8x64xf32>
    %57 = arith.addf %35, %56 : vector<8x64xf32>
    %c0_27 = arith.constant 0 : index
    %c54 = arith.constant 54 : index
    %58 = vector.load %arg2[%c0_27, %c54] : memref<8x144xf32, #tpu.memory_space<vmem>>, vector<8x1xf32>
    %59 = vector.broadcast %58 : vector<8x1xf32> to vector<8x64xf32>
    %60 = arith.mulf %53, %59 : vector<8x64xf32>
    %61 = arith.addf %39, %60 : vector<8x64xf32>
    %c0_28 = arith.constant 0 : index
    %c90 = arith.constant 90 : index
    %62 = vector.load %arg2[%c0_28, %c90] : memref<8x144xf32, #tpu.memory_space<vmem>>, vector<8x1xf32>
    %63 = vector.broadcast %62 : vector<8x1xf32> to vector<8x64xf32>
    %64 = arith.mulf %53, %63 : vector<8x64xf32>
    %65 = arith.addf %43, %64 : vector<8x64xf32>
    %c0_29 = arith.constant 0 : index
    %c126 = arith.constant 126 : index
    %66 = vector.load %arg2[%c0_29, %c126] : memref<8x144xf32, #tpu.memory_space<vmem>>, vector<8x1xf32>
    %67 = vector.broadcast %66 : vector<8x1xf32> to vector<8x64xf32>
    %68 = arith.mulf %53, %67 : vector<8x64xf32>
    %69 = arith.addf %47, %68 : vector<8x64xf32>
    %c0_30 = arith.constant 0 : index
    %c3 = arith.constant 3 : index
    %c0_31 = arith.constant 0 : index
    %70 = vector.load %arg1[%c0_30, %c3, %c0_31] : memref<8x4x64xf32, #tpu.memory_space<vmem>>, vector<8x1x64xf32>
    %71 = vector.shape_cast %70 : vector<8x1x64xf32> to vector<8x64xf32>
    %c9_i32_32 = arith.constant 9 : i32
    %72 = tpu.dynamic_rotate %71 by %c9_i32_32 dim 1 : vector<8x64xf32>, i32 -> vector<8x64xf32>
    %c0_33 = arith.constant 0 : index
    %c0_34 = arith.constant 0 : index
    %73 = vector.load %arg3[%c0_33, %c0_34] : memref<9x64xf32, #tpu.memory_space<vmem>>, vector<1x64xf32>
    %74 = vector.broadcast %73 : vector<1x64xf32> to vector<8x64xf32>
    %75 = arith.mulf %72, %74 : vector<8x64xf32>
    %c0_35 = arith.constant 0 : index
    %c27 = arith.constant 27 : index
    %76 = vector.load %arg2[%c0_35, %c27] : memref<8x144xf32, #tpu.memory_space<vmem>>, vector<8x1xf32>
    %77 = vector.broadcast %76 : vector<8x1xf32> to vector<8x64xf32>
    %78 = arith.mulf %75, %77 : vector<8x64xf32>
    %79 = arith.addf %57, %78 : vector<8x64xf32>
    %c0_36 = arith.constant 0 : index
    %c63 = arith.constant 63 : index
    %80 = vector.load %arg2[%c0_36, %c63] : memref<8x144xf32, #tpu.memory_space<vmem>>, vector<8x1xf32>
    %81 = vector.broadcast %80 : vector<8x1xf32> to vector<8x64xf32>
    %82 = arith.mulf %75, %81 : vector<8x64xf32>
    %83 = arith.addf %61, %82 : vector<8x64xf32>
    %c0_37 = arith.constant 0 : index
    %c99 = arith.constant 99 : index
    %84 = vector.load %arg2[%c0_37, %c99] : memref<8x144xf32, #tpu.memory_space<vmem>>, vector<8x1xf32>
    %85 = vector.broadcast %84 : vector<8x1xf32> to vector<8x64xf32>
    %86 = arith.mulf %75, %85 : vector<8x64xf32>
    %87 = arith.addf %65, %86 : vector<8x64xf32>
    %c0_38 = arith.constant 0 : index
    %c135 = arith.constant 135 : index
    %88 = vector.load %arg2[%c0_38, %c135] : memref<8x144xf32, #tpu.memory_space<vmem>>, vector<8x1xf32>
    %89 = vector.broadcast %88 : vector<8x1xf32> to vector<8x64xf32>
    %90 = arith.mulf %75, %89 : vector<8x64xf32>
    %91 = arith.addf %69, %90 : vector<8x64xf32>
    %c0_39 = arith.constant 0 : index
    %c0_40 = arith.constant 0 : index
    %c0_41 = arith.constant 0 : index
    %92 = vector.load %arg1[%c0_39, %c0_40, %c0_41] : memref<8x4x64xf32, #tpu.memory_space<vmem>>, vector<8x1x64xf32>
    %93 = vector.shape_cast %92 : vector<8x1x64xf32> to vector<8x64xf32>
    %c8_i32 = arith.constant 8 : i32
    %94 = tpu.dynamic_rotate %93 by %c8_i32 dim 1 : vector<8x64xf32>, i32 -> vector<8x64xf32>
    %c1_42 = arith.constant 1 : index
    %c0_43 = arith.constant 0 : index
    %95 = vector.load %arg3[%c1_42, %c0_43] : memref<9x64xf32, #tpu.memory_space<vmem>>, vector<1x64xf32>
    %96 = vector.broadcast %95 : vector<1x64xf32> to vector<8x64xf32>
    %97 = arith.mulf %94, %96 : vector<8x64xf32>
    %c0_44 = arith.constant 0 : index
    %c1_45 = arith.constant 1 : index
    %98 = vector.load %arg2[%c0_44, %c1_45] : memref<8x144xf32, #tpu.memory_space<vmem>>, vector<8x1xf32>
    %99 = vector.broadcast %98 : vector<8x1xf32> to vector<8x64xf32>
    %100 = arith.mulf %97, %99 : vector<8x64xf32>
    %101 = arith.addf %79, %100 : vector<8x64xf32>
    %c0_46 = arith.constant 0 : index
    %c37 = arith.constant 37 : index
    %102 = vector.load %arg2[%c0_46, %c37] : memref<8x144xf32, #tpu.memory_space<vmem>>, vector<8x1xf32>
    %103 = vector.broadcast %102 : vector<8x1xf32> to vector<8x64xf32>
    %104 = arith.mulf %97, %103 : vector<8x64xf32>
    %105 = arith.addf %83, %104 : vector<8x64xf32>
    %c0_47 = arith.constant 0 : index
    %c73 = arith.constant 73 : index
    %106 = vector.load %arg2[%c0_47, %c73] : memref<8x144xf32, #tpu.memory_space<vmem>>, vector<8x1xf32>
    %107 = vector.broadcast %106 : vector<8x1xf32> to vector<8x64xf32>
    %108 = arith.mulf %97, %107 : vector<8x64xf32>
    %109 = arith.addf %87, %108 : vector<8x64xf32>
    %c0_48 = arith.constant 0 : index
    %c109 = arith.constant 109 : index
    %110 = vector.load %arg2[%c0_48, %c109] : memref<8x144xf32, #tpu.memory_space<vmem>>, vector<8x1xf32>
    %111 = vector.broadcast %110 : vector<8x1xf32> to vector<8x64xf32>
    %112 = arith.mulf %97, %111 : vector<8x64xf32>
    %113 = arith.addf %91, %112 : vector<8x64xf32>
    %c0_49 = arith.constant 0 : index
    %c1_50 = arith.constant 1 : index
    %c0_51 = arith.constant 0 : index
    %114 = vector.load %arg1[%c0_49, %c1_50, %c0_51] : memref<8x4x64xf32, #tpu.memory_space<vmem>>, vector<8x1x64xf32>
    %115 = vector.shape_cast %114 : vector<8x1x64xf32> to vector<8x64xf32>
    %c8_i32_52 = arith.constant 8 : i32
    %116 = tpu.dynamic_rotate %115 by %c8_i32_52 dim 1 : vector<8x64xf32>, i32 -> vector<8x64xf32>
    %c1_53 = arith.constant 1 : index
    %c0_54 = arith.constant 0 : index
    %117 = vector.load %arg3[%c1_53, %c0_54] : memref<9x64xf32, #tpu.memory_space<vmem>>, vector<1x64xf32>
    %118 = vector.broadcast %117 : vector<1x64xf32> to vector<8x64xf32>
    %119 = arith.mulf %116, %118 : vector<8x64xf32>
    %c0_55 = arith.constant 0 : index
    %c10 = arith.constant 10 : index
    %120 = vector.load %arg2[%c0_55, %c10] : memref<8x144xf32, #tpu.memory_space<vmem>>, vector<8x1xf32>
    %121 = vector.broadcast %120 : vector<8x1xf32> to vector<8x64xf32>
    %122 = arith.mulf %119, %121 : vector<8x64xf32>
    %123 = arith.addf %101, %122 : vector<8x64xf32>
    %c0_56 = arith.constant 0 : index
    %c46 = arith.constant 46 : index
    %124 = vector.load %arg2[%c0_56, %c46] : memref<8x144xf32, #tpu.memory_space<vmem>>, vector<8x1xf32>
    %125 = vector.broadcast %124 : vector<8x1xf32> to vector<8x64xf32>
    %126 = arith.mulf %119, %125 : vector<8x64xf32>
    %127 = arith.addf %105, %126 : vector<8x64xf32>
    %c0_57 = arith.constant 0 : index
    %c82 = arith.constant 82 : index
    %128 = vector.load %arg2[%c0_57, %c82] : memref<8x144xf32, #tpu.memory_space<vmem>>, vector<8x1xf32>
    %129 = vector.broadcast %128 : vector<8x1xf32> to vector<8x64xf32>
    %130 = arith.mulf %119, %129 : vector<8x64xf32>
    %131 = arith.addf %109, %130 : vector<8x64xf32>
    %c0_58 = arith.constant 0 : index
    %c118 = arith.constant 118 : index
    %132 = vector.load %arg2[%c0_58, %c118] : memref<8x144xf32, #tpu.memory_space<vmem>>, vector<8x1xf32>
    %133 = vector.broadcast %132 : vector<8x1xf32> to vector<8x64xf32>
    %134 = arith.mulf %119, %133 : vector<8x64xf32>
    %135 = arith.addf %113, %134 : vector<8x64xf32>
    %c0_59 = arith.constant 0 : index
    %c2_60 = arith.constant 2 : index
    %c0_61 = arith.constant 0 : index
    %136 = vector.load %arg1[%c0_59, %c2_60, %c0_61] : memref<8x4x64xf32, #tpu.memory_space<vmem>>, vector<8x1x64xf32>
    %137 = vector.shape_cast %136 : vector<8x1x64xf32> to vector<8x64xf32>
    %c8_i32_62 = arith.constant 8 : i32
    %138 = tpu.dynamic_rotate %137 by %c8_i32_62 dim 1 : vector<8x64xf32>, i32 -> vector<8x64xf32>
    %c1_63 = arith.constant 1 : index
    %c0_64 = arith.constant 0 : index
    %139 = vector.load %arg3[%c1_63, %c0_64] : memref<9x64xf32, #tpu.memory_space<vmem>>, vector<1x64xf32>
    %140 = vector.broadcast %139 : vector<1x64xf32> to vector<8x64xf32>
    %141 = arith.mulf %138, %140 : vector<8x64xf32>
    %c0_65 = arith.constant 0 : index
    %c19 = arith.constant 19 : index
    %142 = vector.load %arg2[%c0_65, %c19] : memref<8x144xf32, #tpu.memory_space<vmem>>, vector<8x1xf32>
    %143 = vector.broadcast %142 : vector<8x1xf32> to vector<8x64xf32>
    %144 = arith.mulf %141, %143 : vector<8x64xf32>
    %145 = arith.addf %123, %144 : vector<8x64xf32>
    %c0_66 = arith.constant 0 : index
    %c55 = arith.constant 55 : index
    %146 = vector.load %arg2[%c0_66, %c55] : memref<8x144xf32, #tpu.memory_space<vmem>>, vector<8x1xf32>
    %147 = vector.broadcast %146 : vector<8x1xf32> to vector<8x64xf32>
    %148 = arith.mulf %141, %147 : vector<8x64xf32>
    %149 = arith.addf %127, %148 : vector<8x64xf32>
    %c0_67 = arith.constant 0 : index
    %c91 = arith.constant 91 : index
    %150 = vector.load %arg2[%c0_67, %c91] : memref<8x144xf32, #tpu.memory_space<vmem>>, vector<8x1xf32>
    %151 = vector.broadcast %150 : vector<8x1xf32> to vector<8x64xf32>
    %152 = arith.mulf %141, %151 : vector<8x64xf32>
    %153 = arith.addf %131, %152 : vector<8x64xf32>
    %c0_68 = arith.constant 0 : index
    %c127 = arith.constant 127 : index
    %154 = vector.load %arg2[%c0_68, %c127] : memref<8x144xf32, #tpu.memory_space<vmem>>, vector<8x1xf32>
    %155 = vector.broadcast %154 : vector<8x1xf32> to vector<8x64xf32>
    %156 = arith.mulf %141, %155 : vector<8x64xf32>
    %157 = arith.addf %135, %156 : vector<8x64xf32>
    %c0_69 = arith.constant 0 : index
    %c3_70 = arith.constant 3 : index
    %c0_71 = arith.constant 0 : index
    %158 = vector.load %arg1[%c0_69, %c3_70, %c0_71] : memref<8x4x64xf32, #tpu.memory_space<vmem>>, vector<8x1x64xf32>
    %159 = vector.shape_cast %158 : vector<8x1x64xf32> to vector<8x64xf32>
    %c8_i32_72 = arith.constant 8 : i32
    %160 = tpu.dynamic_rotate %159 by %c8_i32_72 dim 1 : vector<8x64xf32>, i32 -> vector<8x64xf32>
    %c1_73 = arith.constant 1 : index
    %c0_74 = arith.constant 0 : index
    %161 = vector.load %arg3[%c1_73, %c0_74] : memref<9x64xf32, #tpu.memory_space<vmem>>, vector<1x64xf32>
    %162 = vector.broadcast %161 : vector<1x64xf32> to vector<8x64xf32>
    %163 = arith.mulf %160, %162 : vector<8x64xf32>
    %c0_75 = arith.constant 0 : index
    %c28 = arith.constant 28 : index
    %164 = vector.load %arg2[%c0_75, %c28] : memref<8x144xf32, #tpu.memory_space<vmem>>, vector<8x1xf32>
    %165 = vector.broadcast %164 : vector<8x1xf32> to vector<8x64xf32>
    %166 = arith.mulf %163, %165 : vector<8x64xf32>
    %167 = arith.addf %145, %166 : vector<8x64xf32>
    %c0_76 = arith.constant 0 : index
    %c64 = arith.constant 64 : index
    %168 = vector.load %arg2[%c0_76, %c64] : memref<8x144xf32, #tpu.memory_space<vmem>>, vector<8x1xf32>
    %169 = vector.broadcast %168 : vector<8x1xf32> to vector<8x64xf32>
    %170 = arith.mulf %163, %169 : vector<8x64xf32>
    %171 = arith.addf %149, %170 : vector<8x64xf32>
    %c0_77 = arith.constant 0 : index
    %c100 = arith.constant 100 : index
    %172 = vector.load %arg2[%c0_77, %c100] : memref<8x144xf32, #tpu.memory_space<vmem>>, vector<8x1xf32>
    %173 = vector.broadcast %172 : vector<8x1xf32> to vector<8x64xf32>
    %174 = arith.mulf %163, %173 : vector<8x64xf32>
    %175 = arith.addf %153, %174 : vector<8x64xf32>
    %c0_78 = arith.constant 0 : index
    %c136 = arith.constant 136 : index
    %176 = vector.load %arg2[%c0_78, %c136] : memref<8x144xf32, #tpu.memory_space<vmem>>, vector<8x1xf32>
    %177 = vector.broadcast %176 : vector<8x1xf32> to vector<8x64xf32>
    %178 = arith.mulf %163, %177 : vector<8x64xf32>
    %179 = arith.addf %157, %178 : vector<8x64xf32>
    %c0_79 = arith.constant 0 : index
    %c0_80 = arith.constant 0 : index
    %c0_81 = arith.constant 0 : index
    %180 = vector.load %arg1[%c0_79, %c0_80, %c0_81] : memref<8x4x64xf32, #tpu.memory_space<vmem>>, vector<8x1x64xf32>
    %181 = vector.shape_cast %180 : vector<8x1x64xf32> to vector<8x64xf32>
    %c7_i32 = arith.constant 7 : i32
    %182 = tpu.dynamic_rotate %181 by %c7_i32 dim 1 : vector<8x64xf32>, i32 -> vector<8x64xf32>
    %c2_82 = arith.constant 2 : index
    %c0_83 = arith.constant 0 : index
    %183 = vector.load %arg3[%c2_82, %c0_83] : memref<9x64xf32, #tpu.memory_space<vmem>>, vector<1x64xf32>
    %184 = vector.broadcast %183 : vector<1x64xf32> to vector<8x64xf32>
    %185 = arith.mulf %182, %184 : vector<8x64xf32>
    %c0_84 = arith.constant 0 : index
    %c2_85 = arith.constant 2 : index
    %186 = vector.load %arg2[%c0_84, %c2_85] : memref<8x144xf32, #tpu.memory_space<vmem>>, vector<8x1xf32>
    %187 = vector.broadcast %186 : vector<8x1xf32> to vector<8x64xf32>
    %188 = arith.mulf %185, %187 : vector<8x64xf32>
    %189 = arith.addf %167, %188 : vector<8x64xf32>
    %c0_86 = arith.constant 0 : index
    %c38 = arith.constant 38 : index
    %190 = vector.load %arg2[%c0_86, %c38] : memref<8x144xf32, #tpu.memory_space<vmem>>, vector<8x1xf32>
    %191 = vector.broadcast %190 : vector<8x1xf32> to vector<8x64xf32>
    %192 = arith.mulf %185, %191 : vector<8x64xf32>
    %193 = arith.addf %171, %192 : vector<8x64xf32>
    %c0_87 = arith.constant 0 : index
    %c74 = arith.constant 74 : index
    %194 = vector.load %arg2[%c0_87, %c74] : memref<8x144xf32, #tpu.memory_space<vmem>>, vector<8x1xf32>
    %195 = vector.broadcast %194 : vector<8x1xf32> to vector<8x64xf32>
    %196 = arith.mulf %185, %195 : vector<8x64xf32>
    %197 = arith.addf %175, %196 : vector<8x64xf32>
    %c0_88 = arith.constant 0 : index
    %c110 = arith.constant 110 : index
    %198 = vector.load %arg2[%c0_88, %c110] : memref<8x144xf32, #tpu.memory_space<vmem>>, vector<8x1xf32>
    %199 = vector.broadcast %198 : vector<8x1xf32> to vector<8x64xf32>
    %200 = arith.mulf %185, %199 : vector<8x64xf32>
    %201 = arith.addf %179, %200 : vector<8x64xf32>
    %c0_89 = arith.constant 0 : index
    %c1_90 = arith.constant 1 : index
    %c0_91 = arith.constant 0 : index
    %202 = vector.load %arg1[%c0_89, %c1_90, %c0_91] : memref<8x4x64xf32, #tpu.memory_space<vmem>>, vector<8x1x64xf32>
    %203 = vector.shape_cast %202 : vector<8x1x64xf32> to vector<8x64xf32>
    %c7_i32_92 = arith.constant 7 : i32
    %204 = tpu.dynamic_rotate %203 by %c7_i32_92 dim 1 : vector<8x64xf32>, i32 -> vector<8x64xf32>
    %c2_93 = arith.constant 2 : index
    %c0_94 = arith.constant 0 : index
    %205 = vector.load %arg3[%c2_93, %c0_94] : memref<9x64xf32, #tpu.memory_space<vmem>>, vector<1x64xf32>
    %206 = vector.broadcast %205 : vector<1x64xf32> to vector<8x64xf32>
    %207 = arith.mulf %204, %206 : vector<8x64xf32>
    %c0_95 = arith.constant 0 : index
    %c11 = arith.constant 11 : index
    %208 = vector.load %arg2[%c0_95, %c11] : memref<8x144xf32, #tpu.memory_space<vmem>>, vector<8x1xf32>
    %209 = vector.broadcast %208 : vector<8x1xf32> to vector<8x64xf32>
    %210 = arith.mulf %207, %209 : vector<8x64xf32>
    %211 = arith.addf %189, %210 : vector<8x64xf32>
    %c0_96 = arith.constant 0 : index
    %c47 = arith.constant 47 : index
    %212 = vector.load %arg2[%c0_96, %c47] : memref<8x144xf32, #tpu.memory_space<vmem>>, vector<8x1xf32>
    %213 = vector.broadcast %212 : vector<8x1xf32> to vector<8x64xf32>
    %214 = arith.mulf %207, %213 : vector<8x64xf32>
    %215 = arith.addf %193, %214 : vector<8x64xf32>
    %c0_97 = arith.constant 0 : index
    %c83 = arith.constant 83 : index
    %216 = vector.load %arg2[%c0_97, %c83] : memref<8x144xf32, #tpu.memory_space<vmem>>, vector<8x1xf32>
    %217 = vector.broadcast %216 : vector<8x1xf32> to vector<8x64xf32>
    %218 = arith.mulf %207, %217 : vector<8x64xf32>
    %219 = arith.addf %197, %218 : vector<8x64xf32>
    %c0_98 = arith.constant 0 : index
    %c119 = arith.constant 119 : index
    %220 = vector.load %arg2[%c0_98, %c119] : memref<8x144xf32, #tpu.memory_space<vmem>>, vector<8x1xf32>
    %221 = vector.broadcast %220 : vector<8x1xf32> to vector<8x64xf32>
    %222 = arith.mulf %207, %221 : vector<8x64xf32>
    %223 = arith.addf %201, %222 : vector<8x64xf32>
    %c0_99 = arith.constant 0 : index
    %c2_100 = arith.constant 2 : index
    %c0_101 = arith.constant 0 : index
    %224 = vector.load %arg1[%c0_99, %c2_100, %c0_101] : memref<8x4x64xf32, #tpu.memory_space<vmem>>, vector<8x1x64xf32>
    %225 = vector.shape_cast %224 : vector<8x1x64xf32> to vector<8x64xf32>
    %c7_i32_102 = arith.constant 7 : i32
    %226 = tpu.dynamic_rotate %225 by %c7_i32_102 dim 1 : vector<8x64xf32>, i32 -> vector<8x64xf32>
    %c2_103 = arith.constant 2 : index
    %c0_104 = arith.constant 0 : index
    %227 = vector.load %arg3[%c2_103, %c0_104] : memref<9x64xf32, #tpu.memory_space<vmem>>, vector<1x64xf32>
    %228 = vector.broadcast %227 : vector<1x64xf32> to vector<8x64xf32>
    %229 = arith.mulf %226, %228 : vector<8x64xf32>
    %c0_105 = arith.constant 0 : index
    %c20 = arith.constant 20 : index
    %230 = vector.load %arg2[%c0_105, %c20] : memref<8x144xf32, #tpu.memory_space<vmem>>, vector<8x1xf32>
    %231 = vector.broadcast %230 : vector<8x1xf32> to vector<8x64xf32>
    %232 = arith.mulf %229, %231 : vector<8x64xf32>
    %233 = arith.addf %211, %232 : vector<8x64xf32>
    %c0_106 = arith.constant 0 : index
    %c56 = arith.constant 56 : index
    %234 = vector.load %arg2[%c0_106, %c56] : memref<8x144xf32, #tpu.memory_space<vmem>>, vector<8x1xf32>
    %235 = vector.broadcast %234 : vector<8x1xf32> to vector<8x64xf32>
    %236 = arith.mulf %229, %235 : vector<8x64xf32>
    %237 = arith.addf %215, %236 : vector<8x64xf32>
    %c0_107 = arith.constant 0 : index
    %c92 = arith.constant 92 : index
    %238 = vector.load %arg2[%c0_107, %c92] : memref<8x144xf32, #tpu.memory_space<vmem>>, vector<8x1xf32>
    %239 = vector.broadcast %238 : vector<8x1xf32> to vector<8x64xf32>
    %240 = arith.mulf %229, %239 : vector<8x64xf32>
    %241 = arith.addf %219, %240 : vector<8x64xf32>
    %c0_108 = arith.constant 0 : index
    %c128 = arith.constant 128 : index
    %242 = vector.load %arg2[%c0_108, %c128] : memref<8x144xf32, #tpu.memory_space<vmem>>, vector<8x1xf32>
    %243 = vector.broadcast %242 : vector<8x1xf32> to vector<8x64xf32>
    %244 = arith.mulf %229, %243 : vector<8x64xf32>
    %245 = arith.addf %223, %244 : vector<8x64xf32>
    %c0_109 = arith.constant 0 : index
    %c3_110 = arith.constant 3 : index
    %c0_111 = arith.constant 0 : index
    %246 = vector.load %arg1[%c0_109, %c3_110, %c0_111] : memref<8x4x64xf32, #tpu.memory_space<vmem>>, vector<8x1x64xf32>
    %247 = vector.shape_cast %246 : vector<8x1x64xf32> to vector<8x64xf32>
    %c7_i32_112 = arith.constant 7 : i32
    %248 = tpu.dynamic_rotate %247 by %c7_i32_112 dim 1 : vector<8x64xf32>, i32 -> vector<8x64xf32>
    %c2_113 = arith.constant 2 : index
    %c0_114 = arith.constant 0 : index
    %249 = vector.load %arg3[%c2_113, %c0_114] : memref<9x64xf32, #tpu.memory_space<vmem>>, vector<1x64xf32>
    %250 = vector.broadcast %249 : vector<1x64xf32> to vector<8x64xf32>
    %251 = arith.mulf %248, %250 : vector<8x64xf32>
    %c0_115 = arith.constant 0 : index
    %c29 = arith.constant 29 : index
    %252 = vector.load %arg2[%c0_115, %c29] : memref<8x144xf32, #tpu.memory_space<vmem>>, vector<8x1xf32>
    %253 = vector.broadcast %252 : vector<8x1xf32> to vector<8x64xf32>
    %254 = arith.mulf %251, %253 : vector<8x64xf32>
    %255 = arith.addf %233, %254 : vector<8x64xf32>
    %c0_116 = arith.constant 0 : index
    %c65 = arith.constant 65 : index
    %256 = vector.load %arg2[%c0_116, %c65] : memref<8x144xf32, #tpu.memory_space<vmem>>, vector<8x1xf32>
    %257 = vector.broadcast %256 : vector<8x1xf32> to vector<8x64xf32>
    %258 = arith.mulf %251, %257 : vector<8x64xf32>
    %259 = arith.addf %237, %258 : vector<8x64xf32>
    %c0_117 = arith.constant 0 : index
    %c101 = arith.constant 101 : index
    %260 = vector.load %arg2[%c0_117, %c101] : memref<8x144xf32, #tpu.memory_space<vmem>>, vector<8x1xf32>
    %261 = vector.broadcast %260 : vector<8x1xf32> to vector<8x64xf32>
    %262 = arith.mulf %251, %261 : vector<8x64xf32>
    %263 = arith.addf %241, %262 : vector<8x64xf32>
    %c0_118 = arith.constant 0 : index
    %c137 = arith.constant 137 : index
    %264 = vector.load %arg2[%c0_118, %c137] : memref<8x144xf32, #tpu.memory_space<vmem>>, vector<8x1xf32>
    %265 = vector.broadcast %264 : vector<8x1xf32> to vector<8x64xf32>
    %266 = arith.mulf %251, %265 : vector<8x64xf32>
    %267 = arith.addf %245, %266 : vector<8x64xf32>
    %c0_119 = arith.constant 0 : index
    %c0_120 = arith.constant 0 : index
    %c0_121 = arith.constant 0 : index
    %268 = vector.load %arg1[%c0_119, %c0_120, %c0_121] : memref<8x4x64xf32, #tpu.memory_space<vmem>>, vector<8x1x64xf32>
    %269 = vector.shape_cast %268 : vector<8x1x64xf32> to vector<8x64xf32>
    %c1_i32 = arith.constant 1 : i32
    %270 = tpu.dynamic_rotate %269 by %c1_i32 dim 1 : vector<8x64xf32>, i32 -> vector<8x64xf32>
    %c3_122 = arith.constant 3 : index
    %c0_123 = arith.constant 0 : index
    %271 = vector.load %arg3[%c3_122, %c0_123] : memref<9x64xf32, #tpu.memory_space<vmem>>, vector<1x64xf32>
    %272 = vector.broadcast %271 : vector<1x64xf32> to vector<8x64xf32>
    %273 = arith.mulf %270, %272 : vector<8x64xf32>
    %c0_124 = arith.constant 0 : index
    %c3_125 = arith.constant 3 : index
    %274 = vector.load %arg2[%c0_124, %c3_125] : memref<8x144xf32, #tpu.memory_space<vmem>>, vector<8x1xf32>
    %275 = vector.broadcast %274 : vector<8x1xf32> to vector<8x64xf32>
    %276 = arith.mulf %273, %275 : vector<8x64xf32>
    %277 = arith.addf %255, %276 : vector<8x64xf32>
    %c0_126 = arith.constant 0 : index
    %c39 = arith.constant 39 : index
    %278 = vector.load %arg2[%c0_126, %c39] : memref<8x144xf32, #tpu.memory_space<vmem>>, vector<8x1xf32>
    %279 = vector.broadcast %278 : vector<8x1xf32> to vector<8x64xf32>
    %280 = arith.mulf %273, %279 : vector<8x64xf32>
    %281 = arith.addf %259, %280 : vector<8x64xf32>
    %c0_127 = arith.constant 0 : index
    %c75 = arith.constant 75 : index
    %282 = vector.load %arg2[%c0_127, %c75] : memref<8x144xf32, #tpu.memory_space<vmem>>, vector<8x1xf32>
    %283 = vector.broadcast %282 : vector<8x1xf32> to vector<8x64xf32>
    %284 = arith.mulf %273, %283 : vector<8x64xf32>
    %285 = arith.addf %263, %284 : vector<8x64xf32>
    %c0_128 = arith.constant 0 : index
    %c111 = arith.constant 111 : index
    %286 = vector.load %arg2[%c0_128, %c111] : memref<8x144xf32, #tpu.memory_space<vmem>>, vector<8x1xf32>
    %287 = vector.broadcast %286 : vector<8x1xf32> to vector<8x64xf32>
    %288 = arith.mulf %273, %287 : vector<8x64xf32>
    %289 = arith.addf %267, %288 : vector<8x64xf32>
    %c0_129 = arith.constant 0 : index
    %c1_130 = arith.constant 1 : index
    %c0_131 = arith.constant 0 : index
    %290 = vector.load %arg1[%c0_129, %c1_130, %c0_131] : memref<8x4x64xf32, #tpu.memory_space<vmem>>, vector<8x1x64xf32>
    %291 = vector.shape_cast %290 : vector<8x1x64xf32> to vector<8x64xf32>
    %c1_i32_132 = arith.constant 1 : i32
    %292 = tpu.dynamic_rotate %291 by %c1_i32_132 dim 1 : vector<8x64xf32>, i32 -> vector<8x64xf32>
    %c3_133 = arith.constant 3 : index
    %c0_134 = arith.constant 0 : index
    %293 = vector.load %arg3[%c3_133, %c0_134] : memref<9x64xf32, #tpu.memory_space<vmem>>, vector<1x64xf32>
    %294 = vector.broadcast %293 : vector<1x64xf32> to vector<8x64xf32>
    %295 = arith.mulf %292, %294 : vector<8x64xf32>
    %c0_135 = arith.constant 0 : index
    %c12 = arith.constant 12 : index
    %296 = vector.load %arg2[%c0_135, %c12] : memref<8x144xf32, #tpu.memory_space<vmem>>, vector<8x1xf32>
    %297 = vector.broadcast %296 : vector<8x1xf32> to vector<8x64xf32>
    %298 = arith.mulf %295, %297 : vector<8x64xf32>
    %299 = arith.addf %277, %298 : vector<8x64xf32>
    %c0_136 = arith.constant 0 : index
    %c48 = arith.constant 48 : index
    %300 = vector.load %arg2[%c0_136, %c48] : memref<8x144xf32, #tpu.memory_space<vmem>>, vector<8x1xf32>
    %301 = vector.broadcast %300 : vector<8x1xf32> to vector<8x64xf32>
    %302 = arith.mulf %295, %301 : vector<8x64xf32>
    %303 = arith.addf %281, %302 : vector<8x64xf32>
    %c0_137 = arith.constant 0 : index
    %c84 = arith.constant 84 : index
    %304 = vector.load %arg2[%c0_137, %c84] : memref<8x144xf32, #tpu.memory_space<vmem>>, vector<8x1xf32>
    %305 = vector.broadcast %304 : vector<8x1xf32> to vector<8x64xf32>
    %306 = arith.mulf %295, %305 : vector<8x64xf32>
    %307 = arith.addf %285, %306 : vector<8x64xf32>
    %c0_138 = arith.constant 0 : index
    %c120 = arith.constant 120 : index
    %308 = vector.load %arg2[%c0_138, %c120] : memref<8x144xf32, #tpu.memory_space<vmem>>, vector<8x1xf32>
    %309 = vector.broadcast %308 : vector<8x1xf32> to vector<8x64xf32>
    %310 = arith.mulf %295, %309 : vector<8x64xf32>
    %311 = arith.addf %289, %310 : vector<8x64xf32>
    %c0_139 = arith.constant 0 : index
    %c2_140 = arith.constant 2 : index
    %c0_141 = arith.constant 0 : index
    %312 = vector.load %arg1[%c0_139, %c2_140, %c0_141] : memref<8x4x64xf32, #tpu.memory_space<vmem>>, vector<8x1x64xf32>
    %313 = vector.shape_cast %312 : vector<8x1x64xf32> to vector<8x64xf32>
    %c1_i32_142 = arith.constant 1 : i32
    %314 = tpu.dynamic_rotate %313 by %c1_i32_142 dim 1 : vector<8x64xf32>, i32 -> vector<8x64xf32>
    %c3_143 = arith.constant 3 : index
    %c0_144 = arith.constant 0 : index
    %315 = vector.load %arg3[%c3_143, %c0_144] : memref<9x64xf32, #tpu.memory_space<vmem>>, vector<1x64xf32>
    %316 = vector.broadcast %315 : vector<1x64xf32> to vector<8x64xf32>
    %317 = arith.mulf %314, %316 : vector<8x64xf32>
    %c0_145 = arith.constant 0 : index
    %c21 = arith.constant 21 : index
    %318 = vector.load %arg2[%c0_145, %c21] : memref<8x144xf32, #tpu.memory_space<vmem>>, vector<8x1xf32>
    %319 = vector.broadcast %318 : vector<8x1xf32> to vector<8x64xf32>
    %320 = arith.mulf %317, %319 : vector<8x64xf32>
    %321 = arith.addf %299, %320 : vector<8x64xf32>
    %c0_146 = arith.constant 0 : index
    %c57 = arith.constant 57 : index
    %322 = vector.load %arg2[%c0_146, %c57] : memref<8x144xf32, #tpu.memory_space<vmem>>, vector<8x1xf32>
    %323 = vector.broadcast %322 : vector<8x1xf32> to vector<8x64xf32>
    %324 = arith.mulf %317, %323 : vector<8x64xf32>
    %325 = arith.addf %303, %324 : vector<8x64xf32>
    %c0_147 = arith.constant 0 : index
    %c93 = arith.constant 93 : index
    %326 = vector.load %arg2[%c0_147, %c93] : memref<8x144xf32, #tpu.memory_space<vmem>>, vector<8x1xf32>
    %327 = vector.broadcast %326 : vector<8x1xf32> to vector<8x64xf32>
    %328 = arith.mulf %317, %327 : vector<8x64xf32>
    %329 = arith.addf %307, %328 : vector<8x64xf32>
    %c0_148 = arith.constant 0 : index
    %c129 = arith.constant 129 : index
    %330 = vector.load %arg2[%c0_148, %c129] : memref<8x144xf32, #tpu.memory_space<vmem>>, vector<8x1xf32>
    %331 = vector.broadcast %330 : vector<8x1xf32> to vector<8x64xf32>
    %332 = arith.mulf %317, %331 : vector<8x64xf32>
    %333 = arith.addf %311, %332 : vector<8x64xf32>
    %c0_149 = arith.constant 0 : index
    %c3_150 = arith.constant 3 : index
    %c0_151 = arith.constant 0 : index
    %334 = vector.load %arg1[%c0_149, %c3_150, %c0_151] : memref<8x4x64xf32, #tpu.memory_space<vmem>>, vector<8x1x64xf32>
    %335 = vector.shape_cast %334 : vector<8x1x64xf32> to vector<8x64xf32>
    %c1_i32_152 = arith.constant 1 : i32
    %336 = tpu.dynamic_rotate %335 by %c1_i32_152 dim 1 : vector<8x64xf32>, i32 -> vector<8x64xf32>
    %c3_153 = arith.constant 3 : index
    %c0_154 = arith.constant 0 : index
    %337 = vector.load %arg3[%c3_153, %c0_154] : memref<9x64xf32, #tpu.memory_space<vmem>>, vector<1x64xf32>
    %338 = vector.broadcast %337 : vector<1x64xf32> to vector<8x64xf32>
    %339 = arith.mulf %336, %338 : vector<8x64xf32>
    %c0_155 = arith.constant 0 : index
    %c30 = arith.constant 30 : index
    %340 = vector.load %arg2[%c0_155, %c30] : memref<8x144xf32, #tpu.memory_space<vmem>>, vector<8x1xf32>
    %341 = vector.broadcast %340 : vector<8x1xf32> to vector<8x64xf32>
    %342 = arith.mulf %339, %341 : vector<8x64xf32>
    %343 = arith.addf %321, %342 : vector<8x64xf32>
    %c0_156 = arith.constant 0 : index
    %c66 = arith.constant 66 : index
    %344 = vector.load %arg2[%c0_156, %c66] : memref<8x144xf32, #tpu.memory_space<vmem>>, vector<8x1xf32>
    %345 = vector.broadcast %344 : vector<8x1xf32> to vector<8x64xf32>
    %346 = arith.mulf %339, %345 : vector<8x64xf32>
    %347 = arith.addf %325, %346 : vector<8x64xf32>
    %c0_157 = arith.constant 0 : index
    %c102 = arith.constant 102 : index
    %348 = vector.load %arg2[%c0_157, %c102] : memref<8x144xf32, #tpu.memory_space<vmem>>, vector<8x1xf32>
    %349 = vector.broadcast %348 : vector<8x1xf32> to vector<8x64xf32>
    %350 = arith.mulf %339, %349 : vector<8x64xf32>
    %351 = arith.addf %329, %350 : vector<8x64xf32>
    %c0_158 = arith.constant 0 : index
    %c138 = arith.constant 138 : index
    %352 = vector.load %arg2[%c0_158, %c138] : memref<8x144xf32, #tpu.memory_space<vmem>>, vector<8x1xf32>
    %353 = vector.broadcast %352 : vector<8x1xf32> to vector<8x64xf32>
    %354 = arith.mulf %339, %353 : vector<8x64xf32>
    %355 = arith.addf %333, %354 : vector<8x64xf32>
    %c0_159 = arith.constant 0 : index
    %c0_160 = arith.constant 0 : index
    %c0_161 = arith.constant 0 : index
    %356 = vector.load %arg1[%c0_159, %c0_160, %c0_161] : memref<8x4x64xf32, #tpu.memory_space<vmem>>, vector<8x1x64xf32>
    %357 = vector.shape_cast %356 : vector<8x1x64xf32> to vector<8x64xf32>
    %c0_162 = arith.constant 0 : index
    %c4 = arith.constant 4 : index
    %358 = vector.load %arg2[%c0_162, %c4] : memref<8x144xf32, #tpu.memory_space<vmem>>, vector<8x1xf32>
    %359 = vector.broadcast %358 : vector<8x1xf32> to vector<8x64xf32>
    %360 = arith.mulf %357, %359 : vector<8x64xf32>
    %361 = arith.addf %343, %360 : vector<8x64xf32>
    %c0_163 = arith.constant 0 : index
    %c40 = arith.constant 40 : index
    %362 = vector.load %arg2[%c0_163, %c40] : memref<8x144xf32, #tpu.memory_space<vmem>>, vector<8x1xf32>
    %363 = vector.broadcast %362 : vector<8x1xf32> to vector<8x64xf32>
    %364 = arith.mulf %357, %363 : vector<8x64xf32>
    %365 = arith.addf %347, %364 : vector<8x64xf32>
    %c0_164 = arith.constant 0 : index
    %c76 = arith.constant 76 : index
    %366 = vector.load %arg2[%c0_164, %c76] : memref<8x144xf32, #tpu.memory_space<vmem>>, vector<8x1xf32>
    %367 = vector.broadcast %366 : vector<8x1xf32> to vector<8x64xf32>
    %368 = arith.mulf %357, %367 : vector<8x64xf32>
    %369 = arith.addf %351, %368 : vector<8x64xf32>
    %c0_165 = arith.constant 0 : index
    %c112 = arith.constant 112 : index
    %370 = vector.load %arg2[%c0_165, %c112] : memref<8x144xf32, #tpu.memory_space<vmem>>, vector<8x1xf32>
    %371 = vector.broadcast %370 : vector<8x1xf32> to vector<8x64xf32>
    %372 = arith.mulf %357, %371 : vector<8x64xf32>
    %373 = arith.addf %355, %372 : vector<8x64xf32>
    %c0_166 = arith.constant 0 : index
    %c1_167 = arith.constant 1 : index
    %c0_168 = arith.constant 0 : index
    %374 = vector.load %arg1[%c0_166, %c1_167, %c0_168] : memref<8x4x64xf32, #tpu.memory_space<vmem>>, vector<8x1x64xf32>
    %375 = vector.shape_cast %374 : vector<8x1x64xf32> to vector<8x64xf32>
    %c0_169 = arith.constant 0 : index
    %c13 = arith.constant 13 : index
    %376 = vector.load %arg2[%c0_169, %c13] : memref<8x144xf32, #tpu.memory_space<vmem>>, vector<8x1xf32>
    %377 = vector.broadcast %376 : vector<8x1xf32> to vector<8x64xf32>
    %378 = arith.mulf %375, %377 : vector<8x64xf32>
    %379 = arith.addf %361, %378 : vector<8x64xf32>
    %c0_170 = arith.constant 0 : index
    %c49 = arith.constant 49 : index
    %380 = vector.load %arg2[%c0_170, %c49] : memref<8x144xf32, #tpu.memory_space<vmem>>, vector<8x1xf32>
    %381 = vector.broadcast %380 : vector<8x1xf32> to vector<8x64xf32>
    %382 = arith.mulf %375, %381 : vector<8x64xf32>
    %383 = arith.addf %365, %382 : vector<8x64xf32>
    %c0_171 = arith.constant 0 : index
    %c85 = arith.constant 85 : index
    %384 = vector.load %arg2[%c0_171, %c85] : memref<8x144xf32, #tpu.memory_space<vmem>>, vector<8x1xf32>
    %385 = vector.broadcast %384 : vector<8x1xf32> to vector<8x64xf32>
    %386 = arith.mulf %375, %385 : vector<8x64xf32>
    %387 = arith.addf %369, %386 : vector<8x64xf32>
    %c0_172 = arith.constant 0 : index
    %c121 = arith.constant 121 : index
    %388 = vector.load %arg2[%c0_172, %c121] : memref<8x144xf32, #tpu.memory_space<vmem>>, vector<8x1xf32>
    %389 = vector.broadcast %388 : vector<8x1xf32> to vector<8x64xf32>
    %390 = arith.mulf %375, %389 : vector<8x64xf32>
    %391 = arith.addf %373, %390 : vector<8x64xf32>
    %c0_173 = arith.constant 0 : index
    %c2_174 = arith.constant 2 : index
    %c0_175 = arith.constant 0 : index
    %392 = vector.load %arg1[%c0_173, %c2_174, %c0_175] : memref<8x4x64xf32, #tpu.memory_space<vmem>>, vector<8x1x64xf32>
    %393 = vector.shape_cast %392 : vector<8x1x64xf32> to vector<8x64xf32>
    %c0_176 = arith.constant 0 : index
    %c22 = arith.constant 22 : index
    %394 = vector.load %arg2[%c0_176, %c22] : memref<8x144xf32, #tpu.memory_space<vmem>>, vector<8x1xf32>
    %395 = vector.broadcast %394 : vector<8x1xf32> to vector<8x64xf32>
    %396 = arith.mulf %393, %395 : vector<8x64xf32>
    %397 = arith.addf %379, %396 : vector<8x64xf32>
    %c0_177 = arith.constant 0 : index
    %c58 = arith.constant 58 : index
    %398 = vector.load %arg2[%c0_177, %c58] : memref<8x144xf32, #tpu.memory_space<vmem>>, vector<8x1xf32>
    %399 = vector.broadcast %398 : vector<8x1xf32> to vector<8x64xf32>
    %400 = arith.mulf %393, %399 : vector<8x64xf32>
    %401 = arith.addf %383, %400 : vector<8x64xf32>
    %c0_178 = arith.constant 0 : index
    %c94 = arith.constant 94 : index
    %402 = vector.load %arg2[%c0_178, %c94] : memref<8x144xf32, #tpu.memory_space<vmem>>, vector<8x1xf32>
    %403 = vector.broadcast %402 : vector<8x1xf32> to vector<8x64xf32>
    %404 = arith.mulf %393, %403 : vector<8x64xf32>
    %405 = arith.addf %387, %404 : vector<8x64xf32>
    %c0_179 = arith.constant 0 : index
    %c130 = arith.constant 130 : index
    %406 = vector.load %arg2[%c0_179, %c130] : memref<8x144xf32, #tpu.memory_space<vmem>>, vector<8x1xf32>
    %407 = vector.broadcast %406 : vector<8x1xf32> to vector<8x64xf32>
    %408 = arith.mulf %393, %407 : vector<8x64xf32>
    %409 = arith.addf %391, %408 : vector<8x64xf32>
    %c0_180 = arith.constant 0 : index
    %c3_181 = arith.constant 3 : index
    %c0_182 = arith.constant 0 : index
    %410 = vector.load %arg1[%c0_180, %c3_181, %c0_182] : memref<8x4x64xf32, #tpu.memory_space<vmem>>, vector<8x1x64xf32>
    %411 = vector.shape_cast %410 : vector<8x1x64xf32> to vector<8x64xf32>
    %c0_183 = arith.constant 0 : index
    %c31 = arith.constant 31 : index
    %412 = vector.load %arg2[%c0_183, %c31] : memref<8x144xf32, #tpu.memory_space<vmem>>, vector<8x1xf32>
    %413 = vector.broadcast %412 : vector<8x1xf32> to vector<8x64xf32>
    %414 = arith.mulf %411, %413 : vector<8x64xf32>
    %415 = arith.addf %397, %414 : vector<8x64xf32>
    %c0_184 = arith.constant 0 : index
    %c67 = arith.constant 67 : index
    %416 = vector.load %arg2[%c0_184, %c67] : memref<8x144xf32, #tpu.memory_space<vmem>>, vector<8x1xf32>
    %417 = vector.broadcast %416 : vector<8x1xf32> to vector<8x64xf32>
    %418 = arith.mulf %411, %417 : vector<8x64xf32>
    %419 = arith.addf %401, %418 : vector<8x64xf32>
    %c0_185 = arith.constant 0 : index
    %c103 = arith.constant 103 : index
    %420 = vector.load %arg2[%c0_185, %c103] : memref<8x144xf32, #tpu.memory_space<vmem>>, vector<8x1xf32>
    %421 = vector.broadcast %420 : vector<8x1xf32> to vector<8x64xf32>
    %422 = arith.mulf %411, %421 : vector<8x64xf32>
    %423 = arith.addf %405, %422 : vector<8x64xf32>
    %c0_186 = arith.constant 0 : index
    %c139 = arith.constant 139 : index
    %424 = vector.load %arg2[%c0_186, %c139] : memref<8x144xf32, #tpu.memory_space<vmem>>, vector<8x1xf32>
    %425 = vector.broadcast %424 : vector<8x1xf32> to vector<8x64xf32>
    %426 = arith.mulf %411, %425 : vector<8x64xf32>
    %427 = arith.addf %409, %426 : vector<8x64xf32>
    %c0_187 = arith.constant 0 : index
    %c0_188 = arith.constant 0 : index
    %c0_189 = arith.constant 0 : index
    %428 = vector.load %arg1[%c0_187, %c0_188, %c0_189] : memref<8x4x64xf32, #tpu.memory_space<vmem>>, vector<8x1x64xf32>
    %429 = vector.shape_cast %428 : vector<8x1x64xf32> to vector<8x64xf32>
    %c63_i32 = arith.constant 63 : i32
    %430 = tpu.dynamic_rotate %429 by %c63_i32 dim 1 : vector<8x64xf32>, i32 -> vector<8x64xf32>
    %c5 = arith.constant 5 : index
    %c0_190 = arith.constant 0 : index
    %431 = vector.load %arg3[%c5, %c0_190] : memref<9x64xf32, #tpu.memory_space<vmem>>, vector<1x64xf32>
    %432 = vector.broadcast %431 : vector<1x64xf32> to vector<8x64xf32>
    %433 = arith.mulf %430, %432 : vector<8x64xf32>
    %c0_191 = arith.constant 0 : index
    %c5_192 = arith.constant 5 : index
    %434 = vector.load %arg2[%c0_191, %c5_192] : memref<8x144xf32, #tpu.memory_space<vmem>>, vector<8x1xf32>
    %435 = vector.broadcast %434 : vector<8x1xf32> to vector<8x64xf32>
    %436 = arith.mulf %433, %435 : vector<8x64xf32>
    %437 = arith.addf %415, %436 : vector<8x64xf32>
    %c0_193 = arith.constant 0 : index
    %c41 = arith.constant 41 : index
    %438 = vector.load %arg2[%c0_193, %c41] : memref<8x144xf32, #tpu.memory_space<vmem>>, vector<8x1xf32>
    %439 = vector.broadcast %438 : vector<8x1xf32> to vector<8x64xf32>
    %440 = arith.mulf %433, %439 : vector<8x64xf32>
    %441 = arith.addf %419, %440 : vector<8x64xf32>
    %c0_194 = arith.constant 0 : index
    %c77 = arith.constant 77 : index
    %442 = vector.load %arg2[%c0_194, %c77] : memref<8x144xf32, #tpu.memory_space<vmem>>, vector<8x1xf32>
    %443 = vector.broadcast %442 : vector<8x1xf32> to vector<8x64xf32>
    %444 = arith.mulf %433, %443 : vector<8x64xf32>
    %445 = arith.addf %423, %444 : vector<8x64xf32>
    %c0_195 = arith.constant 0 : index
    %c113 = arith.constant 113 : index
    %446 = vector.load %arg2[%c0_195, %c113] : memref<8x144xf32, #tpu.memory_space<vmem>>, vector<8x1xf32>
    %447 = vector.broadcast %446 : vector<8x1xf32> to vector<8x64xf32>
    %448 = arith.mulf %433, %447 : vector<8x64xf32>
    %449 = arith.addf %427, %448 : vector<8x64xf32>
    %c0_196 = arith.constant 0 : index
    %c1_197 = arith.constant 1 : index
    %c0_198 = arith.constant 0 : index
    %450 = vector.load %arg1[%c0_196, %c1_197, %c0_198] : memref<8x4x64xf32, #tpu.memory_space<vmem>>, vector<8x1x64xf32>
    %451 = vector.shape_cast %450 : vector<8x1x64xf32> to vector<8x64xf32>
    %c63_i32_199 = arith.constant 63 : i32
    %452 = tpu.dynamic_rotate %451 by %c63_i32_199 dim 1 : vector<8x64xf32>, i32 -> vector<8x64xf32>
    %c5_200 = arith.constant 5 : index
    %c0_201 = arith.constant 0 : index
    %453 = vector.load %arg3[%c5_200, %c0_201] : memref<9x64xf32, #tpu.memory_space<vmem>>, vector<1x64xf32>
    %454 = vector.broadcast %453 : vector<1x64xf32> to vector<8x64xf32>
    %455 = arith.mulf %452, %454 : vector<8x64xf32>
    %c0_202 = arith.constant 0 : index
    %c14 = arith.constant 14 : index
    %456 = vector.load %arg2[%c0_202, %c14] : memref<8x144xf32, #tpu.memory_space<vmem>>, vector<8x1xf32>
    %457 = vector.broadcast %456 : vector<8x1xf32> to vector<8x64xf32>
    %458 = arith.mulf %455, %457 : vector<8x64xf32>
    %459 = arith.addf %437, %458 : vector<8x64xf32>
    %c0_203 = arith.constant 0 : index
    %c50 = arith.constant 50 : index
    %460 = vector.load %arg2[%c0_203, %c50] : memref<8x144xf32, #tpu.memory_space<vmem>>, vector<8x1xf32>
    %461 = vector.broadcast %460 : vector<8x1xf32> to vector<8x64xf32>
    %462 = arith.mulf %455, %461 : vector<8x64xf32>
    %463 = arith.addf %441, %462 : vector<8x64xf32>
    %c0_204 = arith.constant 0 : index
    %c86 = arith.constant 86 : index
    %464 = vector.load %arg2[%c0_204, %c86] : memref<8x144xf32, #tpu.memory_space<vmem>>, vector<8x1xf32>
    %465 = vector.broadcast %464 : vector<8x1xf32> to vector<8x64xf32>
    %466 = arith.mulf %455, %465 : vector<8x64xf32>
    %467 = arith.addf %445, %466 : vector<8x64xf32>
    %c0_205 = arith.constant 0 : index
    %c122 = arith.constant 122 : index
    %468 = vector.load %arg2[%c0_205, %c122] : memref<8x144xf32, #tpu.memory_space<vmem>>, vector<8x1xf32>
    %469 = vector.broadcast %468 : vector<8x1xf32> to vector<8x64xf32>
    %470 = arith.mulf %455, %469 : vector<8x64xf32>
    %471 = arith.addf %449, %470 : vector<8x64xf32>
    %c0_206 = arith.constant 0 : index
    %c2_207 = arith.constant 2 : index
    %c0_208 = arith.constant 0 : index
    %472 = vector.load %arg1[%c0_206, %c2_207, %c0_208] : memref<8x4x64xf32, #tpu.memory_space<vmem>>, vector<8x1x64xf32>
    %473 = vector.shape_cast %472 : vector<8x1x64xf32> to vector<8x64xf32>
    %c63_i32_209 = arith.constant 63 : i32
    %474 = tpu.dynamic_rotate %473 by %c63_i32_209 dim 1 : vector<8x64xf32>, i32 -> vector<8x64xf32>
    %c5_210 = arith.constant 5 : index
    %c0_211 = arith.constant 0 : index
    %475 = vector.load %arg3[%c5_210, %c0_211] : memref<9x64xf32, #tpu.memory_space<vmem>>, vector<1x64xf32>
    %476 = vector.broadcast %475 : vector<1x64xf32> to vector<8x64xf32>
    %477 = arith.mulf %474, %476 : vector<8x64xf32>
    %c0_212 = arith.constant 0 : index
    %c23 = arith.constant 23 : index
    %478 = vector.load %arg2[%c0_212, %c23] : memref<8x144xf32, #tpu.memory_space<vmem>>, vector<8x1xf32>
    %479 = vector.broadcast %478 : vector<8x1xf32> to vector<8x64xf32>
    %480 = arith.mulf %477, %479 : vector<8x64xf32>
    %481 = arith.addf %459, %480 : vector<8x64xf32>
    %c0_213 = arith.constant 0 : index
    %c59 = arith.constant 59 : index
    %482 = vector.load %arg2[%c0_213, %c59] : memref<8x144xf32, #tpu.memory_space<vmem>>, vector<8x1xf32>
    %483 = vector.broadcast %482 : vector<8x1xf32> to vector<8x64xf32>
    %484 = arith.mulf %477, %483 : vector<8x64xf32>
    %485 = arith.addf %463, %484 : vector<8x64xf32>
    %c0_214 = arith.constant 0 : index
    %c95 = arith.constant 95 : index
    %486 = vector.load %arg2[%c0_214, %c95] : memref<8x144xf32, #tpu.memory_space<vmem>>, vector<8x1xf32>
    %487 = vector.broadcast %486 : vector<8x1xf32> to vector<8x64xf32>
    %488 = arith.mulf %477, %487 : vector<8x64xf32>
    %489 = arith.addf %467, %488 : vector<8x64xf32>
    %c0_215 = arith.constant 0 : index
    %c131 = arith.constant 131 : index
    %490 = vector.load %arg2[%c0_215, %c131] : memref<8x144xf32, #tpu.memory_space<vmem>>, vector<8x1xf32>
    %491 = vector.broadcast %490 : vector<8x1xf32> to vector<8x64xf32>
    %492 = arith.mulf %477, %491 : vector<8x64xf32>
    %493 = arith.addf %471, %492 : vector<8x64xf32>
    %c0_216 = arith.constant 0 : index
    %c3_217 = arith.constant 3 : index
    %c0_218 = arith.constant 0 : index
    %494 = vector.load %arg1[%c0_216, %c3_217, %c0_218] : memref<8x4x64xf32, #tpu.memory_space<vmem>>, vector<8x1x64xf32>
    %495 = vector.shape_cast %494 : vector<8x1x64xf32> to vector<8x64xf32>
    %c63_i32_219 = arith.constant 63 : i32
    %496 = tpu.dynamic_rotate %495 by %c63_i32_219 dim 1 : vector<8x64xf32>, i32 -> vector<8x64xf32>
    %c5_220 = arith.constant 5 : index
    %c0_221 = arith.constant 0 : index
    %497 = vector.load %arg3[%c5_220, %c0_221] : memref<9x64xf32, #tpu.memory_space<vmem>>, vector<1x64xf32>
    %498 = vector.broadcast %497 : vector<1x64xf32> to vector<8x64xf32>
    %499 = arith.mulf %496, %498 : vector<8x64xf32>
    %c0_222 = arith.constant 0 : index
    %c32 = arith.constant 32 : index
    %500 = vector.load %arg2[%c0_222, %c32] : memref<8x144xf32, #tpu.memory_space<vmem>>, vector<8x1xf32>
    %501 = vector.broadcast %500 : vector<8x1xf32> to vector<8x64xf32>
    %502 = arith.mulf %499, %501 : vector<8x64xf32>
    %503 = arith.addf %481, %502 : vector<8x64xf32>
    %c0_223 = arith.constant 0 : index
    %c68 = arith.constant 68 : index
    %504 = vector.load %arg2[%c0_223, %c68] : memref<8x144xf32, #tpu.memory_space<vmem>>, vector<8x1xf32>
    %505 = vector.broadcast %504 : vector<8x1xf32> to vector<8x64xf32>
    %506 = arith.mulf %499, %505 : vector<8x64xf32>
    %507 = arith.addf %485, %506 : vector<8x64xf32>
    %c0_224 = arith.constant 0 : index
    %c104 = arith.constant 104 : index
    %508 = vector.load %arg2[%c0_224, %c104] : memref<8x144xf32, #tpu.memory_space<vmem>>, vector<8x1xf32>
    %509 = vector.broadcast %508 : vector<8x1xf32> to vector<8x64xf32>
    %510 = arith.mulf %499, %509 : vector<8x64xf32>
    %511 = arith.addf %489, %510 : vector<8x64xf32>
    %c0_225 = arith.constant 0 : index
    %c140 = arith.constant 140 : index
    %512 = vector.load %arg2[%c0_225, %c140] : memref<8x144xf32, #tpu.memory_space<vmem>>, vector<8x1xf32>
    %513 = vector.broadcast %512 : vector<8x1xf32> to vector<8x64xf32>
    %514 = arith.mulf %499, %513 : vector<8x64xf32>
    %515 = arith.addf %493, %514 : vector<8x64xf32>
    %c0_226 = arith.constant 0 : index
    %c0_227 = arith.constant 0 : index
    %c0_228 = arith.constant 0 : index
    %516 = vector.load %arg1[%c0_226, %c0_227, %c0_228] : memref<8x4x64xf32, #tpu.memory_space<vmem>>, vector<8x1x64xf32>
    %517 = vector.shape_cast %516 : vector<8x1x64xf32> to vector<8x64xf32>
    %c57_i32 = arith.constant 57 : i32
    %518 = tpu.dynamic_rotate %517 by %c57_i32 dim 1 : vector<8x64xf32>, i32 -> vector<8x64xf32>
    %c6 = arith.constant 6 : index
    %c0_229 = arith.constant 0 : index
    %519 = vector.load %arg3[%c6, %c0_229] : memref<9x64xf32, #tpu.memory_space<vmem>>, vector<1x64xf32>
    %520 = vector.broadcast %519 : vector<1x64xf32> to vector<8x64xf32>
    %521 = arith.mulf %518, %520 : vector<8x64xf32>
    %c0_230 = arith.constant 0 : index
    %c6_231 = arith.constant 6 : index
    %522 = vector.load %arg2[%c0_230, %c6_231] : memref<8x144xf32, #tpu.memory_space<vmem>>, vector<8x1xf32>
    %523 = vector.broadcast %522 : vector<8x1xf32> to vector<8x64xf32>
    %524 = arith.mulf %521, %523 : vector<8x64xf32>
    %525 = arith.addf %503, %524 : vector<8x64xf32>
    %c0_232 = arith.constant 0 : index
    %c42 = arith.constant 42 : index
    %526 = vector.load %arg2[%c0_232, %c42] : memref<8x144xf32, #tpu.memory_space<vmem>>, vector<8x1xf32>
    %527 = vector.broadcast %526 : vector<8x1xf32> to vector<8x64xf32>
    %528 = arith.mulf %521, %527 : vector<8x64xf32>
    %529 = arith.addf %507, %528 : vector<8x64xf32>
    %c0_233 = arith.constant 0 : index
    %c78 = arith.constant 78 : index
    %530 = vector.load %arg2[%c0_233, %c78] : memref<8x144xf32, #tpu.memory_space<vmem>>, vector<8x1xf32>
    %531 = vector.broadcast %530 : vector<8x1xf32> to vector<8x64xf32>
    %532 = arith.mulf %521, %531 : vector<8x64xf32>
    %533 = arith.addf %511, %532 : vector<8x64xf32>
    %c0_234 = arith.constant 0 : index
    %c114 = arith.constant 114 : index
    %534 = vector.load %arg2[%c0_234, %c114] : memref<8x144xf32, #tpu.memory_space<vmem>>, vector<8x1xf32>
    %535 = vector.broadcast %534 : vector<8x1xf32> to vector<8x64xf32>
    %536 = arith.mulf %521, %535 : vector<8x64xf32>
    %537 = arith.addf %515, %536 : vector<8x64xf32>
    %c0_235 = arith.constant 0 : index
    %c1_236 = arith.constant 1 : index
    %c0_237 = arith.constant 0 : index
    %538 = vector.load %arg1[%c0_235, %c1_236, %c0_237] : memref<8x4x64xf32, #tpu.memory_space<vmem>>, vector<8x1x64xf32>
    %539 = vector.shape_cast %538 : vector<8x1x64xf32> to vector<8x64xf32>
    %c57_i32_238 = arith.constant 57 : i32
    %540 = tpu.dynamic_rotate %539 by %c57_i32_238 dim 1 : vector<8x64xf32>, i32 -> vector<8x64xf32>
    %c6_239 = arith.constant 6 : index
    %c0_240 = arith.constant 0 : index
    %541 = vector.load %arg3[%c6_239, %c0_240] : memref<9x64xf32, #tpu.memory_space<vmem>>, vector<1x64xf32>
    %542 = vector.broadcast %541 : vector<1x64xf32> to vector<8x64xf32>
    %543 = arith.mulf %540, %542 : vector<8x64xf32>
    %c0_241 = arith.constant 0 : index
    %c15 = arith.constant 15 : index
    %544 = vector.load %arg2[%c0_241, %c15] : memref<8x144xf32, #tpu.memory_space<vmem>>, vector<8x1xf32>
    %545 = vector.broadcast %544 : vector<8x1xf32> to vector<8x64xf32>
    %546 = arith.mulf %543, %545 : vector<8x64xf32>
    %547 = arith.addf %525, %546 : vector<8x64xf32>
    %c0_242 = arith.constant 0 : index
    %c51 = arith.constant 51 : index
    %548 = vector.load %arg2[%c0_242, %c51] : memref<8x144xf32, #tpu.memory_space<vmem>>, vector<8x1xf32>
    %549 = vector.broadcast %548 : vector<8x1xf32> to vector<8x64xf32>
    %550 = arith.mulf %543, %549 : vector<8x64xf32>
    %551 = arith.addf %529, %550 : vector<8x64xf32>
    %c0_243 = arith.constant 0 : index
    %c87 = arith.constant 87 : index
    %552 = vector.load %arg2[%c0_243, %c87] : memref<8x144xf32, #tpu.memory_space<vmem>>, vector<8x1xf32>
    %553 = vector.broadcast %552 : vector<8x1xf32> to vector<8x64xf32>
    %554 = arith.mulf %543, %553 : vector<8x64xf32>
    %555 = arith.addf %533, %554 : vector<8x64xf32>
    %c0_244 = arith.constant 0 : index
    %c123 = arith.constant 123 : index
    %556 = vector.load %arg2[%c0_244, %c123] : memref<8x144xf32, #tpu.memory_space<vmem>>, vector<8x1xf32>
    %557 = vector.broadcast %556 : vector<8x1xf32> to vector<8x64xf32>
    %558 = arith.mulf %543, %557 : vector<8x64xf32>
    %559 = arith.addf %537, %558 : vector<8x64xf32>
    %c0_245 = arith.constant 0 : index
    %c2_246 = arith.constant 2 : index
    %c0_247 = arith.constant 0 : index
    %560 = vector.load %arg1[%c0_245, %c2_246, %c0_247] : memref<8x4x64xf32, #tpu.memory_space<vmem>>, vector<8x1x64xf32>
    %561 = vector.shape_cast %560 : vector<8x1x64xf32> to vector<8x64xf32>
    %c57_i32_248 = arith.constant 57 : i32
    %562 = tpu.dynamic_rotate %561 by %c57_i32_248 dim 1 : vector<8x64xf32>, i32 -> vector<8x64xf32>
    %c6_249 = arith.constant 6 : index
    %c0_250 = arith.constant 0 : index
    %563 = vector.load %arg3[%c6_249, %c0_250] : memref<9x64xf32, #tpu.memory_space<vmem>>, vector<1x64xf32>
    %564 = vector.broadcast %563 : vector<1x64xf32> to vector<8x64xf32>
    %565 = arith.mulf %562, %564 : vector<8x64xf32>
    %c0_251 = arith.constant 0 : index
    %c24 = arith.constant 24 : index
    %566 = vector.load %arg2[%c0_251, %c24] : memref<8x144xf32, #tpu.memory_space<vmem>>, vector<8x1xf32>
    %567 = vector.broadcast %566 : vector<8x1xf32> to vector<8x64xf32>
    %568 = arith.mulf %565, %567 : vector<8x64xf32>
    %569 = arith.addf %547, %568 : vector<8x64xf32>
    %c0_252 = arith.constant 0 : index
    %c60 = arith.constant 60 : index
    %570 = vector.load %arg2[%c0_252, %c60] : memref<8x144xf32, #tpu.memory_space<vmem>>, vector<8x1xf32>
    %571 = vector.broadcast %570 : vector<8x1xf32> to vector<8x64xf32>
    %572 = arith.mulf %565, %571 : vector<8x64xf32>
    %573 = arith.addf %551, %572 : vector<8x64xf32>
    %c0_253 = arith.constant 0 : index
    %c96 = arith.constant 96 : index
    %574 = vector.load %arg2[%c0_253, %c96] : memref<8x144xf32, #tpu.memory_space<vmem>>, vector<8x1xf32>
    %575 = vector.broadcast %574 : vector<8x1xf32> to vector<8x64xf32>
    %576 = arith.mulf %565, %575 : vector<8x64xf32>
    %577 = arith.addf %555, %576 : vector<8x64xf32>
    %c0_254 = arith.constant 0 : index
    %c132 = arith.constant 132 : index
    %578 = vector.load %arg2[%c0_254, %c132] : memref<8x144xf32, #tpu.memory_space<vmem>>, vector<8x1xf32>
    %579 = vector.broadcast %578 : vector<8x1xf32> to vector<8x64xf32>
    %580 = arith.mulf %565, %579 : vector<8x64xf32>
    %581 = arith.addf %559, %580 : vector<8x64xf32>
    %c0_255 = arith.constant 0 : index
    %c3_256 = arith.constant 3 : index
    %c0_257 = arith.constant 0 : index
    %582 = vector.load %arg1[%c0_255, %c3_256, %c0_257] : memref<8x4x64xf32, #tpu.memory_space<vmem>>, vector<8x1x64xf32>
    %583 = vector.shape_cast %582 : vector<8x1x64xf32> to vector<8x64xf32>
    %c57_i32_258 = arith.constant 57 : i32
    %584 = tpu.dynamic_rotate %583 by %c57_i32_258 dim 1 : vector<8x64xf32>, i32 -> vector<8x64xf32>
    %c6_259 = arith.constant 6 : index
    %c0_260 = arith.constant 0 : index
    %585 = vector.load %arg3[%c6_259, %c0_260] : memref<9x64xf32, #tpu.memory_space<vmem>>, vector<1x64xf32>
    %586 = vector.broadcast %585 : vector<1x64xf32> to vector<8x64xf32>
    %587 = arith.mulf %584, %586 : vector<8x64xf32>
    %c0_261 = arith.constant 0 : index
    %c33 = arith.constant 33 : index
    %588 = vector.load %arg2[%c0_261, %c33] : memref<8x144xf32, #tpu.memory_space<vmem>>, vector<8x1xf32>
    %589 = vector.broadcast %588 : vector<8x1xf32> to vector<8x64xf32>
    %590 = arith.mulf %587, %589 : vector<8x64xf32>
    %591 = arith.addf %569, %590 : vector<8x64xf32>
    %c0_262 = arith.constant 0 : index
    %c69 = arith.constant 69 : index
    %592 = vector.load %arg2[%c0_262, %c69] : memref<8x144xf32, #tpu.memory_space<vmem>>, vector<8x1xf32>
    %593 = vector.broadcast %592 : vector<8x1xf32> to vector<8x64xf32>
    %594 = arith.mulf %587, %593 : vector<8x64xf32>
    %595 = arith.addf %573, %594 : vector<8x64xf32>
    %c0_263 = arith.constant 0 : index
    %c105 = arith.constant 105 : index
    %596 = vector.load %arg2[%c0_263, %c105] : memref<8x144xf32, #tpu.memory_space<vmem>>, vector<8x1xf32>
    %597 = vector.broadcast %596 : vector<8x1xf32> to vector<8x64xf32>
    %598 = arith.mulf %587, %597 : vector<8x64xf32>
    %599 = arith.addf %577, %598 : vector<8x64xf32>
    %c0_264 = arith.constant 0 : index
    %c141 = arith.constant 141 : index
    %600 = vector.load %arg2[%c0_264, %c141] : memref<8x144xf32, #tpu.memory_space<vmem>>, vector<8x1xf32>
    %601 = vector.broadcast %600 : vector<8x1xf32> to vector<8x64xf32>
    %602 = arith.mulf %587, %601 : vector<8x64xf32>
    %603 = arith.addf %581, %602 : vector<8x64xf32>
    %c0_265 = arith.constant 0 : index
    %c0_266 = arith.constant 0 : index
    %c0_267 = arith.constant 0 : index
    %604 = vector.load %arg1[%c0_265, %c0_266, %c0_267] : memref<8x4x64xf32, #tpu.memory_space<vmem>>, vector<8x1x64xf32>
    %605 = vector.shape_cast %604 : vector<8x1x64xf32> to vector<8x64xf32>
    %c56_i32 = arith.constant 56 : i32
    %606 = tpu.dynamic_rotate %605 by %c56_i32 dim 1 : vector<8x64xf32>, i32 -> vector<8x64xf32>
    %c7 = arith.constant 7 : index
    %c0_268 = arith.constant 0 : index
    %607 = vector.load %arg3[%c7, %c0_268] : memref<9x64xf32, #tpu.memory_space<vmem>>, vector<1x64xf32>
    %608 = vector.broadcast %607 : vector<1x64xf32> to vector<8x64xf32>
    %609 = arith.mulf %606, %608 : vector<8x64xf32>
    %c0_269 = arith.constant 0 : index
    %c7_270 = arith.constant 7 : index
    %610 = vector.load %arg2[%c0_269, %c7_270] : memref<8x144xf32, #tpu.memory_space<vmem>>, vector<8x1xf32>
    %611 = vector.broadcast %610 : vector<8x1xf32> to vector<8x64xf32>
    %612 = arith.mulf %609, %611 : vector<8x64xf32>
    %613 = arith.addf %591, %612 : vector<8x64xf32>
    %c0_271 = arith.constant 0 : index
    %c43 = arith.constant 43 : index
    %614 = vector.load %arg2[%c0_271, %c43] : memref<8x144xf32, #tpu.memory_space<vmem>>, vector<8x1xf32>
    %615 = vector.broadcast %614 : vector<8x1xf32> to vector<8x64xf32>
    %616 = arith.mulf %609, %615 : vector<8x64xf32>
    %617 = arith.addf %595, %616 : vector<8x64xf32>
    %c0_272 = arith.constant 0 : index
    %c79 = arith.constant 79 : index
    %618 = vector.load %arg2[%c0_272, %c79] : memref<8x144xf32, #tpu.memory_space<vmem>>, vector<8x1xf32>
    %619 = vector.broadcast %618 : vector<8x1xf32> to vector<8x64xf32>
    %620 = arith.mulf %609, %619 : vector<8x64xf32>
    %621 = arith.addf %599, %620 : vector<8x64xf32>
    %c0_273 = arith.constant 0 : index
    %c115 = arith.constant 115 : index
    %622 = vector.load %arg2[%c0_273, %c115] : memref<8x144xf32, #tpu.memory_space<vmem>>, vector<8x1xf32>
    %623 = vector.broadcast %622 : vector<8x1xf32> to vector<8x64xf32>
    %624 = arith.mulf %609, %623 : vector<8x64xf32>
    %625 = arith.addf %603, %624 : vector<8x64xf32>
    %c0_274 = arith.constant 0 : index
    %c1_275 = arith.constant 1 : index
    %c0_276 = arith.constant 0 : index
    %626 = vector.load %arg1[%c0_274, %c1_275, %c0_276] : memref<8x4x64xf32, #tpu.memory_space<vmem>>, vector<8x1x64xf32>
    %627 = vector.shape_cast %626 : vector<8x1x64xf32> to vector<8x64xf32>
    %c56_i32_277 = arith.constant 56 : i32
    %628 = tpu.dynamic_rotate %627 by %c56_i32_277 dim 1 : vector<8x64xf32>, i32 -> vector<8x64xf32>
    %c7_278 = arith.constant 7 : index
    %c0_279 = arith.constant 0 : index
    %629 = vector.load %arg3[%c7_278, %c0_279] : memref<9x64xf32, #tpu.memory_space<vmem>>, vector<1x64xf32>
    %630 = vector.broadcast %629 : vector<1x64xf32> to vector<8x64xf32>
    %631 = arith.mulf %628, %630 : vector<8x64xf32>
    %c0_280 = arith.constant 0 : index
    %c16 = arith.constant 16 : index
    %632 = vector.load %arg2[%c0_280, %c16] : memref<8x144xf32, #tpu.memory_space<vmem>>, vector<8x1xf32>
    %633 = vector.broadcast %632 : vector<8x1xf32> to vector<8x64xf32>
    %634 = arith.mulf %631, %633 : vector<8x64xf32>
    %635 = arith.addf %613, %634 : vector<8x64xf32>
    %c0_281 = arith.constant 0 : index
    %c52 = arith.constant 52 : index
    %636 = vector.load %arg2[%c0_281, %c52] : memref<8x144xf32, #tpu.memory_space<vmem>>, vector<8x1xf32>
    %637 = vector.broadcast %636 : vector<8x1xf32> to vector<8x64xf32>
    %638 = arith.mulf %631, %637 : vector<8x64xf32>
    %639 = arith.addf %617, %638 : vector<8x64xf32>
    %c0_282 = arith.constant 0 : index
    %c88 = arith.constant 88 : index
    %640 = vector.load %arg2[%c0_282, %c88] : memref<8x144xf32, #tpu.memory_space<vmem>>, vector<8x1xf32>
    %641 = vector.broadcast %640 : vector<8x1xf32> to vector<8x64xf32>
    %642 = arith.mulf %631, %641 : vector<8x64xf32>
    %643 = arith.addf %621, %642 : vector<8x64xf32>
    %c0_283 = arith.constant 0 : index
    %c124 = arith.constant 124 : index
    %644 = vector.load %arg2[%c0_283, %c124] : memref<8x144xf32, #tpu.memory_space<vmem>>, vector<8x1xf32>
    %645 = vector.broadcast %644 : vector<8x1xf32> to vector<8x64xf32>
    %646 = arith.mulf %631, %645 : vector<8x64xf32>
    %647 = arith.addf %625, %646 : vector<8x64xf32>
    %c0_284 = arith.constant 0 : index
    %c2_285 = arith.constant 2 : index
    %c0_286 = arith.constant 0 : index
    %648 = vector.load %arg1[%c0_284, %c2_285, %c0_286] : memref<8x4x64xf32, #tpu.memory_space<vmem>>, vector<8x1x64xf32>
    %649 = vector.shape_cast %648 : vector<8x1x64xf32> to vector<8x64xf32>
    %c56_i32_287 = arith.constant 56 : i32
    %650 = tpu.dynamic_rotate %649 by %c56_i32_287 dim 1 : vector<8x64xf32>, i32 -> vector<8x64xf32>
    %c7_288 = arith.constant 7 : index
    %c0_289 = arith.constant 0 : index
    %651 = vector.load %arg3[%c7_288, %c0_289] : memref<9x64xf32, #tpu.memory_space<vmem>>, vector<1x64xf32>
    %652 = vector.broadcast %651 : vector<1x64xf32> to vector<8x64xf32>
    %653 = arith.mulf %650, %652 : vector<8x64xf32>
    %c0_290 = arith.constant 0 : index
    %c25 = arith.constant 25 : index
    %654 = vector.load %arg2[%c0_290, %c25] : memref<8x144xf32, #tpu.memory_space<vmem>>, vector<8x1xf32>
    %655 = vector.broadcast %654 : vector<8x1xf32> to vector<8x64xf32>
    %656 = arith.mulf %653, %655 : vector<8x64xf32>
    %657 = arith.addf %635, %656 : vector<8x64xf32>
    %c0_291 = arith.constant 0 : index
    %c61 = arith.constant 61 : index
    %658 = vector.load %arg2[%c0_291, %c61] : memref<8x144xf32, #tpu.memory_space<vmem>>, vector<8x1xf32>
    %659 = vector.broadcast %658 : vector<8x1xf32> to vector<8x64xf32>
    %660 = arith.mulf %653, %659 : vector<8x64xf32>
    %661 = arith.addf %639, %660 : vector<8x64xf32>
    %c0_292 = arith.constant 0 : index
    %c97 = arith.constant 97 : index
    %662 = vector.load %arg2[%c0_292, %c97] : memref<8x144xf32, #tpu.memory_space<vmem>>, vector<8x1xf32>
    %663 = vector.broadcast %662 : vector<8x1xf32> to vector<8x64xf32>
    %664 = arith.mulf %653, %663 : vector<8x64xf32>
    %665 = arith.addf %643, %664 : vector<8x64xf32>
    %c0_293 = arith.constant 0 : index
    %c133 = arith.constant 133 : index
    %666 = vector.load %arg2[%c0_293, %c133] : memref<8x144xf32, #tpu.memory_space<vmem>>, vector<8x1xf32>
    %667 = vector.broadcast %666 : vector<8x1xf32> to vector<8x64xf32>
    %668 = arith.mulf %653, %667 : vector<8x64xf32>
    %669 = arith.addf %647, %668 : vector<8x64xf32>
    %c0_294 = arith.constant 0 : index
    %c3_295 = arith.constant 3 : index
    %c0_296 = arith.constant 0 : index
    %670 = vector.load %arg1[%c0_294, %c3_295, %c0_296] : memref<8x4x64xf32, #tpu.memory_space<vmem>>, vector<8x1x64xf32>
    %671 = vector.shape_cast %670 : vector<8x1x64xf32> to vector<8x64xf32>
    %c56_i32_297 = arith.constant 56 : i32
    %672 = tpu.dynamic_rotate %671 by %c56_i32_297 dim 1 : vector<8x64xf32>, i32 -> vector<8x64xf32>
    %c7_298 = arith.constant 7 : index
    %c0_299 = arith.constant 0 : index
    %673 = vector.load %arg3[%c7_298, %c0_299] : memref<9x64xf32, #tpu.memory_space<vmem>>, vector<1x64xf32>
    %674 = vector.broadcast %673 : vector<1x64xf32> to vector<8x64xf32>
    %675 = arith.mulf %672, %674 : vector<8x64xf32>
    %c0_300 = arith.constant 0 : index
    %c34 = arith.constant 34 : index
    %676 = vector.load %arg2[%c0_300, %c34] : memref<8x144xf32, #tpu.memory_space<vmem>>, vector<8x1xf32>
    %677 = vector.broadcast %676 : vector<8x1xf32> to vector<8x64xf32>
    %678 = arith.mulf %675, %677 : vector<8x64xf32>
    %679 = arith.addf %657, %678 : vector<8x64xf32>
    %c0_301 = arith.constant 0 : index
    %c70 = arith.constant 70 : index
    %680 = vector.load %arg2[%c0_301, %c70] : memref<8x144xf32, #tpu.memory_space<vmem>>, vector<8x1xf32>
    %681 = vector.broadcast %680 : vector<8x1xf32> to vector<8x64xf32>
    %682 = arith.mulf %675, %681 : vector<8x64xf32>
    %683 = arith.addf %661, %682 : vector<8x64xf32>
    %c0_302 = arith.constant 0 : index
    %c106 = arith.constant 106 : index
    %684 = vector.load %arg2[%c0_302, %c106] : memref<8x144xf32, #tpu.memory_space<vmem>>, vector<8x1xf32>
    %685 = vector.broadcast %684 : vector<8x1xf32> to vector<8x64xf32>
    %686 = arith.mulf %675, %685 : vector<8x64xf32>
    %687 = arith.addf %665, %686 : vector<8x64xf32>
    %c0_303 = arith.constant 0 : index
    %c142 = arith.constant 142 : index
    %688 = vector.load %arg2[%c0_303, %c142] : memref<8x144xf32, #tpu.memory_space<vmem>>, vector<8x1xf32>
    %689 = vector.broadcast %688 : vector<8x1xf32> to vector<8x64xf32>
    %690 = arith.mulf %675, %689 : vector<8x64xf32>
    %691 = arith.addf %669, %690 : vector<8x64xf32>
    %c0_304 = arith.constant 0 : index
    %c0_305 = arith.constant 0 : index
    %c0_306 = arith.constant 0 : index
    %692 = vector.load %arg1[%c0_304, %c0_305, %c0_306] : memref<8x4x64xf32, #tpu.memory_space<vmem>>, vector<8x1x64xf32>
    %693 = vector.shape_cast %692 : vector<8x1x64xf32> to vector<8x64xf32>
    %c55_i32 = arith.constant 55 : i32
    %694 = tpu.dynamic_rotate %693 by %c55_i32 dim 1 : vector<8x64xf32>, i32 -> vector<8x64xf32>
    %c8 = arith.constant 8 : index
    %c0_307 = arith.constant 0 : index
    %695 = vector.load %arg3[%c8, %c0_307] : memref<9x64xf32, #tpu.memory_space<vmem>>, vector<1x64xf32>
    %696 = vector.broadcast %695 : vector<1x64xf32> to vector<8x64xf32>
    %697 = arith.mulf %694, %696 : vector<8x64xf32>
    %c0_308 = arith.constant 0 : index
    %c8_309 = arith.constant 8 : index
    %698 = vector.load %arg2[%c0_308, %c8_309] : memref<8x144xf32, #tpu.memory_space<vmem>>, vector<8x1xf32>
    %699 = vector.broadcast %698 : vector<8x1xf32> to vector<8x64xf32>
    %700 = arith.mulf %697, %699 : vector<8x64xf32>
    %701 = arith.addf %679, %700 : vector<8x64xf32>
    %c0_310 = arith.constant 0 : index
    %c44 = arith.constant 44 : index
    %702 = vector.load %arg2[%c0_310, %c44] : memref<8x144xf32, #tpu.memory_space<vmem>>, vector<8x1xf32>
    %703 = vector.broadcast %702 : vector<8x1xf32> to vector<8x64xf32>
    %704 = arith.mulf %697, %703 : vector<8x64xf32>
    %705 = arith.addf %683, %704 : vector<8x64xf32>
    %c0_311 = arith.constant 0 : index
    %c80 = arith.constant 80 : index
    %706 = vector.load %arg2[%c0_311, %c80] : memref<8x144xf32, #tpu.memory_space<vmem>>, vector<8x1xf32>
    %707 = vector.broadcast %706 : vector<8x1xf32> to vector<8x64xf32>
    %708 = arith.mulf %697, %707 : vector<8x64xf32>
    %709 = arith.addf %687, %708 : vector<8x64xf32>
    %c0_312 = arith.constant 0 : index
    %c116 = arith.constant 116 : index
    %710 = vector.load %arg2[%c0_312, %c116] : memref<8x144xf32, #tpu.memory_space<vmem>>, vector<8x1xf32>
    %711 = vector.broadcast %710 : vector<8x1xf32> to vector<8x64xf32>
    %712 = arith.mulf %697, %711 : vector<8x64xf32>
    %713 = arith.addf %691, %712 : vector<8x64xf32>
    %c0_313 = arith.constant 0 : index
    %c1_314 = arith.constant 1 : index
    %c0_315 = arith.constant 0 : index
    %714 = vector.load %arg1[%c0_313, %c1_314, %c0_315] : memref<8x4x64xf32, #tpu.memory_space<vmem>>, vector<8x1x64xf32>
    %715 = vector.shape_cast %714 : vector<8x1x64xf32> to vector<8x64xf32>
    %c55_i32_316 = arith.constant 55 : i32
    %716 = tpu.dynamic_rotate %715 by %c55_i32_316 dim 1 : vector<8x64xf32>, i32 -> vector<8x64xf32>
    %c8_317 = arith.constant 8 : index
    %c0_318 = arith.constant 0 : index
    %717 = vector.load %arg3[%c8_317, %c0_318] : memref<9x64xf32, #tpu.memory_space<vmem>>, vector<1x64xf32>
    %718 = vector.broadcast %717 : vector<1x64xf32> to vector<8x64xf32>
    %719 = arith.mulf %716, %718 : vector<8x64xf32>
    %c0_319 = arith.constant 0 : index
    %c17 = arith.constant 17 : index
    %720 = vector.load %arg2[%c0_319, %c17] : memref<8x144xf32, #tpu.memory_space<vmem>>, vector<8x1xf32>
    %721 = vector.broadcast %720 : vector<8x1xf32> to vector<8x64xf32>
    %722 = arith.mulf %719, %721 : vector<8x64xf32>
    %723 = arith.addf %701, %722 : vector<8x64xf32>
    %c0_320 = arith.constant 0 : index
    %c53 = arith.constant 53 : index
    %724 = vector.load %arg2[%c0_320, %c53] : memref<8x144xf32, #tpu.memory_space<vmem>>, vector<8x1xf32>
    %725 = vector.broadcast %724 : vector<8x1xf32> to vector<8x64xf32>
    %726 = arith.mulf %719, %725 : vector<8x64xf32>
    %727 = arith.addf %705, %726 : vector<8x64xf32>
    %c0_321 = arith.constant 0 : index
    %c89 = arith.constant 89 : index
    %728 = vector.load %arg2[%c0_321, %c89] : memref<8x144xf32, #tpu.memory_space<vmem>>, vector<8x1xf32>
    %729 = vector.broadcast %728 : vector<8x1xf32> to vector<8x64xf32>
    %730 = arith.mulf %719, %729 : vector<8x64xf32>
    %731 = arith.addf %709, %730 : vector<8x64xf32>
    %c0_322 = arith.constant 0 : index
    %c125 = arith.constant 125 : index
    %732 = vector.load %arg2[%c0_322, %c125] : memref<8x144xf32, #tpu.memory_space<vmem>>, vector<8x1xf32>
    %733 = vector.broadcast %732 : vector<8x1xf32> to vector<8x64xf32>
    %734 = arith.mulf %719, %733 : vector<8x64xf32>
    %735 = arith.addf %713, %734 : vector<8x64xf32>
    %c0_323 = arith.constant 0 : index
    %c2_324 = arith.constant 2 : index
    %c0_325 = arith.constant 0 : index
    %736 = vector.load %arg1[%c0_323, %c2_324, %c0_325] : memref<8x4x64xf32, #tpu.memory_space<vmem>>, vector<8x1x64xf32>
    %737 = vector.shape_cast %736 : vector<8x1x64xf32> to vector<8x64xf32>
    %c55_i32_326 = arith.constant 55 : i32
    %738 = tpu.dynamic_rotate %737 by %c55_i32_326 dim 1 : vector<8x64xf32>, i32 -> vector<8x64xf32>
    %c8_327 = arith.constant 8 : index
    %c0_328 = arith.constant 0 : index
    %739 = vector.load %arg3[%c8_327, %c0_328] : memref<9x64xf32, #tpu.memory_space<vmem>>, vector<1x64xf32>
    %740 = vector.broadcast %739 : vector<1x64xf32> to vector<8x64xf32>
    %741 = arith.mulf %738, %740 : vector<8x64xf32>
    %c0_329 = arith.constant 0 : index
    %c26 = arith.constant 26 : index
    %742 = vector.load %arg2[%c0_329, %c26] : memref<8x144xf32, #tpu.memory_space<vmem>>, vector<8x1xf32>
    %743 = vector.broadcast %742 : vector<8x1xf32> to vector<8x64xf32>
    %744 = arith.mulf %741, %743 : vector<8x64xf32>
    %745 = arith.addf %723, %744 : vector<8x64xf32>
    %c0_330 = arith.constant 0 : index
    %c62 = arith.constant 62 : index
    %746 = vector.load %arg2[%c0_330, %c62] : memref<8x144xf32, #tpu.memory_space<vmem>>, vector<8x1xf32>
    %747 = vector.broadcast %746 : vector<8x1xf32> to vector<8x64xf32>
    %748 = arith.mulf %741, %747 : vector<8x64xf32>
    %749 = arith.addf %727, %748 : vector<8x64xf32>
    %c0_331 = arith.constant 0 : index
    %c98 = arith.constant 98 : index
    %750 = vector.load %arg2[%c0_331, %c98] : memref<8x144xf32, #tpu.memory_space<vmem>>, vector<8x1xf32>
    %751 = vector.broadcast %750 : vector<8x1xf32> to vector<8x64xf32>
    %752 = arith.mulf %741, %751 : vector<8x64xf32>
    %753 = arith.addf %731, %752 : vector<8x64xf32>
    %c0_332 = arith.constant 0 : index
    %c134 = arith.constant 134 : index
    %754 = vector.load %arg2[%c0_332, %c134] : memref<8x144xf32, #tpu.memory_space<vmem>>, vector<8x1xf32>
    %755 = vector.broadcast %754 : vector<8x1xf32> to vector<8x64xf32>
    %756 = arith.mulf %741, %755 : vector<8x64xf32>
    %757 = arith.addf %735, %756 : vector<8x64xf32>
    %c0_333 = arith.constant 0 : index
    %c3_334 = arith.constant 3 : index
    %c0_335 = arith.constant 0 : index
    %758 = vector.load %arg1[%c0_333, %c3_334, %c0_335] : memref<8x4x64xf32, #tpu.memory_space<vmem>>, vector<8x1x64xf32>
    %759 = vector.shape_cast %758 : vector<8x1x64xf32> to vector<8x64xf32>
    %c55_i32_336 = arith.constant 55 : i32
    %760 = tpu.dynamic_rotate %759 by %c55_i32_336 dim 1 : vector<8x64xf32>, i32 -> vector<8x64xf32>
    %c8_337 = arith.constant 8 : index
    %c0_338 = arith.constant 0 : index
    %761 = vector.load %arg3[%c8_337, %c0_338] : memref<9x64xf32, #tpu.memory_space<vmem>>, vector<1x64xf32>
    %762 = vector.broadcast %761 : vector<1x64xf32> to vector<8x64xf32>
    %763 = arith.mulf %760, %762 : vector<8x64xf32>
    %c0_339 = arith.constant 0 : index
    %c35 = arith.constant 35 : index
    %764 = vector.load %arg2[%c0_339, %c35] : memref<8x144xf32, #tpu.memory_space<vmem>>, vector<8x1xf32>
    %765 = vector.broadcast %764 : vector<8x1xf32> to vector<8x64xf32>
    %766 = arith.mulf %763, %765 : vector<8x64xf32>
    %767 = arith.addf %745, %766 : vector<8x64xf32>
    %c0_340 = arith.constant 0 : index
    %c71 = arith.constant 71 : index
    %768 = vector.load %arg2[%c0_340, %c71] : memref<8x144xf32, #tpu.memory_space<vmem>>, vector<8x1xf32>
    %769 = vector.broadcast %768 : vector<8x1xf32> to vector<8x64xf32>
    %770 = arith.mulf %763, %769 : vector<8x64xf32>
    %771 = arith.addf %749, %770 : vector<8x64xf32>
    %c0_341 = arith.constant 0 : index
    %c107 = arith.constant 107 : index
    %772 = vector.load %arg2[%c0_341, %c107] : memref<8x144xf32, #tpu.memory_space<vmem>>, vector<8x1xf32>
    %773 = vector.broadcast %772 : vector<8x1xf32> to vector<8x64xf32>
    %774 = arith.mulf %763, %773 : vector<8x64xf32>
    %775 = arith.addf %753, %774 : vector<8x64xf32>
    %c0_342 = arith.constant 0 : index
    %c143 = arith.constant 143 : index
    %776 = vector.load %arg2[%c0_342, %c143] : memref<8x144xf32, #tpu.memory_space<vmem>>, vector<8x1xf32>
    %777 = vector.broadcast %776 : vector<8x1xf32> to vector<8x64xf32>
    %778 = arith.mulf %763, %777 : vector<8x64xf32>
    %779 = arith.addf %757, %778 : vector<8x64xf32>
    %780 = tpu.concatenate %767, %771, %775, %779 in 1 : vector<8x64xf32>, vector<8x64xf32>, vector<8x64xf32>, vector<8x64xf32> -> vector<8x256xf32>
    %781 = vector.extract_strided_slice %780 {offsets = [0, 0], sizes = [4, 256], strides = [1, 1]} : vector<8x256xf32> to vector<4x256xf32>
    %c0_343 = arith.constant 0 : index
    %c0_344 = arith.constant 0 : index
    %782 = vector.load %arg4[%c0_343, %c0_344] : memref<4x1xf32, #tpu.memory_space<vmem>>, vector<4x1xf32>
    %783 = vector.broadcast %782 : vector<4x1xf32> to vector<4x256xf32>
    %784 = arith.addf %781, %783 : vector<4x256xf32>
    %785 = vector.extract_strided_slice %784 {offsets = [0, 0], sizes = [1, 256], strides = [1, 1]} : vector<4x256xf32> to vector<1x256xf32>
    %786 = vector.extract_strided_slice %784 {offsets = [1, 0], sizes = [1, 256], strides = [1, 1]} : vector<4x256xf32> to vector<1x256xf32>
    %787 = arith.addf %785, %786 : vector<1x256xf32>
    %788 = vector.extract_strided_slice %784 {offsets = [2, 0], sizes = [1, 256], strides = [1, 1]} : vector<4x256xf32> to vector<1x256xf32>
    %789 = arith.addf %787, %788 : vector<1x256xf32>
    %790 = vector.extract_strided_slice %784 {offsets = [3, 0], sizes = [1, 256], strides = [1, 1]} : vector<4x256xf32> to vector<1x256xf32>
    %791 = arith.addf %789, %790 : vector<1x256xf32>
    %cst_345 = arith.constant 2.500000e-01 : f32
    %792 = vector.broadcast %cst_345 : f32 to vector<1x256xf32>
    %793 = arith.mulf %791, %792 : vector<1x256xf32>
    %794 = vector.broadcast %793 : vector<1x256xf32> to vector<4x256xf32>
    %795 = arith.subf %784, %794 : vector<4x256xf32>
    %796 = vector.extract_strided_slice %795 {offsets = [0, 0], sizes = [1, 256], strides = [1, 1]} : vector<4x256xf32> to vector<1x256xf32>
    %797 = vector.extract_strided_slice %795 {offsets = [0, 0], sizes = [1, 256], strides = [1, 1]} : vector<4x256xf32> to vector<1x256xf32>
    %798 = arith.mulf %796, %797 : vector<1x256xf32>
    %799 = vector.extract_strided_slice %795 {offsets = [1, 0], sizes = [1, 256], strides = [1, 1]} : vector<4x256xf32> to vector<1x256xf32>
    %800 = vector.extract_strided_slice %795 {offsets = [1, 0], sizes = [1, 256], strides = [1, 1]} : vector<4x256xf32> to vector<1x256xf32>
    %801 = arith.mulf %799, %800 : vector<1x256xf32>
    %802 = arith.addf %798, %801 : vector<1x256xf32>
    %803 = vector.extract_strided_slice %795 {offsets = [2, 0], sizes = [1, 256], strides = [1, 1]} : vector<4x256xf32> to vector<1x256xf32>
    %804 = vector.extract_strided_slice %795 {offsets = [2, 0], sizes = [1, 256], strides = [1, 1]} : vector<4x256xf32> to vector<1x256xf32>
    %805 = arith.mulf %803, %804 : vector<1x256xf32>
    %806 = arith.addf %802, %805 : vector<1x256xf32>
    %807 = vector.extract_strided_slice %795 {offsets = [3, 0], sizes = [1, 256], strides = [1, 1]} : vector<4x256xf32> to vector<1x256xf32>
    %808 = vector.extract_strided_slice %795 {offsets = [3, 0], sizes = [1, 256], strides = [1, 1]} : vector<4x256xf32> to vector<1x256xf32>
    %809 = arith.mulf %807, %808 : vector<1x256xf32>
    %810 = arith.addf %806, %809 : vector<1x256xf32>
    %cst_346 = arith.constant 2.500000e-01 : f32
    %811 = vector.broadcast %cst_346 : f32 to vector<1x256xf32>
    %812 = arith.mulf %810, %811 : vector<1x256xf32>
    %cst_347 = arith.constant 9.99999997E-7 : f32
    %813 = vector.broadcast %cst_347 : f32 to vector<1x256xf32>
    %814 = arith.addf %812, %813 : vector<1x256xf32>
    %815 = math.rsqrt %814 : vector<1x256xf32>
    %816 = vector.broadcast %815 : vector<1x256xf32> to vector<4x256xf32>
    %817 = arith.mulf %795, %816 : vector<4x256xf32>
    %c0_348 = arith.constant 0 : index
    %c0_349 = arith.constant 0 : index
    %818 = vector.load %arg5[%c0_348, %c0_349] : memref<4x1xf32, #tpu.memory_space<vmem>>, vector<4x1xf32>
    %819 = vector.broadcast %818 : vector<4x1xf32> to vector<4x256xf32>
    %820 = arith.mulf %817, %819 : vector<4x256xf32>
    %c0_350 = arith.constant 0 : index
    %c0_351 = arith.constant 0 : index
    %821 = vector.load %arg6[%c0_350, %c0_351] : memref<4x1xf32, #tpu.memory_space<vmem>>, vector<4x1xf32>
    %822 = vector.broadcast %821 : vector<4x1xf32> to vector<4x256xf32>
    %823 = arith.addf %820, %822 : vector<4x256xf32>
    %c0_352 = arith.constant 0 : index
    %c0_353 = arith.constant 0 : index
    %824 = vector.load %arg7[%c0_352, %c0_353] : memref<16x4xf32, #tpu.memory_space<vmem>>, vector<16x1xf32>
    %825 = vector.extract_strided_slice %823 {offsets = [0, 0], sizes = [1, 256], strides = [1, 1]} : vector<4x256xf32> to vector<1x256xf32>
    %826 = vector.broadcast %824 : vector<16x1xf32> to vector<16x256xf32>
    %827 = vector.broadcast %825 : vector<1x256xf32> to vector<16x256xf32>
    %828 = arith.mulf %826, %827 : vector<16x256xf32>
    %c0_354 = arith.constant 0 : index
    %c1_355 = arith.constant 1 : index
    %829 = vector.load %arg7[%c0_354, %c1_355] : memref<16x4xf32, #tpu.memory_space<vmem>>, vector<16x1xf32>
    %830 = vector.extract_strided_slice %823 {offsets = [1, 0], sizes = [1, 256], strides = [1, 1]} : vector<4x256xf32> to vector<1x256xf32>
    %831 = vector.broadcast %829 : vector<16x1xf32> to vector<16x256xf32>
    %832 = vector.broadcast %830 : vector<1x256xf32> to vector<16x256xf32>
    %833 = arith.mulf %831, %832 : vector<16x256xf32>
    %834 = arith.addf %828, %833 : vector<16x256xf32>
    %c0_356 = arith.constant 0 : index
    %c2_357 = arith.constant 2 : index
    %835 = vector.load %arg7[%c0_356, %c2_357] : memref<16x4xf32, #tpu.memory_space<vmem>>, vector<16x1xf32>
    %836 = vector.extract_strided_slice %823 {offsets = [2, 0], sizes = [1, 256], strides = [1, 1]} : vector<4x256xf32> to vector<1x256xf32>
    %837 = vector.broadcast %835 : vector<16x1xf32> to vector<16x256xf32>
    %838 = vector.broadcast %836 : vector<1x256xf32> to vector<16x256xf32>
    %839 = arith.mulf %837, %838 : vector<16x256xf32>
    %840 = arith.addf %834, %839 : vector<16x256xf32>
    %c0_358 = arith.constant 0 : index
    %c3_359 = arith.constant 3 : index
    %841 = vector.load %arg7[%c0_358, %c3_359] : memref<16x4xf32, #tpu.memory_space<vmem>>, vector<16x1xf32>
    %842 = vector.extract_strided_slice %823 {offsets = [3, 0], sizes = [1, 256], strides = [1, 1]} : vector<4x256xf32> to vector<1x256xf32>
    %843 = vector.broadcast %841 : vector<16x1xf32> to vector<16x256xf32>
    %844 = vector.broadcast %842 : vector<1x256xf32> to vector<16x256xf32>
    %845 = arith.mulf %843, %844 : vector<16x256xf32>
    %846 = arith.addf %840, %845 : vector<16x256xf32>
    %c0_360 = arith.constant 0 : index
    %c0_361 = arith.constant 0 : index
    %847 = vector.load %arg8[%c0_360, %c0_361] : memref<16x1xf32, #tpu.memory_space<vmem>>, vector<16x1xf32>
    %848 = vector.broadcast %847 : vector<16x1xf32> to vector<16x256xf32>
    %849 = arith.addf %846, %848 : vector<16x256xf32>
    %cst_362 = arith.constant 0.707106769 : f32
    %850 = vector.broadcast %cst_362 : f32 to vector<16x256xf32>
    %851 = arith.mulf %849, %850 : vector<16x256xf32>
    %852 = math.absf %851 : vector<16x256xf32>
    %cst_363 = arith.constant 0.327591091 : f32
    %853 = vector.broadcast %cst_363 : f32 to vector<16x256xf32>
    %854 = arith.mulf %853, %852 : vector<16x256xf32>
    %cst_364 = arith.constant 1.000000e+00 : f32
    %855 = vector.broadcast %cst_364 : f32 to vector<16x256xf32>
    %856 = arith.addf %855, %854 : vector<16x256xf32>
    %cst_365 = arith.constant 1.000000e+00 : f32
    %857 = vector.broadcast %cst_365 : f32 to vector<16x256xf32>
    %858 = arith.divf %857, %856 : vector<16x256xf32>
    %cst_366 = arith.constant 1.06140542 : f32
    %859 = vector.broadcast %cst_366 : f32 to vector<16x256xf32>
    %860 = arith.mulf %858, %859 : vector<16x256xf32>
    %cst_367 = arith.constant -1.45315206 : f32
    %861 = vector.broadcast %cst_367 : f32 to vector<16x256xf32>
    %862 = arith.addf %861, %860 : vector<16x256xf32>
    %863 = arith.mulf %858, %862 : vector<16x256xf32>
    %cst_368 = arith.constant 1.42141378 : f32
    %864 = vector.broadcast %cst_368 : f32 to vector<16x256xf32>
    %865 = arith.addf %864, %863 : vector<16x256xf32>
    %866 = arith.mulf %858, %865 : vector<16x256xf32>
    %cst_369 = arith.constant -0.284496725 : f32
    %867 = vector.broadcast %cst_369 : f32 to vector<16x256xf32>
    %868 = arith.addf %867, %866 : vector<16x256xf32>
    %869 = arith.mulf %858, %868 : vector<16x256xf32>
    %cst_370 = arith.constant 0.254829586 : f32
    %870 = vector.broadcast %cst_370 : f32 to vector<16x256xf32>
    %871 = arith.addf %870, %869 : vector<16x256xf32>
    %872 = arith.mulf %858, %871 : vector<16x256xf32>
    %873 = arith.mulf %852, %852 : vector<16x256xf32>
    %cst_371 = arith.constant 0.000000e+00 : f32
    %874 = vector.broadcast %cst_371 : f32 to vector<16x256xf32>
    %875 = arith.subf %874, %873 : vector<16x256xf32>
    %876 = math.exp %875 : vector<16x256xf32>
    %877 = arith.mulf %872, %876 : vector<16x256xf32>
    %cst_372 = arith.constant 1.000000e+00 : f32
    %878 = vector.broadcast %cst_372 : f32 to vector<16x256xf32>
    %879 = arith.subf %878, %877 : vector<16x256xf32>
    %cst_373 = arith.constant 0.000000e+00 : f32
    %880 = vector.broadcast %cst_373 : f32 to vector<16x256xf32>
    %881 = arith.cmpf oge, %851, %880 : vector<16x256xf32>
    %cst_374 = arith.constant 0.000000e+00 : f32
    %882 = vector.broadcast %cst_374 : f32 to vector<16x256xf32>
    %883 = arith.subf %882, %879 : vector<16x256xf32>
    %884 = arith.select %881, %879, %883 : vector<16x256xi1>, vector<16x256xf32>
    %cst_375 = arith.constant 5.000000e-01 : f32
    %885 = vector.broadcast %cst_375 : f32 to vector<16x256xf32>
    %886 = arith.mulf %885, %849 : vector<16x256xf32>
    %cst_376 = arith.constant 1.000000e+00 : f32
    %887 = vector.broadcast %cst_376 : f32 to vector<16x256xf32>
    %888 = arith.addf %887, %884 : vector<16x256xf32>
    %889 = arith.mulf %886, %888 : vector<16x256xf32>
    %c0_377 = arith.constant 0 : index
    %c0_378 = arith.constant 0 : index
    %890 = vector.load %arg9[%c0_377, %c0_378] : memref<4x16xf32, #tpu.memory_space<vmem>>, vector<4x1xf32>
    %891 = vector.extract_strided_slice %889 {offsets = [0, 0], sizes = [1, 256], strides = [1, 1]} : vector<16x256xf32> to vector<1x256xf32>
    %892 = vector.broadcast %890 : vector<4x1xf32> to vector<4x256xf32>
    %893 = vector.broadcast %891 : vector<1x256xf32> to vector<4x256xf32>
    %894 = arith.mulf %892, %893 : vector<4x256xf32>
    %c0_379 = arith.constant 0 : index
    %c1_380 = arith.constant 1 : index
    %895 = vector.load %arg9[%c0_379, %c1_380] : memref<4x16xf32, #tpu.memory_space<vmem>>, vector<4x1xf32>
    %896 = vector.extract_strided_slice %889 {offsets = [1, 0], sizes = [1, 256], strides = [1, 1]} : vector<16x256xf32> to vector<1x256xf32>
    %897 = vector.broadcast %895 : vector<4x1xf32> to vector<4x256xf32>
    %898 = vector.broadcast %896 : vector<1x256xf32> to vector<4x256xf32>
    %899 = arith.mulf %897, %898 : vector<4x256xf32>
    %900 = arith.addf %894, %899 : vector<4x256xf32>
    %c0_381 = arith.constant 0 : index
    %c2_382 = arith.constant 2 : index
    %901 = vector.load %arg9[%c0_381, %c2_382] : memref<4x16xf32, #tpu.memory_space<vmem>>, vector<4x1xf32>
    %902 = vector.extract_strided_slice %889 {offsets = [2, 0], sizes = [1, 256], strides = [1, 1]} : vector<16x256xf32> to vector<1x256xf32>
    %903 = vector.broadcast %901 : vector<4x1xf32> to vector<4x256xf32>
    %904 = vector.broadcast %902 : vector<1x256xf32> to vector<4x256xf32>
    %905 = arith.mulf %903, %904 : vector<4x256xf32>
    %906 = arith.addf %900, %905 : vector<4x256xf32>
    %c0_383 = arith.constant 0 : index
    %c3_384 = arith.constant 3 : index
    %907 = vector.load %arg9[%c0_383, %c3_384] : memref<4x16xf32, #tpu.memory_space<vmem>>, vector<4x1xf32>
    %908 = vector.extract_strided_slice %889 {offsets = [3, 0], sizes = [1, 256], strides = [1, 1]} : vector<16x256xf32> to vector<1x256xf32>
    %909 = vector.broadcast %907 : vector<4x1xf32> to vector<4x256xf32>
    %910 = vector.broadcast %908 : vector<1x256xf32> to vector<4x256xf32>
    %911 = arith.mulf %909, %910 : vector<4x256xf32>
    %912 = arith.addf %906, %911 : vector<4x256xf32>
    %c0_385 = arith.constant 0 : index
    %c4_386 = arith.constant 4 : index
    %913 = vector.load %arg9[%c0_385, %c4_386] : memref<4x16xf32, #tpu.memory_space<vmem>>, vector<4x1xf32>
    %914 = vector.extract_strided_slice %889 {offsets = [4, 0], sizes = [1, 256], strides = [1, 1]} : vector<16x256xf32> to vector<1x256xf32>
    %915 = vector.broadcast %913 : vector<4x1xf32> to vector<4x256xf32>
    %916 = vector.broadcast %914 : vector<1x256xf32> to vector<4x256xf32>
    %917 = arith.mulf %915, %916 : vector<4x256xf32>
    %918 = arith.addf %912, %917 : vector<4x256xf32>
    %c0_387 = arith.constant 0 : index
    %c5_388 = arith.constant 5 : index
    %919 = vector.load %arg9[%c0_387, %c5_388] : memref<4x16xf32, #tpu.memory_space<vmem>>, vector<4x1xf32>
    %920 = vector.extract_strided_slice %889 {offsets = [5, 0], sizes = [1, 256], strides = [1, 1]} : vector<16x256xf32> to vector<1x256xf32>
    %921 = vector.broadcast %919 : vector<4x1xf32> to vector<4x256xf32>
    %922 = vector.broadcast %920 : vector<1x256xf32> to vector<4x256xf32>
    %923 = arith.mulf %921, %922 : vector<4x256xf32>
    %924 = arith.addf %918, %923 : vector<4x256xf32>
    %c0_389 = arith.constant 0 : index
    %c6_390 = arith.constant 6 : index
    %925 = vector.load %arg9[%c0_389, %c6_390] : memref<4x16xf32, #tpu.memory_space<vmem>>, vector<4x1xf32>
    %926 = vector.extract_strided_slice %889 {offsets = [6, 0], sizes = [1, 256], strides = [1, 1]} : vector<16x256xf32> to vector<1x256xf32>
    %927 = vector.broadcast %925 : vector<4x1xf32> to vector<4x256xf32>
    %928 = vector.broadcast %926 : vector<1x256xf32> to vector<4x256xf32>
    %929 = arith.mulf %927, %928 : vector<4x256xf32>
    %930 = arith.addf %924, %929 : vector<4x256xf32>
    %c0_391 = arith.constant 0 : index
    %c7_392 = arith.constant 7 : index
    %931 = vector.load %arg9[%c0_391, %c7_392] : memref<4x16xf32, #tpu.memory_space<vmem>>, vector<4x1xf32>
    %932 = vector.extract_strided_slice %889 {offsets = [7, 0], sizes = [1, 256], strides = [1, 1]} : vector<16x256xf32> to vector<1x256xf32>
    %933 = vector.broadcast %931 : vector<4x1xf32> to vector<4x256xf32>
    %934 = vector.broadcast %932 : vector<1x256xf32> to vector<4x256xf32>
    %935 = arith.mulf %933, %934 : vector<4x256xf32>
    %936 = arith.addf %930, %935 : vector<4x256xf32>
    %c0_393 = arith.constant 0 : index
    %c8_394 = arith.constant 8 : index
    %937 = vector.load %arg9[%c0_393, %c8_394] : memref<4x16xf32, #tpu.memory_space<vmem>>, vector<4x1xf32>
    %938 = vector.extract_strided_slice %889 {offsets = [8, 0], sizes = [1, 256], strides = [1, 1]} : vector<16x256xf32> to vector<1x256xf32>
    %939 = vector.broadcast %937 : vector<4x1xf32> to vector<4x256xf32>
    %940 = vector.broadcast %938 : vector<1x256xf32> to vector<4x256xf32>
    %941 = arith.mulf %939, %940 : vector<4x256xf32>
    %942 = arith.addf %936, %941 : vector<4x256xf32>
    %c0_395 = arith.constant 0 : index
    %c9_396 = arith.constant 9 : index
    %943 = vector.load %arg9[%c0_395, %c9_396] : memref<4x16xf32, #tpu.memory_space<vmem>>, vector<4x1xf32>
    %944 = vector.extract_strided_slice %889 {offsets = [9, 0], sizes = [1, 256], strides = [1, 1]} : vector<16x256xf32> to vector<1x256xf32>
    %945 = vector.broadcast %943 : vector<4x1xf32> to vector<4x256xf32>
    %946 = vector.broadcast %944 : vector<1x256xf32> to vector<4x256xf32>
    %947 = arith.mulf %945, %946 : vector<4x256xf32>
    %948 = arith.addf %942, %947 : vector<4x256xf32>
    %c0_397 = arith.constant 0 : index
    %c10_398 = arith.constant 10 : index
    %949 = vector.load %arg9[%c0_397, %c10_398] : memref<4x16xf32, #tpu.memory_space<vmem>>, vector<4x1xf32>
    %950 = vector.extract_strided_slice %889 {offsets = [10, 0], sizes = [1, 256], strides = [1, 1]} : vector<16x256xf32> to vector<1x256xf32>
    %951 = vector.broadcast %949 : vector<4x1xf32> to vector<4x256xf32>
    %952 = vector.broadcast %950 : vector<1x256xf32> to vector<4x256xf32>
    %953 = arith.mulf %951, %952 : vector<4x256xf32>
    %954 = arith.addf %948, %953 : vector<4x256xf32>
    %c0_399 = arith.constant 0 : index
    %c11_400 = arith.constant 11 : index
    %955 = vector.load %arg9[%c0_399, %c11_400] : memref<4x16xf32, #tpu.memory_space<vmem>>, vector<4x1xf32>
    %956 = vector.extract_strided_slice %889 {offsets = [11, 0], sizes = [1, 256], strides = [1, 1]} : vector<16x256xf32> to vector<1x256xf32>
    %957 = vector.broadcast %955 : vector<4x1xf32> to vector<4x256xf32>
    %958 = vector.broadcast %956 : vector<1x256xf32> to vector<4x256xf32>
    %959 = arith.mulf %957, %958 : vector<4x256xf32>
    %960 = arith.addf %954, %959 : vector<4x256xf32>
    %c0_401 = arith.constant 0 : index
    %c12_402 = arith.constant 12 : index
    %961 = vector.load %arg9[%c0_401, %c12_402] : memref<4x16xf32, #tpu.memory_space<vmem>>, vector<4x1xf32>
    %962 = vector.extract_strided_slice %889 {offsets = [12, 0], sizes = [1, 256], strides = [1, 1]} : vector<16x256xf32> to vector<1x256xf32>
    %963 = vector.broadcast %961 : vector<4x1xf32> to vector<4x256xf32>
    %964 = vector.broadcast %962 : vector<1x256xf32> to vector<4x256xf32>
    %965 = arith.mulf %963, %964 : vector<4x256xf32>
    %966 = arith.addf %960, %965 : vector<4x256xf32>
    %c0_403 = arith.constant 0 : index
    %c13_404 = arith.constant 13 : index
    %967 = vector.load %arg9[%c0_403, %c13_404] : memref<4x16xf32, #tpu.memory_space<vmem>>, vector<4x1xf32>
    %968 = vector.extract_strided_slice %889 {offsets = [13, 0], sizes = [1, 256], strides = [1, 1]} : vector<16x256xf32> to vector<1x256xf32>
    %969 = vector.broadcast %967 : vector<4x1xf32> to vector<4x256xf32>
    %970 = vector.broadcast %968 : vector<1x256xf32> to vector<4x256xf32>
    %971 = arith.mulf %969, %970 : vector<4x256xf32>
    %972 = arith.addf %966, %971 : vector<4x256xf32>
    %c0_405 = arith.constant 0 : index
    %c14_406 = arith.constant 14 : index
    %973 = vector.load %arg9[%c0_405, %c14_406] : memref<4x16xf32, #tpu.memory_space<vmem>>, vector<4x1xf32>
    %974 = vector.extract_strided_slice %889 {offsets = [14, 0], sizes = [1, 256], strides = [1, 1]} : vector<16x256xf32> to vector<1x256xf32>
    %975 = vector.broadcast %973 : vector<4x1xf32> to vector<4x256xf32>
    %976 = vector.broadcast %974 : vector<1x256xf32> to vector<4x256xf32>
    %977 = arith.mulf %975, %976 : vector<4x256xf32>
    %978 = arith.addf %972, %977 : vector<4x256xf32>
    %c0_407 = arith.constant 0 : index
    %c15_408 = arith.constant 15 : index
    %979 = vector.load %arg9[%c0_407, %c15_408] : memref<4x16xf32, #tpu.memory_space<vmem>>, vector<4x1xf32>
    %980 = vector.extract_strided_slice %889 {offsets = [15, 0], sizes = [1, 256], strides = [1, 1]} : vector<16x256xf32> to vector<1x256xf32>
    %981 = vector.broadcast %979 : vector<4x1xf32> to vector<4x256xf32>
    %982 = vector.broadcast %980 : vector<1x256xf32> to vector<4x256xf32>
    %983 = arith.mulf %981, %982 : vector<4x256xf32>
    %984 = arith.addf %978, %983 : vector<4x256xf32>
    %c0_409 = arith.constant 0 : index
    %c0_410 = arith.constant 0 : index
    %985 = vector.load %arg10[%c0_409, %c0_410] : memref<4x1xf32, #tpu.memory_space<vmem>>, vector<4x1xf32>
    %986 = vector.broadcast %985 : vector<4x1xf32> to vector<4x256xf32>
    %987 = arith.addf %984, %986 : vector<4x256xf32>
    %988 = vector.extract_strided_slice %780 {offsets = [4, 0], sizes = [4, 256], strides = [1, 1]} : vector<8x256xf32> to vector<4x256xf32>
    %c0_411 = arith.constant 0 : index
    %c0_412 = arith.constant 0 : index
    %989 = vector.load %arg4[%c0_411, %c0_412] : memref<4x1xf32, #tpu.memory_space<vmem>>, vector<4x1xf32>
    %990 = vector.broadcast %989 : vector<4x1xf32> to vector<4x256xf32>
    %991 = arith.addf %988, %990 : vector<4x256xf32>
    %992 = vector.extract_strided_slice %991 {offsets = [0, 0], sizes = [1, 256], strides = [1, 1]} : vector<4x256xf32> to vector<1x256xf32>
    %993 = vector.extract_strided_slice %991 {offsets = [1, 0], sizes = [1, 256], strides = [1, 1]} : vector<4x256xf32> to vector<1x256xf32>
    %994 = arith.addf %992, %993 : vector<1x256xf32>
    %995 = vector.extract_strided_slice %991 {offsets = [2, 0], sizes = [1, 256], strides = [1, 1]} : vector<4x256xf32> to vector<1x256xf32>
    %996 = arith.addf %994, %995 : vector<1x256xf32>
    %997 = vector.extract_strided_slice %991 {offsets = [3, 0], sizes = [1, 256], strides = [1, 1]} : vector<4x256xf32> to vector<1x256xf32>
    %998 = arith.addf %996, %997 : vector<1x256xf32>
    %cst_413 = arith.constant 2.500000e-01 : f32
    %999 = vector.broadcast %cst_413 : f32 to vector<1x256xf32>
    %1000 = arith.mulf %998, %999 : vector<1x256xf32>
    %1001 = vector.broadcast %1000 : vector<1x256xf32> to vector<4x256xf32>
    %1002 = arith.subf %991, %1001 : vector<4x256xf32>
    %1003 = vector.extract_strided_slice %1002 {offsets = [0, 0], sizes = [1, 256], strides = [1, 1]} : vector<4x256xf32> to vector<1x256xf32>
    %1004 = vector.extract_strided_slice %1002 {offsets = [0, 0], sizes = [1, 256], strides = [1, 1]} : vector<4x256xf32> to vector<1x256xf32>
    %1005 = arith.mulf %1003, %1004 : vector<1x256xf32>
    %1006 = vector.extract_strided_slice %1002 {offsets = [1, 0], sizes = [1, 256], strides = [1, 1]} : vector<4x256xf32> to vector<1x256xf32>
    %1007 = vector.extract_strided_slice %1002 {offsets = [1, 0], sizes = [1, 256], strides = [1, 1]} : vector<4x256xf32> to vector<1x256xf32>
    %1008 = arith.mulf %1006, %1007 : vector<1x256xf32>
    %1009 = arith.addf %1005, %1008 : vector<1x256xf32>
    %1010 = vector.extract_strided_slice %1002 {offsets = [2, 0], sizes = [1, 256], strides = [1, 1]} : vector<4x256xf32> to vector<1x256xf32>
    %1011 = vector.extract_strided_slice %1002 {offsets = [2, 0], sizes = [1, 256], strides = [1, 1]} : vector<4x256xf32> to vector<1x256xf32>
    %1012 = arith.mulf %1010, %1011 : vector<1x256xf32>
    %1013 = arith.addf %1009, %1012 : vector<1x256xf32>
    %1014 = vector.extract_strided_slice %1002 {offsets = [3, 0], sizes = [1, 256], strides = [1, 1]} : vector<4x256xf32> to vector<1x256xf32>
    %1015 = vector.extract_strided_slice %1002 {offsets = [3, 0], sizes = [1, 256], strides = [1, 1]} : vector<4x256xf32> to vector<1x256xf32>
    %1016 = arith.mulf %1014, %1015 : vector<1x256xf32>
    %1017 = arith.addf %1013, %1016 : vector<1x256xf32>
    %cst_414 = arith.constant 2.500000e-01 : f32
    %1018 = vector.broadcast %cst_414 : f32 to vector<1x256xf32>
    %1019 = arith.mulf %1017, %1018 : vector<1x256xf32>
    %cst_415 = arith.constant 9.99999997E-7 : f32
    %1020 = vector.broadcast %cst_415 : f32 to vector<1x256xf32>
    %1021 = arith.addf %1019, %1020 : vector<1x256xf32>
    %1022 = math.rsqrt %1021 : vector<1x256xf32>
    %1023 = vector.broadcast %1022 : vector<1x256xf32> to vector<4x256xf32>
    %1024 = arith.mulf %1002, %1023 : vector<4x256xf32>
    %c0_416 = arith.constant 0 : index
    %c0_417 = arith.constant 0 : index
    %1025 = vector.load %arg5[%c0_416, %c0_417] : memref<4x1xf32, #tpu.memory_space<vmem>>, vector<4x1xf32>
    %1026 = vector.broadcast %1025 : vector<4x1xf32> to vector<4x256xf32>
    %1027 = arith.mulf %1024, %1026 : vector<4x256xf32>
    %c0_418 = arith.constant 0 : index
    %c0_419 = arith.constant 0 : index
    %1028 = vector.load %arg6[%c0_418, %c0_419] : memref<4x1xf32, #tpu.memory_space<vmem>>, vector<4x1xf32>
    %1029 = vector.broadcast %1028 : vector<4x1xf32> to vector<4x256xf32>
    %1030 = arith.addf %1027, %1029 : vector<4x256xf32>
    %c0_420 = arith.constant 0 : index
    %c0_421 = arith.constant 0 : index
    %1031 = vector.load %arg7[%c0_420, %c0_421] : memref<16x4xf32, #tpu.memory_space<vmem>>, vector<16x1xf32>
    %1032 = vector.extract_strided_slice %1030 {offsets = [0, 0], sizes = [1, 256], strides = [1, 1]} : vector<4x256xf32> to vector<1x256xf32>
    %1033 = vector.broadcast %1031 : vector<16x1xf32> to vector<16x256xf32>
    %1034 = vector.broadcast %1032 : vector<1x256xf32> to vector<16x256xf32>
    %1035 = arith.mulf %1033, %1034 : vector<16x256xf32>
    %c0_422 = arith.constant 0 : index
    %c1_423 = arith.constant 1 : index
    %1036 = vector.load %arg7[%c0_422, %c1_423] : memref<16x4xf32, #tpu.memory_space<vmem>>, vector<16x1xf32>
    %1037 = vector.extract_strided_slice %1030 {offsets = [1, 0], sizes = [1, 256], strides = [1, 1]} : vector<4x256xf32> to vector<1x256xf32>
    %1038 = vector.broadcast %1036 : vector<16x1xf32> to vector<16x256xf32>
    %1039 = vector.broadcast %1037 : vector<1x256xf32> to vector<16x256xf32>
    %1040 = arith.mulf %1038, %1039 : vector<16x256xf32>
    %1041 = arith.addf %1035, %1040 : vector<16x256xf32>
    %c0_424 = arith.constant 0 : index
    %c2_425 = arith.constant 2 : index
    %1042 = vector.load %arg7[%c0_424, %c2_425] : memref<16x4xf32, #tpu.memory_space<vmem>>, vector<16x1xf32>
    %1043 = vector.extract_strided_slice %1030 {offsets = [2, 0], sizes = [1, 256], strides = [1, 1]} : vector<4x256xf32> to vector<1x256xf32>
    %1044 = vector.broadcast %1042 : vector<16x1xf32> to vector<16x256xf32>
    %1045 = vector.broadcast %1043 : vector<1x256xf32> to vector<16x256xf32>
    %1046 = arith.mulf %1044, %1045 : vector<16x256xf32>
    %1047 = arith.addf %1041, %1046 : vector<16x256xf32>
    %c0_426 = arith.constant 0 : index
    %c3_427 = arith.constant 3 : index
    %1048 = vector.load %arg7[%c0_426, %c3_427] : memref<16x4xf32, #tpu.memory_space<vmem>>, vector<16x1xf32>
    %1049 = vector.extract_strided_slice %1030 {offsets = [3, 0], sizes = [1, 256], strides = [1, 1]} : vector<4x256xf32> to vector<1x256xf32>
    %1050 = vector.broadcast %1048 : vector<16x1xf32> to vector<16x256xf32>
    %1051 = vector.broadcast %1049 : vector<1x256xf32> to vector<16x256xf32>
    %1052 = arith.mulf %1050, %1051 : vector<16x256xf32>
    %1053 = arith.addf %1047, %1052 : vector<16x256xf32>
    %c0_428 = arith.constant 0 : index
    %c0_429 = arith.constant 0 : index
    %1054 = vector.load %arg8[%c0_428, %c0_429] : memref<16x1xf32, #tpu.memory_space<vmem>>, vector<16x1xf32>
    %1055 = vector.broadcast %1054 : vector<16x1xf32> to vector<16x256xf32>
    %1056 = arith.addf %1053, %1055 : vector<16x256xf32>
    %cst_430 = arith.constant 0.707106769 : f32
    %1057 = vector.broadcast %cst_430 : f32 to vector<16x256xf32>
    %1058 = arith.mulf %1056, %1057 : vector<16x256xf32>
    %1059 = math.absf %1058 : vector<16x256xf32>
    %cst_431 = arith.constant 0.327591091 : f32
    %1060 = vector.broadcast %cst_431 : f32 to vector<16x256xf32>
    %1061 = arith.mulf %1060, %1059 : vector<16x256xf32>
    %cst_432 = arith.constant 1.000000e+00 : f32
    %1062 = vector.broadcast %cst_432 : f32 to vector<16x256xf32>
    %1063 = arith.addf %1062, %1061 : vector<16x256xf32>
    %cst_433 = arith.constant 1.000000e+00 : f32
    %1064 = vector.broadcast %cst_433 : f32 to vector<16x256xf32>
    %1065 = arith.divf %1064, %1063 : vector<16x256xf32>
    %cst_434 = arith.constant 1.06140542 : f32
    %1066 = vector.broadcast %cst_434 : f32 to vector<16x256xf32>
    %1067 = arith.mulf %1065, %1066 : vector<16x256xf32>
    %cst_435 = arith.constant -1.45315206 : f32
    %1068 = vector.broadcast %cst_435 : f32 to vector<16x256xf32>
    %1069 = arith.addf %1068, %1067 : vector<16x256xf32>
    %1070 = arith.mulf %1065, %1069 : vector<16x256xf32>
    %cst_436 = arith.constant 1.42141378 : f32
    %1071 = vector.broadcast %cst_436 : f32 to vector<16x256xf32>
    %1072 = arith.addf %1071, %1070 : vector<16x256xf32>
    %1073 = arith.mulf %1065, %1072 : vector<16x256xf32>
    %cst_437 = arith.constant -0.284496725 : f32
    %1074 = vector.broadcast %cst_437 : f32 to vector<16x256xf32>
    %1075 = arith.addf %1074, %1073 : vector<16x256xf32>
    %1076 = arith.mulf %1065, %1075 : vector<16x256xf32>
    %cst_438 = arith.constant 0.254829586 : f32
    %1077 = vector.broadcast %cst_438 : f32 to vector<16x256xf32>
    %1078 = arith.addf %1077, %1076 : vector<16x256xf32>
    %1079 = arith.mulf %1065, %1078 : vector<16x256xf32>
    %1080 = arith.mulf %1059, %1059 : vector<16x256xf32>
    %cst_439 = arith.constant 0.000000e+00 : f32
    %1081 = vector.broadcast %cst_439 : f32 to vector<16x256xf32>
    %1082 = arith.subf %1081, %1080 : vector<16x256xf32>
    %1083 = math.exp %1082 : vector<16x256xf32>
    %1084 = arith.mulf %1079, %1083 : vector<16x256xf32>
    %cst_440 = arith.constant 1.000000e+00 : f32
    %1085 = vector.broadcast %cst_440 : f32 to vector<16x256xf32>
    %1086 = arith.subf %1085, %1084 : vector<16x256xf32>
    %cst_441 = arith.constant 0.000000e+00 : f32
    %1087 = vector.broadcast %cst_441 : f32 to vector<16x256xf32>
    %1088 = arith.cmpf oge, %1058, %1087 : vector<16x256xf32>
    %cst_442 = arith.constant 0.000000e+00 : f32
    %1089 = vector.broadcast %cst_442 : f32 to vector<16x256xf32>
    %1090 = arith.subf %1089, %1086 : vector<16x256xf32>
    %1091 = arith.select %1088, %1086, %1090 : vector<16x256xi1>, vector<16x256xf32>
    %cst_443 = arith.constant 5.000000e-01 : f32
    %1092 = vector.broadcast %cst_443 : f32 to vector<16x256xf32>
    %1093 = arith.mulf %1092, %1056 : vector<16x256xf32>
    %cst_444 = arith.constant 1.000000e+00 : f32
    %1094 = vector.broadcast %cst_444 : f32 to vector<16x256xf32>
    %1095 = arith.addf %1094, %1091 : vector<16x256xf32>
    %1096 = arith.mulf %1093, %1095 : vector<16x256xf32>
    %c0_445 = arith.constant 0 : index
    %c0_446 = arith.constant 0 : index
    %1097 = vector.load %arg9[%c0_445, %c0_446] : memref<4x16xf32, #tpu.memory_space<vmem>>, vector<4x1xf32>
    %1098 = vector.extract_strided_slice %1096 {offsets = [0, 0], sizes = [1, 256], strides = [1, 1]} : vector<16x256xf32> to vector<1x256xf32>
    %1099 = vector.broadcast %1097 : vector<4x1xf32> to vector<4x256xf32>
    %1100 = vector.broadcast %1098 : vector<1x256xf32> to vector<4x256xf32>
    %1101 = arith.mulf %1099, %1100 : vector<4x256xf32>
    %c0_447 = arith.constant 0 : index
    %c1_448 = arith.constant 1 : index
    %1102 = vector.load %arg9[%c0_447, %c1_448] : memref<4x16xf32, #tpu.memory_space<vmem>>, vector<4x1xf32>
    %1103 = vector.extract_strided_slice %1096 {offsets = [1, 0], sizes = [1, 256], strides = [1, 1]} : vector<16x256xf32> to vector<1x256xf32>
    %1104 = vector.broadcast %1102 : vector<4x1xf32> to vector<4x256xf32>
    %1105 = vector.broadcast %1103 : vector<1x256xf32> to vector<4x256xf32>
    %1106 = arith.mulf %1104, %1105 : vector<4x256xf32>
    %1107 = arith.addf %1101, %1106 : vector<4x256xf32>
    %c0_449 = arith.constant 0 : index
    %c2_450 = arith.constant 2 : index
    %1108 = vector.load %arg9[%c0_449, %c2_450] : memref<4x16xf32, #tpu.memory_space<vmem>>, vector<4x1xf32>
    %1109 = vector.extract_strided_slice %1096 {offsets = [2, 0], sizes = [1, 256], strides = [1, 1]} : vector<16x256xf32> to vector<1x256xf32>
    %1110 = vector.broadcast %1108 : vector<4x1xf32> to vector<4x256xf32>
    %1111 = vector.broadcast %1109 : vector<1x256xf32> to vector<4x256xf32>
    %1112 = arith.mulf %1110, %1111 : vector<4x256xf32>
    %1113 = arith.addf %1107, %1112 : vector<4x256xf32>
    %c0_451 = arith.constant 0 : index
    %c3_452 = arith.constant 3 : index
    %1114 = vector.load %arg9[%c0_451, %c3_452] : memref<4x16xf32, #tpu.memory_space<vmem>>, vector<4x1xf32>
    %1115 = vector.extract_strided_slice %1096 {offsets = [3, 0], sizes = [1, 256], strides = [1, 1]} : vector<16x256xf32> to vector<1x256xf32>
    %1116 = vector.broadcast %1114 : vector<4x1xf32> to vector<4x256xf32>
    %1117 = vector.broadcast %1115 : vector<1x256xf32> to vector<4x256xf32>
    %1118 = arith.mulf %1116, %1117 : vector<4x256xf32>
    %1119 = arith.addf %1113, %1118 : vector<4x256xf32>
    %c0_453 = arith.constant 0 : index
    %c4_454 = arith.constant 4 : index
    %1120 = vector.load %arg9[%c0_453, %c4_454] : memref<4x16xf32, #tpu.memory_space<vmem>>, vector<4x1xf32>
    %1121 = vector.extract_strided_slice %1096 {offsets = [4, 0], sizes = [1, 256], strides = [1, 1]} : vector<16x256xf32> to vector<1x256xf32>
    %1122 = vector.broadcast %1120 : vector<4x1xf32> to vector<4x256xf32>
    %1123 = vector.broadcast %1121 : vector<1x256xf32> to vector<4x256xf32>
    %1124 = arith.mulf %1122, %1123 : vector<4x256xf32>
    %1125 = arith.addf %1119, %1124 : vector<4x256xf32>
    %c0_455 = arith.constant 0 : index
    %c5_456 = arith.constant 5 : index
    %1126 = vector.load %arg9[%c0_455, %c5_456] : memref<4x16xf32, #tpu.memory_space<vmem>>, vector<4x1xf32>
    %1127 = vector.extract_strided_slice %1096 {offsets = [5, 0], sizes = [1, 256], strides = [1, 1]} : vector<16x256xf32> to vector<1x256xf32>
    %1128 = vector.broadcast %1126 : vector<4x1xf32> to vector<4x256xf32>
    %1129 = vector.broadcast %1127 : vector<1x256xf32> to vector<4x256xf32>
    %1130 = arith.mulf %1128, %1129 : vector<4x256xf32>
    %1131 = arith.addf %1125, %1130 : vector<4x256xf32>
    %c0_457 = arith.constant 0 : index
    %c6_458 = arith.constant 6 : index
    %1132 = vector.load %arg9[%c0_457, %c6_458] : memref<4x16xf32, #tpu.memory_space<vmem>>, vector<4x1xf32>
    %1133 = vector.extract_strided_slice %1096 {offsets = [6, 0], sizes = [1, 256], strides = [1, 1]} : vector<16x256xf32> to vector<1x256xf32>
    %1134 = vector.broadcast %1132 : vector<4x1xf32> to vector<4x256xf32>
    %1135 = vector.broadcast %1133 : vector<1x256xf32> to vector<4x256xf32>
    %1136 = arith.mulf %1134, %1135 : vector<4x256xf32>
    %1137 = arith.addf %1131, %1136 : vector<4x256xf32>
    %c0_459 = arith.constant 0 : index
    %c7_460 = arith.constant 7 : index
    %1138 = vector.load %arg9[%c0_459, %c7_460] : memref<4x16xf32, #tpu.memory_space<vmem>>, vector<4x1xf32>
    %1139 = vector.extract_strided_slice %1096 {offsets = [7, 0], sizes = [1, 256], strides = [1, 1]} : vector<16x256xf32> to vector<1x256xf32>
    %1140 = vector.broadcast %1138 : vector<4x1xf32> to vector<4x256xf32>
    %1141 = vector.broadcast %1139 : vector<1x256xf32> to vector<4x256xf32>
    %1142 = arith.mulf %1140, %1141 : vector<4x256xf32>
    %1143 = arith.addf %1137, %1142 : vector<4x256xf32>
    %c0_461 = arith.constant 0 : index
    %c8_462 = arith.constant 8 : index
    %1144 = vector.load %arg9[%c0_461, %c8_462] : memref<4x16xf32, #tpu.memory_space<vmem>>, vector<4x1xf32>
    %1145 = vector.extract_strided_slice %1096 {offsets = [8, 0], sizes = [1, 256], strides = [1, 1]} : vector<16x256xf32> to vector<1x256xf32>
    %1146 = vector.broadcast %1144 : vector<4x1xf32> to vector<4x256xf32>
    %1147 = vector.broadcast %1145 : vector<1x256xf32> to vector<4x256xf32>
    %1148 = arith.mulf %1146, %1147 : vector<4x256xf32>
    %1149 = arith.addf %1143, %1148 : vector<4x256xf32>
    %c0_463 = arith.constant 0 : index
    %c9_464 = arith.constant 9 : index
    %1150 = vector.load %arg9[%c0_463, %c9_464] : memref<4x16xf32, #tpu.memory_space<vmem>>, vector<4x1xf32>
    %1151 = vector.extract_strided_slice %1096 {offsets = [9, 0], sizes = [1, 256], strides = [1, 1]} : vector<16x256xf32> to vector<1x256xf32>
    %1152 = vector.broadcast %1150 : vector<4x1xf32> to vector<4x256xf32>
    %1153 = vector.broadcast %1151 : vector<1x256xf32> to vector<4x256xf32>
    %1154 = arith.mulf %1152, %1153 : vector<4x256xf32>
    %1155 = arith.addf %1149, %1154 : vector<4x256xf32>
    %c0_465 = arith.constant 0 : index
    %c10_466 = arith.constant 10 : index
    %1156 = vector.load %arg9[%c0_465, %c10_466] : memref<4x16xf32, #tpu.memory_space<vmem>>, vector<4x1xf32>
    %1157 = vector.extract_strided_slice %1096 {offsets = [10, 0], sizes = [1, 256], strides = [1, 1]} : vector<16x256xf32> to vector<1x256xf32>
    %1158 = vector.broadcast %1156 : vector<4x1xf32> to vector<4x256xf32>
    %1159 = vector.broadcast %1157 : vector<1x256xf32> to vector<4x256xf32>
    %1160 = arith.mulf %1158, %1159 : vector<4x256xf32>
    %1161 = arith.addf %1155, %1160 : vector<4x256xf32>
    %c0_467 = arith.constant 0 : index
    %c11_468 = arith.constant 11 : index
    %1162 = vector.load %arg9[%c0_467, %c11_468] : memref<4x16xf32, #tpu.memory_space<vmem>>, vector<4x1xf32>
    %1163 = vector.extract_strided_slice %1096 {offsets = [11, 0], sizes = [1, 256], strides = [1, 1]} : vector<16x256xf32> to vector<1x256xf32>
    %1164 = vector.broadcast %1162 : vector<4x1xf32> to vector<4x256xf32>
    %1165 = vector.broadcast %1163 : vector<1x256xf32> to vector<4x256xf32>
    %1166 = arith.mulf %1164, %1165 : vector<4x256xf32>
    %1167 = arith.addf %1161, %1166 : vector<4x256xf32>
    %c0_469 = arith.constant 0 : index
    %c12_470 = arith.constant 12 : index
    %1168 = vector.load %arg9[%c0_469, %c12_470] : memref<4x16xf32, #tpu.memory_space<vmem>>, vector<4x1xf32>
    %1169 = vector.extract_strided_slice %1096 {offsets = [12, 0], sizes = [1, 256], strides = [1, 1]} : vector<16x256xf32> to vector<1x256xf32>
    %1170 = vector.broadcast %1168 : vector<4x1xf32> to vector<4x256xf32>
    %1171 = vector.broadcast %1169 : vector<1x256xf32> to vector<4x256xf32>
    %1172 = arith.mulf %1170, %1171 : vector<4x256xf32>
    %1173 = arith.addf %1167, %1172 : vector<4x256xf32>
    %c0_471 = arith.constant 0 : index
    %c13_472 = arith.constant 13 : index
    %1174 = vector.load %arg9[%c0_471, %c13_472] : memref<4x16xf32, #tpu.memory_space<vmem>>, vector<4x1xf32>
    %1175 = vector.extract_strided_slice %1096 {offsets = [13, 0], sizes = [1, 256], strides = [1, 1]} : vector<16x256xf32> to vector<1x256xf32>
    %1176 = vector.broadcast %1174 : vector<4x1xf32> to vector<4x256xf32>
    %1177 = vector.broadcast %1175 : vector<1x256xf32> to vector<4x256xf32>
    %1178 = arith.mulf %1176, %1177 : vector<4x256xf32>
    %1179 = arith.addf %1173, %1178 : vector<4x256xf32>
    %c0_473 = arith.constant 0 : index
    %c14_474 = arith.constant 14 : index
    %1180 = vector.load %arg9[%c0_473, %c14_474] : memref<4x16xf32, #tpu.memory_space<vmem>>, vector<4x1xf32>
    %1181 = vector.extract_strided_slice %1096 {offsets = [14, 0], sizes = [1, 256], strides = [1, 1]} : vector<16x256xf32> to vector<1x256xf32>
    %1182 = vector.broadcast %1180 : vector<4x1xf32> to vector<4x256xf32>
    %1183 = vector.broadcast %1181 : vector<1x256xf32> to vector<4x256xf32>
    %1184 = arith.mulf %1182, %1183 : vector<4x256xf32>
    %1185 = arith.addf %1179, %1184 : vector<4x256xf32>
    %c0_475 = arith.constant 0 : index
    %c15_476 = arith.constant 15 : index
    %1186 = vector.load %arg9[%c0_475, %c15_476] : memref<4x16xf32, #tpu.memory_space<vmem>>, vector<4x1xf32>
    %1187 = vector.extract_strided_slice %1096 {offsets = [15, 0], sizes = [1, 256], strides = [1, 1]} : vector<16x256xf32> to vector<1x256xf32>
    %1188 = vector.broadcast %1186 : vector<4x1xf32> to vector<4x256xf32>
    %1189 = vector.broadcast %1187 : vector<1x256xf32> to vector<4x256xf32>
    %1190 = arith.mulf %1188, %1189 : vector<4x256xf32>
    %1191 = arith.addf %1185, %1190 : vector<4x256xf32>
    %c0_477 = arith.constant 0 : index
    %c0_478 = arith.constant 0 : index
    %1192 = vector.load %arg10[%c0_477, %c0_478] : memref<4x1xf32, #tpu.memory_space<vmem>>, vector<4x1xf32>
    %1193 = vector.broadcast %1192 : vector<4x1xf32> to vector<4x256xf32>
    %1194 = arith.addf %1191, %1193 : vector<4x256xf32>
    %1195 = tpu.concatenate %987, %1194 in 0 : vector<4x256xf32>, vector<4x256xf32> -> vector<8x256xf32>
    %c0_479 = arith.constant 0 : index
    %c0_480 = arith.constant 0 : index
    %c0_481 = arith.constant 0 : index
    %1196 = vector.load %arg1[%c0_479, %c0_480, %c0_481] : memref<8x4x64xf32, #tpu.memory_space<vmem>>, vector<8x1x64xf32>
    %1197 = vector.shape_cast %1196 : vector<8x1x64xf32> to vector<8x64xf32>
    %c0_482 = arith.constant 0 : index
    %c1_483 = arith.constant 1 : index
    %c0_484 = arith.constant 0 : index
    %1198 = vector.load %arg1[%c0_482, %c1_483, %c0_484] : memref<8x4x64xf32, #tpu.memory_space<vmem>>, vector<8x1x64xf32>
    %1199 = vector.shape_cast %1198 : vector<8x1x64xf32> to vector<8x64xf32>
    %c0_485 = arith.constant 0 : index
    %c2_486 = arith.constant 2 : index
    %c0_487 = arith.constant 0 : index
    %1200 = vector.load %arg1[%c0_485, %c2_486, %c0_487] : memref<8x4x64xf32, #tpu.memory_space<vmem>>, vector<8x1x64xf32>
    %1201 = vector.shape_cast %1200 : vector<8x1x64xf32> to vector<8x64xf32>
    %c0_488 = arith.constant 0 : index
    %c3_489 = arith.constant 3 : index
    %c0_490 = arith.constant 0 : index
    %1202 = vector.load %arg1[%c0_488, %c3_489, %c0_490] : memref<8x4x64xf32, #tpu.memory_space<vmem>>, vector<8x1x64xf32>
    %1203 = vector.shape_cast %1202 : vector<8x1x64xf32> to vector<8x64xf32>
    %1204 = tpu.concatenate %1197, %1199, %1201, %1203 in 1 : vector<8x64xf32>, vector<8x64xf32>, vector<8x64xf32>, vector<8x64xf32> -> vector<8x256xf32>
    %1205 = arith.addf %1195, %1204 : vector<8x256xf32>
    %c0_491 = arith.constant 0 : index
    %c0_492 = arith.constant 0 : index
    %1206 = vector.load %arg11[%c0_491, %c0_492] : memref<8x256xf32, #tpu.memory_space<vmem>>, vector<8x256xf32>
    tpu.vector_store %arg11[%c0_491, %c0_492], %1205 {strides = array<i32>} : memref<8x256xf32, #tpu.memory_space<vmem>>, vector<8x256xf32>,
    return
  }
  func.func @transform_0(%arg0: i32) -> (i32, i32, i32) {
    %c0_i32 = arith.constant 0 : i32
    %c0_i32_0 = arith.constant 0 : i32
    %c0_i32_1 = arith.constant 0 : i32
    return %arg0, %c0_i32, %c0_i32_0 : i32, i32, i32
  }
  func.func @transform_1(%arg0: i32) -> (i32, i32) {
    %c0_i32 = arith.constant 0 : i32
    %c0_i32_0 = arith.constant 0 : i32
    return %arg0, %c0_i32 : i32, i32
  }
  func.func @transform_2(%arg0: i32) -> (i32, i32) {
    %c0_i32 = arith.constant 0 : i32
    %c0_i32_0 = arith.constant 0 : i32
    %c0_i32_1 = arith.constant 0 : i32
    return %c0_i32, %c0_i32_0 : i32, i32
  }
  func.func @transform_3(%arg0: i32) -> (i32, i32) {
    %c0_i32 = arith.constant 0 : i32
    %c0_i32_0 = arith.constant 0 : i32
    %c0_i32_1 = arith.constant 0 : i32
    return %c0_i32, %c0_i32_0 : i32, i32
  }
  func.func @transform_4(%arg0: i32) -> (i32, i32) {
    %c0_i32 = arith.constant 0 : i32
    %c0_i32_0 = arith.constant 0 : i32
    %c0_i32_1 = arith.constant 0 : i32
    return %c0_i32, %c0_i32_0 : i32, i32
  }
  func.func @transform_5(%arg0: i32) -> (i32, i32) {
    %c0_i32 = arith.constant 0 : i32
    %c0_i32_0 = arith.constant 0 : i32
    %c0_i32_1 = arith.constant 0 : i32
    return %c0_i32, %c0_i32_0 : i32, i32
  }
  func.func @transform_6(%arg0: i32) -> (i32, i32) {
    %c0_i32 = arith.constant 0 : i32
    %c0_i32_0 = arith.constant 0 : i32
    %c0_i32_1 = arith.constant 0 : i32
    return %c0_i32, %c0_i32_0 : i32, i32
  }
  func.func @transform_7(%arg0: i32) -> (i32, i32) {
    %c0_i32 = arith.constant 0 : i32
    %c0_i32_0 = arith.constant 0 : i32
    %c0_i32_1 = arith.constant 0 : i32
    return %c0_i32, %c0_i32_0 : i32, i32
  }
  func.func @transform_8(%arg0: i32) -> (i32, i32) {
    %c0_i32 = arith.constant 0 : i32
    %c0_i32_0 = arith.constant 0 : i32
    %c0_i32_1 = arith.constant 0 : i32
    return %c0_i32, %c0_i32_0 : i32, i32
  }
  func.func @transform_9(%arg0: i32) -> (i32, i32) {
    %c0_i32 = arith.constant 0 : i32
    %c0_i32_0 = arith.constant 0 : i32
    %c0_i32_1 = arith.constant 0 : i32
    return %c0_i32, %c0_i32_0 : i32, i32
  }
  func.func @transform_10(%arg0: i32) -> (i32, i32) {
    %c0_i32 = arith.constant 0 : i32
    %c0_i32_0 = arith.constant 0 : i32
    return %arg0, %c0_i32 : i32, i32
  }
}

</mosaic_0001>

<bundles_post_ra>
// kernel: tpu_custom_call.1
= control target key start
LH: loop header
LB: loop body
LE: loop exit
PB: predicated region body
PF: predicated region fallthrough
CT: control target
= control target key end

     0   :  { %v3849_v2 = vmov 36   ;;  %s3850_s17 = smov 55   ;;  %v6078_v4 = vmov 0   ;;  %vm53_vm0 = vcmask 1041409   ;;  %vm56_vm1 = vcmask 1042434   ;;  %s3853_s15 = smov 64   ;;  %s6058_s0 = inlined_call_operand.vmem [shape: f32[8,4,64], index: 0, kind: input, shape index: {}]   ;;  %s6059_s1 = inlined_call_operand.vmem [shape: f32[8,144], index: 1, kind: input, shape index: {}]   ;;  %s6060_s2 = inlined_call_operand.vmem [shape: f32[9,64], index: 2, kind: input, shape index: {}]   ;;  %s6061_s3 = inlined_call_operand.vmem [shape: f32[4,1], index: 3, kind: input, shape index: {}]   ;;  %s6062_s4 = inlined_call_operand.vmem [shape: f32[4,1], index: 4, kind: input, shape index: {}]   ;;  %s6063_s5 = inlined_call_operand.vmem [shape: f32[4,1], index: 5, kind: input, shape index: {}]   ;;  %s6064_s6 = inlined_call_operand.vmem [shape: f32[16,4], index: 6, kind: input, shape index: {}]   ;;  %s6065_s7 = inlined_call_operand.vmem [shape: f32[16,1], index: 7, kind: input, shape index: {}]   ;;  %s6066_s8 = inlined_call_operand.vmem [shape: f32[4,16], index: 8, kind: input, shape index: {}]   ;;  %s6067_s9 = inlined_call_operand.vmem [shape: f32[4,1], index: 9, kind: input, shape index: {}]   ;;  %s6068_s10 = inlined_call_operand.hbm [shape: f32[8,256], index: 10, kind: output, shape index: {}]  }
   0x1   :  { %v3426_v0 = vld [vmem:[%s6060_s2] ss:$0 sm:$0xff]  ;;  %3581 = vset.pattern.permute.xlu0 %v3849_v2  ;;  %3580 = vset.pattern.permute.xlu1 %v6078_v4  ;;  %v37_v5 = vld [vmem:[%s6058_s0 + $0x4] sm:$0x1]  ;;  %v38_v6 = vld [vmem:[%s6058_s0 + $0x8] sm:$0x1] }
   0x2   :  { %v4056_v1 = vld [vmem:[%s6059_s1] sm:$0xff]  ;;  %87 = vrot.lane.b32.xlu1 %v3426_v0, %s3850_s17  ;;  %v39_v7 = vld [vmem:[%s6058_s0 + $0xc] sm:$0x1]  ;;  %v40_v8 = vld [vmem:[%s6058_s0 + $0x10] sm:$0x1]  ;;  %v52_v11 = vrot.slane %v37_v5, 7 }
   0x3   :  { %v36_v3 = vld [vmem:[%s6058_s0] sm:$0x1]  ;;  %100 = vperm.xlu0 %3581, %v4056_v1   ;;  %v41_v9 = vld [vmem:[%s6058_s0 + $0x14] sm:$0x1]  ;;  %v42_v10 = vld [vmem:[%s6058_s0 + $0x18] sm:$0x1] }
   0x4   :  { %v55_v12 = vrot.slane %v38_v6, 6  ;;  %v58_v13 = vrot.slane %v39_v7, 5  ;;  %v43_v14 = vld [vmem:[%s6058_s0 + $0x1c] sm:$0x1]  ;;  %vm59_vm2 = vcmask 1043459   ;;  %v61_v15 = vrot.slane %v40_v8, 4 }
   0x5   :  { %v54_v16 = vsel %vm53_vm0, %v52_v11, %v36_v3  ;;  %vm62_vm3 = vcmask 1044484   ;;  %v64_v17 = vrot.slane %v41_v9, 3  ;;  %vm65_vm4 = vcmask 1045509   ;;  %v180_v20 = vld [vmem:[%s6058_s0 + $0x6] sm:$0x1] }
   0x6   :  { %94 = vperm.xlu1 %3580, %v4056_v1   ;;  %v57_v18 = vsel %vm56_vm1, %v55_v12, %v54_v16  ;;  %v67_v19 = vrot.slane %v42_v10, 2  ;;  %vm68_vm5 = vcmask 1046534   ;;  %v70_v22 = vrot.slane %v43_v14, 1  ;;  %v181_v23 = vld [vmem:[%s6058_s0 + $0xa] sm:$0x1] }
   0x7   :  { %v60_v21 = vsel %vm59_vm2, %v58_v13, %v57_v18  ;;  %v182_v24 = vld [vmem:[%s6058_s0 + $0xe] sm:$0x1]  ;;  %v3852_v25 = vmov 72   ;;  %vm71_vm6 = vcmask 1047559   ;;  %v179_v27 = vld [vmem:[%s6058_s0 + $0x2] sm:$0x1] }
   0x8   :  { %v63_v26 = vsel %vm62_vm3, %v61_v15, %v60_v21  ;;  %v183_v29 = vld [vmem:[%s6058_s0 + $0x12] sm:$0x1]  ;;  %v195_v30 = vrot.slane %v180_v20, 7  ;;  %v197_v31 = vrot.slane %v181_v23, 6  ;;  %v199_v32 = vrot.slane %v182_v24, 5 }
   0x9   :  { %v66_v28 = vsel %vm65_vm4, %v64_v17, %v63_v26  ;;  %v184_v34 = vld [vmem:[%s6058_s0 + $0x16] sm:$0x1]  ;;  %v118_v35 = vld [vmem:[%s6058_s0 + $0x5] sm:$0x1]  ;;  %v117_v38 = vld [vmem:[%s6058_s0 + $0x1] sm:$0x1] }
   0xa   :  { %3582 = vset.pattern.permute.xlu1 %v3852_v25  ;;  %v69_v33 = vsel %vm68_vm5, %v67_v19, %v66_v28  ;;  %v196_v37 = vsel %vm53_vm0, %v195_v30, %v179_v27  ;;  %v119_v39 = vld [vmem:[%s6058_s0 + $0x9] sm:$0x1]  ;;  %v120_v40 = vld [vmem:[%s6058_s0 + $0xd] sm:$0x1]  ;;  %v201_v42 = vrot.slane %v183_v29, 4  ;;  %v3854_v45 = vmov 108  }
   0xb   :  { %106 = vperm.xlu1 %3582, %v4056_v1   ;;  %v4115_v36 = vsel %vm71_vm6, %v70_v22, %v69_v33  ;;  %v198_v41 = vsel %vm56_vm1, %v197_v31, %v196_v37  ;;  %v121_v43 = vld [vmem:[%s6058_s0 + $0x11] sm:$0x1]  ;;  %v122_v44 = vld [vmem:[%s6058_s0 + $0x15] sm:$0x1]  ;;  %v123_v47 = vld [vmem:[%s6058_s0 + $0x19] sm:$0x1] }
   0xc   :  { %6102 = vst [vmem:[#allocation5_spill] sm:$0xff] %v4115_v36  ;;  %75 = vrot.lane.b32.xlu0 %v4115_v36, %s3853_s15  ;;  %v200_v46 = vsel %vm59_vm2, %v199_v32, %v198_v41  ;;  %v133_v48 = vrot.slane %v118_v35, 7  ;;  %v135_v49 = vrot.slane %v119_v39, 6  ;;  %v137_v50 = vrot.slane %v120_v40, 5  ;;  %v124_v51 = vld [vmem:[%s6058_s0 + $0x1d] sm:$0x1] }
   0xd   :  { %v139_v52 = vrot.slane %v121_v43, 4  ;;  %v185_v53 = vld [vmem:[%s6058_s0 + $0x1a] sm:$0x1]  ;;  %v203_v54 = vrot.slane %v184_v34, 3  ;;  %v141_v56 = vrot.slane %v122_v44, 3  ;;  %v202_v58 = vsel %vm62_vm3, %v201_v42, %v200_v46 }
   0xe   :  { %v134_v55 = vsel %vm53_vm0, %v133_v48, %v117_v38  ;;  %v242_v57 = vld [vmem:[%s6058_s0 + $0x7] sm:$0x1]  ;;  %v143_v60 = vrot.slane %v123_v47, 2  ;;  %v243_v61 = vld [vmem:[%s6058_s0 + $0xb] sm:$0x1]  ;;  %v145_v63 = vrot.slane %v124_v51, 1 }
   0xf   :  { %3583 = vset.pattern.permute.xlu1 %v3854_v45  ;;  %v136_v59 = vsel %vm56_vm1, %v135_v49, %v134_v55  ;;  %v241_v0 = vld [vmem:[%s6058_s0 + $0x3] sm:$0x1]  ;;  %v257_v2 = vrot.slane %v242_v57, 7  ;;  %v3855_v3 = vmov 45   ;;  %v186_v5 = vld [vmem:[%s6058_s0 + $0x1e] sm:$0x1]  ;;  %v204_v8 = vsel %vm65_vm4, %v203_v54, %v202_v58 }
  0x10   :  { %112 = vperm.xlu1 %3583, %v4056_v1   ;;  %v138_v62 = vsel %vm59_vm2, %v137_v50, %v136_v59  ;;  %v205_v6 = vrot.slane %v185_v53, 2  ;;  %v244_v10 = vld [vmem:[%s6058_s0 + $0xf] sm:$0x1]  ;;  %v259_v11 = vrot.slane %v243_v61, 6 }
  0x11   :  { %v140_v7 = vsel %vm62_vm3, %v139_v52, %v138_v62 }
  0x12   :  { %v142_v9 = vsel %vm65_vm4, %v141_v56, %v140_v7 }
  0x14   :  { %3585 = vset.pattern.permute.xlu1 %v3855_v3 }
  0x15   :  { %162 = vperm.xlu1 %3585, %v4056_v1  }
  0x16   :  { %15 = vsyncpa [#allocation3], 0  ;;  %v144_v12 = vsel %vm68_vm5, %v143_v60, %v142_v9  ;;  %v258_v13 = vsel %vm53_vm0, %v257_v2, %v241_v0  ;;  %v207_v14 = vrot.slane %v186_v5, 1  ;;  %v206_v16 = vsel %vm68_vm5, %v205_v6, %v204_v8  ;;  %v245_v17 = vld [vmem:[%s6058_s0 + $0x13] sm:$0x1]  ;;  %s3867_s29 = smov 56  }
  0x17   :  { %v4173_v15 = vsel %vm71_vm6, %v145_v63, %v144_v12  ;;  %v261_v18 = vrot.slane %v244_v10, 5  ;;  %v3856_v19 = vmov 81   ;;  %v260_v20 = vsel %vm56_vm1, %v259_v11, %v258_v13  ;;  %v246_v22 = vld [vmem:[%s6058_s0 + $0x17] sm:$0x1]  ;;  %v247_v26 = vld [vmem:[%s6058_s0 + $0x1b] sm:$0x1] }
  0x18   :  { %6103 = vst [vmem:[#allocation6_spill] sm:$0xff] %v4173_v15  ;;  %148 = vrot.lane.b32.xlu0 %v4173_v15, %s3853_s15  ;;  %v4184_v21 = vsel %vm71_vm6, %v207_v14, %v206_v16  ;;  %v263_v23 = vrot.slane %v245_v17, 4  ;;  %v6070_v24 = vmov 9   ;;  %v265_v27 = vrot.slane %v246_v22, 3  ;;  %v248_v31 = vld [vmem:[%s6058_s0 + $0x1f] sm:$0x1] }
  0x19   :  { %3586 = vset.pattern.permute.xlu1 %v3856_v19  ;;  %6104 = vst [vmem:[#allocation7_spill] sm:$0xff] %v4184_v21  ;;  %3584 = vset.pattern.permute.xlu0 %v6070_v24  ;;  %v262_v25 = vsel %vm59_vm2, %v261_v18, %v260_v20  ;;  %v3858_v28 = vmov 54   ;;  %v3859_v30 = vmov 117   ;;  %v267_v32 = vrot.slane %v247_v26, 2  ;;  %v3427_v45 = vld [vmem:[%s6060_s2 + $0x1] ss:$0 sm:$0xff] }
  0x1a   :  { %168 = vperm.xlu1 %3586, %v4056_v1   ;;  %v264_v29 = vsel %vm62_vm3, %v263_v23, %v262_v25  ;;  %v269_v34 = vrot.slane %v248_v31, 1  ;;  %v3860_v37 = vmov 18   ;;  %v3861_v38 = vmov 90   ;;  %v4244_v63 = vld [vmem:[%s6059_s1 + $0x8] sm:$0xff]  ;;  %v3428_v22 = vld [vmem:[%s6060_s2 + $0x2] ss:$0 sm:$0xff] }
  0x1b   :  { %v266_v33 = vsel %vm65_vm4, %v265_v27, %v264_v29  ;;  %v3862_v40 = vmov 126   ;;  %v3863_v41 = vmov 63   ;;  %v3864_v42 = vmov 27   ;;  %s3886_s14 = smov 57   ;;  %s3899_s19 = smov 63  }
  0x1c   :  { %156 = vperm.xlu0 %3584, %v4056_v1   ;;  %v268_v35 = vsel %vm68_vm5, %v267_v32, %v266_v33  ;;  %v3865_v43 = vmov 99   ;;  %v6072_v44 = vmov 2   ;;  %v6074_v46 = vmov 1   ;;  %s3901_s20 = smov 127   ;;  %s3911_s21 = smov 126  }
  0x1d   :  { %v4208_v39 = vsel %vm71_vm6, %v269_v34, %v268_v35  ;;  %v3869_v47 = vmov 37   ;;  %v3870_v48 = vmov 73   ;;  %v3871_v49 = vmov 109   ;;  %s3913_s22 = smov 120   ;;  %s3930_s27 = smov 1  }
  0x1e   :  { %210 = vrot.lane.b32.xlu1 %v4184_v21, %s3853_s15  ;;  %6105 = vst [vmem:[#allocation8_spill] sm:$0xff] %v4208_v39  ;;  %v6071_v50 = vmov 10   ;;  %v3873_v51 = vmov 46   ;;  %v3874_v52 = vmov 82   ;;  %v3875_v53 = vmov 118   ;;  %s3946_s24 = smov 7  }
  0x1f   :  { %3589 = vset.pattern.permute.xlu1 %v3858_v28  ;;  %v3876_v54 = vmov 19   ;;  %v3877_v55 = vmov 55   ;;  %v3878_v56 = vmov 91   ;;  %v3879_v57 = vmov 127   ;;  %s3949_s25 = smov 48   ;;  %s3984_s28 = smov 8  }
  0x20   :  { %3587 = vset.pattern.permute.xlu0 %v3859_v30  ;;  %v3880_v58 = vmov 28   ;;  %v3881_v59 = vmov 64   ;;  %v3882_v61 = vmov 100   ;;  %vm74_vm7 = vcmask 1048064   ;;  %s3989_s11 = smov 9   ;;  %s3992_s12 = smov 46  }
  0x21   :  { %174 = vperm.xlu0 %3587, %v4056_v1   ;;  %v6076_v2 = vmov 8   ;;  %v3884_v9 = vmov 38   ;;  %v6088_v11 = vmov 3   ;;  %v3887_v27 = vmov 74  }
  0x22   :  { %224 = vperm.xlu1 %3589, %v4056_v1   ;;  %v3888_v29 = vmov 110   ;;  %v6069_v31 = vmov 11   ;;  %v3890_v33 = vmov 47   ;;  %v3891_v35 = vmov 83  }
  0x23   :  { %vm2364_vm8 = vcmask 523264  }
  0x25   :  { %3588 = vset.pattern.permute.xlu0 %v3860_v37 }
  0x26   :  { %3590 = vset.pattern.permute.xlu1 %v3861_v38  ;;  %218 = vperm.xlu0 %3588, %v4056_v1   ;;  %v3892_v38 = vmov 119  }
  0x27   :  { %230 = vperm.xlu1 %3590, %v4056_v1  }
  0x2a   :  { %3591 = vset.pattern.permute.xlu0 %v3862_v40 }
  0x2b   :  { %272 = vrot.lane.b32.xlu1 %v4208_v39, %s3853_s15  ;;  %236 = vperm.xlu0 %3591, %v4056_v1  }
  0x2c   :  { %3593 = vset.pattern.permute.xlu1 %v3863_v41  ;;  %v3893_v41 = vmov 20  }
  0x2f   :  { %286 = vperm.xlu1 %3593, %v4056_v1   ;;  %3592 = vset.pattern.permute.xlu0 %v3864_v42 }
  0x30   :  { %280 = vperm.xlu0 %3592, %v4056_v1  }
  0x33   :  { %3594 = vset.pattern.permute.xlu1 %v3865_v43  ;;  %v3894_v43 = vmov 56  }
  0x34   :  { %292 = vperm.xlu1 %3594, %v4056_v1   ;;  %3611 = vset.pattern.permute.xlu0 %v6072_v44 }
  0x38   :  { %311 = vrot.lane.b32.xlu1 %v3427_v45, %s3867_s29 }
  0x39   :  { %3595 = vset.pattern.permute.xlu1 %v6074_v46 }
  0x3c   :  { %316 = vperm.xlu1 %3595, %v4056_v1  }
  0x40   :  { %3596 = vset.pattern.permute.xlu1 %v3869_v47 }
  0x41   :  { %326 = vperm.xlu1 %3596, %v4056_v1  }
  0x45   :  { %3597 = vset.pattern.permute.xlu1 %v3870_v48  ;;  %v3895_v48 = vmov 92  }
  0x46   :  { %336 = vperm.xlu1 %3597, %v4056_v1  }
  0x4a   :  { %3598 = vset.pattern.permute.xlu1 %v3871_v49 }
  0x4b   :  { %346 = vperm.xlu1 %3598, %v4056_v1  }
  0x4f   :  { %3599 = vset.pattern.permute.xlu1 %v6071_v50 }
  0x50   :  { %357 = vperm.xlu1 %3599, %v4056_v1  }
  0x54   :  { %3600 = vset.pattern.permute.xlu1 %v3873_v51 }
  0x55   :  { %367 = vperm.xlu1 %3600, %v4056_v1  }
  0x59   :  { %3601 = vset.pattern.permute.xlu1 %v3874_v52 }
  0x5a   :  { %377 = vperm.xlu1 %3601, %v4056_v1  }
  0x5e   :  { %3602 = vset.pattern.permute.xlu1 %v3875_v53 }
  0x5f   :  { %387 = vperm.xlu1 %3602, %v4056_v1  }
  0x63   :  { %3603 = vset.pattern.permute.xlu1 %v3876_v54  ;;  %v3896_v54 = vmov 29  }
  0x64   :  { %398 = vperm.xlu1 %3603, %v4056_v1  }
  0x68   :  { %3604 = vset.pattern.permute.xlu1 %v3877_v55 }
  0x69   :  { %408 = vperm.xlu1 %3604, %v4056_v1  }
  0x6d   :  { %3605 = vset.pattern.permute.xlu1 %v3878_v56 }
  0x6e   :  { %418 = vperm.xlu1 %3605, %v4056_v1  }
  0x72   :  { %3606 = vset.pattern.permute.xlu1 %v3879_v57  ;;  %v3897_v57 = vmov 65  }
  0x73   :  { %428 = vperm.xlu1 %3606, %v4056_v1  }
  0x74   :  { %v4236_v60 = vpop.permute.xlu1 %87 }
  0x77   :  { %3607 = vset.pattern.permute.xlu1 %v3880_v58 }
  0x78   :  { %439 = vperm.xlu1 %3607, %v4056_v1  }
  0x7c   :  { %3608 = vset.pattern.permute.xlu1 %v3881_v59  ;;  %v3898_v59 = vmov 101  }
  0x7d   :  { %449 = vperm.xlu1 %3608, %v4056_v1  }
  0x81   :  { %3609 = vset.pattern.permute.xlu1 %v3882_v61 }
  0x82   :  { %v4238_v62 = vpop.permute.xlu0 %100  ;;  %459 = vperm.xlu1 %3609, %v4056_v1  }
  0x85   :  { %v4246_v0 = vpop.permute.xlu1 %94 }
  0x86   :  { %3610 = vset.pattern.permute.xlu1 %v6076_v2  ;;  %v76_v3 = vpop.permute.xlu0 %75  ;;  %v4544_v2 = vld [vmem:[%s6058_s0 + $0xc] sm:$0x1] }
  0x87   :  { %469 = vperm.xlu1 %3610, %v4244_v63   ;;  %v77_v5 = vsel %vm74_vm7, %v76_v3, %v4115_v36 }
  0x88   :  { %78 = vrot.lane.b32.xlu0 %v77_v5, %s3853_s15 }
  0x8a   :  { %v4253_v6 = vpop.permute.xlu1 %106  ;;  %v149_v7 = vpop.permute.xlu0 %148 }
  0x8b   :  { %6106 = vst [vmem:[#allocation9_spill] sm:$0xff] %v4253_v6  ;;  %v150_v8 = vsel %vm74_vm7, %v149_v7, %v4173_v15  ;;  %3612 = vset.pattern.permute.xlu1 %v3884_v9 }
  0x8c   :  { %151 = vrot.lane.b32.xlu1 %v150_v8, %s3853_s15  ;;  %489 = vperm.xlu0 %3611, %v4056_v1   ;;  %v3429_v8 = vld [vmem:[%s6060_s2 + $0x3] ss:$0 sm:$0xff] }
  0x8f   :  { %v4259_v10 = vpop.permute.xlu1 %112 }
  0x90   :  { %3627 = vset.pattern.permute.xlu0 %v6088_v11 }
  0x91   :  { %662 = vperm.xlu0 %3627, %v4056_v1  }
  0x94   :  { %v4263_v12 = vpop.permute.xlu1 %162 }
  0x99   :  { %v4265_v13 = vpop.permute.xlu1 %168 }
  0x9b   :  { %v4308_v45 = vpop.permute.xlu0 %156 }
  0x9d   :  { %v211_v14 = vpop.permute.xlu1 %210 }
  0x9e   :  { %v212_v16 = vsel %vm74_vm7, %v211_v14, %v4184_v21 }
  0x9f   :  { %213 = vrot.lane.b32.xlu1 %v212_v16, %s3853_s15 }
  0xa0   :  { %v4313_v49 = vpop.permute.xlu0 %174 }
  0xa1   :  { %v4270_v17 = vpop.permute.xlu1 %224 }
  0xa5   :  { %v4321_v53 = vpop.permute.xlu0 %218 }
  0xa6   :  { %v4272_v18 = vpop.permute.xlu1 %230 }
  0xa7   :  { %6107 = vst [vmem:[#allocation10_spill] sm:$0xff] %v4272_v18 }
  0xaa   :  { %v273_v19 = vpop.permute.xlu1 %272  ;;  %v4326_v56 = vpop.permute.xlu0 %236 }
  0xab   :  { %v274_v20 = vsel %vm74_vm7, %v273_v19, %v4208_v39  ;;  %v3900_v19 = vmov 39  }
  0xac   :  { %275 = vrot.lane.b32.xlu1 %v274_v20, %s3853_s15 }
  0xae   :  { %v4280_v23 = vpop.permute.xlu1 %286 }
  0xaf   :  { %6108 = vst [vmem:[#allocation11_spill] sm:$0xff] %v4280_v23  ;;  %v4331_v61 = vpop.permute.xlu0 %280 }
  0xb0   :  { %484 = vrot.lane.b32.xlu1 %v3428_v22, %s3886_s14 }
  0xb3   :  { %v4282_v25 = vpop.permute.xlu1 %292 }
  0xb4   :  { %6109 = vst [vmem:[#allocation12_spill] sm:$0xff] %v4282_v25  ;;  %499 = vperm.xlu1 %3612, %v4056_v1  }
  0xb7   :  { %v4285_v26 = vpop.permute.xlu1 %311 }
  0xb8   :  { %3613 = vset.pattern.permute.xlu1 %v3887_v27 }
  0xb9   :  { %509 = vperm.xlu1 %3613, %v4056_v1  }
  0xbb   :  { %v317_v28 = vpop.permute.xlu1 %316 }
  0xbd   :  { %3614 = vset.pattern.permute.xlu1 %v3888_v29  ;;  %v3902_v29 = vmov 75  }
  0xbe   :  { %519 = vperm.xlu1 %3614, %v4056_v1  }
  0xc0   :  { %v4289_v30 = vpop.permute.xlu1 %326 }
  0xc2   :  { %3615 = vset.pattern.permute.xlu1 %v6069_v31 }
  0xc3   :  { %530 = vperm.xlu1 %3615, %v4056_v1  }
  0xc5   :  { %v4293_v32 = vpop.permute.xlu1 %336 }
  0xc7   :  { %3616 = vset.pattern.permute.xlu1 %v3890_v33 }
  0xc8   :  { %540 = vperm.xlu1 %3616, %v4056_v1  }
  0xca   :  { %v4296_v34 = vpop.permute.xlu1 %346 }
  0xcc   :  { %3617 = vset.pattern.permute.xlu1 %v3891_v35 }
  0xcd   :  { %550 = vperm.xlu1 %3617, %v4056_v1  }
  0xcf   :  { %v4299_v37 = vpop.permute.xlu1 %357 }
  0xd1   :  { %3618 = vset.pattern.permute.xlu1 %v3892_v38 }
  0xd2   :  { %560 = vperm.xlu1 %3618, %v4056_v1  }
  0xd4   :  { %v4302_v40 = vpop.permute.xlu1 %367 }
  0xd6   :  { %3619 = vset.pattern.permute.xlu1 %v3893_v41 }
  0xd7   :  { %571 = vperm.xlu1 %3619, %v4056_v1  }
  0xd9   :  { %v4305_v42 = vpop.permute.xlu1 %377 }
  0xdb   :  { %3620 = vset.pattern.permute.xlu1 %v3894_v43  ;;  %v6086_v43 = vmov 12  }
  0xdc   :  { %581 = vperm.xlu1 %3620, %v4056_v1  }
  0xde   :  { %v4310_v47 = vpop.permute.xlu1 %387 }
  0xe0   :  { %3621 = vset.pattern.permute.xlu1 %v3895_v48 }
  0xe1   :  { %591 = vperm.xlu1 %3621, %v4056_v1  }
  0xe3   :  { %v4315_v51 = vpop.permute.xlu1 %398 }
  0xe5   :  { %3622 = vset.pattern.permute.xlu1 %v6078_v4 }
  0xe6   :  { %601 = vperm.xlu1 %3622, %v4244_v63  }
  0xe8   :  { %v4319_v52 = vpop.permute.xlu1 %408 }
  0xea   :  { %3623 = vset.pattern.permute.xlu1 %v3896_v54  ;;  %v3905_v54 = vmov 48  }
  0xeb   :  { %612 = vperm.xlu1 %3623, %v4056_v1  }
  0xed   :  { %v4324_v55 = vpop.permute.xlu1 %418 }
  0xef   :  { %3624 = vset.pattern.permute.xlu1 %v3897_v57 }
  0xf0   :  { %622 = vperm.xlu1 %3624, %v4056_v1  }
  0xf2   :  { %v4329_v58 = vpop.permute.xlu1 %428 }
  0xf4   :  { %3625 = vset.pattern.permute.xlu1 %v3898_v59  ;;  %v3906_v59 = vmov 84  }
  0xf5   :  { %632 = vperm.xlu1 %3625, %v4056_v1  }
  0xf7   :  { %v4334_v3 = vpop.permute.xlu1 %439 }
  0xf9   :  { %3626 = vset.pattern.permute.xlu1 %v6070_v24 }
  0xfa   :  { %642 = vperm.xlu1 %3626, %v4244_v63   ;;  %v79_v5 = vpop.permute.xlu0 %78 }
  0xfb   :  { %v4340_v7 = vsel %vm74_vm7, %v79_v5, %v4115_v36 }
  0xfc   :  { %v4345_v9 = vpop.permute.xlu1 %449  ;;  %v314_v14 = vmul.f32 %v4285_v26, %v4340_v7 }
  0xfe   :  { %657 = vrot.lane.b32.xlu1 %v3429_v8, %s3899_s19  ;;  %v319_v16 = vmul.f32 %v317_v28, %v314_v14  ;;  %v329_v22 = vmul.f32 %v4289_v30, %v314_v14  ;;  %v339_v33 = vmul.f32 %v4293_v32, %v314_v14  ;;  %v349_v35 = vmul.f32 %v4296_v34, %v314_v14 }
  0xff   :  { %3628 = vset.pattern.permute.xlu1 %v3900_v19  ;;  %v3903_v30 = vmov 111   ;;  %v3908_v19 = vmov 21  }
 0x100   :  { %321 = vrot.lane.b32.xlu0 %v319_v16, %s3901_s20 }
 0x101   :  { %v4350_v20 = vpop.permute.xlu1 %459 }
 0x102   :  { %672 = vperm.xlu1 %3628, %v4056_v1  }
 0x104   :  { %331 = vrot.lane.b32.xlu0 %v329_v22, %s3901_s20  ;;  %v3909_v22 = vmov 57  }
 0x106   :  { %v4355_v27 = vpop.permute.xlu1 %469  ;;  %3629 = vset.pattern.permute.xlu1 %v3902_v29 }
 0x107   :  { %682 = vperm.xlu1 %3629, %v4056_v1  }
 0x108   :  { %341 = vrot.lane.b32.xlu0 %v339_v33, %s3901_s20  ;;  %v3910_v33 = vmov 93  }
 0x10a   :  { %v152_v28 = vpop.permute.xlu1 %151 }
 0x10b   :  { %v4363_v38 = vsel %vm74_vm7, %v152_v28, %v4173_v15  ;;  %3630 = vset.pattern.permute.xlu1 %v3903_v30 }
 0x10c   :  { %692 = vperm.xlu1 %3630, %v4056_v1   ;;  %351 = vrot.lane.b32.xlu0 %v349_v35, %s3901_s20  ;;  %v355_v32 = vmul.f32 %v4285_v26, %v4363_v38 }
 0x10e   :  { %v360_v41 = vmul.f32 %v4299_v37, %v355_v32  ;;  %v370_v34 = vmul.f32 %v4302_v40, %v355_v32  ;;  %v380_v57 = vmul.f32 %v4305_v42, %v355_v32  ;;  %v390_v5 = vmul.f32 %v4310_v47, %v355_v32  ;;  %v490_v32 = vpop.permute.xlu0 %489 }
 0x10f   :  { %v3907_v42 = vmov 120  }
 0x110   :  { %3631 = vset.pattern.permute.xlu1 %v6086_v43  ;;  %362 = vrot.lane.b32.xlu0 %v360_v41, %s3901_s20 }
 0x111   :  { %703 = vperm.xlu1 %3631, %v4056_v1   ;;  %v214_v48 = vpop.permute.xlu1 %213 }
 0x112   :  { %v4379_v37 = vsel %vm74_vm7, %v214_v48, %v4184_v21 }
 0x113   :  { %v396_v40 = vmul.f32 %v4285_v26, %v4379_v37 }
 0x114   :  { %372 = vrot.lane.b32.xlu0 %v370_v34, %s3901_s20  ;;  %v3912_v34 = vmov 30  }
 0x115   :  { %3632 = vset.pattern.permute.xlu1 %v3905_v54  ;;  %v401_v8 = vmul.f32 %v4315_v51, %v396_v40  ;;  %v411_v14 = vmul.f32 %v4319_v52, %v396_v40  ;;  %v421_v47 = vmul.f32 %v4324_v55, %v396_v40  ;;  %v431_v52 = vmul.f32 %v4329_v58, %v396_v40 }
 0x116   :  { %713 = vperm.xlu1 %3632, %v4056_v1  }
 0x118   :  { %382 = vrot.lane.b32.xlu0 %v380_v57, %s3901_s20 }
 0x11a   :  { %3633 = vset.pattern.permute.xlu1 %v3906_v59 }
 0x11b   :  { %723 = vperm.xlu1 %3633, %v4056_v1  }
 0x11c   :  { %392 = vrot.lane.b32.xlu0 %v390_v5, %s3901_s20 }
 0x11e   :  { %v276_v16 = vpop.permute.xlu1 %275 }
 0x11f   :  { %3634 = vset.pattern.permute.xlu1 %v3907_v42  ;;  %v4396_v51 = vsel %vm74_vm7, %v276_v16, %v4208_v39 }
 0x120   :  { %733 = vperm.xlu1 %3634, %v4056_v1   ;;  %403 = vrot.lane.b32.xlu0 %v401_v8, %s3901_s20  ;;  %v437_v29 = vmul.f32 %v4285_v26, %v4396_v51 }
 0x122   :  { %v442_v55 = vmul.f32 %v4334_v3, %v437_v29  ;;  %v485_v28 = vpop.permute.xlu1 %484  ;;  %v452_v30 = vmul.f32 %v4345_v9, %v437_v29  ;;  %v462_v3 = vmul.f32 %v4350_v20, %v437_v29  ;;  %v472_v9 = vmul.f32 %v4355_v27, %v437_v29 }
 0x123   :  { %v487_v35 = vmul.f32 %v485_v28, %v4340_v7  ;;  %v528_v40 = vmul.f32 %v485_v28, %v4363_v38 }
 0x124   :  { %3635 = vset.pattern.permute.xlu1 %v3908_v19  ;;  %413 = vrot.lane.b32.xlu0 %v411_v14, %s3901_s20 }
 0x125   :  { %744 = vperm.xlu1 %3635, %v4056_v1   ;;  %v492_v26 = vmul.f32 %v490_v32, %v487_v35 }
 0x128   :  { %423 = vrot.lane.b32.xlu0 %v421_v47, %s3901_s20 }
 0x129   :  { %3636 = vset.pattern.permute.xlu1 %v3909_v22  ;;  %v569_v22 = vmul.f32 %v485_v28, %v4379_v37 }
 0x12a   :  { %754 = vperm.xlu1 %3636, %v4056_v1  }
 0x12c   :  { %433 = vrot.lane.b32.xlu0 %v431_v52, %s3901_s20 }
 0x12e   :  { %3637 = vset.pattern.permute.xlu1 %v3910_v33 }
 0x12f   :  { %764 = vperm.xlu1 %3637, %v4056_v1  }
 0x130   :  { %444 = vrot.lane.b32.xlu0 %v442_v55, %s3901_s20 }
 0x133   :  { %3638 = vset.pattern.permute.xlu1 %v6074_v46  ;;  %v500_v58 = vpop.permute.xlu1 %499 }
 0x134   :  { %774 = vperm.xlu1 %3638, %v4244_v63   ;;  %454 = vrot.lane.b32.xlu0 %v452_v30, %s3901_s20  ;;  %v502_v54 = vmul.f32 %v500_v58, %v487_v35  ;;  %v610_v58 = vmul.f32 %v485_v28, %v4396_v51 }
 0x138   :  { %v510_v41 = vpop.permute.xlu1 %509  ;;  %464 = vrot.lane.b32.xlu0 %v462_v3, %s3901_s20  ;;  %494 = vrot.lane.b32.xlu1 %v492_v26, %s3911_s21 }
 0x139   :  { %3639 = vset.pattern.permute.xlu1 %v3912_v34  ;;  %v512_v57 = vmul.f32 %v510_v41, %v487_v35 }
 0x13c   :  { %474 = vrot.lane.b32.xlu0 %v472_v9, %s3901_s20 }
 0x13d   :  { %v520_v48 = vpop.permute.xlu1 %519 }
 0x13e   :  { %v522_v20 = vmul.f32 %v520_v48, %v487_v35 }
 0x140   :  { %504 = vrot.lane.b32.xlu0 %v502_v54, %s3911_s21 }
 0x142   :  { %v531_v59 = vpop.permute.xlu1 %530 }
 0x143   :  { %v533_v8 = vmul.f32 %v531_v59, %v528_v40 }
 0x144   :  { %514 = vrot.lane.b32.xlu0 %v512_v57, %s3911_s21 }
 0x147   :  { %v541_v5 = vpop.permute.xlu1 %540 }
 0x148   :  { %524 = vrot.lane.b32.xlu0 %v522_v20, %s3911_s21  ;;  %v543_v27 = vmul.f32 %v541_v5, %v528_v40  ;;  %v663_v20 = vpop.permute.xlu0 %662 }
 0x14c   :  { %v551_v42 = vpop.permute.xlu1 %550  ;;  %535 = vrot.lane.b32.xlu0 %v533_v8, %s3911_s21 }
 0x14d   :  { %v553_v16 = vmul.f32 %v551_v42, %v528_v40 }
 0x150   :  { %545 = vrot.lane.b32.xlu0 %v543_v27, %s3911_s21 }
 0x151   :  { %v561_v14 = vpop.permute.xlu1 %560 }
 0x152   :  { %v563_v19 = vmul.f32 %v561_v14, %v528_v40  ;;  %v3914_v14 = vmov 66  }
 0x154   :  { %555 = vrot.lane.b32.xlu0 %v553_v16, %s3911_s21 }
 0x156   :  { %v572_v47 = vpop.permute.xlu1 %571 }
 0x157   :  { %v574_v52 = vmul.f32 %v572_v47, %v569_v22 }
 0x158   :  { %565 = vrot.lane.b32.xlu0 %v563_v19, %s3911_s21 }
 0x15b   :  { %v582_v29 = vpop.permute.xlu1 %581 }
 0x15c   :  { %576 = vrot.lane.b32.xlu0 %v574_v52, %s3911_s21  ;;  %v584_v33 = vmul.f32 %v582_v29, %v569_v22 }
 0x160   :  { %v592_v55 = vpop.permute.xlu1 %591  ;;  %586 = vrot.lane.b32.xlu0 %v584_v33, %s3911_s21 }
 0x161   :  { %v594_v35 = vmul.f32 %v592_v55, %v569_v22 }
 0x164   :  { %596 = vrot.lane.b32.xlu0 %v594_v35, %s3911_s21  ;;  %v6084_v35 = vmov 4  }
 0x165   :  { %v602_v30 = vpop.permute.xlu1 %601 }
 0x166   :  { %v604_v32 = vmul.f32 %v602_v30, %v569_v22  ;;  %v3915_v22 = vmov 102  }
 0x168   :  { %606 = vrot.lane.b32.xlu0 %v604_v32, %s3911_s21 }
 0x16a   :  { %v613_v26 = vpop.permute.xlu1 %612 }
 0x16b   :  { %v615_v3 = vmul.f32 %v613_v26, %v610_v58 }
 0x16d   :  { %617 = vrot.lane.b32.xlu0 %v615_v3, %s3911_s21 }
 0x16f   :  { %v623_v41 = vpop.permute.xlu1 %622 }
 0x170   :  { %v625_v34 = vmul.f32 %v623_v41, %v610_v58 }
 0x172   :  { %627 = vrot.lane.b32.xlu0 %v625_v34, %s3911_s21  ;;  %v3918_v34 = vmov 76  }
 0x174   :  { %v633_v9 = vpop.permute.xlu1 %632 }
 0x175   :  { %v635_v48 = vmul.f32 %v633_v9, %v610_v58 }
 0x177   :  { %637 = vrot.lane.b32.xlu0 %v635_v48, %s3911_s21 }
 0x179   :  { %v643_v54 = vpop.permute.xlu1 %642 }
 0x17a   :  { %v645_v57 = vmul.f32 %v643_v54, %v610_v58  ;;  %v3917_v58 = vmov 40   ;;  %v3919_v54 = vmov 112  }
 0x17c   :  { %647 = vrot.lane.b32.xlu0 %v645_v57, %s3911_s21 }
 0x17d   :  { %v4435_v59 = vpop.permute.xlu1 %657 }
 0x17e   :  { %v660_v28 = vmul.f32 %v4435_v59, %v4340_v7  ;;  %v701_v47 = vmul.f32 %v4435_v59, %v4363_v38  ;;  %v742_v41 = vmul.f32 %v4435_v59, %v4379_v37 }
 0x180   :  { %v665_v5 = vmul.f32 %v663_v20, %v660_v28  ;;  %v4462_v20 = vpop.permute.xlu0 %321 }
 0x181   :  { %v673_v40 = vpop.permute.xlu1 %672  ;;  %6110 = vst [vmem:[#allocation13_spill] sm:$0xff] %v4462_v20 }
 0x182   :  { %v675_v8 = vmul.f32 %v673_v40, %v660_v28  ;;  %667 = vrot.lane.b32.xlu1 %v665_v5, %s3913_s22  ;;  %v6082_v5 = vmov 13  }
 0x184   :  { %677 = vrot.lane.b32.xlu0 %v675_v8, %s3913_s22 }
 0x186   :  { %v683_v42 = vpop.permute.xlu1 %682  ;;  %785 = vperm.xlu1 %3639, %v4056_v1  }
 0x187   :  { %v685_v27 = vmul.f32 %v683_v42, %v660_v28  ;;  %v4468_v42 = vpop.permute.xlu0 %331 }
 0x188   :  { %6111 = vst [vmem:[#allocation14_spill] sm:$0xff] %v4468_v42 }
 0x189   :  { %687 = vrot.lane.b32.xlu0 %v685_v27, %s3913_s22  ;;  %v3921_v27 = vmov 49  }
 0x18a   :  { %3640 = vset.pattern.permute.xlu1 %v3914_v14 }
 0x18b   :  { %v693_v16 = vpop.permute.xlu1 %692  ;;  %795 = vperm.xlu1 %3640, %v4056_v1  }
 0x18c   :  { %v695_v19 = vmul.f32 %v693_v16, %v660_v28 }
 0x18e   :  { %697 = vrot.lane.b32.xlu0 %v695_v19, %s3913_s22  ;;  %v3922_v19 = vmov 85  }
 0x18f   :  { %3641 = vset.pattern.permute.xlu1 %v3915_v22  ;;  %v3923_v22 = vmov 121  }
 0x190   :  { %v704_v52 = vpop.permute.xlu1 %703  ;;  %805 = vperm.xlu1 %3641, %v4056_v1  }
 0x191   :  { %v706_v29 = vmul.f32 %v704_v52, %v701_v47 }
 0x193   :  { %708 = vrot.lane.b32.xlu0 %v706_v29, %s3913_s22  ;;  %v3924_v29 = vmov 22  }
 0x194   :  { %3642 = vset.pattern.permute.xlu1 %v6071_v50 }
 0x195   :  { %v714_v33 = vpop.permute.xlu1 %713  ;;  %815 = vperm.xlu1 %3642, %v4244_v63  }
 0x196   :  { %v716_v55 = vmul.f32 %v714_v33, %v701_v47  ;;  %v3790_v33 = vld [vmem:[%s6059_s1] sm:$0xff] }
 0x198   :  { %718 = vrot.lane.b32.xlu0 %v716_v55, %s3913_s22 }
 0x199   :  { %3643 = vset.pattern.permute.xlu1 %v6084_v35 }
 0x19a   :  { %v724_v30 = vpop.permute.xlu1 %723  ;;  %825 = vperm.xlu1 %3643, %v4056_v1  }
 0x19b   :  { %v726_v32 = vmul.f32 %v724_v30, %v701_v47  ;;  %v3925_v30 = vmov 58  }
 0x19d   :  { %728 = vrot.lane.b32.xlu0 %v726_v32, %s3913_s22 }
 0x19e   :  { %3644 = vset.pattern.permute.xlu1 %v3917_v58  ;;  %v3926_v58 = vmov 94  }
 0x19f   :  { %v734_v26 = vpop.permute.xlu1 %733  ;;  %877 = vperm.xlu1 %3644, %v4056_v1  }
 0x1a0   :  { %v736_v3 = vmul.f32 %v734_v26, %v701_v47  ;;  %v4472_v47 = vpop.permute.xlu0 %341  ;;  %v3927_v26 = vmov 31  }
 0x1a1   :  { %6112 = vst [vmem:[#allocation15_spill] sm:$0xff] %v4472_v47 }
 0x1a2   :  { %738 = vrot.lane.b32.xlu0 %v736_v3, %s3913_s22 }
 0x1a3   :  { %3645 = vset.pattern.permute.xlu1 %v3918_v34 }
 0x1a4   :  { %v745_v9 = vpop.permute.xlu1 %744  ;;  %929 = vperm.xlu1 %3645, %v4056_v1   ;;  %v4476_v52 = vpop.permute.xlu0 %351 }
 0x1a5   :  { %v747_v48 = vmul.f32 %v745_v9, %v742_v41  ;;  %v3929_v9 = vmov 103  }
 0x1a7   :  { %749 = vrot.lane.b32.xlu0 %v747_v48, %s3913_s22 }
 0x1a8   :  { %3646 = vset.pattern.permute.xlu1 %v3919_v54  ;;  %v4481_v55 = vpop.permute.xlu0 %362  ;;  %v3430_v54 = vld [vmem:[%s6060_s2 + $0x5] ss:$0 sm:$0xff] }
 0x1a9   :  { %v755_v57 = vpop.permute.xlu1 %754  ;;  %981 = vperm.xlu1 %3646, %v4056_v1   ;;  %6113 = vst [vmem:[#allocation16_spill] sm:$0xff] %v4481_v55 }
 0x1aa   :  { %v757_v28 = vmul.f32 %v755_v57, %v742_v41 }
 0x1ac   :  { %759 = vrot.lane.b32.xlu0 %v757_v28, %s3913_s22  ;;  %v4483_v32 = vpop.permute.xlu0 %372 }
 0x1ad   :  { %3647 = vset.pattern.permute.xlu1 %v6082_v5  ;;  %6114 = vst [vmem:[#allocation17_spill] sm:$0xff] %v4483_v32  ;;  %v4556_v5 = vld [vmem:[%s6058_s0 + $0x14] sm:$0x1] }
 0x1ae   :  { %v765_v40 = vpop.permute.xlu1 %764  ;;  %1033 = vperm.xlu1 %3647, %v4056_v1  }
 0x1af   :  { %v767_v8 = vmul.f32 %v765_v40, %v742_v41 }
 0x1b1   :  { %769 = vrot.lane.b32.xlu0 %v767_v8, %s3913_s22 }
 0x1b2   :  { %3648 = vset.pattern.permute.xlu1 %v3921_v27 }
 0x1b3   :  { %v775_v14 = vpop.permute.xlu1 %774  ;;  %1085 = vperm.xlu1 %3648, %v4056_v1  }
 0x1b4   :  { %v777_v16 = vmul.f32 %v775_v14, %v742_v41  ;;  %v3928_v41 = vmov 67  }
 0x1b6   :  { %779 = vrot.lane.b32.xlu0 %v777_v16, %s3913_s22 }
 0x1b7   :  { %3649 = vset.pattern.permute.xlu1 %v3922_v19  ;;  %v4508_v27 = vpop.permute.xlu1 %494 }
 0x1b8   :  { %1137 = vperm.xlu1 %3649, %v4056_v1   ;;  %6121 = vst [vmem:[#allocation24_spill] sm:$0xff] %v4508_v27 }
 0x1bc   :  { %3650 = vset.pattern.permute.xlu1 %v3923_v22 }
 0x1bd   :  { %1189 = vperm.xlu1 %3650, %v4056_v1   ;;  %v4485_v1 = vpop.permute.xlu0 %382 }
 0x1be   :  { %6115 = vst [vmem:[#allocation18_spill] sm:$0xff] %v4485_v1 }
 0x1c1   :  { %3651 = vset.pattern.permute.xlu1 %v3924_v29  ;;  %v4489_v3 = vpop.permute.xlu0 %392 }
 0x1c2   :  { %1241 = vperm.xlu1 %3651, %v3790_v33  }
 0x1c5   :  { %v4491_v34 = vpop.permute.xlu0 %403 }
 0x1c6   :  { %3652 = vset.pattern.permute.xlu1 %v3925_v30  ;;  %6116 = vst [vmem:[#allocation19_spill] sm:$0xff] %v4491_v34 }
 0x1c7   :  { %1293 = vperm.xlu1 %3652, %v3790_v33  }
 0x1c9   :  { %v4493_v48 = vpop.permute.xlu0 %413 }
 0x1ca   :  { %6117 = vst [vmem:[#allocation20_spill] sm:$0xff] %v4493_v48 }
 0x1cb   :  { %3653 = vset.pattern.permute.xlu1 %v3926_v58 }
 0x1cc   :  { %1345 = vperm.xlu1 %3653, %v3790_v33  }
 0x1cd   :  { %v4500_v57 = vpop.permute.xlu0 %423 }
 0x1ce   :  { %6118 = vst [vmem:[#allocation21_spill] sm:$0xff] %v4500_v57 }
 0x1d0   :  { %3654 = vset.pattern.permute.xlu1 %v6072_v44 }
 0x1d1   :  { %1397 = vperm.xlu1 %3654, %v4244_v63   ;;  %v4502_v28 = vpop.permute.xlu0 %433 }
 0x1d5   :  { %3655 = vset.pattern.permute.xlu1 %v3927_v26  ;;  %v4504_v40 = vpop.permute.xlu0 %444 }
 0x1d6   :  { %1449 = vperm.xlu1 %3655, %v3790_v33   ;;  %6119 = vst [vmem:[#allocation22_spill] sm:$0xff] %v4504_v40 }
 0x1d9   :  { %v4506_v8 = vpop.permute.xlu0 %454 }
 0x1da   :  { %3656 = vset.pattern.permute.xlu1 %v3928_v41  ;;  %6120 = vst [vmem:[#allocation23_spill] sm:$0xff] %v4506_v8 }
 0x1db   :  { %1501 = vperm.xlu1 %3656, %v3790_v33  }
 0x1dd   :  { %v4510_v14 = vpop.permute.xlu0 %464 }
 0x1de   :  { %6122 = vst [vmem:[#allocation25_spill] sm:$0xff] %v4510_v14 }
 0x1df   :  { %3657 = vset.pattern.permute.xlu1 %v3929_v9 }
 0x1e0   :  { %1553 = vperm.xlu1 %3657, %v3790_v33  }
 0x1e1   :  { %v4516_v22 = vpop.permute.xlu0 %474 }
 0x1e4   :  { %3658 = vset.pattern.permute.xlu1 %v6069_v31  ;;  %v6080_v31 = vmov 5  }
 0x1e5   :  { %1605 = vperm.xlu1 %3658, %v4244_v63   ;;  %v783_v63 = vmul.f32 %v4435_v59, %v4396_v51  ;;  %v4519_v58 = vpop.permute.xlu0 %504  ;;  %3659 = vset.pattern.permute.xlu0 %v6080_v31  ;;  %v4550_v31 = vld [vmem:[%s6058_s0 + $0x10] sm:$0x1] }
 0x1e6   :  { %6124 = vst [vmem:[#allocation27_spill] sm:$0xff] %v4519_v58 }
 0x1e9   :  { %1662 = vrot.lane.b32.xlu1 %v3430_v54, %s3930_s27  ;;  %v4522_v9 = vpop.permute.xlu0 %514 }
 0x1ea   :  { %6125 = vst [vmem:[#allocation28_spill] sm:$0xff] %v4522_v9 }
 0x1f4   :  { %v4512_v16 = vpop.permute.xlu1 %667 }
 0x1f5   :  { %6123 = vst [vmem:[#allocation26_spill] sm:$0xff] %v4512_v16 }
 0x205   :  { %v786_v19 = vpop.permute.xlu1 %785 }
 0x206   :  { %v788_v29 = vmul.f32 %v786_v19, %v783_v63  ;;  %v4527_v19 = vpop.permute.xlu0 %524 }
 0x208   :  { %790 = vrot.lane.b32.xlu0 %v788_v29, %s3913_s22 }
 0x20a   :  { %v796_v33 = vpop.permute.xlu1 %795  ;;  %v4559_v35 = vpop.permute.xlu0 %535 }
 0x20b   :  { %v798_v30 = vmul.f32 %v796_v33, %v783_v63  ;;  %6126 = vst [vmem:[#allocation29_spill] sm:$0xff] %v4559_v35 }
 0x20d   :  { %800 = vrot.lane.b32.xlu0 %v798_v30, %s3913_s22 }
 0x20f   :  { %v806_v26 = vpop.permute.xlu1 %805 }
 0x210   :  { %v808_v41 = vmul.f32 %v806_v26, %v783_v63 }
 0x212   :  { %810 = vrot.lane.b32.xlu0 %v808_v41, %s3913_s22  ;;  %v4532_v41 = vld [vmem:[%s6058_s0 + $0x4] sm:$0x1] }
 0x214   :  { %v816_v54 = vpop.permute.xlu1 %815 }
 0x215   :  { %v818_v59 = vmul.f32 %v816_v54, %v783_v63  ;;  %v4538_v54 = vld [vmem:[%s6058_s0 + $0x8] sm:$0x1] }
 0x217   :  { %820 = vrot.lane.b32.xlu0 %v818_v59, %s3913_s22 }
 0x219   :  { %v826_v29 = vpop.permute.xlu1 %825 }
 0x21a   :  { %v827_v33 = vrot.slane %v826_v29, 1  ;;  %v828_v24 = vrot.slane %v826_v29, 2  ;;  %v829_v50 = vrot.slane %v826_v29, 3  ;;  %v830_v30 = vrot.slane %v826_v29, 4 }
 0x21b   :  { %v831_v44 = vrot.slane %v826_v29, 5  ;;  %v832_v26 = vrot.slane %v826_v29, 6  ;;  %v833_v46 = vrot.slane %v826_v29, 7 }
 0x21c   :  { %v843_v63 = vmul.f32 %v4532_v41, %v827_v33  ;;  %v844_v59 = vmul.f32 %v4538_v54, %v828_v24  ;;  %v845_v4 = vmul.f32 %v4544_v2, %v829_v50  ;;  %v846_v33 = vmul.f32 %v4550_v31, %v830_v30  ;;  %v4564_v50 = vld [vmem:[%s6058_s0] sm:$0x1]  ;;  %v4570_v30 = vld [vmem:[%s6058_s0 + $0x18] sm:$0x1] }
 0x21d   :  { %v847_v24 = vmul.f32 %v4556_v5, %v831_v44  ;;  %v842_v11 = vmul.f32 %v4564_v50, %v826_v29  ;;  %v848_v21 = vmul.f32 %v4570_v30, %v832_v26  ;;  %v4576_v44 = vld [vmem:[%s6058_s0 + $0x1c] sm:$0x1] }
 0x21e   :  { %v878_v43 = vpop.permute.xlu1 %877  ;;  %v858_v36 = vrot.slane %v843_v63, 7  ;;  %v860_v39 = vrot.slane %v844_v59, 6  ;;  %v849_v15 = vmul.f32 %v4576_v44, %v833_v46  ;;  %v862_v16 = vrot.slane %v845_v4, 5 }
 0x21f   :  { %v864_v9 = vrot.slane %v846_v33, 4  ;;  %v866_v58 = vrot.slane %v847_v24, 3  ;;  %v879_v35 = vrot.slane %v878_v43, 1  ;;  %v880_v14 = vrot.slane %v878_v43, 2 }
 0x220   :  { %v859_v29 = vsel %vm53_vm0, %v858_v36, %v842_v11  ;;  %v881_v27 = vrot.slane %v878_v43, 3  ;;  %v882_v26 = vrot.slane %v878_v43, 4  ;;  %v883_v63 = vrot.slane %v878_v43, 5  ;;  %v4586_v11 = vpop.permute.xlu0 %545 }
 0x221   :  { %v861_v8 = vsel %vm56_vm1, %v860_v39, %v859_v29  ;;  %v868_v57 = vrot.slane %v848_v21, 2  ;;  %v884_v48 = vrot.slane %v878_v43, 6  ;;  %v885_v40 = vrot.slane %v878_v43, 7  ;;  %6127 = vst [vmem:[#allocation30_spill] sm:$0xff] %v4586_v11 }
 0x222   :  { %v863_v59 = vsel %vm59_vm2, %v862_v16, %v861_v8  ;;  %v895_v4 = vmul.f32 %v4532_v41, %v879_v35  ;;  %v896_v46 = vmul.f32 %v4538_v54, %v880_v14  ;;  %v897_v36 = vmul.f32 %v4544_v2, %v881_v27 }
 0x223   :  { %v865_v1 = vsel %vm62_vm3, %v864_v9, %v863_v59  ;;  %v870_v33 = vrot.slane %v849_v15, 1  ;;  %v898_v24 = vmul.f32 %v4550_v31, %v882_v26  ;;  %v899_v8 = vmul.f32 %v4556_v5, %v883_v63  ;;  %v930_v21 = vpop.permute.xlu1 %929 }
 0x224   :  { %v867_v39 = vsel %vm65_vm4, %v866_v58, %v865_v1  ;;  %v894_v9 = vmul.f32 %v4564_v50, %v878_v43  ;;  %v900_v35 = vmul.f32 %v4570_v30, %v884_v48  ;;  %v910_v29 = vrot.slane %v895_v4, 7 }
 0x225   :  { %v869_v16 = vsel %vm68_vm5, %v868_v57, %v867_v39  ;;  %v901_v27 = vmul.f32 %v4576_v44, %v885_v40  ;;  %v912_v59 = vrot.slane %v896_v46, 6  ;;  %v914_v11 = vrot.slane %v897_v36, 5  ;;  %v4600_v40 = vpop.permute.xlu0 %555 }
 0x226   :  { %v871_v14 = vsel %vm71_vm6, %v870_v33, %v869_v16  ;;  %v911_v15 = vsel %vm53_vm0, %v910_v29, %v894_v9  ;;  %v916_v1 = vrot.slane %v898_v24, 4  ;;  %v918_v58 = vrot.slane %v899_v8, 3  ;;  %6128 = vst [vmem:[#allocation31_spill] sm:$0xff] %v4600_v40 }
 0x227   :  { %872 = vrot.lane.b32.xlu0 %v871_v14, %s3850_s17  ;;  %v920_v26 = vrot.slane %v900_v35, 2  ;;  %v913_v57 = vsel %vm56_vm1, %v912_v59, %v911_v15  ;;  %v931_v63 = vrot.slane %v930_v21, 1  ;;  %v932_v43 = vrot.slane %v930_v21, 2 }
 0x228   :  { %v933_v39 = vrot.slane %v930_v21, 3  ;;  %v915_v48 = vsel %vm59_vm2, %v914_v11, %v913_v57  ;;  %v934_v4 = vrot.slane %v930_v21, 4  ;;  %v935_v33 = vrot.slane %v930_v21, 5  ;;  %v982_v11 = vpop.permute.xlu1 %981 }
 0x229   :  { %v936_v16 = vrot.slane %v930_v21, 6  ;;  %v917_v46 = vsel %vm62_vm3, %v916_v1, %v915_v48  ;;  %v922_v36 = vrot.slane %v901_v27, 1  ;;  %v937_v14 = vrot.slane %v930_v21, 7 }
 0x22a   :  { %v947_v24 = vmul.f32 %v4532_v41, %v931_v63  ;;  %v919_v8 = vsel %vm65_vm4, %v918_v58, %v917_v46  ;;  %v948_v9 = vmul.f32 %v4538_v54, %v932_v43  ;;  %v949_v35 = vmul.f32 %v4544_v2, %v933_v39 }
 0x22b   :  { %v950_v29 = vmul.f32 %v4550_v31, %v934_v4  ;;  %v921_v59 = vsel %vm68_vm5, %v920_v26, %v919_v8  ;;  %v946_v15 = vmul.f32 %v4564_v50, %v930_v21  ;;  %v951_v57 = vmul.f32 %v4556_v5, %v935_v33  ;;  %v4616_v33 = vpop.permute.xlu0 %565 }
 0x22c   :  { %v952_v27 = vmul.f32 %v4570_v30, %v936_v16  ;;  %v923_v1 = vsel %vm71_vm6, %v922_v36, %v921_v59  ;;  %v953_v63 = vmul.f32 %v4576_v44, %v937_v14  ;;  %v962_v58 = vrot.slane %v947_v24, 7 }
 0x22d   :  { %v964_v48 = vrot.slane %v948_v9, 6  ;;  %924 = vrot.lane.b32.xlu0 %v923_v1, %s3850_s17  ;;  %v966_v43 = vrot.slane %v949_v35, 5  ;;  %v968_v39 = vrot.slane %v950_v29, 4  ;;  %v970_v4 = vrot.slane %v951_v57, 3 }
 0x22e   :  { %v972_v46 = vrot.slane %v952_v27, 2  ;;  %v963_v26 = vsel %vm53_vm0, %v962_v58, %v946_v15  ;;  %v983_v8 = vrot.slane %v982_v11, 1  ;;  %v984_v21 = vrot.slane %v982_v11, 2  ;;  %v1034_v58 = vpop.permute.xlu1 %1033 }
 0x22f   :  { %v985_v40 = vrot.slane %v982_v11, 3  ;;  %v965_v16 = vsel %vm56_vm1, %v964_v48, %v963_v26  ;;  %v986_v36 = vrot.slane %v982_v11, 4  ;;  %v987_v59 = vrot.slane %v982_v11, 5 }
 0x230   :  { %v988_v14 = vrot.slane %v982_v11, 6  ;;  %v967_v24 = vsel %vm59_vm2, %v966_v43, %v965_v16  ;;  %v974_v9 = vrot.slane %v953_v63, 1  ;;  %v989_v1 = vrot.slane %v982_v11, 7 }
 0x231   :  { %v999_v35 = vmul.f32 %v4532_v41, %v983_v8  ;;  %v969_v29 = vsel %vm62_vm3, %v968_v39, %v967_v24  ;;  %v1000_v15 = vmul.f32 %v4538_v54, %v984_v21  ;;  %v1001_v57 = vmul.f32 %v4544_v2, %v985_v40  ;;  %v4632_v21 = vpop.permute.xlu0 %576 }
 0x232   :  { %v1002_v27 = vmul.f32 %v4550_v31, %v986_v36  ;;  %v971_v48 = vsel %vm65_vm4, %v970_v4, %v969_v29  ;;  %v998_v26 = vmul.f32 %v4564_v50, %v982_v11  ;;  %v1003_v32 = vmul.f32 %v4556_v5, %v987_v59  ;;  %6129 = vst [vmem:[#allocation32_spill] sm:$0xff] %v4632_v21 }
 0x233   :  { %v1004_v63 = vmul.f32 %v4570_v30, %v988_v14  ;;  %v973_v43 = vsel %vm68_vm5, %v972_v46, %v971_v48  ;;  %v1005_v41 = vmul.f32 %v4576_v44, %v989_v1  ;;  %v1014_v39 = vrot.slane %v999_v35, 7  ;;  %v4648_v35 = vld [vmem:[%s6058_s0 + $0x9] sm:$0x1] }
 0x234   :  { %v1016_v8 = vrot.slane %v1000_v15, 6  ;;  %v975_v54 = vsel %vm71_vm6, %v974_v9, %v973_v43  ;;  %v1018_v2 = vrot.slane %v1001_v57, 5  ;;  %v1020_v40 = vrot.slane %v1002_v27, 4  ;;  %v4642_v9 = vld [vmem:[%s6058_s0 + $0x5] sm:$0x1]  ;;  %v1086_v27 = vpop.permute.xlu1 %1085 }
 0x235   :  { %v1022_v31 = vrot.slane %v1003_v32, 3  ;;  %976 = vrot.lane.b32.xlu0 %v975_v54, %s3850_s17  ;;  %v1015_v50 = vsel %vm53_vm0, %v1014_v39, %v998_v26  ;;  %v1024_v5 = vrot.slane %v1004_v63, 2  ;;  %v1035_v11 = vrot.slane %v1034_v58, 1  ;;  %v4654_v15 = vld [vmem:[%s6058_s0 + $0xd] sm:$0x1] }
 0x236   :  { %v1036_v30 = vrot.slane %v1034_v58, 2  ;;  %v1017_v4 = vsel %vm56_vm1, %v1016_v8, %v1015_v50  ;;  %v1037_v46 = vrot.slane %v1034_v58, 3  ;;  %v1038_v44 = vrot.slane %v1034_v58, 4  ;;  %v4661_v26 = vld [vmem:[%s6058_s0 + $0x11] sm:$0x1] }
 0x237   :  { %v1039_v16 = vrot.slane %v1034_v58, 5  ;;  %v1019_v36 = vsel %vm59_vm2, %v1018_v2, %v1017_v4  ;;  %v1026_v59 = vrot.slane %v1005_v41, 1  ;;  %v1040_v14 = vrot.slane %v1034_v58, 6  ;;  %v4667_v43 = vld [vmem:[%s6058_s0 + $0x15] sm:$0x1] }
 0x238   :  { %v1041_v24 = vrot.slane %v1034_v58, 7  ;;  %v1021_v32 = vsel %vm62_vm3, %v1020_v40, %v1019_v36  ;;  %v1051_v1 = vmul.f32 %v4642_v9, %v1035_v11  ;;  %v1052_v29 = vmul.f32 %v4648_v35, %v1036_v30  ;;  %v4673_v39 = vld [vmem:[%s6058_s0 + $0x19] sm:$0x1]  ;;  %v4680_v2 = vld [vmem:[%s6058_s0 + $0x1] sm:$0x1]  ;;  %v4683_v11 = vpop.permute.xlu0 %586 }
 0x239   :  { %v1053_v57 = vmul.f32 %v4654_v15, %v1037_v46  ;;  %v1023_v48 = vsel %vm65_vm4, %v1022_v31, %v1021_v32  ;;  %v1054_v63 = vmul.f32 %v4661_v26, %v1038_v44  ;;  %v1055_v41 = vmul.f32 %v4667_v43, %v1039_v16  ;;  %6130 = vst [vmem:[#allocation33_spill] sm:$0xff] %v4683_v11  ;;  %v4689_v4 = vld [vmem:[%s6058_s0 + $0x1d] sm:$0x1] }
 0x23a   :  { %v1056_v8 = vmul.f32 %v4673_v39, %v1040_v14  ;;  %v1025_v54 = vsel %vm68_vm5, %v1024_v5, %v1023_v48  ;;  %v1050_v40 = vmul.f32 %v4680_v2, %v1034_v58  ;;  %v1066_v31 = vrot.slane %v1051_v1, 7 }
 0x23b   :  { %v1068_v50 = vrot.slane %v1052_v29, 6  ;;  %v1027_v30 = vsel %vm71_vm6, %v1026_v59, %v1025_v54  ;;  %v1057_v5 = vmul.f32 %v4689_v4, %v1041_v24  ;;  %v1070_v46 = vrot.slane %v1053_v57, 5 }
 0x23c   :  { %v1072_v44 = vrot.slane %v1054_v63, 4  ;;  %1028 = vrot.lane.b32.xlu0 %v1027_v30, %s3850_s17  ;;  %v1067_v16 = vsel %vm53_vm0, %v1066_v31, %v1050_v40  ;;  %v1074_v58 = vrot.slane %v1055_v41, 3  ;;  %v1076_v36 = vrot.slane %v1056_v8, 2  ;;  %v4703_v30 = vpop.permute.xlu0 %596 }
 0x23d   :  { %v1087_v14 = vrot.slane %v1086_v27, 1  ;;  %v1069_v32 = vsel %vm56_vm1, %v1068_v50, %v1067_v16  ;;  %v1088_v1 = vrot.slane %v1086_v27, 2  ;;  %v1089_v59 = vrot.slane %v1086_v27, 3  ;;  %6131 = vst [vmem:[#allocation34_spill] sm:$0xff] %v4703_v30 }
 0x23e   :  { %v1090_v29 = vrot.slane %v1086_v27, 4  ;;  %v1071_v48 = vsel %vm59_vm2, %v1070_v46, %v1069_v32  ;;  %v1091_v54 = vrot.slane %v1086_v27, 5  ;;  %v1092_v11 = vrot.slane %v1086_v27, 6  ;;  %v1138_v46 = vpop.permute.xlu1 %1137 }
 0x23f   :  { %v1093_v21 = vrot.slane %v1086_v27, 7  ;;  %v1073_v24 = vsel %vm62_vm3, %v1072_v44, %v1071_v48  ;;  %v1078_v57 = vrot.slane %v1057_v5, 1  ;;  %v1103_v63 = vmul.f32 %v4642_v9, %v1087_v14 }
 0x240   :  { %v1104_v40 = vmul.f32 %v4648_v35, %v1088_v1  ;;  %v1075_v41 = vsel %vm65_vm4, %v1074_v58, %v1073_v24  ;;  %v1105_v8 = vmul.f32 %v4654_v15, %v1089_v59  ;;  %v1106_v31 = vmul.f32 %v4661_v26, %v1090_v29 }
 0x241   :  { %v1107_v50 = vmul.f32 %v4667_v43, %v1091_v54  ;;  %v1077_v16 = vsel %vm68_vm5, %v1076_v36, %v1075_v41  ;;  %v1102_v44 = vmul.f32 %v4680_v2, %v1086_v27  ;;  %v1108_v5 = vmul.f32 %v4673_v39, %v1092_v11 }
 0x242   :  { %v1118_v14 = vrot.slane %v1103_v63, 7  ;;  %v1079_v32 = vsel %vm71_vm6, %v1078_v57, %v1077_v16  ;;  %v1109_v58 = vmul.f32 %v4689_v4, %v1093_v21  ;;  %v1120_v1 = vrot.slane %v1104_v40, 6 }
 0x243   :  { %v1122_v59 = vrot.slane %v1105_v8, 5  ;;  %1080 = vrot.lane.b32.xlu0 %v1079_v32, %s3850_s17  ;;  %v1124_v48 = vrot.slane %v1106_v31, 4  ;;  %v1126_v54 = vrot.slane %v1107_v50, 3  ;;  %v1128_v24 = vrot.slane %v1108_v5, 2 }
 0x244   :  { %v1119_v29 = vsel %vm53_vm0, %v1118_v14, %v1102_v44  ;;  %v1139_v41 = vrot.slane %v1138_v46, 1  ;;  %v1140_v27 = vrot.slane %v1138_v46, 2  ;;  %v1141_v30 = vrot.slane %v1138_v46, 3  ;;  %v4716_v44 = vpop.permute.xlu0 %606 }
 0x245   :  { %v1121_v36 = vsel %vm56_vm1, %v1120_v1, %v1119_v29  ;;  %v1142_v63 = vrot.slane %v1138_v46, 4  ;;  %v1143_v57 = vrot.slane %v1138_v46, 5  ;;  %v1144_v16 = vrot.slane %v1138_v46, 6  ;;  %v1190_v1 = vpop.permute.xlu1 %1189 }
 0x246   :  { %v1123_v11 = vsel %vm59_vm2, %v1122_v59, %v1121_v36  ;;  %v1130_v40 = vrot.slane %v1109_v58, 1  ;;  %v1145_v8 = vrot.slane %v1138_v46, 7  ;;  %v1155_v32 = vmul.f32 %v4642_v9, %v1139_v41 }
 0x247   :  { %v1125_v21 = vsel %vm62_vm3, %v1124_v48, %v1123_v11  ;;  %v1156_v50 = vmul.f32 %v4648_v35, %v1140_v27  ;;  %v1157_v5 = vmul.f32 %v4654_v15, %v1141_v30  ;;  %v1158_v14 = vmul.f32 %v4661_v26, %v1142_v63 }
 0x248   :  { %v1127_v31 = vsel %vm65_vm4, %v1126_v54, %v1125_v21  ;;  %v1154_v29 = vmul.f32 %v4680_v2, %v1138_v46  ;;  %v1159_v58 = vmul.f32 %v4667_v43, %v1143_v57  ;;  %v1160_v48 = vmul.f32 %v4673_v39, %v1144_v16 }
 0x249   :  { %v1129_v59 = vsel %vm68_vm5, %v1128_v24, %v1127_v31  ;;  %v1161_v41 = vmul.f32 %v4689_v4, %v1145_v8  ;;  %v1170_v54 = vrot.slane %v1155_v32, 7  ;;  %v1172_v11 = vrot.slane %v1156_v50, 6 }
 0x24a   :  { %v1131_v36 = vsel %vm71_vm6, %v1130_v40, %v1129_v59  ;;  %v1174_v30 = vrot.slane %v1157_v5, 5  ;;  %v1176_v27 = vrot.slane %v1158_v14, 4  ;;  %v1178_v63 = vrot.slane %v1159_v58, 3  ;;  %v4731_v59 = vpop.permute.xlu0 %617 }
 0x24b   :  { %1132 = vrot.lane.b32.xlu0 %v1131_v36, %s3850_s17  ;;  %v1180_v21 = vrot.slane %v1160_v48, 2  ;;  %v1171_v24 = vsel %vm53_vm0, %v1170_v54, %v1154_v29  ;;  %v1191_v31 = vrot.slane %v1190_v1, 1  ;;  %v1192_v46 = vrot.slane %v1190_v1, 2  ;;  %6132 = vst [vmem:[#allocation35_spill] sm:$0xff] %v4731_v59  ;;  %v1242_v36 = vpop.permute.xlu1 %1241 }
 0x24c   :  { %v1193_v34 = vrot.slane %v1190_v1, 3  ;;  %v1173_v57 = vsel %vm56_vm1, %v1172_v11, %v1171_v24  ;;  %v1194_v16 = vrot.slane %v1190_v1, 4  ;;  %v1195_v47 = vrot.slane %v1190_v1, 5 }
 0x24d   :  { %v1196_v40 = vrot.slane %v1190_v1, 6  ;;  %v1175_v8 = vsel %vm59_vm2, %v1174_v30, %v1173_v57  ;;  %v1182_v32 = vrot.slane %v1161_v41, 1  ;;  %v1197_v50 = vrot.slane %v1190_v1, 7 }
 0x24e   :  { %v1207_v5 = vmul.f32 %v4642_v9, %v1191_v31  ;;  %v1177_v14 = vsel %vm62_vm3, %v1176_v27, %v1175_v8  ;;  %v1208_v29 = vmul.f32 %v4648_v35, %v1192_v46  ;;  %v1209_v58 = vmul.f32 %v4654_v15, %v1193_v34 }
 0x24f   :  { %v1210_v48 = vmul.f32 %v4661_v26, %v1194_v16  ;;  %v1179_v54 = vsel %vm65_vm4, %v1178_v63, %v1177_v14  ;;  %v1206_v11 = vmul.f32 %v4680_v2, %v1190_v1  ;;  %v1211_v24 = vmul.f32 %v4667_v43, %v1195_v47  ;;  %v4748_v43 = vpop.permute.xlu0 %627  ;;  %v4762_v14 = vld [vmem:[%s6058_s0 + $0xa] sm:$0x1] }
 0x250   :  { %v1212_v41 = vmul.f32 %v4673_v39, %v1196_v40  ;;  %v1181_v30 = vsel %vm68_vm5, %v1180_v21, %v1179_v54  ;;  %v1213_v9 = vmul.f32 %v4689_v4, %v1197_v50  ;;  %v1222_v27 = vrot.slane %v1207_v5, 7  ;;  %6133 = vst [vmem:[#allocation36_spill] sm:$0xff] %v4748_v43  ;;  %v4756_v50 = vld [vmem:[%s6058_s0 + $0x6] sm:$0x1]  ;;  %v1294_v54 = vpop.permute.xlu1 %1293 }
 0x251   :  { %v1224_v31 = vrot.slane %v1208_v29, 6  ;;  %v1183_v35 = vsel %vm71_vm6, %v1182_v32, %v1181_v30  ;;  %v1226_v34 = vrot.slane %v1209_v58, 5  ;;  %v1228_v15 = vrot.slane %v1210_v48, 4  ;;  %v4768_v58 = vld [vmem:[%s6058_s0 + $0xe] sm:$0x1] }
 0x252   :  { %v1230_v26 = vrot.slane %v1211_v24, 3  ;;  %1184 = vrot.lane.b32.xlu0 %v1183_v35, %s3850_s17  ;;  %v1223_v63 = vsel %vm53_vm0, %v1222_v27, %v1206_v11  ;;  %v1232_v2 = vrot.slane %v1212_v41, 2  ;;  %v1243_v1 = vrot.slane %v1242_v36, 1  ;;  %v4775_v24 = vld [vmem:[%s6058_s0 + $0x12] sm:$0x1] }
 0x253   :  { %v1244_v47 = vrot.slane %v1242_v36, 2  ;;  %v1225_v39 = vsel %vm56_vm1, %v1224_v31, %v1223_v63  ;;  %v1245_v21 = vrot.slane %v1242_v36, 3  ;;  %v1246_v4 = vrot.slane %v1242_v36, 4  ;;  %v4781_v30 = vld [vmem:[%s6058_s0 + $0x16] sm:$0x1] }
 0x254   :  { %v1247_v46 = vrot.slane %v1242_v36, 5  ;;  %v1227_v57 = vsel %vm59_vm2, %v1226_v34, %v1225_v39  ;;  %v1234_v16 = vrot.slane %v1213_v9, 1  ;;  %v1248_v40 = vrot.slane %v1242_v36, 6  ;;  %v4787_v27 = vld [vmem:[%s6058_s0 + $0x1a] sm:$0x1] }
 0x255   :  { %v1249_v8 = vrot.slane %v1242_v36, 7  ;;  %v1229_v32 = vsel %vm62_vm3, %v1228_v15, %v1227_v57  ;;  %v1259_v5 = vmul.f32 %v4756_v50, %v1243_v1  ;;  %v1260_v29 = vmul.f32 %v4762_v14, %v1244_v47  ;;  %v4794_v34 = vld [vmem:[%s6058_s0 + $0x2] sm:$0x1]  ;;  %v4801_v47 = vld [vmem:[%s6058_s0 + $0x1e] sm:$0x1] }
 0x256   :  { %v1261_v48 = vmul.f32 %v4768_v58, %v1245_v21  ;;  %v1231_v11 = vsel %vm65_vm4, %v1230_v26, %v1229_v32  ;;  %v1262_v41 = vmul.f32 %v4775_v24, %v1246_v4  ;;  %v1263_v9 = vmul.f32 %v4781_v30, %v1247_v46  ;;  %v4804_v4 = vpop.permute.xlu0 %637 }
 0x257   :  { %v1264_v31 = vmul.f32 %v4787_v27, %v1248_v40  ;;  %v1233_v35 = vsel %vm68_vm5, %v1232_v2, %v1231_v11  ;;  %v1258_v15 = vmul.f32 %v4794_v34, %v1242_v36  ;;  %v1274_v26 = vrot.slane %v1259_v5, 7  ;;  %6134 = vst [vmem:[#allocation37_spill] sm:$0xff] %v4804_v4 }
 0x258   :  { %v1276_v63 = vrot.slane %v1260_v29, 6  ;;  %v1235_v1 = vsel %vm71_vm6, %v1234_v16, %v1233_v35  ;;  %v1265_v39 = vmul.f32 %v4801_v47, %v1249_v8  ;;  %v1278_v21 = vrot.slane %v1261_v48, 5 }
 0x259   :  { %v1280_v2 = vrot.slane %v1262_v41, 4  ;;  %1236 = vrot.lane.b32.xlu0 %v1235_v1, %s3850_s17  ;;  %v1275_v46 = vsel %vm53_vm0, %v1274_v26, %v1258_v15  ;;  %v1282_v36 = vrot.slane %v1263_v9, 3  ;;  %v1284_v57 = vrot.slane %v1264_v31, 2 }
 0x25a   :  { %v1295_v40 = vrot.slane %v1294_v54, 1  ;;  %v1277_v16 = vsel %vm56_vm1, %v1276_v63, %v1275_v46  ;;  %v1296_v32 = vrot.slane %v1294_v54, 2  ;;  %v1297_v5 = vrot.slane %v1294_v54, 3  ;;  %v1346_v46 = vpop.permute.xlu1 %1345 }
 0x25b   :  { %v1298_v29 = vrot.slane %v1294_v54, 4  ;;  %v1279_v11 = vsel %vm59_vm2, %v1278_v21, %v1277_v16  ;;  %v1299_v35 = vrot.slane %v1294_v54, 5  ;;  %v1300_v8 = vrot.slane %v1294_v54, 6 }
 0x25c   :  { %v1301_v48 = vrot.slane %v1294_v54, 7  ;;  %v1281_v41 = vsel %vm62_vm3, %v1280_v2, %v1279_v11  ;;  %v1286_v4 = vrot.slane %v1265_v39, 1  ;;  %v1311_v1 = vmul.f32 %v4756_v50, %v1295_v40  ;;  %v4820_v11 = vpop.permute.xlu0 %647 }
 0x25d   :  { %v1312_v15 = vmul.f32 %v4762_v14, %v1296_v32  ;;  %v1283_v9 = vsel %vm65_vm4, %v1282_v36, %v1281_v41  ;;  %v1313_v31 = vmul.f32 %v4768_v58, %v1297_v5  ;;  %v1314_v26 = vmul.f32 %v4775_v24, %v1298_v29 }
 0x25e   :  { %v1315_v63 = vmul.f32 %v4781_v30, %v1299_v35  ;;  %v1285_v21 = vsel %vm68_vm5, %v1284_v57, %v1283_v9  ;;  %v1310_v16 = vmul.f32 %v4794_v34, %v1294_v54  ;;  %v1316_v2 = vmul.f32 %v4787_v27, %v1300_v8 }
 0x25f   :  { %v1326_v39 = vrot.slane %v1311_v1, 7  ;;  %v1287_v40 = vsel %vm71_vm6, %v1286_v4, %v1285_v21  ;;  %v1317_v36 = vmul.f32 %v4801_v47, %v1301_v48  ;;  %v1328_v32 = vrot.slane %v1312_v15, 6 }
 0x260   :  { %v1330_v5 = vrot.slane %v1313_v31, 5  ;;  %1288 = vrot.lane.b32.xlu0 %v1287_v40, %s3850_s17  ;;  %v1332_v35 = vrot.slane %v1314_v26, 4  ;;  %v1334_v41 = vrot.slane %v1315_v63, 3  ;;  %v1336_v57 = vrot.slane %v1316_v2, 2  ;;  %v4828_v48 = vpop.permute.xlu0 %677 }
 0x261   :  { %v1327_v29 = vsel %vm53_vm0, %v1326_v39, %v1310_v16  ;;  %v1347_v9 = vrot.slane %v1346_v46, 1  ;;  %v1348_v8 = vrot.slane %v1346_v46, 2  ;;  %v1349_v1 = vrot.slane %v1346_v46, 3  ;;  %6135 = vst [vmem:[#allocation38_spill] sm:$0xff] %v4828_v48 }
 0x262   :  { %v1329_v54 = vsel %vm56_vm1, %v1328_v32, %v1327_v29  ;;  %v1350_v59 = vrot.slane %v1346_v46, 4  ;;  %v1351_v4 = vrot.slane %v1346_v46, 5  ;;  %v1352_v21 = vrot.slane %v1346_v46, 6  ;;  %v1398_v32 = vpop.permute.xlu1 %1397 }
 0x263   :  { %v1331_v43 = vsel %vm59_vm2, %v1330_v5, %v1329_v54  ;;  %v1338_v31 = vrot.slane %v1317_v36, 1  ;;  %v1353_v40 = vrot.slane %v1346_v46, 7  ;;  %v1363_v26 = vmul.f32 %v4756_v50, %v1347_v9 }
 0x264   :  { %v1333_v15 = vsel %vm62_vm3, %v1332_v35, %v1331_v43  ;;  %v1364_v16 = vmul.f32 %v4762_v14, %v1348_v8  ;;  %v1365_v2 = vmul.f32 %v4768_v58, %v1349_v1  ;;  %v1366_v39 = vmul.f32 %v4775_v24, %v1350_v59 }
 0x265   :  { %v1335_v63 = vsel %vm65_vm4, %v1334_v41, %v1333_v15  ;;  %v1362_v29 = vmul.f32 %v4794_v34, %v1346_v46  ;;  %v1367_v54 = vmul.f32 %v4781_v30, %v1351_v4  ;;  %v1368_v43 = vmul.f32 %v4787_v27, %v1352_v21  ;;  %v4844_v4 = vpop.permute.xlu0 %687 }
 0x266   :  { %v1337_v5 = vsel %vm68_vm5, %v1336_v57, %v1335_v63  ;;  %v1369_v35 = vmul.f32 %v4801_v47, %v1353_v40  ;;  %v1378_v41 = vrot.slane %v1363_v26, 7  ;;  %v1380_v9 = vrot.slane %v1364_v16, 6  ;;  %6136 = vst [vmem:[#allocation39_spill] sm:$0xff] %v4844_v4 }
 0x267   :  { %v1339_v36 = vsel %vm71_vm6, %v1338_v31, %v1337_v5  ;;  %v1382_v8 = vrot.slane %v1365_v2, 5  ;;  %v1384_v1 = vrot.slane %v1366_v39, 4  ;;  %v1386_v59 = vrot.slane %v1367_v54, 3 }
 0x268   :  { %1340 = vrot.lane.b32.xlu0 %v1339_v36, %s3850_s17  ;;  %v1388_v15 = vrot.slane %v1368_v43, 2  ;;  %v1379_v57 = vsel %vm53_vm0, %v1378_v41, %v1362_v29  ;;  %v1399_v63 = vrot.slane %v1398_v32, 1  ;;  %v1400_v46 = vrot.slane %v1398_v32, 2  ;;  %v1450_v41 = vpop.permute.xlu1 %1449 }
 0x269   :  { %v1401_v48 = vrot.slane %v1398_v32, 3  ;;  %v1381_v21 = vsel %vm56_vm1, %v1380_v9, %v1379_v57  ;;  %v1402_v31 = vrot.slane %v1398_v32, 4  ;;  %v1403_v5 = vrot.slane %v1398_v32, 5 }
 0x26a   :  { %v1404_v40 = vrot.slane %v1398_v32, 6  ;;  %v1383_v26 = vsel %vm59_vm2, %v1382_v8, %v1381_v21  ;;  %v1390_v16 = vrot.slane %v1369_v35, 1  ;;  %v1405_v36 = vrot.slane %v1398_v32, 7 }
 0x26b   :  { %v1415_v2 = vmul.f32 %v4756_v50, %v1399_v63  ;;  %v1385_v39 = vsel %vm62_vm3, %v1384_v1, %v1383_v26  ;;  %v1416_v29 = vmul.f32 %v4762_v14, %v1400_v46  ;;  %v1417_v54 = vmul.f32 %v4768_v58, %v1401_v48  ;;  %v4860_v46 = vpop.permute.xlu0 %697 }
 0x26c   :  { %v1418_v43 = vmul.f32 %v4775_v24, %v1402_v31  ;;  %v1387_v9 = vsel %vm65_vm4, %v1386_v59, %v1385_v39  ;;  %v1414_v57 = vmul.f32 %v4794_v34, %v1398_v32  ;;  %v1419_v4 = vmul.f32 %v4781_v30, %v1403_v5 }
 0x26d   :  { %v1420_v35 = vmul.f32 %v4787_v27, %v1404_v40  ;;  %v1389_v8 = vsel %vm68_vm5, %v1388_v15, %v1387_v9  ;;  %v1421_v50 = vmul.f32 %v4801_v47, %v1405_v36  ;;  %v1430_v1 = vrot.slane %v1415_v2, 7  ;;  %v4876_v2 = vld [vmem:[%s6058_s0 + $0xb] sm:$0x1]  ;;  %v4889_v9 = vld [vmem:[%s6058_s0 + $0x13] sm:$0x1] }
 0x26e   :  { %v1432_v63 = vrot.slane %v1416_v29, 6  ;;  %v1391_v14 = vsel %vm71_vm6, %v1390_v16, %v1389_v8  ;;  %v1434_v58 = vrot.slane %v1417_v54, 5  ;;  %v1436_v48 = vrot.slane %v1418_v43, 4  ;;  %v4870_v16 = vld [vmem:[%s6058_s0 + $0x7] sm:$0x1] }
 0x26f   :  { %v1438_v24 = vrot.slane %v1419_v4, 3  ;;  %1392 = vrot.lane.b32.xlu0 %v1391_v14, %s3850_s17  ;;  %v1431_v34 = vsel %vm53_vm0, %v1430_v1, %v1414_v57  ;;  %v1440_v30 = vrot.slane %v1420_v35, 2  ;;  %v1451_v32 = vrot.slane %v1450_v41, 1  ;;  %v4882_v29 = vld [vmem:[%s6058_s0 + $0xf] sm:$0x1] }
 0x270   :  { %v1452_v27 = vrot.slane %v1450_v41, 2  ;;  %v1433_v59 = vsel %vm56_vm1, %v1432_v63, %v1431_v34  ;;  %v1453_v15 = vrot.slane %v1450_v41, 3  ;;  %v1454_v47 = vrot.slane %v1450_v41, 4  ;;  %v4895_v35 = vld [vmem:[%s6058_s0 + $0x17] sm:$0x1]  ;;  %v4911_v34 = vpop.permute.xlu0 %708 }
 0x271   :  { %v1455_v21 = vrot.slane %v1450_v41, 5  ;;  %v1435_v31 = vsel %vm59_vm2, %v1434_v58, %v1433_v59  ;;  %v1442_v5 = vrot.slane %v1421_v50, 1  ;;  %v1456_v40 = vrot.slane %v1450_v41, 6  ;;  %v4901_v50 = vld [vmem:[%s6058_s0 + $0x1b] sm:$0x1]  ;;  %6137 = vst [vmem:[#allocation40_spill] sm:$0xff] %v4911_v34 }
 0x272   :  { %v1457_v26 = vrot.slane %v1450_v41, 7  ;;  %v1437_v4 = vsel %vm62_vm3, %v1436_v48, %v1435_v31  ;;  %v1467_v36 = vmul.f32 %v4870_v16, %v1451_v32  ;;  %v1468_v39 = vmul.f32 %v4876_v2, %v1452_v27  ;;  %v4908_v14 = vld [vmem:[%s6058_s0 + $0x3] sm:$0x1]  ;;  %v1502_v32 = vpop.permute.xlu1 %1501 }
 0x273   :  { %v1469_v54 = vmul.f32 %v4882_v29, %v1453_v15  ;;  %v1439_v43 = vsel %vm65_vm4, %v1438_v24, %v1437_v4  ;;  %v1470_v57 = vmul.f32 %v4889_v9, %v1454_v47  ;;  %v1471_v8 = vmul.f32 %v4895_v35, %v1455_v21 }
 0x274   :  { %v1472_v1 = vmul.f32 %v4901_v50, %v1456_v40  ;;  %v1441_v63 = vsel %vm68_vm5, %v1440_v30, %v1439_v43  ;;  %v1466_v58 = vmul.f32 %v4908_v14, %v1450_v41  ;;  %v1482_v48 = vrot.slane %v1467_v36, 7  ;;  %v4918_v30 = vld [vmem:[%s6058_s0 + $0x1f] sm:$0x1] }
 0x275   :  { %v1484_v24 = vrot.slane %v1468_v39, 6  ;;  %v1443_v27 = vsel %vm71_vm6, %v1442_v5, %v1441_v63  ;;  %v1473_v59 = vmul.f32 %v4918_v30, %v1457_v26  ;;  %v1486_v47 = vrot.slane %v1469_v54, 5 }
 0x276   :  { %1444 = vrot.lane.b32.xlu0 %v1443_v27, %s3850_s17  ;;  %v1483_v15 = vsel %vm53_vm0, %v1482_v48, %v1466_v58  ;;  %v1488_v21 = vrot.slane %v1470_v57, 4  ;;  %v1490_v31 = vrot.slane %v1471_v8, 3  ;;  %v1492_v40 = vrot.slane %v1472_v1, 2  ;;  %v4927_v48 = vpop.permute.xlu0 %718  ;;  %v1554_v57 = vpop.permute.xlu1 %1553 }
 0x277   :  { %v1485_v41 = vsel %vm56_vm1, %v1484_v24, %v1483_v15  ;;  %v1503_v5 = vrot.slane %v1502_v32, 1  ;;  %v1504_v36 = vrot.slane %v1502_v32, 2  ;;  %v1505_v39 = vrot.slane %v1502_v32, 3  ;;  %6138 = vst [vmem:[#allocation41_spill] sm:$0xff] %v4927_v48 }
 0x278   :  { %v1487_v4 = vsel %vm59_vm2, %v1486_v47, %v1485_v41  ;;  %v1506_v63 = vrot.slane %v1502_v32, 4  ;;  %v1507_v27 = vrot.slane %v1502_v32, 5  ;;  %v1508_v34 = vrot.slane %v1502_v32, 6 }
 0x279   :  { %v1489_v43 = vsel %vm62_vm3, %v1488_v21, %v1487_v4  ;;  %v1494_v42 = vrot.slane %v1473_v59, 1  ;;  %v1509_v58 = vrot.slane %v1502_v32, 7  ;;  %v1519_v54 = vmul.f32 %v4870_v16, %v1503_v5 }
 0x27a   :  { %v1491_v26 = vsel %vm65_vm4, %v1490_v31, %v1489_v43  ;;  %v1520_v1 = vmul.f32 %v4876_v2, %v1504_v36  ;;  %v1521_v24 = vmul.f32 %v4882_v29, %v1505_v39  ;;  %v1522_v15 = vmul.f32 %v4889_v9, %v1506_v63 }
 0x27b   :  { %v1493_v8 = vsel %vm68_vm5, %v1492_v40, %v1491_v26  ;;  %v1518_v41 = vmul.f32 %v4908_v14, %v1502_v32  ;;  %v1523_v59 = vmul.f32 %v4895_v35, %v1507_v27  ;;  %v1524_v21 = vmul.f32 %v4901_v50, %v1508_v34 }
 0x27c   :  { %v1495_v47 = vsel %vm71_vm6, %v1494_v42, %v1493_v8  ;;  %v1525_v31 = vmul.f32 %v4918_v30, %v1509_v58  ;;  %v1534_v4 = vrot.slane %v1519_v54, 7  ;;  %v1536_v40 = vrot.slane %v1520_v1, 6 }
 0x27d   :  { %1496 = vrot.lane.b32.xlu0 %v1495_v47, %s3850_s17  ;;  %v1538_v5 = vrot.slane %v1521_v24, 5  ;;  %v1540_v36 = vrot.slane %v1522_v15, 4  ;;  %v1542_v43 = vrot.slane %v1523_v59, 3  ;;  %v1544_v39 = vrot.slane %v1524_v21, 2  ;;  %v4941_v47 = vpop.permute.xlu0 %728 }
 0x27e   :  { %v1555_v26 = vrot.slane %v1554_v57, 1  ;;  %v1535_v63 = vsel %vm53_vm0, %v1534_v4, %v1518_v41  ;;  %v1556_v42 = vrot.slane %v1554_v57, 2  ;;  %v1557_v8 = vrot.slane %v1554_v57, 3  ;;  %6139 = vst [vmem:[#allocation42_spill] sm:$0xff] %v4941_v47  ;;  %v1606_v4 = vpop.permute.xlu1 %1605 }
 0x27f   :  { %v1558_v32 = vrot.slane %v1554_v57, 4  ;;  %v1537_v27 = vsel %vm56_vm1, %v1536_v40, %v1535_v63  ;;  %v1559_v48 = vrot.slane %v1554_v57, 5  ;;  %v1560_v34 = vrot.slane %v1554_v57, 6 }
 0x280   :  { %v1561_v55 = vrot.slane %v1554_v57, 7  ;;  %v1539_v58 = vsel %vm59_vm2, %v1538_v5, %v1537_v27  ;;  %v1546_v54 = vrot.slane %v1525_v31, 1  ;;  %v1571_v1 = vmul.f32 %v4870_v16, %v1555_v26 }
 0x281   :  { %v1572_v24 = vmul.f32 %v4876_v2, %v1556_v42  ;;  %v1541_v15 = vsel %vm62_vm3, %v1540_v36, %v1539_v58  ;;  %v1573_v41 = vmul.f32 %v4882_v29, %v1557_v8  ;;  %v1574_v59 = vmul.f32 %v4889_v9, %v1558_v32 }
 0x282   :  { %v1575_v21 = vmul.f32 %v4895_v35, %v1559_v48  ;;  %v1543_v40 = vsel %vm65_vm4, %v1542_v43, %v1541_v15  ;;  %v1570_v63 = vmul.f32 %v4908_v14, %v1554_v57  ;;  %v1576_v5 = vmul.f32 %v4901_v50, %v1560_v34 }
 0x283   :  { %v1586_v31 = vrot.slane %v1571_v1, 7  ;;  %v1545_v26 = vsel %vm68_vm5, %v1544_v39, %v1543_v40  ;;  %v1577_v42 = vmul.f32 %v4918_v30, %v1561_v55  ;;  %v1588_v27 = vrot.slane %v1572_v24, 6  ;;  %v4959_v1 = vpop.permute.xlu0 %738 }
 0x284   :  { %v1590_v36 = vrot.slane %v1573_v41, 5  ;;  %v1547_v8 = vsel %vm71_vm6, %v1546_v54, %v1545_v26  ;;  %v1592_v58 = vrot.slane %v1574_v59, 4  ;;  %v1594_v48 = vrot.slane %v1575_v21, 3 }
 0x285   :  { %v1587_v32 = vsel %vm53_vm0, %v1586_v31, %v1570_v63  ;;  %1548 = vrot.lane.b32.xlu0 %v1547_v8, %s3850_s17  ;;  %v1596_v57 = vrot.slane %v1576_v5, 2  ;;  %v1607_v15 = vrot.slane %v1606_v4, 1  ;;  %v1608_v34 = vrot.slane %v1606_v4, 2 }
 0x286   :  { %v1589_v43 = vsel %vm56_vm1, %v1588_v27, %v1587_v32  ;;  %v1609_v55 = vrot.slane %v1606_v4, 3  ;;  %v1610_v24 = vrot.slane %v1606_v4, 4  ;;  %v1611_v41 = vrot.slane %v1606_v4, 5 }
 0x287   :  { %v1591_v39 = vsel %vm59_vm2, %v1590_v36, %v1589_v43  ;;  %v1598_v40 = vrot.slane %v1577_v42, 1  ;;  %v1612_v63 = vrot.slane %v1606_v4, 6  ;;  %v1613_v59 = vrot.slane %v1606_v4, 7 }
 0x288   :  { %v1593_v54 = vsel %vm62_vm3, %v1592_v58, %v1591_v39  ;;  %v1623_v31 = vmul.f32 %v4870_v16, %v1607_v15  ;;  %v1624_v5 = vmul.f32 %v4876_v2, %v1608_v34  ;;  %v1625_v26 = vmul.f32 %v4882_v29, %v1609_v55 }
 0x289   :  { %v1595_v21 = vsel %vm65_vm4, %v1594_v48, %v1593_v54  ;;  %v1622_v36 = vmul.f32 %v4908_v14, %v1606_v4  ;;  %v1626_v8 = vmul.f32 %v4889_v9, %v1610_v24  ;;  %v1627_v42 = vmul.f32 %v4895_v35, %v1611_v41  ;;  %v4974_v48 = vpop.permute.xlu0 %749  ;;  %v4990_v41 = vld [vmem:[%s6059_s1] sm:$0xff] }
 0x28a   :  { %v1597_v27 = vsel %vm68_vm5, %v1596_v57, %v1595_v21  ;;  %v1638_v58 = vrot.slane %v1623_v31, 7  ;;  %v1640_v43 = vrot.slane %v1624_v5, 6  ;;  %v1628_v16 = vmul.f32 %v4901_v50, %v1612_v63  ;;  %6140 = vst [vmem:[#allocation43_spill] sm:$0xff] %v4974_v48 }
 0x28b   :  { %v1599_v32 = vsel %vm71_vm6, %v1598_v40, %v1597_v27  ;;  %v1629_v2 = vmul.f32 %v4918_v30, %v1613_v59  ;;  %v1642_v57 = vrot.slane %v1625_v26, 5  ;;  %v1644_v9 = vrot.slane %v1626_v8, 4 }
 0x28c   :  { %1600 = vrot.lane.b32.xlu0 %v1599_v32, %s3850_s17  ;;  %v1639_v29 = vsel %vm53_vm0, %v1638_v58, %v1622_v36  ;;  %v1646_v15 = vrot.slane %v1627_v42, 3  ;;  %v1648_v34 = vrot.slane %v1628_v16, 2  ;;  %v3932_v40 = vmov 41  }
 0x28d   :  { %v1641_v14 = vsel %vm56_vm1, %v1640_v43, %v1639_v29  ;;  %v1650_v55 = vrot.slane %v1629_v2, 1  ;;  %v4983_v24 = vpop.permute.xlu0 %759  ;;  %3660 = vset.pattern.permute.xlu1 %v3932_v40  ;;  %v6094_v40 = vmov 14   ;;  %vm3397_vm1 = vcmask 1043456  }
 0x28e   :  { %v1643_v4 = vsel %vm59_vm2, %v1642_v57, %v1641_v14  ;;  %6141 = vst [vmem:[#allocation44_spill] sm:$0xff] %v4983_v24 }
 0x28f   :  { %v1645_v35 = vsel %vm62_vm3, %v1644_v9, %v1643_v4 }
 0x290   :  { %v1647_v39 = vsel %vm65_vm4, %v1646_v15, %v1645_v35  ;;  %v5035_v15 = vpop.permute.xlu1 %1662 }
 0x291   :  { %v1649_v50 = vsel %vm68_vm5, %v1648_v34, %v1647_v39  ;;  %v4993_v54 = vpop.permute.xlu0 %769  ;;  %v1665_v34 = vmul.f32 %v5035_v15, %v4340_v7 }
 0x292   :  { %v1651_v30 = vsel %vm71_vm6, %v1650_v55, %v1649_v50  ;;  %6142 = vst [vmem:[#allocation45_spill] sm:$0xff] %v4993_v54  ;;  %v3934_v50 = vmov 77  }
 0x293   :  { %1652 = vrot.lane.b32.xlu0 %v1651_v30, %s3850_s17  ;;  %s3933_s17 = smov 54   ;;  %v3935_v30 = vmov 113  }
 0x295   :  { %v4995_v63 = vpop.permute.xlu0 %779 }
 0x297   :  { %1667 = vperm.xlu0 %3659, %v4990_v41  }
 0x299   :  { %v4997_v59 = vpop.permute.xlu0 %790 }
 0x29a   :  { %6143 = vst [vmem:[#allocation46_spill] sm:$0xff] %v4997_v59  ;;  %v5272_v59 = vmul.f32 %v4396_v51, %v4236_v60 }
 0x29d   :  { %v4999_v21 = vpop.permute.xlu0 %800 }
 0x29e   :  { %6144 = vst [vmem:[#allocation47_spill] sm:$0xff] %v4999_v21 }
 0x2a1   :  { %v5001_v31 = vpop.permute.xlu0 %810 }
 0x2a2   :  { %6145 = vst [vmem:[#allocation48_spill] sm:$0xff] %v5001_v31  ;;  %v5255_v31 = vmul.f32 %v4236_v60, %v4340_v7 }
 0x2a4   :  { %v115_v54 = vmul.f32 %v4259_v10, %v5255_v31 }
 0x2a5   :  { %v5003_v5 = vpop.permute.xlu0 %820 }
 0x2a9   :  { %v5005_v26 = vpop.permute.xlu0 %872 }
 0x2aa   :  { %6146 = vst [vmem:[#allocation49_spill] sm:$0xff] %v5005_v26 }
 0x2ad   :  { %v5007_v27 = vpop.permute.xlu0 %924 }
 0x2ae   :  { %6147 = vst [vmem:[#allocation50_spill] sm:$0xff] %v5007_v27 }
 0x2b1   :  { %v5009_v36 = vpop.permute.xlu0 %976 }
 0x2b2   :  { %6148 = vst [vmem:[#allocation51_spill] sm:$0xff] %v5009_v36  ;;  %v3974_v36 = vmov 53  }
 0x2b5   :  { %v5011_v8 = vpop.permute.xlu0 %1028 }
 0x2b9   :  { %v5013_v32 = vpop.permute.xlu0 %1080 }
 0x2ba   :  { %6149 = vst [vmem:[#allocation52_spill] sm:$0xff] %v5013_v32 }
 0x2bd   :  { %v5015_v42 = vpop.permute.xlu0 %1132 }
 0x2be   :  { %6150 = vst [vmem:[#allocation53_spill] sm:$0xff] %v5015_v42 }
 0x2c4   :  { %v5017_v58 = vpop.permute.xlu0 %1184 }
 0x2c5   :  { %6151 = vst [vmem:[#allocation54_spill] sm:$0xff] %v5017_v58 }
 0x2cb   :  { %v5019_v43 = vpop.permute.xlu0 %1236 }
 0x2d2   :  { %v5021_v16 = vpop.permute.xlu0 %1288 }
 0x2d3   :  { %6152 = vst [vmem:[#allocation55_spill] sm:$0xff] %v5021_v16  ;;  %v3973_v16 = vmov 17  }
 0x2da   :  { %v5023_v2 = vpop.permute.xlu0 %1340 }
 0x2db   :  { %6153 = vst [vmem:[#allocation56_spill] sm:$0xff] %v5023_v2 }
 0x2e1   :  { %v5025_v29 = vpop.permute.xlu0 %1392 }
 0x2e2   :  { %6154 = vst [vmem:[#allocation57_spill] sm:$0xff] %v5025_v29 }
 0x2e8   :  { %v5027_v57 = vpop.permute.xlu0 %1444 }
 0x2ef   :  { %v5029_v14 = vpop.permute.xlu0 %1496 }
 0x2f0   :  { %6155 = vst [vmem:[#allocation58_spill] sm:$0xff] %v5029_v14 }
 0x2f7   :  { %v5031_v9 = vpop.permute.xlu0 %1548 }
 0x2f8   :  { %6156 = vst [vmem:[#allocation59_spill] sm:$0xff] %v5031_v9 }
 0x2fe   :  { %v5033_v4 = vpop.permute.xlu0 %1600 }
 0x2ff   :  { %6157 = vst [vmem:[#allocation60_spill] sm:$0xff] %v5033_v4  ;;  %v3937_v4 = vmov 50  }
 0x305   :  { %v5037_v35 = vpop.permute.xlu0 %1652 }
 0x316   :  { %v1668_v39 = vpop.permute.xlu0 %1667 }
 0x317   :  { %v1670_v55 = vmul.f32 %v1668_v39, %v1665_v34  ;;  %v3938_v39 = vmov 86  }
 0x319   :  { %1672 = vrot.lane.b32.xlu1 %v1670_v55, %s3933_s17  ;;  %v3939_v55 = vmov 122  }
 0x31d   :  { %1677 = vperm.xlu1 %3660, %v4990_v41  }
 0x321   :  { %3661 = vset.pattern.permute.xlu1 %v3934_v50  ;;  %v3940_v50 = vmov 23  }
 0x322   :  { %1687 = vperm.xlu1 %3661, %v4990_v41  }
 0x326   :  { %3662 = vset.pattern.permute.xlu1 %v3935_v30  ;;  %v3941_v30 = vmov 59  }
 0x327   :  { %1697 = vperm.xlu1 %3662, %v4990_v41  }
 0x32b   :  { %3663 = vset.pattern.permute.xlu1 %v6094_v40  ;;  %v3942_v40 = vmov 95  }
 0x32c   :  { %1708 = vperm.xlu1 %3663, %v4990_v41  }
 0x330   :  { %3664 = vset.pattern.permute.xlu1 %v3937_v4  ;;  %v6158_v4 = vmov 3  }
 0x331   :  { %1718 = vperm.xlu1 %3664, %v4990_v41  }
 0x335   :  { %3665 = vset.pattern.permute.xlu1 %v3938_v39  ;;  %v5057_v39 = vld [vmem:[%s6059_s1 + $0x8] sm:$0xff] }
 0x336   :  { %1728 = vperm.xlu1 %3665, %v4990_v41  }
 0x33a   :  { %3666 = vset.pattern.permute.xlu1 %v3939_v55  ;;  %v3943_v55 = vmov 32  }
 0x33b   :  { %1738 = vperm.xlu1 %3666, %v4990_v41  }
 0x33f   :  { %3667 = vset.pattern.permute.xlu1 %v3940_v50  ;;  %v3944_v50 = vmov 68  }
 0x340   :  { %1749 = vperm.xlu1 %3667, %v4990_v41  }
 0x344   :  { %3668 = vset.pattern.permute.xlu1 %v3941_v30  ;;  %v6159_v30 = vmov 12  }
 0x345   :  { %1759 = vperm.xlu1 %3668, %v4990_v41  }
 0x349   :  { %3669 = vset.pattern.permute.xlu1 %v3942_v40  ;;  %v3945_v40 = vmov 104  }
 0x34a   :  { %1769 = vperm.xlu1 %3669, %v4990_v41  }
 0x34e   :  { %3670 = vset.pattern.permute.xlu1 %v6158_v4  ;;  %v3431_v4 = vld [vmem:[%s6060_s2 + $0x6] ss:$0 sm:$0xff] }
 0x34f   :  { %1779 = vperm.xlu1 %3670, %v5057_v39  }
 0x353   :  { %3671 = vset.pattern.permute.xlu1 %v3943_v55  ;;  %v6096_v55 = vmov 6  }
 0x354   :  { %1790 = vperm.xlu1 %3671, %v4990_v41   ;;  %3675 = vset.pattern.permute.xlu0 %v6096_v55 }
 0x358   :  { %3672 = vset.pattern.permute.xlu1 %v3944_v50 }
 0x359   :  { %1800 = vperm.xlu1 %3672, %v4990_v41  }
 0x35d   :  { %3673 = vset.pattern.permute.xlu1 %v3945_v40 }
 0x35e   :  { %1810 = vperm.xlu1 %3673, %v4990_v41  }
 0x362   :  { %3674 = vset.pattern.permute.xlu1 %v6159_v30 }
 0x363   :  { %1820 = vperm.xlu1 %3674, %v5057_v39  }
 0x367   :  { %1835 = vrot.lane.b32.xlu1 %v3431_v4, %s3946_s24  ;;  %v1706_v4 = vmul.f32 %v5035_v15, %v4363_v38 }
 0x38b   :  { %v5069_v50 = vpop.permute.xlu1 %1672 }
 0x38c   :  { %6160 = vst [vmem:[#allocation61_spill] sm:$0xff] %v5069_v50 }
 0x39c   :  { %v1678_v9 = vpop.permute.xlu1 %1677 }
 0x39d   :  { %v1680_v29 = vmul.f32 %v1678_v9, %v1665_v34 }
 0x39f   :  { %1682 = vrot.lane.b32.xlu0 %v1680_v29, %s3933_s17 }
 0x3a1   :  { %v1688_v40 = vpop.permute.xlu1 %1687 }
 0x3a2   :  { %v1690_v2 = vmul.f32 %v1688_v40, %v1665_v34 }
 0x3a4   :  { %1692 = vrot.lane.b32.xlu0 %v1690_v2, %s3933_s17 }
 0x3a6   :  { %v1698_v30 = vpop.permute.xlu1 %1697 }
 0x3a7   :  { %v1700_v14 = vmul.f32 %v1698_v30, %v1665_v34 }
 0x3a9   :  { %1702 = vrot.lane.b32.xlu0 %v1700_v14, %s3933_s17  ;;  %v1747_v14 = vmul.f32 %v5035_v15, %v4379_v37 }
 0x3ab   :  { %v1709_v58 = vpop.permute.xlu1 %1708 }
 0x3ac   :  { %v1711_v42 = vmul.f32 %v1709_v58, %v1706_v4 }
 0x3ae   :  { %1713 = vrot.lane.b32.xlu0 %v1711_v42, %s3933_s17 }
 0x3b0   :  { %v1719_v55 = vpop.permute.xlu1 %1718 }
 0x3b1   :  { %v1721_v50 = vmul.f32 %v1719_v55, %v1706_v4 }
 0x3b3   :  { %1723 = vrot.lane.b32.xlu0 %v1721_v50, %s3933_s17 }
 0x3b5   :  { %v1729_v29 = vpop.permute.xlu1 %1728 }
 0x3b6   :  { %v1731_v9 = vmul.f32 %v1729_v29, %v1706_v4 }
 0x3b8   :  { %1733 = vrot.lane.b32.xlu0 %v1731_v9, %s3933_s17 }
 0x3ba   :  { %v1739_v2 = vpop.permute.xlu1 %1738 }
 0x3bb   :  { %v1741_v40 = vmul.f32 %v1739_v2, %v1706_v4  ;;  %v1788_v4 = vmul.f32 %v5035_v15, %v4396_v51 }
 0x3bd   :  { %1743 = vrot.lane.b32.xlu0 %v1741_v40, %s3933_s17 }
 0x3bf   :  { %v1750_v34 = vpop.permute.xlu1 %1749 }
 0x3c0   :  { %v1752_v30 = vmul.f32 %v1750_v34, %v1747_v14 }
 0x3c2   :  { %1754 = vrot.lane.b32.xlu0 %v1752_v30, %s3933_s17 }
 0x3c4   :  { %v1760_v42 = vpop.permute.xlu1 %1759 }
 0x3c5   :  { %v1762_v58 = vmul.f32 %v1760_v42, %v1747_v14 }
 0x3c7   :  { %1764 = vrot.lane.b32.xlu0 %v1762_v58, %s3933_s17 }
 0x3c9   :  { %v1770_v55 = vpop.permute.xlu1 %1769 }
 0x3ca   :  { %v1772_v50 = vmul.f32 %v1770_v55, %v1747_v14 }
 0x3cc   :  { %1774 = vrot.lane.b32.xlu0 %v1772_v50, %s3933_s17 }
 0x3ce   :  { %v1780_v29 = vpop.permute.xlu1 %1779 }
 0x3cf   :  { %v1782_v9 = vmul.f32 %v1780_v29, %v1747_v14  ;;  %v3948_v14 = vmov 42  }
 0x3d0   :  { %3676 = vset.pattern.permute.xlu1 %v3948_v14 }
 0x3d1   :  { %1784 = vrot.lane.b32.xlu0 %v1782_v9, %s3933_s17 }
 0x3d3   :  { %v1791_v2 = vpop.permute.xlu1 %1790 }
 0x3d4   :  { %v1793_v40 = vmul.f32 %v1791_v2, %v1788_v4 }
 0x3d6   :  { %1795 = vrot.lane.b32.xlu0 %v1793_v40, %s3933_s17 }
 0x3d8   :  { %v1801_v34 = vpop.permute.xlu1 %1800 }
 0x3d9   :  { %v1803_v30 = vmul.f32 %v1801_v34, %v1788_v4 }
 0x3db   :  { %1805 = vrot.lane.b32.xlu0 %v1803_v30, %s3933_s17 }
 0x3dd   :  { %v1811_v42 = vpop.permute.xlu1 %1810 }
 0x3de   :  { %v1813_v58 = vmul.f32 %v1811_v42, %v1788_v4 }
 0x3e0   :  { %1815 = vrot.lane.b32.xlu0 %v1813_v58, %s3933_s17 }
 0x3e2   :  { %v1821_v55 = vpop.permute.xlu1 %1820 }
 0x3e3   :  { %v1823_v50 = vmul.f32 %v1821_v55, %v1788_v4 }
 0x3e5   :  { %1825 = vrot.lane.b32.xlu0 %v1823_v50, %s3933_s17 }
 0x3e9   :  { %1840 = vperm.xlu0 %3675, %v4990_v41  }
 0x411   :  { %v5093_v15 = vpop.permute.xlu0 %1682 }
 0x412   :  { %6161 = vst [vmem:[#allocation62_spill] sm:$0xff] %v5093_v15  ;;  %v5121_v15 = vpop.permute.xlu1 %1835 }
 0x416   :  { %v5095_v29 = vpop.permute.xlu0 %1692 }
 0x417   :  { %6162 = vst [vmem:[#allocation63_spill] sm:$0xff] %v5095_v29 }
 0x41b   :  { %v5097_v9 = vpop.permute.xlu0 %1702 }
 0x420   :  { %v5099_v2 = vpop.permute.xlu0 %1713 }
 0x421   :  { %6163 = vst [vmem:[#allocation64_spill] sm:$0xff] %v5099_v2 }
 0x425   :  { %v5101_v40 = vpop.permute.xlu0 %1723 }
 0x426   :  { %6164 = vst [vmem:[#allocation65_spill] sm:$0xff] %v5101_v40 }
 0x42a   :  { %v5103_v34 = vpop.permute.xlu0 %1733 }
 0x42b   :  { %6165 = vst [vmem:[#allocation66_spill] sm:$0xff] %v5103_v34  ;;  %v5127_v34 = vmul.f32 %v5121_v15, %v4340_v7 }
 0x42f   :  { %v5105_v30 = vpop.permute.xlu0 %1743 }
 0x434   :  { %v5107_v4 = vpop.permute.xlu0 %1754 }
 0x435   :  { %6166 = vst [vmem:[#allocation67_spill] sm:$0xff] %v5107_v4 }
 0x439   :  { %v5109_v42 = vpop.permute.xlu0 %1764 }
 0x43a   :  { %6167 = vst [vmem:[#allocation68_spill] sm:$0xff] %v5109_v42 }
 0x43e   :  { %v5111_v58 = vpop.permute.xlu0 %1774 }
 0x43f   :  { %6168 = vst [vmem:[#allocation69_spill] sm:$0xff] %v5111_v58  ;;  %v3950_v58 = vmov 78  }
 0x443   :  { %v5113_v55 = vpop.permute.xlu0 %1784 }
 0x448   :  { %v5115_v50 = vpop.permute.xlu0 %1795 }
 0x449   :  { %6169 = vst [vmem:[#allocation70_spill] sm:$0xff] %v5115_v50  ;;  %v3953_v50 = vmov 51  }
 0x44d   :  { %v5117_v14 = vpop.permute.xlu0 %1805 }
 0x44e   :  { %6170 = vst [vmem:[#allocation71_spill] sm:$0xff] %v5117_v14  ;;  %v6098_v14 = vmov 15  }
 0x452   :  { %v5119_v29 = vpop.permute.xlu0 %1815 }
 0x453   :  { %6171 = vst [vmem:[#allocation72_spill] sm:$0xff] %v5119_v29  ;;  %v3951_v29 = vmov 114  }
 0x457   :  { %v5123_v40 = vpop.permute.xlu0 %1825 }
 0x468   :  { %v1841_v4 = vpop.permute.xlu0 %1840 }
 0x469   :  { %v1843_v42 = vmul.f32 %v1841_v4, %v5127_v34  ;;  %v3954_v4 = vmov 87  }
 0x46b   :  { %1845 = vrot.lane.b32.xlu1 %v1843_v42, %s3949_s25  ;;  %v3955_v42 = vmov 123  }
 0x46f   :  { %1850 = vperm.xlu1 %3676, %v4990_v41  }
 0x473   :  { %3677 = vset.pattern.permute.xlu1 %v3950_v58  ;;  %v3957_v58 = vmov 60  }
 0x474   :  { %1860 = vperm.xlu1 %3677, %v4990_v41  }
 0x478   :  { %3678 = vset.pattern.permute.xlu1 %v3951_v29  ;;  %v3956_v29 = vmov 24  }
 0x479   :  { %1870 = vperm.xlu1 %3678, %v4990_v41  }
 0x47d   :  { %3679 = vset.pattern.permute.xlu1 %v6098_v14  ;;  %v3958_v14 = vmov 96  }
 0x47e   :  { %1881 = vperm.xlu1 %3679, %v4990_v41  }
 0x482   :  { %3680 = vset.pattern.permute.xlu1 %v3953_v50  ;;  %v6172_v50 = vmov 4  }
 0x483   :  { %1891 = vperm.xlu1 %3680, %v4990_v41  }
 0x487   :  { %3681 = vset.pattern.permute.xlu1 %v3954_v4  ;;  %v3959_v4 = vmov 33  }
 0x488   :  { %1901 = vperm.xlu1 %3681, %v4990_v41  }
 0x48c   :  { %3682 = vset.pattern.permute.xlu1 %v3955_v42  ;;  %v3960_v42 = vmov 69  }
 0x48d   :  { %1911 = vperm.xlu1 %3682, %v4990_v41   ;;  %3688 = vset.pattern.permute.xlu0 %v3960_v42  ;;  %v3965_v42 = vmov 52  }
 0x491   :  { %3683 = vset.pattern.permute.xlu1 %v3956_v29  ;;  %v3961_v29 = vmov 105  }
 0x492   :  { %1922 = vperm.xlu1 %3683, %v4990_v41  }
 0x496   :  { %3684 = vset.pattern.permute.xlu1 %v3957_v58  ;;  %v6173_v58 = vmov 13  }
 0x497   :  { %1932 = vperm.xlu1 %3684, %v4990_v41  }
 0x49b   :  { %3685 = vset.pattern.permute.xlu1 %v3958_v14  ;;  %v3962_v14 = vmov 43  }
 0x49c   :  { %1942 = vperm.xlu1 %3685, %v4990_v41  }
 0x4a0   :  { %3686 = vset.pattern.permute.xlu1 %v6172_v50  ;;  %v3963_v50 = vmov 79  }
 0x4a1   :  { %1952 = vperm.xlu1 %3686, %v5057_v39  }
 0x4a5   :  { %3687 = vset.pattern.permute.xlu1 %v3959_v4  ;;  %v3964_v4 = vmov 16  }
 0x4a6   :  { %1963 = vperm.xlu1 %3687, %v4990_v41  }
 0x4aa   :  { %3690 = vset.pattern.permute.xlu1 %v3961_v29  ;;  %v3966_v29 = vmov 124  }
 0x4ab   :  { %1983 = vperm.xlu1 %3690, %v4990_v41  }
 0x4af   :  { %3691 = vset.pattern.permute.xlu1 %v6173_v58  ;;  %v3967_v58 = vmov 25  }
 0x4b0   :  { %1993 = vperm.xlu1 %3691, %v5057_v39  }
 0x4b4   :  { %3692 = vset.pattern.permute.xlu1 %v3962_v14  ;;  %v3968_v14 = vmov 97  }
 0x4b5   :  { %2023 = vperm.xlu1 %3692, %v4990_v41  }
 0x4b9   :  { %3693 = vset.pattern.permute.xlu1 %v3963_v50  ;;  %v6174_v50 = vmov 5  }
 0x4ba   :  { %2033 = vperm.xlu1 %3693, %v4990_v41  }
 0x4be   :  { %3695 = vset.pattern.permute.xlu1 %v3964_v4  ;;  %v3969_v4 = vmov 34  }
 0x4bf   :  { %2054 = vperm.xlu1 %3695, %v4990_v41  }
 0x4c3   :  { %3696 = vset.pattern.permute.xlu1 %v3965_v42  ;;  %v3970_v42 = vmov 106  }
 0x4c4   :  { %2064 = vperm.xlu1 %3696, %v4990_v41  }
 0x4c8   :  { %3698 = vset.pattern.permute.xlu1 %v3966_v29  ;;  %v6175_v29 = vmov 14  }
 0x4c9   :  { %2084 = vperm.xlu1 %3698, %v4990_v41  }
 0x4cd   :  { %3699 = vset.pattern.permute.xlu1 %v3967_v58 }
 0x4ce   :  { %2095 = vperm.xlu1 %3699, %v4990_v41  }
 0x4d2   :  { %3701 = vset.pattern.permute.xlu1 %v3968_v14  ;;  %v3971_v14 = vmov 44  }
 0x4d3   :  { %2115 = vperm.xlu1 %3701, %v4990_v41  }
 0x4d7   :  { %3702 = vset.pattern.permute.xlu1 %v6174_v50 }
 0x4d8   :  { %2125 = vperm.xlu1 %3702, %v5057_v39  }
 0x4dc   :  { %3703 = vset.pattern.permute.xlu1 %v3969_v4  ;;  %v3972_v4 = vmov 80  }
 0x4dd   :  { %2136 = vperm.xlu1 %3703, %v4990_v41   ;;  %v5161_v58 = vpop.permute.xlu1 %1845 }
 0x4de   :  { %6176 = vst [vmem:[#allocation73_spill] sm:$0xff] %v5161_v58 }
 0x4e1   :  { %3705 = vset.pattern.permute.xlu1 %v3970_v42 }
 0x4e2   :  { %2156 = vperm.xlu1 %3705, %v4990_v41  }
 0x4e6   :  { %3706 = vset.pattern.permute.xlu1 %v6175_v29 }
 0x4e7   :  { %2166 = vperm.xlu1 %3706, %v5057_v39  }
 0x4eb   :  { %3708 = vset.pattern.permute.xlu1 %v3971_v14 }
 0x4ec   :  { %2196 = vperm.xlu1 %3708, %v4990_v41  }
 0x4ee   :  { %v1851_v50 = vpop.permute.xlu1 %1850 }
 0x4ef   :  { %v1853_v2 = vmul.f32 %v1851_v50, %v5127_v34 }
 0x4f0   :  { %3709 = vset.pattern.permute.xlu1 %v3972_v4 }
 0x4f1   :  { %1855 = vrot.lane.b32.xlu0 %v1853_v2, %s3949_s25  ;;  %2206 = vperm.xlu1 %3709, %v4990_v41   ;;  %v1879_v2 = vmul.f32 %v5121_v15, %v4363_v38 }
 0x4f3   :  { %v1861_v42 = vpop.permute.xlu1 %1860 }
 0x4f4   :  { %v1863_v29 = vmul.f32 %v1861_v42, %v5127_v34  ;;  %v3975_v42 = vmov 125  }
 0x4f5   :  { %3711 = vset.pattern.permute.xlu1 %v3973_v16 }
 0x4f6   :  { %1865 = vrot.lane.b32.xlu0 %v1863_v29, %s3949_s25  ;;  %2227 = vperm.xlu1 %3711, %v4990_v41  }
 0x4f8   :  { %v1871_v14 = vpop.permute.xlu1 %1870 }
 0x4f9   :  { %v1873_v58 = vmul.f32 %v1871_v14, %v5127_v34  ;;  %v3976_v34 = vmov 26   ;;  %v3977_v14 = vmov 98  }
 0x4fa   :  { %3712 = vset.pattern.permute.xlu1 %v3974_v36 }
 0x4fb   :  { %1875 = vrot.lane.b32.xlu0 %v1873_v58, %s3949_s25  ;;  %2237 = vperm.xlu1 %3712, %v4990_v41  }
 0x4fd   :  { %v1882_v50 = vpop.permute.xlu1 %1881 }
 0x4fe   :  { %v1884_v4 = vmul.f32 %v1882_v50, %v1879_v2 }
 0x4ff   :  { %3714 = vset.pattern.permute.xlu1 %v3975_v42  ;;  %v6177_v42 = vmov 6  }
 0x500   :  { %1886 = vrot.lane.b32.xlu0 %v1884_v4, %s3949_s25  ;;  %2257 = vperm.xlu1 %3714, %v4990_v41  }
 0x502   :  { %v1892_v16 = vpop.permute.xlu1 %1891 }
 0x503   :  { %v1894_v29 = vmul.f32 %v1892_v16, %v1879_v2  ;;  %v1920_v16 = vmul.f32 %v5121_v15, %v4379_v37 }
 0x504   :  { %3715 = vset.pattern.permute.xlu1 %v3976_v34 }
 0x505   :  { %1896 = vrot.lane.b32.xlu0 %v1894_v29, %s3949_s25  ;;  %2268 = vperm.xlu1 %3715, %v4990_v41  }
 0x507   :  { %v1902_v36 = vpop.permute.xlu1 %1901 }
 0x508   :  { %v1904_v58 = vmul.f32 %v1902_v36, %v1879_v2  ;;  %v3978_v36 = vmov 35  }
 0x509   :  { %3717 = vset.pattern.permute.xlu1 %v3977_v14 }
 0x50a   :  { %1906 = vrot.lane.b32.xlu0 %v1904_v58, %s3949_s25  ;;  %2288 = vperm.xlu1 %3717, %v4990_v41  }
 0x50c   :  { %v1912_v50 = vpop.permute.xlu1 %1911 }
 0x50d   :  { %v1914_v4 = vmul.f32 %v1912_v50, %v1879_v2  ;;  %v3979_v2 = vmov 107  }
 0x50e   :  { %3718 = vset.pattern.permute.xlu1 %v6177_v42  ;;  %v6178_v42 = vmov 15  }
 0x50f   :  { %1916 = vrot.lane.b32.xlu0 %v1914_v4, %s3949_s25  ;;  %2298 = vperm.xlu1 %3718, %v5057_v39  }
 0x511   :  { %v1923_v29 = vpop.permute.xlu1 %1922 }
 0x512   :  { %v1925_v34 = vmul.f32 %v1923_v29, %v1920_v16 }
 0x513   :  { %3719 = vset.pattern.permute.xlu1 %v3978_v36  ;;  %v6179_v36 = vmov 0  }
 0x514   :  { %1927 = vrot.lane.b32.xlu0 %v1925_v34, %s3949_s25  ;;  %2309 = vperm.xlu1 %3719, %v4990_v41  }
 0x516   :  { %v1933_v58 = vpop.permute.xlu1 %1932 }
 0x517   :  { %v1935_v14 = vmul.f32 %v1933_v58, %v1920_v16  ;;  %v6100_v58 = vmov 7  }
 0x518   :  { %3721 = vset.pattern.permute.xlu1 %v3979_v2  ;;  %v3982_v2 = vmov 88  }
 0x519   :  { %1937 = vrot.lane.b32.xlu0 %v1935_v14, %s3949_s25  ;;  %2329 = vperm.xlu1 %3721, %v4990_v41   ;;  %v3981_v14 = vmov 115  }
 0x51b   :  { %v1943_v50 = vpop.permute.xlu1 %1942 }
 0x51c   :  { %v1945_v4 = vmul.f32 %v1943_v50, %v1920_v16  ;;  %v3432_v50 = vld [vmem:[%s6060_s2 + $0x7] ss:$0 sm:$0xff] }
 0x51d   :  { %3722 = vset.pattern.permute.xlu1 %v6178_v42 }
 0x51e   :  { %1947 = vrot.lane.b32.xlu0 %v1945_v4, %s3949_s25  ;;  %2339 = vperm.xlu1 %3722, %v5057_v39   ;;  %v6180_v4 = vmov 8  }
 0x520   :  { %v1953_v29 = vpop.permute.xlu1 %1952 }
 0x521   :  { %v1955_v34 = vmul.f32 %v1953_v29, %v1920_v16  ;;  %v3983_v16 = vmov 61   ;;  %v3986_v29 = vmov 116  }
 0x522   :  { %3724 = vset.pattern.permute.xlu1 %v6179_v36 }
 0x523   :  { %1957 = vrot.lane.b32.xlu0 %v1955_v34, %s3949_s25  ;;  %v3987_v34 = vmov 89  }
 0x527   :  { %1973 = vperm.xlu0 %3688, %v4990_v41  }
 0x52b   :  { %3689 = vset.pattern.permute.xlu0 %v6100_v58 }
 0x52c   :  { %300 = vperm.xlu0 %3689, %v5057_v39   ;;  %v3985_v39 = vmov 70  }
 0x530   :  { %2013 = vperm.xlu0 %3689, %v4990_v41  }
 0x534   :  { %3694 = vset.pattern.permute.xlu0 %v3981_v14  ;;  %v3988_v14 = vmov 62  }
 0x535   :  { %2043 = vperm.xlu0 %3694, %v4990_v41  }
 0x539   :  { %3697 = vset.pattern.permute.xlu0 %v3982_v2  ;;  %v3433_v2 = vld [vmem:[%s6060_s2 + $0x8] ss:$0 sm:$0xff]  ;;  %s3991_s2 = smov 47  }
 0x53a   :  { %2074 = vperm.xlu0 %3697, %v4990_v41  }
 0x53e   :  { %3700 = vset.pattern.permute.xlu0 %v3983_v16  ;;  %v1964_v16 = vpop.permute.xlu1 %1963 }
 0x53f   :  { %2105 = vperm.xlu0 %3700, %v4990_v41  }
 0x543   :  { %2008 = vrot.lane.b32.xlu0 %v3432_v50, %s3984_s28  ;;  %v3990_v50 = vmov 71  }
 0x544   :  { %3704 = vset.pattern.permute.xlu0 %v3985_v39  ;;  %v1961_v39 = vmul.f32 %v5121_v15, %v4396_v51 }
 0x547   :  { %2146 = vperm.xlu0 %3704, %v4990_v41  }
 0x54b   :  { %3707 = vset.pattern.permute.xlu0 %v6180_v4 }
 0x54c   :  { %2186 = vperm.xlu0 %3707, %v4990_v41  }
 0x550   :  { %3710 = vset.pattern.permute.xlu0 %v3986_v29  ;;  %v1966_v29 = vmul.f32 %v1964_v16, %v1961_v39 }
 0x551   :  { %2216 = vperm.xlu0 %3710, %v4990_v41  }
 0x555   :  { %3713 = vset.pattern.permute.xlu0 %v3987_v34  ;;  %v1984_v34 = vpop.permute.xlu1 %1983 }
 0x556   :  { %2247 = vperm.xlu0 %3713, %v4990_v41   ;;  %v1986_v58 = vmul.f32 %v1984_v34, %v1961_v39 }
 0x559   :  { %v1994_v15 = vpop.permute.xlu1 %1993 }
 0x55a   :  { %3716 = vset.pattern.permute.xlu0 %v3988_v14  ;;  %v1996_v20 = vmul.f32 %v1994_v15, %v1961_v39 }
 0x55b   :  { %2278 = vperm.xlu0 %3716, %v4990_v41  }
 0x55f   :  { %2181 = vrot.lane.b32.xlu0 %v3433_v2, %s3989_s11 }
 0x560   :  { %3720 = vset.pattern.permute.xlu0 %v3990_v50 }
 0x563   :  { %2319 = vperm.xlu0 %3720, %v4990_v41   ;;  %v5218_v14 = vpop.permute.xlu0 %1855  ;;  %v2024_v41 = vpop.permute.xlu1 %2023 }
 0x564   :  { %6181 = vst [vmem:[#allocation74_spill] sm:$0xff] %v5218_v14 }
 0x567   :  { %1968 = vrot.lane.b32.xlu0 %v1966_v29, %s3949_s25  ;;  %v2034_v14 = vpop.permute.xlu1 %2033 }
 0x568   :  { %3723 = vset.pattern.permute.xlu0 %v6179_v36  ;;  %v5223_v2 = vpop.permute.xlu0 %1865 }
 0x569   :  { %6182 = vst [vmem:[#allocation75_spill] sm:$0xff] %v5223_v2 }
 0x56b   :  { %1988 = vrot.lane.b32.xlu0 %v1986_v58, %s3949_s25  ;;  %v5235_v29 = vpop.permute.xlu1 %2054 }
 0x56d   :  { %v5225_v42 = vpop.permute.xlu0 %1875 }
 0x56f   :  { %v2065_v58 = vpop.permute.xlu1 %2064 }
 0x572   :  { %v5227_v50 = vpop.permute.xlu0 %1886 }
 0x573   :  { %6183 = vst [vmem:[#allocation76_spill] sm:$0xff] %v5227_v50  ;;  %v5241_v2 = vpop.permute.xlu1 %2084 }
 0x577   :  { %v5229_v4 = vpop.permute.xlu0 %1896  ;;  %v5245_v50 = vpop.permute.xlu1 %2095 }
 0x578   :  { %6184 = vst [vmem:[#allocation77_spill] sm:$0xff] %v5229_v4  ;;  %v5249_v4 = vmul.f32 %v4363_v38, %v4236_v60 }
 0x57c   :  { %v5231_v16 = vpop.permute.xlu0 %1906 }
 0x57d   :  { %6185 = vst [vmem:[#allocation78_spill] sm:$0xff] %v5231_v16 }
 0x581   :  { %v5233_v27 = vpop.permute.xlu0 %1916 }
 0x586   :  { %v5237_v34 = vpop.permute.xlu0 %1927 }
 0x587   :  { %6186 = vst [vmem:[#allocation79_spill] sm:$0xff] %v5237_v34  ;;  %v5259_v34 = vmul.f32 %v4379_v37, %v4236_v60 }
 0x589   :  { %v239_v24 = vmul.f32 %v4326_v56, %v5259_v34 }
 0x58b   :  { %v5239_v36 = vpop.permute.xlu0 %1937 }
 0x58c   :  { %6187 = vst [vmem:[#allocation80_spill] sm:$0xff] %v5239_v36  ;;  %v5261_v36 = vpop.permute.xlu1 %2115 }
 0x590   :  { %v5243_v32 = vpop.permute.xlu0 %1947  ;;  %v5274_v47 = vpop.permute.xlu1 %2125 }
 0x591   :  { %6188 = vst [vmem:[#allocation81_spill] sm:$0xff] %v5243_v32  ;;  %v177_v32 = vmul.f32 %v4313_v49, %v5249_v4 }
 0x593   :  { %v178_v48 = vadd.f32 %v177_v32, %v115_v54 }
 0x594   :  { %v5279_v18 = vpop.permute.xlu1 %2136 }
 0x595   :  { %v5251_v16 = vpop.permute.xlu0 %1957  ;;  %v240_v23 = vadd.f32 %v239_v24, %v178_v48 }
 0x598   :  { %v5284_v32 = vpop.permute.xlu1 %2156 }
 0x59c   :  { %v5289_v24 = vpop.permute.xlu1 %2166 }
 0x5a0   :  { %v5294_v15 = vpop.permute.xlu1 %2196 }
 0x5a6   :  { %v1974_v21 = vpop.permute.xlu0 %1973 }
 0x5a7   :  { %v1976_v26 = vmul.f32 %v1974_v21, %v1961_v39 }
 0x5a9   :  { %1978 = vrot.lane.b32.xlu1 %v1976_v26, %s3949_s25 }
 0x5ab   :  { %v301_v25 = vpop.permute.xlu0 %300 }
 0x5ac   :  { %v303_v49 = vmul.f32 %v301_v25, %v5272_v59 }
 0x5ad   :  { %1998 = vrot.lane.b32.xlu1 %v1996_v20, %s3949_s25 }
 0x5ae   :  { %v304_v10 = vadd.f32 %v303_v49, %v240_v23 }
 0x5af   :  { %v2014_v21 = vpop.permute.xlu0 %2013 }
 0x5b0   :  { %v354_v56 = vadd.f32 %v4476_v52, %v304_v10 }
 0x5b2   :  { %v395_v26 = vadd.f32 %v4489_v3, %v354_v56 }
 0x5b4   :  { %v436_v60 = vadd.f32 %v4502_v28, %v395_v26  ;;  %v2044_v6 = vpop.permute.xlu0 %2043 }
 0x5b6   :  { %v477_v54 = vadd.f32 %v4516_v22, %v436_v60 }
 0x5b8   :  { %v527_v48 = vadd.f32 %v4527_v19, %v477_v54 }
 0x5b9   :  { %v2075_v25 = vpop.permute.xlu0 %2074 }
 0x5ba   :  { %v568_v20 = vadd.f32 %v4616_v33, %v527_v48 }
 0x5bc   :  { %v609_v23 = vadd.f32 %v4716_v44, %v568_v20  ;;  %v2207_v44 = vpop.permute.xlu1 %2206 }
 0x5be   :  { %v650_v52 = vadd.f32 %v4820_v11, %v609_v23  ;;  %v2106_v39 = vpop.permute.xlu0 %2105 }
 0x5c0   :  { %v700_v3 = vadd.f32 %v4860_v46, %v650_v52  ;;  %v2228_v48 = vpop.permute.xlu1 %2227 }
 0x5c2   :  { %v741_v28 = vadd.f32 %v4959_v1, %v700_v3  ;;  %v2009_v22 = vpop.permute.xlu0 %2008 }
 0x5c3   :  { %v2011_v49 = vmul.f32 %v2009_v22, %v4340_v7  ;;  %v2052_v11 = vmul.f32 %v2009_v22, %v4363_v38 }
 0x5c4   :  { %v782_v19 = vadd.f32 %v4995_v63, %v741_v28 }
 0x5c5   :  { %v2016_v10 = vmul.f32 %v2014_v21, %v2011_v49  ;;  %v2026_v33 = vmul.f32 %v2024_v41, %v2011_v49  ;;  %v2046_v46 = vmul.f32 %v2044_v6, %v2011_v49  ;;  %v2036_v1 = vmul.f32 %v2034_v14, %v2011_v49 }
 0x5c6   :  { %v2147_v56 = vpop.permute.xlu0 %2146  ;;  %v823_v26 = vadd.f32 %v5003_v5, %v782_v19  ;;  %v2057_v21 = vmul.f32 %v5235_v29, %v2052_v11  ;;  %v2067_v60 = vmul.f32 %v2065_v58, %v2052_v11  ;;  %v2093_v14 = vmul.f32 %v2009_v22, %v4379_v37  ;;  %v2238_v29 = vpop.permute.xlu1 %2237 }
 0x5c7   :  { %2018 = vrot.lane.b32.xlu0 %v2016_v10, %s3991_s2  ;;  %2028 = vrot.lane.b32.xlu1 %v2026_v33, %s3991_s2  ;;  %v2077_v20 = vmul.f32 %v2075_v25, %v2052_v11  ;;  %v2087_v23 = vmul.f32 %v5241_v2, %v2052_v11 }
 0x5c8   :  { %v1031_v41 = vadd.f32 %v5011_v8, %v823_v26  ;;  %v2108_v52 = vmul.f32 %v2106_v39, %v2093_v14  ;;  %v2098_v3 = vmul.f32 %v5245_v50, %v2093_v14  ;;  %v2128_v25 = vmul.f32 %v5274_v47, %v2093_v14 }
 0x5ca   :  { %v1239_v54 = vadd.f32 %v5019_v43, %v1031_v41  ;;  %v2258_v49 = vpop.permute.xlu1 %2257 }
 0x5cb   :  { %2048 = vrot.lane.b32.xlu1 %v2046_v46, %s3991_s2  ;;  %2038 = vrot.lane.b32.xlu0 %v2036_v1, %s3991_s2  ;;  %v2187_v63 = vpop.permute.xlu0 %2186 }
 0x5cc   :  { %v1447_v6 = vadd.f32 %v5027_v57, %v1239_v54 }
 0x5ce   :  { %v1655_v8 = vadd.f32 %v5037_v35, %v1447_v6  ;;  %v2118_v35 = vmul.f32 %v5261_v36, %v2093_v14  ;;  %v2269_v47 = vpop.permute.xlu1 %2268 }
 0x5cf   :  { %2059 = vrot.lane.b32.xlu0 %v2057_v21, %s3991_s2  ;;  %2069 = vrot.lane.b32.xlu1 %v2067_v60, %s3991_s2 }
 0x5d0   :  { %v2217_v5 = vpop.permute.xlu0 %2216  ;;  %v1705_v43 = vadd.f32 %v5097_v9, %v1655_v8  ;;  %v2134_v9 = vmul.f32 %v2009_v22, %v4396_v51  ;;  %v221_v8 = vmul.f32 %v4321_v53, %v5259_v34  ;;  %v227_v53 = vmul.f32 %v4270_v17, %v5259_v34 }
 0x5d2   :  { %v1746_v57 = vadd.f32 %v5105_v30, %v1705_v43  ;;  %v2149_v50 = vmul.f32 %v2147_v56, %v2134_v9  ;;  %v2139_v36 = vmul.f32 %v5279_v18, %v2134_v9  ;;  %v2169_v10 = vmul.f32 %v5289_v24, %v2134_v9 }
 0x5d3   :  { %2079 = vrot.lane.b32.xlu0 %v2077_v20, %s3991_s2  ;;  %2089 = vrot.lane.b32.xlu1 %v2087_v23, %s3991_s2  ;;  %v159_v20 = vmul.f32 %v4308_v45, %v5249_v4  ;;  %v97_v23 = vmul.f32 %v4246_v0, %v5255_v31  ;;  %v165_v43 = vmul.f32 %v4263_v12, %v5249_v4  ;;  %v6189_v12 = vld [vmem:[#allocation9_spill] sm:$0xff] }
 0x5d4   :  { %v1787_v2 = vadd.f32 %v5113_v55, %v1746_v57  ;;  %v103_v0 = vmul.f32 %v4238_v62, %v5255_v31  ;;  %v6193_v62 = vld [vmem:[#allocation13_spill] sm:$0xff] }
 0x5d5   :  { %v2248_v58 = vpop.permute.xlu0 %2247 }
 0x5d6   :  { %v1828_v28 = vadd.f32 %v5123_v40, %v1787_v2  ;;  %v109_v2 = vmul.f32 %v6189_v12, %v5255_v31  ;;  %v6212_v12 = vld [vmem:[#allocation35_spill] sm:$0xff] }
 0x5d7   :  { %2110 = vrot.lane.b32.xlu1 %v2108_v52, %s3991_s2  ;;  %2100 = vrot.lane.b32.xlu0 %v2098_v3, %s3991_s2  ;;  %v171_v52 = vmul.f32 %v4265_v13, %v5249_v4  ;;  %v6191_v13 = vld [vmem:[#allocation11_spill] sm:$0xff] }
 0x5d8   :  { %v1878_v30 = vadd.f32 %v5225_v42, %v1828_v28  ;;  %v2159_v42 = vmul.f32 %v5284_v32, %v2134_v9  ;;  %v289_v4 = vmul.f32 %v6191_v13, %v5272_v59  ;;  %v6215_v13 = vld [vmem:[#allocation26_spill] sm:$0xff] }
 0x5d9   :  { %v172_v9 = vadd.f32 %v171_v52, %v109_v2  ;;  %v6210_v52 = vld [vmem:[#allocation30_spill] sm:$0xff] }
 0x5da   :  { %v2279_v39 = vpop.permute.xlu0 %2278  ;;  %v1919_v19 = vadd.f32 %v5233_v27, %v1878_v30  ;;  %v2289_v27 = vpop.permute.xlu1 %2288 }
 0x5db   :  { %2120 = vrot.lane.b32.xlu0 %v2118_v35, %s3991_s2  ;;  %2130 = vrot.lane.b32.xlu1 %v2128_v25, %s3991_s2  ;;  %v6190_v35 = vld [vmem:[#allocation10_spill] sm:$0xff]  ;;  %v166_v25 = vadd.f32 %v165_v43, %v103_v0 }
 0x5dc   :  { %v5333_v40 = vadd.f32 %v5251_v16, %v1919_v19 }
 0x5de   :  { %v2182_v55 = vpop.permute.xlu0 %2181  ;;  %v2299_v32 = vpop.permute.xlu1 %2298 }
 0x5df   :  { %2151 = vrot.lane.b32.xlu1 %v2149_v50, %s3991_s2  ;;  %2141 = vrot.lane.b32.xlu0 %v2139_v36, %s3991_s2  ;;  %v2184_v22 = vmul.f32 %v2182_v55, %v4340_v7  ;;  %v2225_v16 = vmul.f32 %v2182_v55, %v4363_v38  ;;  %v2307_v21 = vmul.f32 %v2182_v55, %v4396_v51  ;;  %v2367_v51 = vld [vmem:[%s6061_s3] sm:$0xf]  ;;  %s3993_s3 = smov 73  }
 0x5e0   :  { %v228_v50 = vadd.f32 %v227_v53, %v166_v25  ;;  %v6214_v25 = vld [vmem:[#allocation34_spill] sm:$0xff] }
 0x5e1   :  { %v2199_v18 = vmul.f32 %v5294_v15, %v2184_v22  ;;  %v2189_v33 = vmul.f32 %v2187_v63, %v2184_v22  ;;  %v2219_v7 = vmul.f32 %v2217_v5, %v2184_v22  ;;  %v2209_v56 = vmul.f32 %v2207_v44, %v2184_v22  ;;  %v6195_v22 = vld [vmem:[#allocation14_spill] sm:$0xff] }
 0x5e2   :  { %v2240_v24 = vmul.f32 %v2238_v29, %v2225_v16  ;;  %v2230_v11 = vmul.f32 %v2228_v48, %v2225_v16  ;;  %v2266_v15 = vmul.f32 %v2182_v55, %v4379_v37  ;;  %v2260_v46 = vmul.f32 %v2258_v49, %v2225_v16  ;;  %v2310_v1 = vpop.permute.xlu1 %2309  ;;  %v2320_v60 = vpop.permute.xlu0 %2319  ;;  %v6192_v49 = vld [vmem:[#allocation12_spill] sm:$0xff] }
 0x5e3   :  { %2171 = vrot.lane.b32.xlu1 %v2169_v10, %s3991_s2  ;;  %2161 = vrot.lane.b32.xlu0 %v2159_v42, %s3991_s2  ;;  %v2250_v26 = vmul.f32 %v2248_v58, %v2225_v16  ;;  %v2322_v37 = vmul.f32 %v2320_v60, %v2307_v21  ;;  %v2312_v6 = vmul.f32 %v2310_v1, %v2307_v21  ;;  %v6196_v42 = vld [vmem:[#allocation15_spill] sm:$0xff] }
 0x5e4   :  { %v2281_v38 = vmul.f32 %v2279_v39, %v2266_v15  ;;  %v2271_v44 = vmul.f32 %v2269_v47, %v2266_v15  ;;  %v2301_v41 = vmul.f32 %v2299_v32, %v2266_v15  ;;  %v2291_v54 = vmul.f32 %v2289_v27, %v2266_v15  ;;  %v6197_v27 = vld [vmem:[#allocation19_spill] sm:$0xff]  ;;  %v6199_v32 = vld [vmem:[#allocation18_spill] sm:$0xff] }
 0x5e5   :  { %v160_v29 = vadd.f32 %v159_v20, %v97_v23  ;;  %v283_v58 = vmul.f32 %v4331_v61, %v5272_v59  ;;  %v233_v61 = vmul.f32 %v6190_v35, %v5259_v34  ;;  %v295_v39 = vmul.f32 %v6192_v49, %v5272_v59  ;;  %v6194_v34 = vld [vmem:[#allocation16_spill] sm:$0xff]  ;;  %v6204_v60 = vld [vmem:[#allocation23_spill] sm:$0xff]  ;;  %v6213_v35 = vld [vmem:[#allocation33_spill] sm:$0xff] }
 0x5e6   :  { %v2330_v63 = vpop.permute.xlu1 %2329  ;;  %v5375_v3 = vpop.permute.xlu0 %1968  ;;  %v290_v31 = vadd.f32 %v289_v4, %v228_v50  ;;  %v6208_v20 = vld [vmem:[#allocation28_spill] sm:$0xff] }
 0x5e7   :  { %2201 = vrot.lane.b32.xlu1 %v2199_v18, %s3992_s12  ;;  %2191 = vrot.lane.b32.xlu0 %v2189_v33, %s3992_s12  ;;  %v2332_v14 = vmul.f32 %v2330_v63, %v2307_v21  ;;  %v222_v45 = vadd.f32 %v221_v8, %v160_v29  ;;  %v234_v19 = vadd.f32 %v233_v61, %v172_v9  ;;  %v6209_v8 = vld [vmem:[#allocation32_spill] sm:$0xff] }
 0x5e8   :  { %v334_v10 = vadd.f32 %v6195_v22, %v290_v31 }
 0x5e9   :  { %v284_v28 = vadd.f32 %v283_v58, %v222_v45  ;;  %v296_v36 = vadd.f32 %v295_v39, %v234_v19  ;;  %v6211_v45 = vld [vmem:[#allocation31_spill] sm:$0xff]  ;;  %v6216_v39 = vld [vmem:[#allocation36_spill] sm:$0xff] }
 0x5ea   :  { %v2340_v48 = vpop.permute.xlu1 %2339  ;;  %v5392_v17 = vpop.permute.xlu0 %1988  ;;  %v6218_v19 = vld [vmem:[#allocation40_spill] sm:$0xff] }
 0x5eb   :  { %2221 = vrot.lane.b32.xlu1 %v2219_v7, %s3992_s12  ;;  %2211 = vrot.lane.b32.xlu0 %v2209_v56, %s3992_s12  ;;  %v2342_v5 = vmul.f32 %v2340_v48, %v2307_v21  ;;  %v324_v30 = vadd.f32 %v6193_v62, %v284_v28  ;;  %v344_v18 = vadd.f32 %v6196_v42, %v296_v36  ;;  %v6198_v7 = vld [vmem:[#allocation17_spill] sm:$0xff]  ;;  %v6219_v36 = vld [vmem:[#allocation38_spill] sm:$0xff] }
 0x5ec   :  { %v375_v56 = vadd.f32 %v6198_v7, %v334_v10  ;;  %v6221_v10 = vld [vmem:[#allocation43_spill] sm:$0xff] }
 0x5ed   :  { %v365_v47 = vadd.f32 %v6194_v34, %v324_v30  ;;  %v6217_v30 = vld [vmem:[#allocation37_spill] sm:$0xff] }
 0x5ef   :  { %2242 = vrot.lane.b32.xlu1 %v2240_v24, %s3992_s12  ;;  %2232 = vrot.lane.b32.xlu0 %v2230_v11, %s3992_s12  ;;  %v406_v33 = vadd.f32 %v6197_v27, %v365_v47  ;;  %v385_v24 = vadd.f32 %v6199_v32, %v344_v18  ;;  %v6200_v11 = vld [vmem:[#allocation22_spill] sm:$0xff]  ;;  %v6220_v47 = vld [vmem:[#allocation39_spill] sm:$0xff] }
 0x5f1   :  { %v447_v15 = vadd.f32 %v6200_v11, %v406_v33  ;;  %v6222_v33 = vld [vmem:[#allocation41_spill] sm:$0xff] }
 0x5f3   :  { %2262 = vrot.lane.b32.xlu1 %v2260_v46, %s3992_s12  ;;  %2252 = vrot.lane.b32.xlu0 %v2250_v26, %s3992_s12  ;;  %v6201_v46 = vld [vmem:[#allocation20_spill] sm:$0xff]  ;;  %v6202_v26 = vld [vmem:[#allocation21_spill] sm:$0xff] }
 0x5f4   :  { %v416_v1 = vadd.f32 %v6201_v46, %v375_v56  ;;  %v6223_v56 = vld [vmem:[#allocation42_spill] sm:$0xff] }
 0x5f7   :  { %2283 = vrot.lane.b32.xlu1 %v2281_v38, %s3992_s12  ;;  %2273 = vrot.lane.b32.xlu0 %v2271_v44, %s3992_s12  ;;  %v426_v38 = vadd.f32 %v6202_v26, %v385_v24  ;;  %v6203_v44 = vld [vmem:[#allocation24_spill] sm:$0xff]  ;;  %v6224_v24 = vld [vmem:[#allocation46_spill] sm:$0xff] }
 0x5f8   :  { %v497_v63 = vadd.f32 %v6203_v44, %v447_v15  ;;  %v6225_v15 = vld [vmem:[#allocation44_spill] sm:$0xff] }
 0x5fb   :  { %2303 = vrot.lane.b32.xlu1 %v2301_v41, %s3992_s12  ;;  %2293 = vrot.lane.b32.xlu0 %v2291_v54, %s3992_s12  ;;  %v457_v54 = vadd.f32 %v6204_v60, %v416_v1  ;;  %v6226_v1 = vld [vmem:[#allocation45_spill] sm:$0xff] }
 0x5ff   :  { %2324 = vrot.lane.b32.xlu1 %v2322_v37, %s3992_s12  ;;  %2314 = vrot.lane.b32.xlu0 %v2312_v6, %s3992_s12  ;;  %v6205_v37 = vld [vmem:[#allocation25_spill] sm:$0xff] }
 0x600   :  { %v467_v48 = vadd.f32 %v6205_v37, %v426_v38  ;;  %v6206_v6 = vld [vmem:[#allocation29_spill] sm:$0xff] }
 0x601   :  { %v6227_v38 = vld [vmem:[#allocation49_spill] sm:$0xff] }
 0x602   :  { %v517_v23 = vadd.f32 %v6208_v20, %v467_v48  ;;  %v6229_v48 = vld [vmem:[#allocation48_spill] sm:$0xff] }
 0x603   :  { %2344 = vrot.lane.b32.xlu1 %v2342_v5, %s3992_s12  ;;  %2334 = vrot.lane.b32.xlu0 %v2332_v14, %s3992_s12  ;;  %v538_v5 = vadd.f32 %v6206_v6, %v497_v63  ;;  %v6207_v14 = vld [vmem:[#allocation27_spill] sm:$0xff] }
 0x604   :  { %v558_v53 = vadd.f32 %v6211_v45, %v517_v23  ;;  %v6232_v23 = vld [vmem:[#allocation51_spill] sm:$0xff] }
 0x605   :  { %v579_v43 = vadd.f32 %v6209_v8, %v538_v5  ;;  %v6230_v5 = vld [vmem:[#allocation52_spill] sm:$0xff] }
 0x606   :  { %v599_v28 = vadd.f32 %v6214_v25, %v558_v53  ;;  %v6234_v53 = vld [vmem:[#allocation53_spill] sm:$0xff] }
 0x607   :  { %2370 = vperm.xlu0 %3723, %v2367_v51   ;;  %v507_v51 = vadd.f32 %v6207_v14, %v457_v54  ;;  %v620_v2 = vadd.f32 %v6212_v12, %v579_v43  ;;  %v6228_v54 = vld [vmem:[#allocation47_spill] sm:$0xff] }
 0x608   :  { %v640_v50 = vadd.f32 %v6217_v30, %v599_v28  ;;  %v6233_v43 = vld [vmem:[#allocation55_spill] sm:$0xff]  ;;  %v6237_v28 = vld [vmem:[#allocation56_spill] sm:$0xff] }
 0x609   :  { %v548_v0 = vadd.f32 %v6210_v52, %v507_v51  ;;  %v670_v4 = vadd.f32 %v6215_v13, %v620_v2  ;;  %v6231_v51 = vld [vmem:[#allocation50_spill] sm:$0xff] }
 0x60a   :  { %v690_v22 = vadd.f32 %v6220_v47, %v640_v50  ;;  %v6235_v2 = vld [vmem:[#allocation54_spill] sm:$0xff] }
 0x60b   :  { %v589_v61 = vadd.f32 %v6213_v35, %v548_v0  ;;  %v711_v31 = vadd.f32 %v6218_v19, %v670_v4  ;;  %v6238_v4 = vld [vmem:[#allocation57_spill] sm:$0xff] }
 0x60c   :  { %v731_v32 = vadd.f32 %v6223_v56, %v690_v22  ;;  %v6242_v22 = vld [vmem:[#allocation64_spill] sm:$0xff] }
 0x60d   :  { %v630_v62 = vadd.f32 %v6216_v39, %v589_v61  ;;  %v752_v42 = vadd.f32 %v6221_v10, %v711_v31  ;;  %v6236_v61 = vld [vmem:[#allocation58_spill] sm:$0xff]  ;;  %v6240_v31 = vld [vmem:[#allocation59_spill] sm:$0xff] }
 0x60e   :  { %v772_v26 = vadd.f32 %v6226_v1, %v731_v32  ;;  %v6245_v32 = vld [vmem:[#allocation67_spill] sm:$0xff] }
 0x60f   :  { %v680_v34 = vadd.f32 %v6219_v36, %v630_v62  ;;  %v793_v11 = vadd.f32 %v6224_v24, %v752_v42  ;;  %v6239_v62 = vld [vmem:[#allocation61_spill] sm:$0xff]  ;;  %v6243_v42 = vld [vmem:[#allocation62_spill] sm:$0xff] }
 0x610   :  { %v813_v6 = vadd.f32 %v6229_v48, %v772_v26  ;;  %v6247_v26 = vld [vmem:[#allocation66_spill] sm:$0xff] }
 0x611   :  { %v721_v7 = vadd.f32 %v6222_v33, %v680_v34  ;;  %v875_v44 = vadd.f32 %v6227_v38, %v793_v11  ;;  %v6241_v34 = vld [vmem:[#allocation60_spill] sm:$0xff] }
 0x612   :  { %v979_v8 = vadd.f32 %v6232_v23, %v813_v6  ;;  %v6250_v6 = vld [vmem:[#allocation69_spill] sm:$0xff] }
 0x613   :  { %v762_v46 = vadd.f32 %v6225_v15, %v721_v7  ;;  %v1083_v14 = vadd.f32 %v6230_v5, %v875_v44  ;;  %v6244_v7 = vld [vmem:[#allocation63_spill] sm:$0xff]  ;;  %v6248_v44 = vld [vmem:[#allocation70_spill] sm:$0xff] }
 0x614   :  { %v1187_v35 = vadd.f32 %v6235_v2, %v979_v8  ;;  %v6252_v8 = vld [vmem:[#allocation71_spill] sm:$0xff] }
 0x615   :  { %v803_v37 = vadd.f32 %v6228_v54, %v762_v46  ;;  %v1291_v52 = vadd.f32 %v6233_v43, %v1083_v14  ;;  %v6246_v46 = vld [vmem:[#allocation65_spill] sm:$0xff] }
 0x616   :  { %v1395_v39 = vadd.f32 %v6238_v4, %v1187_v35  ;;  %v6251_v14 = vld [vmem:[#allocation73_spill] sm:$0xff]  ;;  %v6255_v35 = vld [vmem:[#allocation74_spill] sm:$0xff] }
 0x617   :  { %v927_v20 = vadd.f32 %v6231_v51, %v803_v37  ;;  %v1499_v25 = vadd.f32 %v6236_v61, %v1291_v52  ;;  %v6249_v37 = vld [vmem:[#allocation68_spill] sm:$0xff] }
 0x618   :  { %v1603_v47 = vadd.f32 %v6241_v34, %v1395_v39  ;;  %v6253_v52 = vld [vmem:[#allocation72_spill] sm:$0xff] }
 0x619   :  { %v1135_v12 = vadd.f32 %v6234_v53, %v927_v20  ;;  %v1675_v30 = vadd.f32 %v6239_v62, %v1499_v25  ;;  %v6256_v25 = vld [vmem:[#allocation75_spill] sm:$0xff] }
 0x61a   :  { %v1695_v56 = vadd.f32 %v6244_v7, %v1603_v47 }
 0x61b   :  { %v5377_v57 = vpop.permute.xlu1 %1978  ;;  %v1343_v13 = vadd.f32 %v6237_v28, %v1135_v12  ;;  %v1716_v10 = vadd.f32 %v6242_v22, %v1675_v30  ;;  %v6254_v12 = vld [vmem:[#allocation76_spill] sm:$0xff]  ;;  %v6258_v30 = vld [vmem:[#allocation77_spill] sm:$0xff] }
 0x61c   :  { %v1736_v38 = vadd.f32 %v6247_v26, %v1695_v56  ;;  %v6260_v22 = vld [vmem:[#allocation80_spill] sm:$0xff] }
 0x61d   :  { %v1551_v36 = vadd.f32 %v6240_v31, %v1343_v13  ;;  %v1757_v24 = vadd.f32 %v6245_v32, %v1716_v10  ;;  %v6257_v13 = vld [vmem:[#allocation79_spill] sm:$0xff] }
 0x61e   :  { %v1777_v5 = vadd.f32 %v6250_v6, %v1736_v38 }
 0x61f   :  { %v5394_v55 = vpop.permute.xlu1 %1998  ;;  %v1685_v33 = vadd.f32 %v6243_v42, %v1551_v36  ;;  %v1798_v54 = vadd.f32 %v6248_v44, %v1757_v24  ;;  %v6259_v36 = vld [vmem:[#allocation78_spill] sm:$0xff]  ;;  %v6261_v42 = vld [vmem:[#allocation81_spill] sm:$0xff] }
 0x620   :  { %v1818_v53 = vadd.f32 %v6253_v52, %v1777_v5 }
 0x621   :  { %v1726_v1 = vadd.f32 %v6246_v46, %v1685_v33  ;;  %v1848_v51 = vadd.f32 %v6251_v14, %v1798_v54 }
 0x622   :  { %v1868_v28 = vadd.f32 %v6256_v25, %v1818_v53  ;;  %v6263_v25 = vmov 2  }
 0x623   :  { %v1767_v48 = vadd.f32 %v6249_v37, %v1726_v1  ;;  %v1889_v2 = vadd.f32 %v6254_v12, %v1848_v51  ;;  %v2001_v37 = vadd.f32 %v5394_v55, %v5333_v40 }
 0x624   :  { %v1909_v34 = vadd.f32 %v6259_v36, %v1868_v28  ;;  %v2462_v28 = vld [vmem:[%s6064_s6 + $0x8] sm:$0xff]  ;;  %v6267_v36 = vmov 7  }
 0x625   :  { %v1808_v43 = vadd.f32 %v6252_v8, %v1767_v48  ;;  %v1930_v4 = vadd.f32 %v6257_v13, %v1889_v2  ;;  %v6264_v13 = vmov 3  }
 0x626   :  { %v1950_v33 = vadd.f32 %v6261_v42, %v1909_v34  ;;  %v6268_v34 = vmov 10   ;;  %v6271_v42 = vmov 6  }
 0x627   :  { %v1858_v61 = vadd.f32 %v6255_v35, %v1808_v43  ;;  %v1971_v47 = vadd.f32 %v5375_v3, %v1930_v4  ;;  %v6265_v4 = vmov 0  }
 0x628   :  { %v1991_v24 = vadd.f32 %v5392_v17, %v1950_v33  ;;  %v6272_v33 = vmov 8  }
 0x629   :  { %v1899_v31 = vadd.f32 %v6258_v30, %v1858_v61  ;;  %v6262_v61 = vmov 1   ;;  %v6266_v30 = vmov 4  }
 0x62b   :  { %v1940_v10 = vadd.f32 %v6260_v22, %v1899_v31  ;;  %v2558_v31 = vld [vmem:[%s6065_s7 + $0x8] sm:$0xff]  ;;  %v2937_v22 = vld [vmem:[%s6067_s9] sm:$0xf] }
 0x62d   :  { %v1981_v46 = vadd.f32 %v5377_v57, %v1940_v10  ;;  %v6270_v10 = vmov 5  }
 0x639   :  { %v5400_v16 = vpop.permute.xlu0 %2018  ;;  %v5402_v59 = vpop.permute.xlu1 %2028 }
 0x63a   :  { %v2021_v7 = vadd.f32 %v5400_v16, %v1971_v47  ;;  %v2031_v26 = vadd.f32 %v5402_v59, %v1981_v46  ;;  %v6269_v47 = vmov 13   ;;  %v6277_v46 = vmov 15  }
 0x63d   :  { %v5410_v41 = vpop.permute.xlu0 %2038  ;;  %v5412_v21 = vpop.permute.xlu1 %2048 }
 0x63e   :  { %v2041_v38 = vadd.f32 %v5410_v41, %v1991_v24  ;;  %v2051_v57 = vadd.f32 %v5412_v21, %v2001_v37  ;;  %v6276_v24 = vmov 14  }
 0x641   :  { %v5420_v29 = vpop.permute.xlu0 %2059  ;;  %v5422_v58 = vpop.permute.xlu1 %2069 }
 0x642   :  { %v2062_v1 = vadd.f32 %v5420_v29, %v2021_v7  ;;  %v2072_v16 = vadd.f32 %v5422_v58, %v2031_v26  ;;  %v6273_v7 = vmov 9   ;;  %v6279_v26 = vld [vmem:[#allocation8_spill] sm:$0xff] }
 0x645   :  { %v5430_v9 = vpop.permute.xlu0 %2079  ;;  %v5432_v49 = vpop.permute.xlu1 %2089 }
 0x646   :  { %v2082_v48 = vadd.f32 %v5430_v9, %v2041_v38 }
 0x649   :  { %v5440_v18 = vpop.permute.xlu0 %2100  ;;  %v5442_v27 = vpop.permute.xlu1 %2110 }
 0x64a   :  { %v2103_v3 = vadd.f32 %v5440_v18, %v2062_v1  ;;  %v2113_v29 = vadd.f32 %v5442_v27, %v2072_v16  ;;  %v2092_v18 = vadd.f32 %v5432_v49, %v2051_v57  ;;  %v6278_v1 = vld [vmem:[#allocation6_spill] sm:$0xff] }
 0x64d   :  { %v5450_v63 = vpop.permute.xlu0 %2120  ;;  %v5452_v60 = vpop.permute.xlu1 %2130 }
 0x64e   :  { %v2123_v59 = vadd.f32 %v5450_v63, %v2082_v48  ;;  %v2133_v40 = vadd.f32 %v5452_v60, %v2092_v18 }
 0x651   :  { %v2152_v0 = vpop.permute.xlu1 %2151  ;;  %v2142_v45 = vpop.permute.xlu0 %2141 }
 0x652   :  { %v2144_v17 = vadd.f32 %v2142_v45, %v2103_v3  ;;  %v2154_v14 = vadd.f32 %v2152_v0, %v2113_v29 }
 0x655   :  { %v2172_v50 = vpop.permute.xlu1 %2171  ;;  %v2162_v19 = vpop.permute.xlu0 %2161 }
 0x656   :  { %v2164_v51 = vadd.f32 %v2162_v19, %v2123_v59  ;;  %v2174_v21 = vadd.f32 %v2172_v50, %v2133_v40  ;;  %v2445_v50 = vld [vmem:[%s6062_s4] sm:$0xf] }
 0x659   :  { %v2202_v11 = vpop.permute.xlu1 %2201  ;;  %v2192_v15 = vpop.permute.xlu0 %2191 }
 0x65a   :  { %v2194_v6 = vadd.f32 %v2192_v15, %v2144_v17  ;;  %v2204_v55 = vadd.f32 %v2202_v11, %v2154_v14  ;;  %v2397_v17 = vlaneseq }
 0x65d   :  { %v2222_v20 = vpop.permute.xlu1 %2221  ;;  %v2212_v23 = vpop.permute.xlu0 %2211 }
 0x65e   :  { %v2214_v58 = vadd.f32 %v2212_v23, %v2164_v51  ;;  %v2224_v63 = vadd.f32 %v2222_v20, %v2174_v21  ;;  %v2461_v20 = vld [vmem:[%s6064_s6] sm:$0xff] }
 0x65f   :  { %v2453_v23 = vld [vmem:[%s6063_s5] sm:$0xf] }
 0x661   :  { %v2243_v39 = vpop.permute.xlu1 %2242  ;;  %v2233_v62 = vpop.permute.xlu0 %2232 }
 0x662   :  { %v2235_v8 = vadd.f32 %v2233_v62, %v2194_v6  ;;  %v2245_v52 = vadd.f32 %v2243_v39, %v2204_v55  ;;  %v2557_v39 = vld [vmem:[%s6065_s7] sm:$0xff]  ;;  %v5562_v55 = vshrl.u32 %v2397_v17, 7  ;;  %s3994_s7 = smov [#allocation2]  }
 0x663   :  { %v2681_v62 = vld [vmem:[%s6066_s8] sm:$0xf]  ;;  %s3418_s9 = sshll.u32 %s3994_s7, 4  ;;  %s3419_s9 = int_to_ptr.vmem [resolvable:$true] %s3418_s9 }
 0x664   :  { %p3830_p1 = scmp.lt.s32.totalorder %s3419_s9, %s3419_s9 }
 0x665   :  { %v2263_v56 = vpop.permute.xlu1 %2262  ;;  %v2253_v32 = vpop.permute.xlu0 %2252 }
 0x666   :  { %v2255_v27 = vadd.f32 %v2253_v32, %v2214_v58  ;;  %v2265_v0 = vadd.f32 %v2263_v56, %v2224_v63  ;;  %v6274_v56 = vmov 11   ;;  %v6275_v32 = vmov 12  }
 0x669   :  { %v2284_v44 = vpop.permute.xlu1 %2283  ;;  %v2274_v54 = vpop.permute.xlu0 %2273 }
 0x66a   :  { %v2276_v9 = vadd.f32 %v2274_v54, %v2235_v8  ;;  %v2286_v15 = vadd.f32 %v2284_v44, %v2245_v52 }
 0x66d   :  { %v2304_v41 = vpop.permute.xlu1 %2303  ;;  %v2294_v5 = vpop.permute.xlu0 %2293 }
 0x66e   :  { %v2296_v12 = vadd.f32 %v2294_v5, %v2255_v27  ;;  %v2306_v60 = vadd.f32 %v2304_v41, %v2265_v0 }
 0x671   :  { %v2315_v45 = vpop.permute.xlu0 %2314  ;;  %v2325_v43 = vpop.permute.xlu1 %2324 }
 0x672   :  { %v2317_v53 = vadd.f32 %v2315_v45, %v2276_v9  ;;  %v2327_v19 = vadd.f32 %v2325_v43, %v2286_v15 }
 0x674   :  { %2349 = vrot.lane.b32.xlu1 %v2317_v53, %s3993_s3 }
 0x675   :  { %v2335_v49 = vpop.permute.xlu0 %2334  ;;  %v2345_v35 = vpop.permute.xlu1 %2344 }
 0x676   :  { %v2337_v2 = vadd.f32 %v2335_v49, %v2296_v12  ;;  %v2347_v11 = vadd.f32 %v2345_v35, %v2306_v60  ;;  %v5565_v12 = vsub.s32 0, %v5562_v55  ;;  %v5568_v49 = vsub.s32 4, %v5562_v55 }
 0x678   :  { %2357 = vrot.lane.b32.xlu0 %v2337_v2, %s3993_s3  ;;  %2353 = vrot.lane.b32.xlu1 %v2327_v19, %s3989_s11 }
 0x67c   :  { %2448 = vperm.xlu0 %3723, %v2445_v50   ;;  %2361 = vrot.lane.b32.xlu1 %v2347_v11, %s3989_s11 }
 0x680   :  { %2465 = vperm.xlu0 %3723, %v2461_v20   ;;  %2456 = vperm.xlu1 %3724, %v2453_v23  }
 0x684   :  { %3725 = vset.pattern.permute.xlu1 %v6262_v61  ;;  %3726 = vset.pattern.permute.xlu0 %v6263_v25 }
 0x685   :  { %2486 = vperm.xlu1 %3725, %v2461_v20   ;;  %2510 = vperm.xlu0 %3726, %v2461_v20  }
 0x686   :  { %v2371_v3 = vpop.permute.xlu0 %2370 }
 0x687   :  { %v2945_v44 = vrot.slane %v2371_v3, 4 }
 0x689   :  { %3727 = vset.pattern.permute.xlu1 %v6264_v13  ;;  %3729 = vset.pattern.permute.xlu0 %v6265_v4 }
 0x68a   :  { %2534 = vperm.xlu1 %3727, %v2461_v20   ;;  %2470 = vperm.xlu0 %3729, %v2462_v28  }
 0x68e   :  { %3728 = vset.pattern.permute.xlu1 %v6265_v4  ;;  %3732 = vset.pattern.permute.xlu0 %v6264_v13 }
 0x68f   :  { %2561 = vperm.xlu1 %3728, %v2557_v39   ;;  %2538 = vperm.xlu0 %3732, %v2462_v28  }
 0x693   :  { %3730 = vset.pattern.permute.xlu1 %v6262_v61  ;;  %3734 = vset.pattern.permute.xlu0 %v6262_v61 }
 0x694   :  { %2490 = vperm.xlu1 %3730, %v2462_v28   ;;  %2698 = vperm.xlu0 %3734, %v2681_v62  }
 0x698   :  { %3731 = vset.pattern.permute.xlu1 %v6263_v25  ;;  %3737 = vset.pattern.permute.xlu0 %v6266_v30 }
 0x699   :  { %2514 = vperm.xlu1 %3731, %v2462_v28   ;;  %2746 = vperm.xlu0 %3737, %v2681_v62  }
 0x69d   :  { %3733 = vset.pattern.permute.xlu1 %v6265_v4  ;;  %3740 = vset.pattern.permute.xlu0 %v6267_v36 }
 0x69e   :  { %2566 = vperm.xlu1 %3733, %v2558_v31   ;;  %2794 = vperm.xlu0 %3740, %v2681_v62  }
 0x6a2   :  { %2684 = vperm.xlu1 %3733, %v2681_v62   ;;  %3743 = vset.pattern.permute.xlu0 %v6268_v34 }
 0x6a3   :  { %2842 = vperm.xlu0 %3743, %v2681_v62  }
 0x6a6   :  { %3735 = vset.pattern.permute.xlu1 %v6263_v25 }
 0x6a7   :  { %2714 = vperm.xlu1 %3735, %v2681_v62   ;;  %3746 = vset.pattern.permute.xlu0 %v6269_v47 }
 0x6a8   :  { %2890 = vperm.xlu0 %3746, %v2681_v62  }
 0x6ab   :  { %3736 = vset.pattern.permute.xlu1 %v6264_v13 }
 0x6ac   :  { %2730 = vperm.xlu1 %3736, %v2681_v62   ;;  %3749 = vset.pattern.permute.xlu0 %v6265_v4 }
 0x6ad   :  { %2940 = vperm.xlu0 %3749, %v2937_v22  }
 0x6b0   :  { %3738 = vset.pattern.permute.xlu1 %v6270_v10 }
 0x6b1   :  { %2762 = vperm.xlu1 %3738, %v2681_v62  }
 0x6b5   :  { %3739 = vset.pattern.permute.xlu1 %v6271_v42 }
 0x6b6   :  { %2778 = vperm.xlu1 %3739, %v2681_v62  }
 0x6ba   :  { %3741 = vset.pattern.permute.xlu1 %v6272_v33 }
 0x6bb   :  { %2810 = vperm.xlu1 %3741, %v2681_v62  }
 0x6bf   :  { %3742 = vset.pattern.permute.xlu1 %v6273_v7 }
 0x6c0   :  { %2826 = vperm.xlu1 %3742, %v2681_v62  }
 0x6c4   :  { %3744 = vset.pattern.permute.xlu1 %v6274_v56 }
 0x6c5   :  { %2858 = vperm.xlu1 %3744, %v2681_v62  }
 0x6c9   :  { %3745 = vset.pattern.permute.xlu1 %v6275_v32 }
 0x6ca   :  { %2874 = vperm.xlu1 %3745, %v2681_v62  }
 0x6ce   :  { %3747 = vset.pattern.permute.xlu1 %v6276_v24 }
 0x6cf   :  { %2906 = vperm.xlu1 %3747, %v2681_v62  }
 0x6d3   :  { %3748 = vset.pattern.permute.xlu1 %v6277_v46 }
 0x6d4   :  { %2922 = vperm.xlu1 %3748, %v2681_v62  }
 0x6d8   :  { %3400 = vrot.lane.b32.xlu1 %v6278_v1, %s3853_s15 }
 0x6dc   :  { %3403 = vrot.lane.b32.xlu1 %v6279_v26, %s3853_s15  ;;  %s3825_s15 = scalar_lea.vmem %s3419_s9, 256 }
 0x6dd   :  { %p3826_p0 = scmp.ne.s32.totalorder %s3419_s9, %s3825_s15  ;;  %p3831_p2 = scmp.lt.s32.totalorder %s3825_s15, %s3825_s15 }
 0x6df   :  { %p3832_p3 = por %p3831_p2, %p3830_p1 }
 0x6e1   :  { %p3833_p4 = pnand %p3832_p3, %p3826_p0 }
 0x6e6   :  { %v2350_v38 = vpop.permute.xlu1 %2349 }
 0x6ea   :  { %v2354_v54 = vpop.permute.xlu1 %2353  ;;  %v2358_v57 = vpop.permute.xlu0 %2357 }
 0x6eb   :  { %v2365_v37 = vsel %vm2364_vm8, %v2350_v38, %v2354_v54 }
 0x6ec   :  { %v2373_v16 = vadd.f32 %v2371_v3, %v2365_v37  ;;  %v2947_v48 = vadd.f32 %v2945_v44, %v2365_v37 }
 0x6ee   :  { %v2377_v29 = vrot.slane %v2373_v16, 1  ;;  %v2951_v59 = vrot.slane %v2947_v48, 1  ;;  %v2362_v6 = vpop.permute.xlu1 %2361  ;;  %v2383_v8 = vrot.slane %v2373_v16, 2  ;;  %v2957_v40 = vrot.slane %v2947_v48, 2 }
 0x6ef   :  { %v2366_v41 = vsel %vm2364_vm8, %v2358_v57, %v2362_v6  ;;  %v2963_v45 = vrot.slane %v2947_v48, 3  ;;  %v2389_v21 = vrot.slane %v2373_v16, 3 }
 0x6f0   :  { %v2381_v5 = vadd.f32 %v2377_v29, %v2373_v16  ;;  %v2955_v18 = vadd.f32 %v2951_v59, %v2947_v48  ;;  %v2374_v14 = vadd.f32 %v2371_v3, %v2366_v41  ;;  %v2948_v51 = vadd.f32 %v2945_v44, %v2366_v41 }
 0x6f2   :  { %v2378_v58 = vrot.slane %v2374_v14, 1  ;;  %v2952_v9 = vrot.slane %v2948_v51, 1  ;;  %v2387_v43 = vadd.f32 %v2383_v8, %v2381_v5  ;;  %v2961_v52 = vadd.f32 %v2957_v40, %v2955_v18 }
 0x6f3   :  { %v2384_v53 = vrot.slane %v2374_v14, 2  ;;  %v2958_v15 = vrot.slane %v2948_v51, 2  ;;  %v2964_v2 = vrot.slane %v2948_v51, 3  ;;  %v2390_v60 = vrot.slane %v2374_v14, 3 }
 0x6f4   :  { %v2382_v27 = vadd.f32 %v2378_v58, %v2374_v14  ;;  %v2956_v63 = vadd.f32 %v2952_v9, %v2948_v51  ;;  %v2393_v0 = vadd.f32 %v2389_v21, %v2387_v43  ;;  %v2967_v19 = vadd.f32 %v2963_v45, %v2961_v52 }
 0x6f6   :  { %v2388_v35 = vadd.f32 %v2384_v53, %v2382_v27  ;;  %v2962_v50 = vadd.f32 %v2958_v15, %v2956_v63  ;;  %v2395_v11 = vmul.f32 0.25, %v2393_v0  ;;  %v2969_v20 = vmul.f32 0.25, %v2967_v19 }
 0x6f8   :  { %v2394_v23 = vadd.f32 %v2390_v60, %v2388_v35  ;;  %v2968_v61 = vadd.f32 %v2964_v2, %v2962_v50  ;;  %v2400_v25 = vrot.slane %v2395_v11, %v5565_v12  ;;  %v2974_v28 = vrot.slane %v2969_v20, %v5568_v49 }
 0x6fa   :  { %v2396_v13 = vmul.f32 0.25, %v2394_v23  ;;  %v2970_v4 = vmul.f32 0.25, %v2968_v61  ;;  %v2405_v39 = vsub.f32 %v2373_v16, %v2400_v25  ;;  %v2979_v62 = vsub.f32 %v2947_v48, %v2974_v28 }
 0x6fb   :  { %v2449_v63 = vpop.permute.xlu0 %2448  ;;  %v5579_v25 = vsub.s32 1, %v5562_v55 }
 0x6fc   :  { %v2404_v30 = vrot.slane %v2396_v13, %v5565_v12  ;;  %v2978_v31 = vrot.slane %v2970_v4, %v5568_v49  ;;  %v2407_v36 = vmul.f32 %v2405_v39, %v2405_v39  ;;  %v2981_v34 = vmul.f32 %v2979_v62, %v2979_v62 }
 0x6fd   :  { %v3019_v11 = vrot.slane %v2449_v63, 4  ;;  %v5582_v4 = vsub.s32 5, %v5562_v55 }
 0x6fe   :  { %v2406_v47 = vsub.f32 %v2374_v14, %v2404_v30  ;;  %v2980_v22 = vsub.f32 %v2948_v51, %v2978_v31  ;;  %v2411_v10 = vrot.slane %v2407_v36, 1  ;;  %v2985_v42 = vrot.slane %v2981_v34, 1 }
 0x6ff   :  { %v2417_v32 = vrot.slane %v2407_v36, 2  ;;  %v2991_v46 = vrot.slane %v2981_v34, 2  ;;  %v2423_v3 = vrot.slane %v2407_v36, 3  ;;  %v2997_v54 = vrot.slane %v2981_v34, 3  ;;  %v2457_v27 = vpop.permute.xlu1 %2456 }
 0x700   :  { %v2408_v33 = vmul.f32 %v2406_v47, %v2406_v47  ;;  %v2982_v7 = vmul.f32 %v2980_v22, %v2980_v22  ;;  %v2415_v56 = vadd.f32 %v2411_v10, %v2407_v36  ;;  %v2989_v24 = vadd.f32 %v2985_v42, %v2981_v34 }
 0x701   :  { %v3023_v20 = vrot.slane %v2457_v27, 4 }
 0x702   :  { %v2412_v1 = vrot.slane %v2408_v33, 1  ;;  %v2986_v26 = vrot.slane %v2982_v7, 1  ;;  %v2421_v38 = vadd.f32 %v2417_v32, %v2415_v56  ;;  %v2995_v44 = vadd.f32 %v2991_v46, %v2989_v24 }
 0x703   :  { %v2418_v16 = vrot.slane %v2408_v33, 2  ;;  %v2992_v17 = vrot.slane %v2982_v7, 2  ;;  %v2424_v6 = vrot.slane %v2408_v33, 3  ;;  %v2998_v5 = vrot.slane %v2982_v7, 3 }
 0x704   :  { %v2416_v37 = vadd.f32 %v2412_v1, %v2408_v33  ;;  %v2990_v48 = vadd.f32 %v2986_v26, %v2982_v7  ;;  %v2427_v57 = vadd.f32 %v2423_v3, %v2421_v38  ;;  %v3001_v29 = vadd.f32 %v2997_v54, %v2995_v44  ;;  %v2487_v30 = vpop.permute.xlu1 %2486  ;;  %v2466_v7 = vpop.permute.xlu0 %2465 }
 0x705   :  { %v5589_v33 = vsub.s32 3, %v5562_v55  ;;  %v5600_v26 = vsub.s32 2, %v5562_v55 }
 0x706   :  { %v2422_v59 = vadd.f32 %v2418_v16, %v2416_v37  ;;  %v2996_v41 = vadd.f32 %v2992_v17, %v2990_v48  ;;  %v2429_v18 = vmul.f32 0.25, %v2427_v57  ;;  %v3003_v14 = vmul.f32 0.25, %v3001_v29 }
 0x707   :  { %v5608_v17 = vsub.s32 6, %v5562_v55 }
 0x708   :  { %v2428_v51 = vadd.f32 %v2424_v6, %v2422_v59  ;;  %v3002_v8 = vadd.f32 %v2998_v5, %v2996_v41  ;;  %v2431_v40 = vadd.f32 1e-06, %v2429_v18  ;;  %v3005_v58 = vadd.f32 1e-06, %v3003_v14 }
 0x709   :  { %v2535_v37 = vpop.permute.xlu1 %2534 }
 0x70a   :  { %v2430_v9 = vmul.f32 0.25, %v2428_v51  ;;  %v3004_v45 = vmul.f32 0.25, %v3002_v8  ;;  %3750 = vrsqrt.f32 %v2431_v40 }
 0x70b   :  { %3752 = vrsqrt.f32 %v3005_v58 }
 0x70c   :  { %v2432_v43 = vadd.f32 1e-06, %v2430_v9  ;;  %v3006_v21 = vadd.f32 1e-06, %v3004_v45  ;;  %v2511_v45 = vpop.permute.xlu0 %2510 }
 0x70e   :  { %3754 = vrsqrt.f32 %v2432_v43 }
 0x70f   :  { %3756 = vrsqrt.f32 %v3006_v21 }
 0x714   :  { %v3751_v52 = vpop.eup %3750 }
 0x715   :  { %v3753_v53 = vpop.eup %3752  ;;  %v2438_v15 = vrot.slane %v3751_v52, %v5565_v12 }
 0x716   :  { %v3012_v0 = vrot.slane %v3753_v53, %v5568_v49  ;;  %v2562_v53 = vpop.permute.xlu1 %2561 }
 0x717   :  { %v2443_v2 = vmul.f32 %v2438_v15, %v2405_v39 }
 0x718   :  { %v3755_v19 = vpop.eup %3754  ;;  %v3017_v50 = vmul.f32 %v3012_v0, %v2979_v62 }
 0x719   :  { %v3757_v35 = vpop.eup %3756  ;;  %v2442_v60 = vrot.slane %v3755_v19, %v5565_v12  ;;  %v2451_v23 = vmul.f32 %v2449_v63, %v2443_v2 }
 0x71a   :  { %v3016_v61 = vrot.slane %v3757_v35, %v5568_v49  ;;  %v3021_v13 = vmul.f32 %v3019_v11, %v3017_v50 }
 0x71b   :  { %v2444_v28 = vmul.f32 %v2442_v60, %v2406_v47  ;;  %v2459_v39 = vadd.f32 %v2457_v27, %v2451_v23 }
 0x71c   :  { %v3018_v31 = vmul.f32 %v3016_v61, %v2980_v22  ;;  %v3025_v34 = vadd.f32 %v3023_v20, %v3021_v13  ;;  %v5596_v22 = vsub.s32 7, %v5562_v55 }
 0x71d   :  { %v2452_v36 = vmul.f32 %v2449_v63, %v2444_v28  ;;  %v2476_v62 = vrot.slane %v2459_v39, %v5565_v12  ;;  %v5586_v42 = vrot.slane %v2459_v39, %v5579_v25  ;;  %v5611_v59 = vrot.slane %v2459_v39, %v5589_v33 }
 0x71e   :  { %v3022_v10 = vmul.f32 %v3019_v11, %v3018_v31  ;;  %v3030_v56 = vrot.slane %v3025_v34, %v5568_v49  ;;  %v5593_v32 = vrot.slane %v3025_v34, %v5582_v4  ;;  %v5614_v6 = vrot.slane %v3025_v34, %v5596_v22 }
 0x71f   :  { %v2460_v47 = vadd.f32 %v2457_v27, %v2452_v36  ;;  %v2481_v46 = vmul.f32 %v2476_v62, %v2466_v7  ;;  %v2501_v1 = vmul.f32 %v5586_v42, %v2487_v30  ;;  %v2520_v40 = vrot.slane %v2459_v39, %v5600_v26  ;;  %v2471_v39 = vpop.permute.xlu0 %2470  ;;  %v2491_v36 = vpop.permute.xlu1 %2490 }
 0x720   :  { %v3026_v24 = vadd.f32 %v3023_v20, %v3022_v10  ;;  %v3035_v44 = vmul.f32 %v3030_v56, %v2466_v7  ;;  %v3047_v54 = vmul.f32 %v5593_v32, %v2487_v30  ;;  %v5627_v43 = vrot.slane %v3025_v34, %v5608_v17 }
 0x721   :  { %v2480_v38 = vrot.slane %v2460_v47, %v5565_v12  ;;  %v2500_v3 = vrot.slane %v2460_v47, %v5579_v25  ;;  %v2505_v5 = vadd.f32 %v2501_v1, %v2481_v46  ;;  %v5617_v14 = vrot.slane %v2460_v47, %v5589_v33 }
 0x722   :  { %v3034_v16 = vrot.slane %v3026_v24, %v5568_v49  ;;  %v3046_v48 = vrot.slane %v3026_v24, %v5582_v4  ;;  %v3051_v8 = vadd.f32 %v3047_v54, %v3035_v44  ;;  %v5621_v55 = vrot.slane %v2460_v47, %v5600_v26 }
 0x723   :  { %v2482_v57 = vmul.f32 %v2480_v38, %v2466_v7  ;;  %v2502_v29 = vmul.f32 %v2500_v3, %v2487_v30  ;;  %v5624_v9 = vrot.slane %v3026_v24, %v5596_v22  ;;  %v5630_v21 = vrot.slane %v3026_v24, %v5608_v17 }
 0x724   :  { %v3036_v41 = vmul.f32 %v3034_v16, %v2466_v7  ;;  %v3048_v18 = vmul.f32 %v3046_v48, %v2487_v30  ;;  %v2525_v52 = vmul.f32 %v2520_v40, %v2511_v45  ;;  %v2526_v27 = vmul.f32 %v5621_v55, %v2511_v45 }
 0x725   :  { %v2506_v51 = vadd.f32 %v2502_v29, %v2482_v57  ;;  %v3063_v63 = vmul.f32 %v5627_v43, %v2511_v45  ;;  %v3064_v15 = vmul.f32 %v5630_v21, %v2511_v45  ;;  %v2549_v0 = vmul.f32 %v5611_v59, %v2535_v37  ;;  %v2515_v45 = vpop.permute.xlu1 %2514 }
 0x726   :  { %v3052_v58 = vadd.f32 %v3048_v18, %v3036_v41  ;;  %v2550_v19 = vmul.f32 %v5617_v14, %v2535_v37  ;;  %v2529_v2 = vadd.f32 %v2525_v52, %v2505_v5  ;;  %v3079_v60 = vmul.f32 %v5614_v6, %v2535_v37 }
 0x727   :  { %v2530_v35 = vadd.f32 %v2526_v27, %v2506_v51  ;;  %v3080_v50 = vmul.f32 %v5624_v9, %v2535_v37  ;;  %v3067_v11 = vadd.f32 %v3063_v63, %v3051_v8  ;;  %v2483_v7 = vmul.f32 %v2476_v62, %v2471_v39 }
 0x728   :  { %v3068_v20 = vadd.f32 %v3064_v15, %v3052_v58  ;;  %v2553_v23 = vadd.f32 %v2549_v0, %v2529_v2  ;;  %v2484_v47 = vmul.f32 %v2480_v38, %v2471_v39  ;;  %v3037_v1 = vmul.f32 %v3030_v56, %v2471_v39  ;;  %v2539_v58 = vpop.permute.xlu0 %2538 }
 0x729   :  { %v2554_v61 = vadd.f32 %v2550_v19, %v2530_v35  ;;  %v3083_v28 = vadd.f32 %v3079_v60, %v3067_v11  ;;  %v2503_v44 = vmul.f32 %v5586_v42, %v2491_v36  ;;  %v2504_v57 = vmul.f32 %v2500_v3, %v2491_v36 }
 0x72a   :  { %v3084_v13 = vadd.f32 %v3080_v50, %v3068_v20  ;;  %v5639_v30 = vadd.f32 %v2562_v53, %v2553_v23  ;;  %v3049_v29 = vmul.f32 %v5593_v32, %v2491_v36  ;;  %v3038_v41 = vmul.f32 %v3034_v16, %v2471_v39 }
 0x72b   :  { %v5641_v31 = vadd.f32 %v2562_v53, %v2554_v61  ;;  %v5643_v34 = vadd.f32 %v3083_v28, %v2562_v53  ;;  %v3050_v5 = vmul.f32 %v3046_v48, %v2491_v36  ;;  %v2507_v8 = vadd.f32 %v2503_v44, %v2483_v7  ;;  %v2567_v36 = vpop.permute.xlu1 %2566 }
 0x72c   :  { %v5645_v10 = vadd.f32 %v3084_v13, %v2562_v53  ;;  %v5648_v24 = vmul.f32 0.70710677, %v5639_v30  ;;  %v2508_v3 = vadd.f32 %v2504_v57, %v2484_v47  ;;  %v3053_v53 = vadd.f32 %v3049_v29, %v3037_v1 }
 0x72d   :  { %v5651_v46 = vmul.f32 0.70710677, %v5641_v31  ;;  %v5655_v54 = vmul.f32 0.70710677, %v5643_v34  ;;  %v3054_v0 = vadd.f32 %v3050_v5, %v3038_v41  ;;  %v2551_v16 = vmul.f32 %v5611_v59, %v2539_v58 }
 0x72e   :  { %v5658_v37 = vmul.f32 0.70710677, %v5645_v10  ;;  %v2577_v62 = vand.u32 2147483647, %v5648_v24  ;;  %v2552_v48 = vmul.f32 %v5617_v14, %v2539_v58  ;;  %v2527_v2 = vmul.f32 %v2520_v40, %v2515_v45 }
 0x72f   :  { %v2578_v38 = vand.u32 2147483647, %v5651_v46  ;;  %v3095_v18 = vand.u32 2147483647, %v5655_v54  ;;  %v2528_v50 = vmul.f32 %v5621_v55, %v2515_v45  ;;  %v3065_v13 = vmul.f32 %v5627_v43, %v2515_v45 }
 0x730   :  { %v3096_v56 = vand.u32 2147483647, %v5658_v37  ;;  %v2581_v42 = vmul.f32 0.3275911, %v2577_v62  ;;  %v2633_v15 = vmul.f32 %v2577_v62, %v2577_v62  ;;  %v2531_v23 = vadd.f32 %v2527_v2, %v2507_v8 }
 0x731   :  { %v2582_v51 = vmul.f32 0.3275911, %v2578_v38  ;;  %v3099_v52 = vmul.f32 0.3275911, %v3095_v18  ;;  %v2634_v19 = vmul.f32 %v2578_v38, %v2578_v38  ;;  %v3151_v60 = vmul.f32 %v3095_v18, %v3095_v18 }
 0x732   :  { %v3100_v27 = vmul.f32 0.3275911, %v3096_v56  ;;  %v2585_v32 = vadd.f32 1.0, %v2581_v42  ;;  %v3152_v20 = vmul.f32 %v3096_v56, %v3096_v56  ;;  %v2637_v61 = vsub.f32 0.0, %v2633_v15 }
 0x733   :  { %v2586_v63 = vadd.f32 1.0, %v2582_v51  ;;  %v3103_v35 = vadd.f32 1.0, %v3099_v52  ;;  %v2532_v28 = vadd.f32 %v2528_v50, %v2508_v3  ;;  %v3066_v39 = vmul.f32 %v5630_v21, %v2515_v45 }
 0x734   :  { %3758 = vrcp.f32 %v2585_v32  ;;  %v3104_v11 = vadd.f32 1.0, %v3100_v27  ;;  %v2638_v59 = vsub.f32 0.0, %v2634_v19  ;;  %v3081_v14 = vmul.f32 %v5614_v6, %v2539_v58 }
 0x735   :  { %3760 = vrcp.f32 %v2586_v63  ;;  %v3082_v40 = vmul.f32 %v5624_v9, %v2539_v58  ;;  %v2555_v7 = vadd.f32 %v2551_v16, %v2531_v23  ;;  %v3069_v47 = vadd.f32 %v3065_v13, %v3053_v53 }
 0x736   :  { %3762 = vrcp.f32 %v3103_v35  ;;  %v3070_v55 = vadd.f32 %v3066_v39, %v3054_v0  ;;  %v2556_v1 = vadd.f32 %v2552_v48, %v2532_v28  ;;  %v3155_v44 = vsub.f32 0.0, %v3151_v60 }
 0x737   :  { %3764 = vrcp.f32 %v3104_v11  ;;  %v3156_v57 = vsub.f32 0.0, %v3152_v20  ;;  %v5672_v29 = vadd.f32 %v2567_v36, %v2555_v7  ;;  %v2641_v62 = vmul.f32 1.442695, %v2637_v61 }
 0x738   :  { %v3085_v43 = vadd.f32 %v3081_v14, %v3069_v47  ;;  %v3086_v38 = vadd.f32 %v3082_v40, %v3070_v55  ;;  %v5674_v21 = vadd.f32 %v2567_v36, %v2556_v1  ;;  %v2643_v41 = vmul.f32 1.442695, %v2638_v59 }
 0x739   :  { %v5677_v6 = vmul.f32 0.70710677, %v5672_v29  ;;  %v5680_v9 = vmul.f32 0.5, %v5639_v30  ;;  %v5690_v42 = vmul.f32 0.5, %v5641_v31  ;;  %v3159_v51 = vmul.f32 1.442695, %v3155_v44 }
 0x73a   :  { %v5683_v5 = vmul.f32 0.70710677, %v5674_v21  ;;  %v5685_v18 = vadd.f32 %v3085_v43, %v2567_v36  ;;  %v5687_v56 = vadd.f32 %v3086_v38, %v2567_v36  ;;  %v5693_v8 = vmul.f32 0.5, %v5643_v34 }
 0x73b   :  { %v2579_v58 = vand.u32 2147483647, %v5677_v6  ;;  %3766 = vpow2.f32 %v2641_v62  ;;  %v3161_v30 = vmul.f32 1.442695, %v3156_v57  ;;  %v5718_v28 = vmul.f32 0.5, %v5645_v10 }
 0x73c   :  { %v2580_v52 = vand.u32 2147483647, %v5683_v5  ;;  %v5700_v27 = vmul.f32 0.70710677, %v5685_v18  ;;  %3768 = vpow2.f32 %v2643_v41  ;;  %v5706_v34 = vmul.f32 0.70710677, %v5687_v56 }
 0x73d   :  { %v2583_v53 = vmul.f32 0.3275911, %v2579_v58  ;;  %v2635_v15 = vmul.f32 %v2579_v58, %v2579_v58  ;;  %3770 = vpow2.f32 %v3159_v51  ;;  %vm2657_vm9 = vcmp.ge.f32.partialorder %v5648_v24, 0.0 }
 0x73e   :  { %v5696_v45 = vpop.eup %3758  ;;  %v2584_v63 = vmul.f32 0.3275911, %v2580_v52  ;;  %v3097_v0 = vand.u32 2147483647, %v5700_v27  ;;  %v3098_v48 = vand.u32 2147483647, %v5706_v34  ;;  %v2636_v50 = vmul.f32 %v2580_v52, %v2580_v52 }
 0x73f   :  { %v5702_v3 = vpop.eup %3760  ;;  %v2597_v31 = vmul.f32 1.0614054, %v5696_v45  ;;  %v2587_v16 = vadd.f32 1.0, %v2583_v53  ;;  %v2639_v36 = vsub.f32 0.0, %v2635_v15  ;;  %vm2658_vm10 = vcmp.ge.f32.partialorder %v5651_v46, 0.0 }
 0x740   :  { %v2598_v32 = vmul.f32 1.0614054, %v5702_v3  ;;  %v5711_v2 = vpop.eup %3762  ;;  %v2588_v60 = vadd.f32 1.0, %v2584_v63  ;;  %v3101_v11 = vmul.f32 0.3275911, %v3097_v0  ;;  %v2640_v55 = vsub.f32 0.0, %v2636_v50 }
 0x741   :  { %v2601_v19 = vadd.f32 -1.4531521, %v2597_v31  ;;  %v5713_v20 = vpop.eup %3764  ;;  %v3115_v61 = vmul.f32 1.0614054, %v5711_v2  ;;  %3772 = vrcp.f32 %v2587_v16  ;;  %v3102_v40 = vmul.f32 0.3275911, %v3098_v48 }
 0x742   :  { %v2602_v35 = vadd.f32 -1.4531521, %v2598_v32  ;;  %v3116_v39 = vmul.f32 1.0614054, %v5713_v20  ;;  %3774 = vrcp.f32 %v2588_v60  ;;  %v3105_v1 = vadd.f32 1.0, %v3101_v11 }
 0x743   :  { %v2605_v23 = vmul.f32 %v5696_v45, %v2601_v19  ;;  %v3119_v14 = vadd.f32 -1.4531521, %v3115_v61  ;;  %3776 = vpow2.f32 %v3161_v30  ;;  %v3106_v57 = vadd.f32 1.0, %v3102_v40 }
 0x744   :  { %v2606_v13 = vmul.f32 %v5702_v3, %v2602_v35  ;;  %v3120_v47 = vadd.f32 -1.4531521, %v3116_v39  ;;  %v3153_v62 = vmul.f32 %v3097_v0, %v3097_v0  ;;  %3778 = vrcp.f32 %v3105_v1 }
 0x745   :  { %v2609_v59 = vadd.f32 1.4214138, %v2605_v23  ;;  %v3123_v10 = vmul.f32 %v5711_v2, %v3119_v14  ;;  %v3767_v43 = vpop.eup %3766  ;;  %v3154_v51 = vmul.f32 %v3098_v48, %v3098_v48  ;;  %3780 = vrcp.f32 %v3106_v57 }
 0x746   :  { %v2610_v7 = vadd.f32 1.4214138, %v2606_v13  ;;  %v3124_v41 = vmul.f32 %v5713_v20, %v3120_v47  ;;  %v3769_v58 = vpop.eup %3768  ;;  %v3157_v31 = vsub.f32 0.0, %v3153_v62  ;;  %v5727_v63 = vmul.f32 0.5, %v5672_v29 }
 0x747   :  { %v2613_v44 = vmul.f32 %v5696_v45, %v2609_v59  ;;  %v3127_v52 = vadd.f32 1.4214138, %v3123_v10  ;;  %v3158_v15 = vsub.f32 0.0, %v3154_v51  ;;  %v3771_v19 = vpop.eup %3770  ;;  %v2645_v35 = vmul.f32 1.442695, %v2639_v36 }
 0x748   :  { %v2614_v38 = vmul.f32 %v5702_v3, %v2610_v7  ;;  %v3128_v32 = vadd.f32 1.4214138, %v3124_v41  ;;  %v5732_v60 = vmul.f32 0.5, %v5674_v21  ;;  %v2647_v11 = vmul.f32 1.442695, %v2640_v55 }
 0x749   :  { %v2617_v30 = vadd.f32 -0.28449672, %v2613_v44  ;;  %v3131_v16 = vmul.f32 %v5711_v2, %v3127_v52  ;;  %v3163_v23 = vmul.f32 1.442695, %v3157_v31  ;;  %v3165_v39 = vmul.f32 1.442695, %v3158_v15  ;;  %v5752_v52 = vpop.permute.xlu1 %2684 }
 0x74a   :  { %v2618_v53 = vadd.f32 -0.28449672, %v2614_v38  ;;  %v3132_v50 = vmul.f32 %v5713_v20, %v3128_v32  ;;  %3782 = vpow2.f32 %v2645_v35  ;;  %vm3175_vm11 = vcmp.ge.f32.partialorder %v5655_v54, 0.0 }
 0x74b   :  { %v2621_v0 = vmul.f32 %v5696_v45, %v2617_v30  ;;  %v5736_v61 = vpop.eup %3772  ;;  %v3135_v13 = vadd.f32 -0.28449672, %v3131_v16  ;;  %3784 = vpow2.f32 %v2647_v11  ;;  %vm3176_vm12 = vcmp.ge.f32.partialorder %v5658_v37, 0.0 }
 0x74c   :  { %v2622_v48 = vmul.f32 %v5702_v3, %v2618_v53  ;;  %v5738_v59 = vpop.eup %3774  ;;  %v3136_v36 = vadd.f32 -0.28449672, %v3132_v50  ;;  %v2599_v21 = vmul.f32 1.0614054, %v5736_v61  ;;  %3786 = vpow2.f32 %v3163_v23 }
 0x74d   :  { %v2625_v29 = vadd.f32 0.2548296, %v2621_v0  ;;  %v3777_v40 = vpop.eup %3776  ;;  %v3139_v47 = vmul.f32 %v5711_v2, %v3135_v13  ;;  %v2600_v55 = vmul.f32 1.0614054, %v5738_v59  ;;  %3788 = vpow2.f32 %v3165_v39 }
 0x74e   :  { %v2626_v14 = vadd.f32 0.2548296, %v2622_v48  ;;  %v3140_v44 = vmul.f32 %v5713_v20, %v3136_v36  ;;  %v2603_v10 = vadd.f32 -1.4531521, %v2599_v21  ;;  %v5748_v41 = vpop.eup %3778  ;;  %vm2659_vm13 = vcmp.ge.f32.partialorder %v5677_v6, 0.0 }
 0x74f   :  { %v2629_v7 = vmul.f32 %v5696_v45, %v2625_v29  ;;  %v3143_v62 = vadd.f32 0.2548296, %v3139_v47  ;;  %v2604_v38 = vadd.f32 -1.4531521, %v2600_v55  ;;  %v3117_v32 = vmul.f32 1.0614054, %v5748_v41  ;;  %v5769_v55 = vpop.permute.xlu1 %2714 }
 0x750   :  { %v2630_v1 = vmul.f32 %v5702_v3, %v2626_v14  ;;  %v3144_v51 = vadd.f32 0.2548296, %v3140_v44  ;;  %v2607_v30 = vmul.f32 %v5736_v61, %v2603_v10  ;;  %v5754_v3 = vpop.eup %3780  ;;  %v5788_v54 = vmul.f32 0.5, %v5685_v18 }
 0x751   :  { %v2649_v57 = vmul.f32 %v3767_v43, %v2629_v7  ;;  %v3147_v53 = vmul.f32 %v5711_v2, %v3143_v62  ;;  %v2608_v43 = vmul.f32 %v5738_v59, %v2604_v38  ;;  %v3118_v16 = vmul.f32 1.0614054, %v5754_v3 }
 0x752   :  { %v2650_v45 = vmul.f32 %v3769_v58, %v2630_v1  ;;  %v3148_v15 = vmul.f32 %v5713_v20, %v3144_v51  ;;  %v2611_v0 = vadd.f32 1.4214138, %v2607_v30  ;;  %v3121_v11 = vadd.f32 -1.4531521, %v3117_v32 }
 0x753   :  { %v2653_v31 = vsub.f32 1.0, %v2649_v57  ;;  %v3167_v48 = vmul.f32 %v3771_v19, %v3147_v53  ;;  %v2612_v50 = vadd.f32 1.4214138, %v2608_v43  ;;  %v3122_v13 = vadd.f32 -1.4531521, %v3118_v16 }
 0x754   :  { %v2654_v58 = vsub.f32 1.0, %v2650_v45  ;;  %v3168_v29 = vmul.f32 %v3777_v40, %v3148_v15  ;;  %v2615_v2 = vmul.f32 %v5736_v61, %v2611_v0  ;;  %v3125_v20 = vmul.f32 %v5748_v41, %v3121_v11  ;;  %v3783_v40 = vpop.eup %3782 }
 0x755   :  { %v2661_v35 = vsub.f32 0.0, %v2653_v31  ;;  %v3171_v14 = vsub.f32 1.0, %v3167_v48  ;;  %v2616_v36 = vmul.f32 %v5738_v59, %v2612_v50  ;;  %v3126_v24 = vmul.f32 %v5754_v3, %v3122_v13  ;;  %v3785_v57 = vpop.eup %3784 }
 0x756   :  { %v2662_v23 = vsub.f32 0.0, %v2654_v58  ;;  %v3172_v19 = vsub.f32 1.0, %v3168_v29  ;;  %v2619_v47 = vadd.f32 -0.28449672, %v2615_v2  ;;  %v3129_v46 = vadd.f32 1.4214138, %v3125_v20  ;;  %v3787_v51 = vpop.eup %3786 }
 0x757   :  { %v2665_v39 = vsel %vm2657_vm9, %v2653_v31, %v2661_v35  ;;  %v3179_v44 = vsub.f32 0.0, %v3171_v14  ;;  %v2620_v10 = vadd.f32 -0.28449672, %v2616_v36  ;;  %v3130_v43 = vadd.f32 1.4214138, %v3126_v24  ;;  %v3789_v32 = vpop.eup %3788 }
 0x758   :  { %v2666_v21 = vsel %vm2658_vm10, %v2654_v58, %v2662_v23  ;;  %v2673_v7 = vadd.f32 1.0, %v2665_v39  ;;  %v3180_v38 = vsub.f32 0.0, %v3172_v19  ;;  %v2623_v45 = vmul.f32 %v5736_v61, %v2619_v47  ;;  %v5797_v23 = vpop.permute.xlu1 %2730 }
 0x759   :  { %v2674_v1 = vadd.f32 1.0, %v2666_v21  ;;  %v3183_v31 = vsel %vm3175_vm11, %v3171_v14, %v3179_v44  ;;  %v2624_v53 = vmul.f32 %v5738_v59, %v2620_v10  ;;  %v3133_v0 = vmul.f32 %v5748_v41, %v3129_v46 }
 0x75a   :  { %v5773_v62 = vmul.f32 %v2673_v7, %v5680_v9  ;;  %v3184_v58 = vsel %vm3176_vm12, %v3172_v19, %v3180_v38  ;;  %v3191_v9 = vadd.f32 1.0, %v3183_v31  ;;  %v2627_v15 = vadd.f32 0.2548296, %v2623_v45 }
 0x75b   :  { %v5777_v30 = vmul.f32 %v2674_v1, %v5690_v42  ;;  %v3192_v16 = vadd.f32 1.0, %v3184_v58  ;;  %v2628_v35 = vadd.f32 0.2548296, %v2624_v53  ;;  %v3134_v42 = vmul.f32 %v5754_v3, %v3130_v43 }
 0x75c   :  { %v5791_v48 = vmul.f32 %v3191_v9, %v5693_v8  ;;  %v2631_v50 = vmul.f32 %v5736_v61, %v2627_v15  ;;  %vm2660_vm14 = vcmp.ge.f32.partialorder %v5683_v5, 0.0  ;;  %v3137_v37 = vadd.f32 -0.28449672, %v3133_v0  ;;  %v2763_v45 = vpop.permute.xlu1 %2762 }
 0x75d   :  { %v2690_v11 = vrot.slane %v5773_v62, %v5565_v12  ;;  %v5800_v29 = vmul.f32 %v3192_v16, %v5718_v28  ;;  %v2632_v2 = vmul.f32 %v5738_v59, %v2628_v35  ;;  %v3138_v18 = vadd.f32 -0.28449672, %v3134_v42 }
 0x75e   :  { %v2694_v8 = vrot.slane %v5777_v30, %v5565_v12  ;;  %v2651_v13 = vmul.f32 %v3783_v40, %v2631_v50  ;;  %v3141_v61 = vmul.f32 %v5748_v41, %v3137_v37  ;;  %v5807_v39 = vmul.f32 0.5, %v5687_v56 }
 0x75f   :  { %v3202_v14 = vrot.slane %v5791_v48, %v5565_v12  ;;  %v2652_v36 = vmul.f32 %v3785_v57, %v2632_v2  ;;  %v3142_v20 = vmul.f32 %v5754_v3, %v3138_v18  ;;  %v3206_v28 = vrot.slane %v5800_v29, %v5565_v12 }
 0x760   :  { %v2720_v59 = vrot.slane %v5773_v62, %v5600_v26  ;;  %v2655_v21 = vsub.f32 1.0, %v2651_v13  ;;  %v3145_v7 = vadd.f32 0.2548296, %v3141_v61  ;;  %v5817_v19 = vmul.f32 %v2690_v11, %v5752_v52  ;;  %v2779_v13 = vpop.permute.xlu1 %2778 }
 0x761   :  { %v2724_v56 = vrot.slane %v5777_v30, %v5600_v26  ;;  %v2656_v47 = vsub.f32 1.0, %v2652_v36  ;;  %v3146_v40 = vadd.f32 0.2548296, %v3142_v20  ;;  %vm3177_vm15 = vcmp.ge.f32.partialorder %v5700_v27, 0.0 }
 0x762   :  { %v5823_v1 = vmul.f32 %v2694_v8, %v5752_v52  ;;  %v5826_v44 = vmul.f32 %v3202_v14, %v5752_v52  ;;  %v2663_v10 = vsub.f32 0.0, %v2655_v21  ;;  %v3149_v24 = vmul.f32 %v5748_v41, %v3145_v7 }
 0x763   :  { %vm3178_vm0 = vcmp.ge.f32.partialorder %v5706_v34, 0.0  ;;  %v5831_v57 = vmul.f32 %v3206_v28, %v5752_v52  ;;  %v3224_v38 = vrot.slane %v5791_v48, %v5600_v26  ;;  %v2664_v46 = vsub.f32 0.0, %v2656_v47 }
 0x764   :  { %v3150_v31 = vmul.f32 %v5754_v3, %v3146_v40  ;;  %v3228_v53 = vrot.slane %v5800_v29, %v5600_v26  ;;  %v5839_v43 = vmul.f32 %v2720_v59, %v5769_v55  ;;  %v2667_v41 = vsel %vm2659_vm13, %v2655_v21, %v2663_v10 }
 0x765   :  { %v3169_v58 = vmul.f32 %v3787_v51, %v3149_v24  ;;  %v5844_v52 = vmul.f32 %v2724_v56, %v5769_v55  ;;  %v2736_v9 = vrot.slane %v5773_v62, %v5589_v33  ;;  %v2668_v15 = vsel %vm2660_vm14, %v2656_v47, %v2664_v46 }
 0x766   :  { %v2675_v3 = vadd.f32 1.0, %v2667_v41  ;;  %v3170_v0 = vmul.f32 %v3789_v32, %v3150_v31  ;;  %v2740_v16 = vrot.slane %v5777_v30, %v5589_v33  ;;  %v2676_v35 = vadd.f32 1.0, %v2668_v15 }
 0x767   :  { %v3173_v42 = vsub.f32 1.0, %v3169_v58  ;;  %v5853_v6 = vmul.f32 %v3224_v38, %v5769_v55  ;;  %v3236_v51 = vrot.slane %v5791_v48, %v5589_v33  ;;  %v5861_v5 = vmul.f32 %v3228_v53, %v5769_v55 }
 0x768   :  { %v5858_v50 = vmul.f32 %v2675_v3, %v5727_v63  ;;  %v3174_v37 = vsub.f32 1.0, %v3170_v0  ;;  %v3240_v32 = vrot.slane %v5800_v29, %v5589_v33  ;;  %v5866_v11 = vmul.f32 %v2676_v35, %v5732_v60 }
 0x769   :  { %v3181_v2 = vsub.f32 0.0, %v3173_v42  ;;  %v5869_v18 = vmul.f32 %v2736_v9, %v5797_v23  ;;  %v5872_v8 = vmul.f32 %v2740_v16, %v5797_v23  ;;  %v2768_v61 = vrot.slane %v5773_v62, %v5582_v4  ;;  %v2699_v16 = vpop.permute.xlu0 %2698 }
 0x76a   :  { %v3182_v63 = vsub.f32 0.0, %v3174_v37  ;;  %v2772_v55 = vrot.slane %v5777_v30, %v5582_v4  ;;  %v3260_v14 = vrot.slane %v5791_v48, %v5582_v4  ;;  %v3241_v36 = vmul.f32 %v3236_v51, %v5797_v23 }
 0x76b   :  { %v3185_v60 = vsel %vm3177_vm15, %v3173_v42, %v3181_v2  ;;  %v3264_v20 = vrot.slane %v5800_v29, %v5582_v4  ;;  %v2784_v28 = vrot.slane %v5773_v62, %v5608_v17  ;;  %v3242_v7 = vmul.f32 %v3240_v32, %v5797_v23 }
 0x76c   :  { %v3186_v59 = vsel %vm3178_vm0, %v3174_v37, %v3182_v63  ;;  %v3193_v21 = vadd.f32 1.0, %v3185_v60  ;;  %v2788_v56 = vrot.slane %v5777_v30, %v5608_v17  ;;  %v5892_v27 = vmul.f32 %v2768_v61, %v2763_v45 }
 0x76d   :  { %v3194_v47 = vadd.f32 1.0, %v3186_v59  ;;  %v5894_v40 = vmul.f32 %v2772_v55, %v2763_v45  ;;  %v3272_v10 = vrot.slane %v5791_v48, %v5608_v17  ;;  %v5901_v38 = vmul.f32 %v3260_v14, %v2763_v45 }
 0x76e   :  { %v5899_v24 = vmul.f32 %v3193_v21, %v5788_v54  ;;  %v5903_v34 = vmul.f32 %v3264_v20, %v2763_v45  ;;  %v3276_v23 = vrot.slane %v5800_v29, %v5608_v17  ;;  %v5910_v31 = vmul.f32 %v2784_v28, %v2779_v13  ;;  %v2811_v54 = vpop.permute.xlu1 %2810 }
 0x76f   :  { %v5908_v46 = vmul.f32 %v3194_v47, %v5807_v39  ;;  %v2816_v53 = vrot.slane %v5858_v50, %v5565_v12  ;;  %v2820_v41 = vrot.slane %v5866_v11, %v5565_v12  ;;  %v5916_v58 = vmul.f32 %v2788_v56, %v2779_v13 }
 0x770   :  { %v3296_v45 = vrot.slane %v5899_v24, %v5565_v12  ;;  %v2704_v9 = vrot.slane %v5773_v62, %v5579_v25  ;;  %v2708_v39 = vrot.slane %v5777_v30, %v5579_v25  ;;  %v5924_v15 = vmul.f32 %v3272_v10, %v2779_v13 }
 0x771   :  { %v5926_v3 = vmul.f32 %v3276_v23, %v2779_v13  ;;  %v3300_v0 = vrot.slane %v5908_v46, %v5565_v12  ;;  %v3212_v35 = vrot.slane %v5791_v48, %v5579_v25  ;;  %v5932_v42 = vmul.f32 %v2816_v53, %v2811_v54 }
 0x772   :  { %v2709_v51 = vmul.f32 %v2704_v9, %v2699_v16  ;;  %v2710_v37 = vmul.f32 %v2708_v39, %v2699_v16  ;;  %v3216_v32 = vrot.slane %v5800_v29, %v5579_v25  ;;  %v5936_v2 = vmul.f32 %v2820_v41, %v2811_v54  ;;  %v2827_v56 = vpop.permute.xlu1 %2826 }
 0x773   :  { %v3217_v63 = vmul.f32 %v3212_v35, %v2699_v16  ;;  %v2832_v13 = vrot.slane %v5858_v50, %v5579_v25  ;;  %v2836_v12 = vrot.slane %v5866_v11, %v5579_v25  ;;  %v5942_v61 = vmul.f32 %v3296_v45, %v2811_v54 }
 0x774   :  { %v2711_v55 = vadd.f32 %v2709_v51, %v5817_v19  ;;  %v2712_v14 = vadd.f32 %v2710_v37, %v5823_v1  ;;  %v3218_v60 = vmul.f32 %v3216_v32, %v2699_v16  ;;  %v5946_v20 = vmul.f32 %v3300_v0, %v2811_v54  ;;  %v2747_v54 = vpop.permute.xlu0 %2746 }
 0x775   :  { %v3219_v28 = vadd.f32 %v3217_v63, %v5826_v44  ;;  %v3308_v59 = vrot.slane %v5899_v24, %v5579_v25  ;;  %v3312_v21 = vrot.slane %v5908_v46, %v5579_v25  ;;  %v5956_v23 = vmul.f32 %v2832_v13, %v2827_v56 }
 0x776   :  { %v2727_v47 = vadd.f32 %v5839_v43, %v2711_v55  ;;  %v2728_v10 = vadd.f32 %v5844_v52, %v2712_v14  ;;  %v3220_v19 = vadd.f32 %v3218_v60, %v5831_v57  ;;  %v5959_v53 = vmul.f32 %v2836_v12, %v2827_v56  ;;  %v2859_v32 = vpop.permute.xlu1 %2858 }
 0x777   :  { %v3231_v1 = vadd.f32 %v5853_v6, %v3219_v28  ;;  %v2752_v44 = vrot.slane %v5773_v62, %v5568_v49  ;;  %v2756_v41 = vrot.slane %v5777_v30, %v5568_v49  ;;  %v3248_v57 = vrot.slane %v5791_v48, %v5568_v49 }
 0x778   :  { %v3232_v25 = vadd.f32 %v5861_v5, %v3220_v19  ;;  %v2743_v43 = vadd.f32 %v5869_v18, %v2727_v47  ;;  %v2744_v52 = vadd.f32 %v5872_v8, %v2728_v10  ;;  %v3252_v39 = vrot.slane %v5800_v29, %v5568_v49  ;;  %v2795_v10 = vpop.permute.xlu0 %2794 }
 0x779   :  { %v2757_v45 = vmul.f32 %v2752_v44, %v2747_v54  ;;  %v2758_v6 = vmul.f32 %v2756_v41, %v2747_v54  ;;  %v3243_v9 = vadd.f32 %v3241_v36, %v3231_v1  ;;  %v3253_v16 = vmul.f32 %v3248_v57, %v2747_v54 }
 0x77a   :  { %v3244_v0 = vadd.f32 %v3242_v7, %v3232_v25  ;;  %v2864_v35 = vrot.slane %v5858_v50, %v5589_v33  ;;  %v2868_v5 = vrot.slane %v5866_v11, %v5589_v33  ;;  %v3313_v18 = vmul.f32 %v3308_v59, %v2827_v56 }
 0x77b   :  { %v2759_v51 = vadd.f32 %v2757_v45, %v2743_v43  ;;  %v2760_v8 = vadd.f32 %v2758_v6, %v2744_v52  ;;  %v3254_v37 = vmul.f32 %v3252_v39, %v2747_v54  ;;  %v3314_v63 = vmul.f32 %v3312_v21, %v2827_v56 }
 0x77c   :  { %v3255_v13 = vadd.f32 %v3253_v16, %v3243_v9  ;;  %v3332_v36 = vrot.slane %v5899_v24, %v5589_v33  ;;  %v3336_v7 = vrot.slane %v5908_v46, %v5589_v33  ;;  %v2869_v60 = vmul.f32 %v2864_v35, %v2859_v32 }
 0x77d   :  { %v2775_v12 = vadd.f32 %v5892_v27, %v2759_v51  ;;  %v2776_v55 = vadd.f32 %v5894_v40, %v2760_v8  ;;  %v3256_v14 = vadd.f32 %v3254_v37, %v3244_v0  ;;  %v2870_v59 = vmul.f32 %v2868_v5, %v2859_v32  ;;  %v2843_v0 = vpop.permute.xlu0 %2842 }
 0x77e   :  { %v3267_v28 = vadd.f32 %v5901_v38, %v3255_v13  ;;  %v2800_v47 = vrot.slane %v5773_v62, %v5596_v22  ;;  %v2804_v21 = vrot.slane %v5777_v30, %v5596_v22  ;;  %v3284_v40 = vrot.slane %v5791_v48, %v5596_v22 }
 0x77f   :  { %v3268_v56 = vadd.f32 %v5903_v34, %v3256_v14  ;;  %v2791_v33 = vadd.f32 %v5910_v31, %v2775_v12  ;;  %v2792_v27 = vadd.f32 %v5916_v58, %v2776_v55  ;;  %v3288_v62 = vrot.slane %v5800_v29, %v5596_v22  ;;  %v2875_v58 = vpop.permute.xlu1 %2874 }
 0x780   :  { %v2805_v19 = vmul.f32 %v2800_v47, %v2795_v10  ;;  %v2806_v1 = vmul.f32 %v2804_v21, %v2795_v10  ;;  %v3279_v38 = vadd.f32 %v5924_v15, %v3267_v28  ;;  %v3289_v30 = vmul.f32 %v3284_v40, %v2795_v10 }
 0x781   :  { %v3280_v44 = vadd.f32 %v5926_v3, %v3268_v56  ;;  %v2880_v34 = vrot.slane %v5858_v50, %v5568_v49  ;;  %v2884_v31 = vrot.slane %v5866_v11, %v5568_v49  ;;  %v3337_v41 = vmul.f32 %v3332_v36, %v2859_v32 }
 0x782   :  { %v2807_v25 = vadd.f32 %v2805_v19, %v2791_v33  ;;  %v2808_v48 = vadd.f32 %v2806_v1, %v2792_v27  ;;  %v3290_v54 = vmul.f32 %v3288_v62, %v2795_v10  ;;  %v3338_v43 = vmul.f32 %v3336_v7, %v2859_v32  ;;  %v2891_v10 = vpop.permute.xlu0 %2890 }
 0x783   :  { %v3291_v52 = vadd.f32 %v3289_v30, %v3279_v38  ;;  %v3344_v15 = vrot.slane %v5899_v24, %v5568_v49  ;;  %v3348_v29 = vrot.slane %v5908_v46, %v5568_v49  ;;  %v2885_v6 = vmul.f32 %v2880_v34, %v2875_v58  ;;  %v2907_v32 = vpop.permute.xlu1 %2906 }
 0x784   :  { %v2823_v3 = vadd.f32 %v5932_v42, %v2807_v25  ;;  %v2824_v57 = vadd.f32 %v5936_v2, %v2808_v48  ;;  %v3292_v45 = vadd.f32 %v3290_v54, %v3280_v44  ;;  %v2886_v39 = vmul.f32 %v2884_v31, %v2875_v58 }
 0x785   :  { %v3303_v9 = vadd.f32 %v5942_v61, %v3291_v52  ;;  %v2848_v16 = vrot.slane %v5858_v50, %v5600_v26  ;;  %v2852_v35 = vrot.slane %v5866_v11, %v5600_v26  ;;  %v3320_v2 = vrot.slane %v5899_v24, %v5600_v26 }
 0x786   :  { %v3304_v5 = vadd.f32 %v5946_v20, %v3292_v45  ;;  %v2839_v49 = vadd.f32 %v5956_v23, %v2823_v3  ;;  %v2840_v42 = vadd.f32 %v5959_v53, %v2824_v57  ;;  %v3324_v37 = vrot.slane %v5908_v46, %v5600_v26 }
 0x787   :  { %v2853_v51 = vmul.f32 %v2848_v16, %v2843_v0  ;;  %v2854_v8 = vmul.f32 %v2852_v35, %v2843_v0  ;;  %v3315_v61 = vadd.f32 %v3313_v18, %v3303_v9  ;;  %v3325_v36 = vmul.f32 %v3320_v2, %v2843_v0  ;;  %v2941_v35 = vpop.permute.xlu0 %2940 }
 0x788   :  { %v3316_v13 = vadd.f32 %v3314_v63, %v3304_v5  ;;  %v2912_v7 = vrot.slane %v5858_v50, %v5608_v17  ;;  %v2916_v20 = vrot.slane %v5866_v11, %v5608_v17  ;;  %v3349_v23 = vmul.f32 %v3344_v15, %v2875_v58 }
 0x789   :  { %v2855_v53 = vadd.f32 %v2853_v51, %v2839_v49  ;;  %v2856_v12 = vadd.f32 %v2854_v8, %v2840_v42  ;;  %v3326_v55 = vmul.f32 %v3324_v37, %v2843_v0  ;;  %v3350_v14 = vmul.f32 %v3348_v29, %v2875_v58  ;;  %v6280_v37 = vld [vmem:[#allocation5_spill] sm:$0xff] }
 0x78a   :  { %v3327_v28 = vadd.f32 %v3325_v36, %v3315_v61  ;;  %v3368_v18 = vrot.slane %v5899_v24, %v5608_v17  ;;  %v3372_v26 = vrot.slane %v5908_v46, %v5608_v17  ;;  %v2917_v56 = vmul.f32 %v2912_v7, %v2907_v32  ;;  %v2923_v17 = vpop.permute.xlu1 %2922  ;;  %v6281_v7 = vld [vmem:[#allocation7_spill] sm:$0xff] }
 0x78b   :  { %v2871_v63 = vadd.f32 %v2869_v60, %v2855_v53  ;;  %v2872_v47 = vadd.f32 %v2870_v59, %v2856_v12  ;;  %v3328_v21 = vadd.f32 %v3326_v55, %v3316_v13  ;;  %v2918_v27 = vmul.f32 %v2916_v20, %v2907_v32 }
 0x78c   :  { %v3339_v33 = vadd.f32 %v3337_v41, %v3327_v28  ;;  %v2896_v40 = vrot.slane %v5858_v50, %v5582_v4  ;;  %v2900_v19 = vrot.slane %v5866_v11, %v5582_v4  ;;  %v3356_v44 = vrot.slane %v5899_v24, %v5582_v4 }
 0x78d   :  { %v3340_v1 = vadd.f32 %v3338_v43, %v3328_v21  ;;  %v2887_v38 = vadd.f32 %v2885_v6, %v2871_v63  ;;  %v2888_v62 = vadd.f32 %v2886_v39, %v2872_v47  ;;  %v3360_v34 = vrot.slane %v5908_v46, %v5582_v4 }
 0x78e   :  { %v2901_v60 = vmul.f32 %v2896_v40, %v2891_v10  ;;  %v2902_v59 = vmul.f32 %v2900_v19, %v2891_v10  ;;  %v3351_v30 = vadd.f32 %v3349_v23, %v3339_v33  ;;  %v3361_v58 = vmul.f32 %v3356_v44, %v2891_v10  ;;  %v3401_v4 = vpop.permute.xlu1 %3400 }
 0x78f   :  { %v3352_v31 = vadd.f32 %v3350_v14, %v3340_v1  ;;  %v2928_v41 = vrot.slane %v5858_v50, %v5596_v22  ;;  %v2932_v25 = vrot.slane %v5866_v11, %v5596_v22  ;;  %v3362_v43 = vmul.f32 %v3360_v34, %v2891_v10 }
 0x790   :  { %v2903_v48 = vadd.f32 %v2901_v60, %v2887_v38  ;;  %v2904_v54 = vadd.f32 %v2902_v59, %v2888_v62  ;;  %v3380_v52 = vrot.slane %v5899_v24, %v5596_v22  ;;  %v3373_v15 = vmul.f32 %v3368_v18, %v2907_v32 }
 0x791   :  { %v3363_v29 = vadd.f32 %v3361_v58, %v3351_v30  ;;  %v3384_v3 = vrot.slane %v5908_v46, %v5596_v22  ;;  %v3374_v57 = vmul.f32 %v3372_v26, %v2907_v32  ;;  %v3364_v45 = vadd.f32 %v3362_v43, %v3352_v31 }
 0x792   :  { %v2919_v6 = vadd.f32 %v2917_v56, %v2903_v48  ;;  %v2920_v9 = vadd.f32 %v2918_v27, %v2904_v54  ;;  %v2933_v50 = vmul.f32 %v2928_v41, %v2923_v17  ;;  %v3385_v39 = vmul.f32 %v3380_v52, %v2923_v17  ;;  %v3404_v8 = vpop.permute.xlu1 %3403 }
 0x793   :  { %v3375_v0 = vadd.f32 %v3373_v15, %v3363_v29  ;;  %v2934_v11 = vmul.f32 %v2932_v25, %v2923_v17  ;;  %v3386_v16 = vmul.f32 %v3384_v3, %v2923_v17  ;;  %v3376_v5 = vadd.f32 %v3374_v57, %v3364_v45 }
 0x794   :  { %v2935_v49 = vadd.f32 %v2933_v50, %v2919_v6  ;;  %v3406_v32 = vsel %vm2364_vm8, %v6280_v37, %v3401_v4  ;;  %v3407_v20 = vsel %vm2364_vm8, %v6281_v7, %v3404_v8 }
 0x795   :  { %v3387_v42 = vadd.f32 %v3385_v39, %v3375_v0  ;;  %v2936_v24 = vadd.f32 %v2934_v11, %v2920_v9  ;;  %v3388_v2 = vadd.f32 %v3386_v16, %v3376_v5 }
 0x796   :  { %v2943_v22 = vadd.f32 %v2941_v35, %v2935_v49 }
 0x797   :  { %v3389_v51 = vadd.f32 %v3387_v42, %v2941_v35  ;;  %v3390_v61 = vadd.f32 %v3388_v2, %v2941_v35  ;;  %v2944_v13 = vadd.f32 %v2941_v35, %v2936_v24 }
 0x799   :  { %v3393_v46 = vrot.slane %v3389_v51, 4  ;;  %v3394_v36 = vrot.slane %v3390_v61, 4 }
 0x79b   :  { %v3398_v23 = vsel %vm3397_vm1, %v2943_v22, %v3393_v46  ;;  %v3399_v12 = vsel %vm3397_vm1, %v2944_v13, %v3394_v36 }
 0x79c   :  { %v3408_v53 = vadd.f32 %v3406_v32, %v3398_v23  ;;  %v3409_v55 = vadd.f32 %v3407_v20, %v3399_v12 }
 0x79e   :  { %3410 = vst [vmem:[#allocation2] sm:$0xff] %v3408_v53  ;;  %3411 = vst [vmem:[#allocation2 + $0x8] sm:$0xff] %v3409_v55 }
 0x79f   :  { %3836 = shalt.err (!%p3833_p4)
}
 0x7a0   :  { %s3837_s28 = scalar_lea.hbm %s6068_s10, 256 }
 0x7a1   :  { %p3838_p5 = scmp.ne.s32.totalorder %s6068_s10, %s3837_s28  ;;  %p3841_p6 = scmp.lt.u32.totalorder %s3837_s28, %s6068_s10 }
 0x7a3   :  { %p3843_p7 = pnand %p3841_p6, %p3838_p5 }
 0x7a5   :  { %3846 = shalt.err (!%p3843_p7)
}
 0x7a6   :  { %3421 = dma.vmem_to_hbm [thread:$0]  %s3419_s9, 256, %s6068_s10, [#allocation3]  }
 0x7a7   :  { %3847 = dma.done.wait [#allocation3], 256  }
 0x7a8   :  { %3848 = vsyncadd [#allocation3], 4294967040 }
 0x7a9   :  { %3425 = vsyncpa [#allocation3], 1 }

</bundles_post_ra>
